<compile_context>
chip_gen: v7x
topology: tpu7x:2x2x1
jax: 0.10.0
libtpu: 0.0.40
codegen_flags: <defaults>
</compile_context>

<pallas_src>
import functools

import numpy as np
import jax
import jax.numpy as jnp
from jax.experimental import pallas as pl
from jax.experimental.pallas import tpu as pltpu

_VMEM = pl.BlockSpec(memory_space=pltpu.MemorySpace.VMEM)


# ----------------------------------------------------------------------------
# Kernel 1: map conv tower (conv1 + ReLU + conv2 + ReLU)
# ----------------------------------------------------------------------------
def _shift_rows(y, d):
    """z[i] = y[i + d] for in-range rows, zeros elsewhere (static d)."""
    if d == 0:
        return y
    c = y.shape[1]
    z = jnp.zeros((abs(d), c), y.dtype)
    if d > 0:
        return jnp.concatenate([y[d:, :], z], axis=0)
    return jnp.concatenate([z, y[:d, :]], axis=0)


def _conv_tower_kernel(x_ref, mask_ref, w1_ref, b1_ref, w2_ref, b2_ref, o_ref, *, W):
    # x: (B*H*W, Cin) rows in (b, h, w) order; weights: (9, Cin, Cout); masks: (9, N, 1).
    def conv3x3_relu(y, w_ref, b_ref):
        n = y.shape[0]
        cout = w_ref.shape[-1]
        acc = jnp.zeros((n, cout), jnp.float32)
        k = 0
        for dh in (-1, 0, 1):
            for dw in (-1, 0, 1):
                ys = _shift_rows(y, dh * W + dw) * mask_ref[k]
                acc = acc + jnp.dot(ys, w_ref[k], preferred_element_type=jnp.float32)
                k += 1
        return jnp.maximum(acc + b_ref[...], 0.0)

    y1 = conv3x3_relu(x_ref[...], w1_ref, b1_ref)
    o_ref[...] = conv3x3_relu(y1, w2_ref, b2_ref)


def _conv_tower(x_rows, masks, w1, b1, w2, b2, W):
    n = x_rows.shape[0]
    cout = w2.shape[-1]
    return pl.pallas_call(
        functools.partial(_conv_tower_kernel, W=W),
        out_shape=jax.ShapeDtypeStruct((n, cout), jnp.float32),
        in_specs=[_VMEM] * 6,
        out_specs=_VMEM,
    )(x_rows, masks, w1, b1, w2, b2)


def _conv_valid_masks(B, H, W):
    n = B * H * W
    idx = np.arange(n)
    hh = (idx // W) % H
    ww = idx % W
    ms = []
    for dh in (-1, 0, 1):
        for dw in (-1, 0, 1):
            m = ((hh + dh >= 0) & (hh + dh < H) & (ww + dw >= 0) & (ww + dw < W))
            ms.append(m.astype(np.float32))
    return jnp.asarray(np.stack(ms, axis=0)[:, :, None])  # (9, B*H*W, 1)


# ----------------------------------------------------------------------------
# Kernel 2: fused feature branches -> shared-embedding slab + ship features
# ----------------------------------------------------------------------------
def _features_kernel(map_ref, u_ref, ship_ref,
                     wmap_ref, bmap_ref, wu_ref, bu_ref, wea_ref, bea_ref,
                     wship_ref, bship_ref, slab_ref, shipf_ref):
    bf16 = jnp.bfloat16
    map_feat = jnp.dot(map_ref[...].astype(bf16), wmap_ref[...],
                       preferred_element_type=jnp.float32) + bmap_ref[...]     # (B, 128)
    h = jnp.dot(u_ref[...].astype(bf16), wu_ref[...],
                preferred_element_type=jnp.float32) + bu_ref[...]
    h = jnp.maximum(h, 0.0)   # (B, 352): [enemy_h 128 | ally_h 128 | relic 32 | match 32 | sap 32]
    ea = jnp.dot(h[:, :256].astype(bf16), wea_ref[...],
                 preferred_element_type=jnp.float32) + bea_ref[...]             # (B, 128)
    # slab columns: [map 128 | enemy 64 | ally 64 | relic 32 | match 32 | sap 32]
    slab_ref[...] = jnp.concatenate([map_feat, ea, h[:, 256:]], axis=1)
    sf = jnp.dot(ship_ref[...].astype(bf16), wship_ref[...],
                 preferred_element_type=jnp.float32) + bship_ref[...]           # (S*B, 64)
    shipf_ref[...] = jnp.maximum(sf, 0.0)


def _features(map_flat, u, ship_tm, fp):
    B = map_flat.shape[0]
    n = ship_tm.shape[0]
    return pl.pallas_call(
        _features_kernel,
        out_shape=(jax.ShapeDtypeStruct((B, 352), jnp.float32),
                   jax.ShapeDtypeStruct((n, 64), jnp.float32)),
        in_specs=[_VMEM] * 11,
        out_specs=(_VMEM, _VMEM),
    )(map_flat, u, ship_tm, fp["w_map"], fp["b_map"], fp["w_u"], fp["b_u"],
      fp["w_ea2"], fp["b_ea2"], fp["w_ship"], fp["b_ship"])


# ----------------------------------------------------------------------------
# Kernel 3: GRU with hoisted input projection + folded shared-embedding repeat
# ----------------------------------------------------------------------------
def _gru_kernel(slab_ref, shipf_ref, h0_ref, wihs_ref, wihp_ref, whh_ref,
                bih_ref, bhh_ref, out_ref, hn_ref):
    bf16 = jnp.bfloat16
    B, Hd = h0_ref.shape
    S = out_ref.shape[0]
    # Input projection hoisted out of the recurrence; the shared 320-dim part is
    # computed once per batch row (repeat over S folded away).
    gi_sh = jnp.dot(slab_ref[...].astype(bf16), wihs_ref[...],
                    preferred_element_type=jnp.float32) + bih_ref[...]          # (B, 3H)
    gi_sp = jnp.dot(shipf_ref[...].astype(bf16), wihp_ref[...],
                    preferred_element_type=jnp.float32)                          # (S*B, 3H)
    h = h0_ref[...]
    for t in range(S):                                  # static, fully unrolled
        gi = gi_sh + gi_sp[t * B:(t + 1) * B, :]
        gh = jnp.dot(h.astype(bf16), whh_ref[...],
                     preferred_element_type=jnp.float32) + bhh_ref[...]
        r = jax.nn.sigmoid(gi[:, :Hd] + gh[:, :Hd])
        z = jax.nn.sigmoid(gi[:, Hd:2 * Hd] + gh[:, Hd:2 * Hd])
        n = jnp.tanh(gi[:, 2 * Hd:] + r * gh[:, 2 * Hd:])
        h = (1.0 - z) * n + z * h
        out_ref[t] = h
    hn_ref[...] = h


def _gru(slab, shipf, h0, fp, S):
    B, Hd = h0.shape
    return pl.pallas_call(
        _gru_kernel,
        out_shape=(jax.ShapeDtypeStruct((S, B, Hd), jnp.float32),
                   jax.ShapeDtypeStruct((B, Hd), jnp.float32)),
        in_specs=[_VMEM] * 8,
        out_specs=(_VMEM, _VMEM),
    )(slab, shipf, h0, fp["w_ih_shared"], fp["w_ih_ship"], fp["w_hh"],
      fp["b_ih"], fp["b_hh"])


# ----------------------------------------------------------------------------
# Kernel 4: fused heads, packed lane-dense output slab
# ----------------------------------------------------------------------------
def _heads_kernel(rnn_ref, sapf_ref,
                  wp1_ref, bp1_ref, wp2_ref, bp2_ref, wwf_ref, bwf_ref,
                  wao1_ref, bao1_ref, wao2_ref, bao2_ref, wv_ref, bv_ref,
                  o_ref):
    bf16 = jnp.bfloat16
    N = rnn_ref.shape[0]
    B = sapf_ref.shape[0]
    S = N // B
    rnn = rnn_ref[...]
    rnn_b = rnn.astype(bf16)
    # weight policy head (softmax)
    wp_h = jnp.maximum(jnp.dot(rnn_b, wp1_ref[...], preferred_element_type=jnp.float32)
                       + bp1_ref[...], 0.0)
    logits = jnp.dot(wp_h.astype(bf16), wp2_ref[...],
                     preferred_element_type=jnp.float32) + bp2_ref[...]
    logits = logits - jnp.max(logits, axis=-1, keepdims=True)
    e = jnp.exp(logits)
    weights_out = e * pl.reciprocal(jnp.sum(e, axis=-1, keepdims=True), approx=True)
    # weights_fc
    wf = jnp.maximum(jnp.dot(weights_out.astype(bf16), wwf_ref[...],
                             preferred_element_type=jnp.float32) + bwf_ref[...], 0.0)
    # sap features repeated over the (time-major) sequence dimension
    sap_rep = jnp.concatenate([sapf_ref[...]] * S, axis=0)            # (N, 32)
    cai = jnp.concatenate([rnn, wf, sap_rep], axis=1)                 # (N, 352)
    cai_b = cai.astype(bf16)
    # action + offset first layers fused into one (352, 256) matmul
    h_ao = jnp.maximum(jnp.dot(cai_b, wao1_ref[...], preferred_element_type=jnp.float32)
                       + bao1_ref[...], 0.0)                          # [act1 128 | off1 128]
    ao = jnp.dot(h_ao.astype(bf16), wao2_ref[...],
                 preferred_element_type=jnp.float32) + bao2_ref[...]  # [action A | offset 2]
    # TODO(synk): PyTorch declares value_head = Linear(256+64, 1) but applies it to the
    # 352-dim combined_action_input (would raise at runtime); we apply the declared
    # 320->1 layer via a zero-padded (352, 1) weight (reads rnn_out ++ weights_features).
    value = jnp.dot(cai_b, wv_ref[...], preferred_element_type=jnp.float32) + bv_ref[...]
    pad_w = o_ref.shape[1] - (weights_out.shape[1] + ao.shape[1] + 1)
    pieces = [weights_out, ao, value]
    if pad_w > 0:
        pieces.append(jnp.zeros((N, pad_w), jnp.float32))
    o_ref[...] = jnp.concatenate(pieces, axis=1)


def _heads(rnn_flat, sap_feat, fp, out_w):
    n = rnn_flat.shape[0]
    return pl.pallas_call(
        _heads_kernel,
        out_shape=jax.ShapeDtypeStruct((n, out_w), jnp.float32),
        in_specs=[_VMEM] * 14,
        out_specs=_VMEM,
    )(rnn_flat, sap_feat, fp["w_p1"], fp["b_p1"], fp["w_p2"], fp["b_p2"],
      fp["w_wf"], fp["b_wf"], fp["w_ao1"], fp["b_ao1"], fp["w_ao2"], fp["b_ao2"],
      fp["w_v"], fp["b_v"])


# ----------------------------------------------------------------------------
# Parameters: synthetic init in PyTorch layout + one-time repack for the kernels
# ----------------------------------------------------------------------------
def init_params(key, map_dims, num_ships, action_space):
    """Synthetic params in PyTorch layout: nn.Linear (out,in); nn.Conv2d (out,in,3,3);
    nn.GRU weight_ih_l0 (3H,in) / weight_hh_l0 (3H,H), gate order (r, z, n)."""
    keys = iter(jax.random.split(key, 64))

    def lin(out_f, in_f):
        s = 1.0 / float(in_f) ** 0.5
        return {"w": jax.random.uniform(next(keys), (out_f, in_f), jnp.float32, -s, s),
                "b": jax.random.uniform(next(keys), (out_f,), jnp.float32, -s, s)}

    def conv(cout, cin):
        s = 1.0 / float(cin * 9) ** 0.5
        return {"w": jax.random.uniform(next(keys), (cout, cin, 3, 3), jnp.float32, -s, s),
                "b": jax.random.uniform(next(keys), (cout,), jnp.float32, -s, s)}

    H, W = map_dims
    p = {
        "conv1": conv(16, 3), "conv2": conv(32, 16), "map_lin": lin(128, H * W * 32),
        "enemy1": lin(128, num_ships * 4), "enemy2": lin(64, 128),
        "ally1": lin(128, num_ships * 4), "ally2": lin(64, 128),
        "ship": lin(64, 4), "relic": lin(32, 2), "match": lin(32, 2),
        # match_num_fc is declared in __init__ but never used in forward(): skipped.
        "weights_fc": lin(64, 4), "sap": lin(32, 1),
        "wpol1": lin(64, 256), "wpol2": lin(4, 64),
        "act1": lin(128, 256 + 64 + 32), "act2": lin(action_space, 128),
        "off1": lin(128, 256 + 64 + 32), "off2": lin(2, 128),
        "value": lin(1, 256 + 64),
    }
    Hd, In = 256, 128 + 64 + 64 + 64 + 32 + 32
    s = 1.0 / float(Hd) ** 0.5
    p["gru"] = {
        "w_ih": jax.random.uniform(next(keys), (3 * Hd, In), jnp.float32, -s, s),
        "w_hh": jax.random.uniform(next(keys), (3 * Hd, Hd), jnp.float32, -s, s),
        "b_ih": jax.random.uniform(next(keys), (3 * Hd,), jnp.float32, -s, s),
        "b_hh": jax.random.uniform(next(keys), (3 * Hd,), jnp.float32, -s, s),
    }
    return p


def prepare_params(p, map_dims, num_ships):
    """One-time repack of PyTorch-layout params into the fused kernel layout."""
    H, W = map_dims
    HW = H * W
    bf16 = jnp.bfloat16
    tw = lambda lp: jnp.asarray(lp["w"]).T
    tb = lambda lp: jnp.asarray(lp["b"]).reshape(1, -1).astype(jnp.float32)

    fp = {}

    # conv weights -> (9 = kh*3 + kw, cin, cout), f32 (tiny, K-bound on the MXU anyway)
    def conv9(cp):
        w = jnp.transpose(jnp.asarray(cp["w"]), (2, 3, 1, 0))        # (kh, kw, cin, cout)
        return w.reshape(9, w.shape[2], w.shape[3]).astype(jnp.float32)
    fp["w_c1"], fp["b_c1"] = conv9(p["conv1"]), tb(p["conv1"])
    fp["w_c2"], fp["b_c2"] = conv9(p["conv2"]), tb(p["conv2"])

    # map_lin: fold the NCHW-flatten vs NHWC-flatten difference into a row permutation.
    wmap = tw(p["map_lin"])                                          # (HW*32, 128), NCHW rows
    j = np.arange(HW * 32)
    perm = (j % 32) * HW + (j // 32)                                 # NHWC row j <- NCHW row perm[j]
    fp["w_map"] = wmap[perm].astype(bf16)
    fp["b_map"] = tb(p["map_lin"])

    # First layers of the small branches packed into one block-diagonal matmul.
    n4 = num_ships * 4
    wu = jnp.zeros((2 * n4 + 5, 352), jnp.float32)
    wu = wu.at[0:n4, 0:128].set(tw(p["enemy1"]))
    wu = wu.at[n4:2 * n4, 128:256].set(tw(p["ally1"]))
    wu = wu.at[2 * n4:2 * n4 + 2, 256:288].set(tw(p["relic"]))
    wu = wu.at[2 * n4 + 2:2 * n4 + 4, 288:320].set(tw(p["match"]))
    wu = wu.at[2 * n4 + 4:2 * n4 + 5, 320:352].set(tw(p["sap"]))
    fp["w_u"] = wu.astype(bf16)
    fp["b_u"] = jnp.concatenate([tb(p["enemy1"]), tb(p["ally1"]), tb(p["relic"]),
                                 tb(p["match"]), tb(p["sap"])], axis=1)

    wea = jnp.zeros((256, 128), jnp.float32)
    wea = wea.at[0:128, 0:64].set(tw(p["enemy2"]))
    wea = wea.at[128:256, 64:128].set(tw(p["ally2"]))
    fp["w_ea2"] = wea.astype(bf16)
    fp["b_ea2"] = jnp.concatenate([tb(p["enemy2"]), tb(p["ally2"])], axis=1)

    fp["w_ship"], fp["b_ship"] = tw(p["ship"]).astype(bf16), tb(p["ship"])

    # GRU: transpose to (in, 3H); split into a shared block (320, zero-padded to match the
    # 352-wide slab) and a ship block (64) so the shared part of gi is computed per batch row.
    wih = jnp.asarray(p["gru"]["w_ih"]).T                            # (384, 768)
    fp["w_ih_shared"] = jnp.concatenate(
        [wih[:320], jnp.zeros((32, wih.shape[1]), jnp.float32)], axis=0).astype(bf16)
    fp["w_ih_ship"] = wih[320:].astype(bf16)
    fp["w_hh"] = jnp.asarray(p["gru"]["w_hh"]).T.astype(bf16)        # (256, 768)
    fp["b_ih"] = jnp.asarray(p["gru"]["b_ih"]).reshape(1, -1).astype(jnp.float32)
    fp["b_hh"] = jnp.asarray(p["gru"]["b_hh"]).reshape(1, -1).astype(jnp.float32)

    # Heads.
    fp["w_p1"], fp["b_p1"] = tw(p["wpol1"]).astype(bf16), tb(p["wpol1"])
    fp["w_p2"], fp["b_p2"] = tw(p["wpol2"]).astype(bf16), tb(p["wpol2"])
    fp["w_wf"], fp["b_wf"] = tw(p["weights_fc"]).astype(bf16), tb(p["weights_fc"])
    fp["w_ao1"] = jnp.concatenate([tw(p["act1"]), tw(p["off1"])], axis=1).astype(bf16)  # (352, 256)
    fp["b_ao1"] = jnp.concatenate([tb(p["act1"]), tb(p["off1"])], axis=1)
    A = p["act2"]["w"].shape[0]
    wao2 = jnp.zeros((256, A + 2), jnp.float32)
    wao2 = wao2.at[0:128, 0:A].set(tw(p["act2"]))
    wao2 = wao2.at[128:256, A:A + 2].set(tw(p["off2"]))
    fp["w_ao2"] = wao2.astype(bf16)
    fp["b_ao2"] = jnp.concatenate([tb(p["act2"]), tb(p["off2"])], axis=1)
    # value head zero-padded to 352 inputs (documented deviation, see TODO in _heads_kernel)
    fp["w_v"] = jnp.concatenate([tw(p["value"]),
                                 jnp.zeros((32, 1), jnp.float32)], axis=0).astype(bf16)
    fp["b_v"] = tb(p["value"])
    return fp


# ----------------------------------------------------------------------------
# Forward pass (mirrors AgentNetwork.forward)
# ----------------------------------------------------------------------------
def agent_network_forward(fp, shared_inputs, ship_states, hidden_state=None):
    map_memory = shared_inputs["map_memory"]        # (B, 3, H, W)  NCHW
    enemy_memory = shared_inputs["enemy_memory"]    # (B, num_ships, 4)
    ally_memory = shared_inputs["ally_memory"]      # (B, num_ships, 4)
    relic_points = shared_inputs["relic_points"]    # (B, 2)
    match_points = shared_inputs["match_points"]    # (B, 2)
    sap_range = shared_inputs["sap_range"]          # (B, 1)

    B, _, H, W = map_memory.shape
    # The PyTorch reference repeats the shared embedding ship_states.size(0) times,
    # which only typechecks when ship_states is (B, S, 4) with S == B.
    assert ship_states.shape[0] == B and ship_states.shape[-1] == 4
    S = ship_states.shape[1]
    assert S == ship_states.shape[0], "reference semantics require ship_states.size(0) == seq length"
    f32 = jnp.float32

    # ---- 1. map conv tower (one kernel) ----
    x_rows = jnp.transpose(map_memory, (0, 2, 3, 1)).reshape(B * H * W, 3).astype(f32)
    masks = _conv_valid_masks(B, H, W)
    y2 = _conv_tower(x_rows, masks, fp["w_c1"], fp["b_c1"], fp["w_c2"], fp["b_c2"], W)
    map_flat = y2.reshape(B, H * W * 32)            # contiguous (free) reshape; map_lin weight
                                                    # rows were permuted to NHWC order at prep time

    # ---- 2. fused feature branches (one kernel) ----
    u = jnp.concatenate([enemy_memory.reshape(B, -1).astype(f32),
                         ally_memory.reshape(B, -1).astype(f32),
                         relic_points.astype(f32), match_points.astype(f32),
                         sap_range.astype(f32)], axis=1)
    ship_tm = jnp.transpose(ship_states, (1, 0, 2)).reshape(S * B, 4).astype(f32)  # time-major rows
    slab, ship_feat = _features(map_flat, u, ship_tm, fp)
    # slab: [map 128 | enemy 64 | ally 64 | relic 32 | match 32 | sap 32]

    # ---- 3. GRU (one kernel) ----
    if hidden_state is None:
        h0 = jnp.zeros((B, 256), f32)
    else:
        h0 = hidden_state.reshape(B, 256).astype(f32)
    rnn_tm, h_n = _gru(slab, ship_feat, h0, fp, S)   # (S, B, 256), (B, 256)

    # ---- 4. fused heads (one kernel, packed 128-lane output slab) ----
    A = fp["w_ao2"].shape[1] - 2
    out_w = 128
    assert 4 + A + 2 + 1 <= out_w
    sap_feat = slab[:, 320:352]
    head_slab = _heads(rnn_tm.reshape(S * B, 256), sap_feat, fp, out_w)   # (S*B, out_w)

    heads_bt = jnp.transpose(head_slab.reshape(S, B, out_w), (1, 0, 2))   # (B, S, out_w)
    weights_out = heads_bt[..., 0:4]
    action_probs = heads_bt[..., 4:4 + A]            # raw logits, as in the reference
    sap_offset = heads_bt[..., 4 + A:6 + A]
    value = heads_bt[..., 6 + A:7 + A]
    hidden_state_out = h_n[None, :, :]               # (1, B, 256)
    return weights_out, action_probs, sap_offset, value, hidden_state_out


# ----------------------------------------------------------------------------
# Demo
# ----------------------------------------------------------------------------
if __name__ == "__main__":
    map_dims = (8, 8)
    num_ships = 4
    action_space = 6
    B = 4            # reference forward only typechecks when batch == ship_states.size(0)
    S = B

    key = jax.random.PRNGKey(0)
    k_params, k_in = jax.random.split(key)
    torch_params = init_params(k_params, map_dims, num_ships, action_space)
    fp = prepare_params(torch_params, map_dims, num_ships)

    ks = jax.random.split(k_in, 7)
    shared_inputs = {
        "map_memory": jax.random.normal(ks[0], (B, 3, map_dims[0], map_dims[1]), jnp.float32),
        "enemy_memory": jax.random.normal(ks[1], (B, num_ships, 4), jnp.float32),
        "ally_memory": jax.random.normal(ks[2], (B, num_ships, 4), jnp.float32),
        "relic_points": jax.random.normal(ks[3], (B, 2), jnp.float32),
        "match_points": jax.random.normal(ks[4], (B, 2), jnp.float32),
        "sap_range": jax.random.normal(ks[5], (B, 1), jnp.float32),
    }
    ship_states = jax.random.normal(ks[6], (B, S, 4), jnp.float32)

    fwd = jax.jit(agent_network_forward)
    outs = jax.block_until_ready(fwd(fp, shared_inputs, ship_states))
    weights_out, action_probs, sap_offset, value, hidden = outs

    assert weights_out.shape == (B, S, 4)
    assert action_probs.shape == (B, S, action_space)
    assert sap_offset.shape == (B, S, 2)
    assert value.shape == (B, S, 1)
    assert hidden.shape == (1, B, 256)
    for o in (weights_out, action_probs, sap_offset, value, hidden):
        assert bool(jnp.all(jnp.isfinite(o)))
    # softmax rows should sum to ~1 (approx reciprocal on the denominator)
    assert bool(jnp.all(jnp.abs(jnp.sum(weights_out, axis=-1) - 1.0) < 1e-2))
    print("KERNEL_OK")
</pallas_src>

<mosaic_0001>
module attributes {stable_mosaic.version = 11 : i64} {
  func.func @_conv_tower_kernel(%arg0: memref<256x3xf32, #tpu.memory_space<vmem>>, %arg1: memref<9x256x1xf32, #tpu.memory_space<vmem>>, %arg2: memref<9x3x16xf32, #tpu.memory_space<vmem>>, %arg3: memref<1x16xf32, #tpu.memory_space<vmem>>, %arg4: memref<9x16x32xf32, #tpu.memory_space<vmem>>, %arg5: memref<1x32xf32, #tpu.memory_space<vmem>>, %arg6: memref<256x32xf32, #tpu.memory_space<vmem>>) attributes {dimension_semantics = [], scalar_prefetch = 0 : i64, scratch_operands = 0 : i64, tpu.core_type = #tpu.core_type<tc>} {
    %c0 = arith.constant 0 : index
    %c0_0 = arith.constant 0 : index
    %0 = vector.load %arg0[%c0, %c0_0] : memref<256x3xf32, #tpu.memory_space<vmem>>, vector<256x3xf32>
    %cst = arith.constant 0.000000e+00 : f32
    %1 = vector.broadcast %cst : f32 to vector<256x16xf32>
    %cst_1 = arith.constant 0.000000e+00 : f32
    %2 = vector.broadcast %cst_1 : f32 to vector<9x3xf32>
    %3 = vector.extract_strided_slice %0 {offsets = [0, 0], sizes = [247, 3], strides = [1, 1]} : vector<256x3xf32> to vector<247x3xf32>
    %4 = tpu.concatenate %2, %3 in 0 : vector<9x3xf32>, vector<247x3xf32> -> vector<256x3xf32>
    %c0_2 = arith.constant 0 : index
    %c0_3 = arith.constant 0 : index
    %c0_4 = arith.constant 0 : index
    %5 = vector.load %arg1[%c0_2, %c0_3, %c0_4] : memref<9x256x1xf32, #tpu.memory_space<vmem>>, vector<1x256x1xf32>
    %6 = vector.shape_cast %5 : vector<1x256x1xf32> to vector<256x1xf32>
    %7 = vector.broadcast %6 : vector<256x1xf32> to vector<256x3xf32>
    %8 = arith.mulf %4, %7 : vector<256x3xf32>
    %c0_5 = arith.constant 0 : index
    %c0_6 = arith.constant 0 : index
    %c0_7 = arith.constant 0 : index
    %9 = vector.load %arg2[%c0_5, %c0_6, %c0_7] : memref<9x3x16xf32, #tpu.memory_space<vmem>>, vector<1x3x16xf32>
    %10 = vector.shape_cast %9 : vector<1x3x16xf32> to vector<3x16xf32>
    %cst_8 = arith.constant dense<0.000000e+00> : vector<256x16xf32>
    %11 = tpu.matmul %8, %10, %cst_8 {dimension_numbers = #tpu.dot_dimension_numbers<[1], [0], [0], [1], [0, 0, 1, 1], [], []>} : vector<256x3xf32>, vector<3x16xf32>, vector<256x16xf32> -> vector<256x16xf32>
    %12 = arith.addf %1, %11 : vector<256x16xf32>
    %cst_9 = arith.constant 0.000000e+00 : f32
    %13 = vector.broadcast %cst_9 : f32 to vector<8x3xf32>
    %14 = vector.extract_strided_slice %0 {offsets = [0, 0], sizes = [248, 3], strides = [1, 1]} : vector<256x3xf32> to vector<248x3xf32>
    %15 = tpu.concatenate %13, %14 in 0 : vector<8x3xf32>, vector<248x3xf32> -> vector<256x3xf32>
    %c1 = arith.constant 1 : index
    %c0_10 = arith.constant 0 : index
    %c0_11 = arith.constant 0 : index
    %16 = vector.load %arg1[%c1, %c0_10, %c0_11] : memref<9x256x1xf32, #tpu.memory_space<vmem>>, vector<1x256x1xf32>
    %17 = vector.shape_cast %16 : vector<1x256x1xf32> to vector<256x1xf32>
    %18 = vector.broadcast %17 : vector<256x1xf32> to vector<256x3xf32>
    %19 = arith.mulf %15, %18 : vector<256x3xf32>
    %c1_12 = arith.constant 1 : index
    %c0_13 = arith.constant 0 : index
    %c0_14 = arith.constant 0 : index
    %20 = vector.load %arg2[%c1_12, %c0_13, %c0_14] : memref<9x3x16xf32, #tpu.memory_space<vmem>>, vector<1x3x16xf32>
    %21 = vector.shape_cast %20 : vector<1x3x16xf32> to vector<3x16xf32>
    %cst_15 = arith.constant dense<0.000000e+00> : vector<256x16xf32>
    %22 = tpu.matmul %19, %21, %cst_15 {dimension_numbers = #tpu.dot_dimension_numbers<[1], [0], [0], [1], [0, 0, 1, 1], [], []>} : vector<256x3xf32>, vector<3x16xf32>, vector<256x16xf32> -> vector<256x16xf32>
    %23 = arith.addf %12, %22 : vector<256x16xf32>
    %cst_16 = arith.constant 0.000000e+00 : f32
    %24 = vector.broadcast %cst_16 : f32 to vector<7x3xf32>
    %25 = vector.extract_strided_slice %0 {offsets = [0, 0], sizes = [249, 3], strides = [1, 1]} : vector<256x3xf32> to vector<249x3xf32>
    %26 = tpu.concatenate %24, %25 in 0 : vector<7x3xf32>, vector<249x3xf32> -> vector<256x3xf32>
    %c2 = arith.constant 2 : index
    %c0_17 = arith.constant 0 : index
    %c0_18 = arith.constant 0 : index
    %27 = vector.load %arg1[%c2, %c0_17, %c0_18] : memref<9x256x1xf32, #tpu.memory_space<vmem>>, vector<1x256x1xf32>
    %28 = vector.shape_cast %27 : vector<1x256x1xf32> to vector<256x1xf32>
    %29 = vector.broadcast %28 : vector<256x1xf32> to vector<256x3xf32>
    %30 = arith.mulf %26, %29 : vector<256x3xf32>
    %c2_19 = arith.constant 2 : index
    %c0_20 = arith.constant 0 : index
    %c0_21 = arith.constant 0 : index
    %31 = vector.load %arg2[%c2_19, %c0_20, %c0_21] : memref<9x3x16xf32, #tpu.memory_space<vmem>>, vector<1x3x16xf32>
    %32 = vector.shape_cast %31 : vector<1x3x16xf32> to vector<3x16xf32>
    %cst_22 = arith.constant dense<0.000000e+00> : vector<256x16xf32>
    %33 = tpu.matmul %30, %32, %cst_22 {dimension_numbers = #tpu.dot_dimension_numbers<[1], [0], [0], [1], [0, 0, 1, 1], [], []>} : vector<256x3xf32>, vector<3x16xf32>, vector<256x16xf32> -> vector<256x16xf32>
    %34 = arith.addf %23, %33 : vector<256x16xf32>
    %cst_23 = arith.constant 0.000000e+00 : f32
    %35 = vector.broadcast %cst_23 : f32 to vector<1x3xf32>
    %36 = vector.extract_strided_slice %0 {offsets = [0, 0], sizes = [255, 3], strides = [1, 1]} : vector<256x3xf32> to vector<255x3xf32>
    %37 = tpu.concatenate %35, %36 in 0 : vector<1x3xf32>, vector<255x3xf32> -> vector<256x3xf32>
    %c3 = arith.constant 3 : index
    %c0_24 = arith.constant 0 : index
    %c0_25 = arith.constant 0 : index
    %38 = vector.load %arg1[%c3, %c0_24, %c0_25] : memref<9x256x1xf32, #tpu.memory_space<vmem>>, vector<1x256x1xf32>
    %39 = vector.shape_cast %38 : vector<1x256x1xf32> to vector<256x1xf32>
    %40 = vector.broadcast %39 : vector<256x1xf32> to vector<256x3xf32>
    %41 = arith.mulf %37, %40 : vector<256x3xf32>
    %c3_26 = arith.constant 3 : index
    %c0_27 = arith.constant 0 : index
    %c0_28 = arith.constant 0 : index
    %42 = vector.load %arg2[%c3_26, %c0_27, %c0_28] : memref<9x3x16xf32, #tpu.memory_space<vmem>>, vector<1x3x16xf32>
    %43 = vector.shape_cast %42 : vector<1x3x16xf32> to vector<3x16xf32>
    %cst_29 = arith.constant dense<0.000000e+00> : vector<256x16xf32>
    %44 = tpu.matmul %41, %43, %cst_29 {dimension_numbers = #tpu.dot_dimension_numbers<[1], [0], [0], [1], [0, 0, 1, 1], [], []>} : vector<256x3xf32>, vector<3x16xf32>, vector<256x16xf32> -> vector<256x16xf32>
    %45 = arith.addf %34, %44 : vector<256x16xf32>
    %c4 = arith.constant 4 : index
    %c0_30 = arith.constant 0 : index
    %c0_31 = arith.constant 0 : index
    %46 = vector.load %arg1[%c4, %c0_30, %c0_31] : memref<9x256x1xf32, #tpu.memory_space<vmem>>, vector<1x256x1xf32>
    %47 = vector.shape_cast %46 : vector<1x256x1xf32> to vector<256x1xf32>
    %48 = vector.broadcast %47 : vector<256x1xf32> to vector<256x3xf32>
    %49 = arith.mulf %0, %48 : vector<256x3xf32>
    %c4_32 = arith.constant 4 : index
    %c0_33 = arith.constant 0 : index
    %c0_34 = arith.constant 0 : index
    %50 = vector.load %arg2[%c4_32, %c0_33, %c0_34] : memref<9x3x16xf32, #tpu.memory_space<vmem>>, vector<1x3x16xf32>
    %51 = vector.shape_cast %50 : vector<1x3x16xf32> to vector<3x16xf32>
    %cst_35 = arith.constant dense<0.000000e+00> : vector<256x16xf32>
    %52 = tpu.matmul %49, %51, %cst_35 {dimension_numbers = #tpu.dot_dimension_numbers<[1], [0], [0], [1], [0, 0, 1, 1], [], []>} : vector<256x3xf32>, vector<3x16xf32>, vector<256x16xf32> -> vector<256x16xf32>
    %53 = arith.addf %45, %52 : vector<256x16xf32>
    %cst_36 = arith.constant 0.000000e+00 : f32
    %54 = vector.broadcast %cst_36 : f32 to vector<1x3xf32>
    %55 = vector.extract_strided_slice %0 {offsets = [1, 0], sizes = [255, 3], strides = [1, 1]} : vector<256x3xf32> to vector<255x3xf32>
    %56 = tpu.concatenate %55, %54 in 0 : vector<255x3xf32>, vector<1x3xf32> -> vector<256x3xf32>
    %c5 = arith.constant 5 : index
    %c0_37 = arith.constant 0 : index
    %c0_38 = arith.constant 0 : index
    %57 = vector.load %arg1[%c5, %c0_37, %c0_38] : memref<9x256x1xf32, #tpu.memory_space<vmem>>, vector<1x256x1xf32>
    %58 = vector.shape_cast %57 : vector<1x256x1xf32> to vector<256x1xf32>
    %59 = vector.broadcast %58 : vector<256x1xf32> to vector<256x3xf32>
    %60 = arith.mulf %56, %59 : vector<256x3xf32>
    %c5_39 = arith.constant 5 : index
    %c0_40 = arith.constant 0 : index
    %c0_41 = arith.constant 0 : index
    %61 = vector.load %arg2[%c5_39, %c0_40, %c0_41] : memref<9x3x16xf32, #tpu.memory_space<vmem>>, vector<1x3x16xf32>
    %62 = vector.shape_cast %61 : vector<1x3x16xf32> to vector<3x16xf32>
    %cst_42 = arith.constant dense<0.000000e+00> : vector<256x16xf32>
    %63 = tpu.matmul %60, %62, %cst_42 {dimension_numbers = #tpu.dot_dimension_numbers<[1], [0], [0], [1], [0, 0, 1, 1], [], []>} : vector<256x3xf32>, vector<3x16xf32>, vector<256x16xf32> -> vector<256x16xf32>
    %64 = arith.addf %53, %63 : vector<256x16xf32>
    %cst_43 = arith.constant 0.000000e+00 : f32
    %65 = vector.broadcast %cst_43 : f32 to vector<7x3xf32>
    %66 = vector.extract_strided_slice %0 {offsets = [7, 0], sizes = [249, 3], strides = [1, 1]} : vector<256x3xf32> to vector<249x3xf32>
    %67 = tpu.concatenate %66, %65 in 0 : vector<249x3xf32>, vector<7x3xf32> -> vector<256x3xf32>
    %c6 = arith.constant 6 : index
    %c0_44 = arith.constant 0 : index
    %c0_45 = arith.constant 0 : index
    %68 = vector.load %arg1[%c6, %c0_44, %c0_45] : memref<9x256x1xf32, #tpu.memory_space<vmem>>, vector<1x256x1xf32>
    %69 = vector.shape_cast %68 : vector<1x256x1xf32> to vector<256x1xf32>
    %70 = vector.broadcast %69 : vector<256x1xf32> to vector<256x3xf32>
    %71 = arith.mulf %67, %70 : vector<256x3xf32>
    %c6_46 = arith.constant 6 : index
    %c0_47 = arith.constant 0 : index
    %c0_48 = arith.constant 0 : index
    %72 = vector.load %arg2[%c6_46, %c0_47, %c0_48] : memref<9x3x16xf32, #tpu.memory_space<vmem>>, vector<1x3x16xf32>
    %73 = vector.shape_cast %72 : vector<1x3x16xf32> to vector<3x16xf32>
    %cst_49 = arith.constant dense<0.000000e+00> : vector<256x16xf32>
    %74 = tpu.matmul %71, %73, %cst_49 {dimension_numbers = #tpu.dot_dimension_numbers<[1], [0], [0], [1], [0, 0, 1, 1], [], []>} : vector<256x3xf32>, vector<3x16xf32>, vector<256x16xf32> -> vector<256x16xf32>
    %75 = arith.addf %64, %74 : vector<256x16xf32>
    %cst_50 = arith.constant 0.000000e+00 : f32
    %76 = vector.broadcast %cst_50 : f32 to vector<8x3xf32>
    %77 = vector.extract_strided_slice %0 {offsets = [8, 0], sizes = [248, 3], strides = [1, 1]} : vector<256x3xf32> to vector<248x3xf32>
    %78 = tpu.concatenate %77, %76 in 0 : vector<248x3xf32>, vector<8x3xf32> -> vector<256x3xf32>
    %c7 = arith.constant 7 : index
    %c0_51 = arith.constant 0 : index
    %c0_52 = arith.constant 0 : index
    %79 = vector.load %arg1[%c7, %c0_51, %c0_52] : memref<9x256x1xf32, #tpu.memory_space<vmem>>, vector<1x256x1xf32>
    %80 = vector.shape_cast %79 : vector<1x256x1xf32> to vector<256x1xf32>
    %81 = vector.broadcast %80 : vector<256x1xf32> to vector<256x3xf32>
    %82 = arith.mulf %78, %81 : vector<256x3xf32>
    %c7_53 = arith.constant 7 : index
    %c0_54 = arith.constant 0 : index
    %c0_55 = arith.constant 0 : index
    %83 = vector.load %arg2[%c7_53, %c0_54, %c0_55] : memref<9x3x16xf32, #tpu.memory_space<vmem>>, vector<1x3x16xf32>
    %84 = vector.shape_cast %83 : vector<1x3x16xf32> to vector<3x16xf32>
    %cst_56 = arith.constant dense<0.000000e+00> : vector<256x16xf32>
    %85 = tpu.matmul %82, %84, %cst_56 {dimension_numbers = #tpu.dot_dimension_numbers<[1], [0], [0], [1], [0, 0, 1, 1], [], []>} : vector<256x3xf32>, vector<3x16xf32>, vector<256x16xf32> -> vector<256x16xf32>
    %86 = arith.addf %75, %85 : vector<256x16xf32>
    %cst_57 = arith.constant 0.000000e+00 : f32
    %87 = vector.broadcast %cst_57 : f32 to vector<9x3xf32>
    %88 = vector.extract_strided_slice %0 {offsets = [9, 0], sizes = [247, 3], strides = [1, 1]} : vector<256x3xf32> to vector<247x3xf32>
    %89 = tpu.concatenate %88, %87 in 0 : vector<247x3xf32>, vector<9x3xf32> -> vector<256x3xf32>
    %c8 = arith.constant 8 : index
    %c0_58 = arith.constant 0 : index
    %c0_59 = arith.constant 0 : index
    %90 = vector.load %arg1[%c8, %c0_58, %c0_59] : memref<9x256x1xf32, #tpu.memory_space<vmem>>, vector<1x256x1xf32>
    %91 = vector.shape_cast %90 : vector<1x256x1xf32> to vector<256x1xf32>
    %92 = vector.broadcast %91 : vector<256x1xf32> to vector<256x3xf32>
    %93 = arith.mulf %89, %92 : vector<256x3xf32>
    %c8_60 = arith.constant 8 : index
    %c0_61 = arith.constant 0 : index
    %c0_62 = arith.constant 0 : index
    %94 = vector.load %arg2[%c8_60, %c0_61, %c0_62] : memref<9x3x16xf32, #tpu.memory_space<vmem>>, vector<1x3x16xf32>
    %95 = vector.shape_cast %94 : vector<1x3x16xf32> to vector<3x16xf32>
    %cst_63 = arith.constant dense<0.000000e+00> : vector<256x16xf32>
    %96 = tpu.matmul %93, %95, %cst_63 {dimension_numbers = #tpu.dot_dimension_numbers<[1], [0], [0], [1], [0, 0, 1, 1], [], []>} : vector<256x3xf32>, vector<3x16xf32>, vector<256x16xf32> -> vector<256x16xf32>
    %97 = arith.addf %86, %96 : vector<256x16xf32>
    %c0_64 = arith.constant 0 : index
    %c0_65 = arith.constant 0 : index
    %98 = vector.load %arg3[%c0_64, %c0_65] : memref<1x16xf32, #tpu.memory_space<vmem>>, vector<1x16xf32>
    %99 = vector.broadcast %98 : vector<1x16xf32> to vector<256x16xf32>
    %100 = arith.addf %97, %99 : vector<256x16xf32>
    %cst_66 = arith.constant 0.000000e+00 : f32
    %101 = vector.broadcast %cst_66 : f32 to vector<256x16xf32>
    %102 = arith.maximumf %100, %101 : vector<256x16xf32>
    %cst_67 = arith.constant 0.000000e+00 : f32
    %103 = vector.broadcast %cst_67 : f32 to vector<256x32xf32>
    %cst_68 = arith.constant 0.000000e+00 : f32
    %104 = vector.broadcast %cst_68 : f32 to vector<9x16xf32>
    %105 = vector.extract_strided_slice %102 {offsets = [0, 0], sizes = [247, 16], strides = [1, 1]} : vector<256x16xf32> to vector<247x16xf32>
    %106 = tpu.concatenate %104, %105 in 0 : vector<9x16xf32>, vector<247x16xf32> -> vector<256x16xf32>
    %c0_69 = arith.constant 0 : index
    %c0_70 = arith.constant 0 : index
    %c0_71 = arith.constant 0 : index
    %107 = vector.load %arg1[%c0_69, %c0_70, %c0_71] : memref<9x256x1xf32, #tpu.memory_space<vmem>>, vector<1x256x1xf32>
    %108 = vector.shape_cast %107 : vector<1x256x1xf32> to vector<256x1xf32>
    %109 = vector.broadcast %108 : vector<256x1xf32> to vector<256x16xf32>
    %110 = arith.mulf %106, %109 : vector<256x16xf32>
    %c0_72 = arith.constant 0 : index
    %c0_73 = arith.constant 0 : index
    %c0_74 = arith.constant 0 : index
    %111 = vector.load %arg4[%c0_72, %c0_73, %c0_74] : memref<9x16x32xf32, #tpu.memory_space<vmem>>, vector<1x16x32xf32>
    %112 = vector.shape_cast %111 : vector<1x16x32xf32> to vector<16x32xf32>
    %cst_75 = arith.constant dense<0.000000e+00> : vector<256x32xf32>
    %113 = tpu.matmul %110, %112, %cst_75 {dimension_numbers = #tpu.dot_dimension_numbers<[1], [0], [0], [1], [0, 0, 1, 1], [], []>} : vector<256x16xf32>, vector<16x32xf32>, vector<256x32xf32> -> vector<256x32xf32>
    %114 = arith.addf %103, %113 : vector<256x32xf32>
    %cst_76 = arith.constant 0.000000e+00 : f32
    %115 = vector.broadcast %cst_76 : f32 to vector<8x16xf32>
    %116 = vector.extract_strided_slice %102 {offsets = [0, 0], sizes = [248, 16], strides = [1, 1]} : vector<256x16xf32> to vector<248x16xf32>
    %117 = tpu.concatenate %115, %116 in 0 : vector<8x16xf32>, vector<248x16xf32> -> vector<256x16xf32>
    %c1_77 = arith.constant 1 : index
    %c0_78 = arith.constant 0 : index
    %c0_79 = arith.constant 0 : index
    %118 = vector.load %arg1[%c1_77, %c0_78, %c0_79] : memref<9x256x1xf32, #tpu.memory_space<vmem>>, vector<1x256x1xf32>
    %119 = vector.shape_cast %118 : vector<1x256x1xf32> to vector<256x1xf32>
    %120 = vector.broadcast %119 : vector<256x1xf32> to vector<256x16xf32>
    %121 = arith.mulf %117, %120 : vector<256x16xf32>
    %c1_80 = arith.constant 1 : index
    %c0_81 = arith.constant 0 : index
    %c0_82 = arith.constant 0 : index
    %122 = vector.load %arg4[%c1_80, %c0_81, %c0_82] : memref<9x16x32xf32, #tpu.memory_space<vmem>>, vector<1x16x32xf32>
    %123 = vector.shape_cast %122 : vector<1x16x32xf32> to vector<16x32xf32>
    %cst_83 = arith.constant dense<0.000000e+00> : vector<256x32xf32>
    %124 = tpu.matmul %121, %123, %cst_83 {dimension_numbers = #tpu.dot_dimension_numbers<[1], [0], [0], [1], [0, 0, 1, 1], [], []>} : vector<256x16xf32>, vector<16x32xf32>, vector<256x32xf32> -> vector<256x32xf32>
    %125 = arith.addf %114, %124 : vector<256x32xf32>
    %cst_84 = arith.constant 0.000000e+00 : f32
    %126 = vector.broadcast %cst_84 : f32 to vector<7x16xf32>
    %127 = vector.extract_strided_slice %102 {offsets = [0, 0], sizes = [249, 16], strides = [1, 1]} : vector<256x16xf32> to vector<249x16xf32>
    %128 = tpu.concatenate %126, %127 in 0 : vector<7x16xf32>, vector<249x16xf32> -> vector<256x16xf32>
    %c2_85 = arith.constant 2 : index
    %c0_86 = arith.constant 0 : index
    %c0_87 = arith.constant 0 : index
    %129 = vector.load %arg1[%c2_85, %c0_86, %c0_87] : memref<9x256x1xf32, #tpu.memory_space<vmem>>, vector<1x256x1xf32>
    %130 = vector.shape_cast %129 : vector<1x256x1xf32> to vector<256x1xf32>
    %131 = vector.broadcast %130 : vector<256x1xf32> to vector<256x16xf32>
    %132 = arith.mulf %128, %131 : vector<256x16xf32>
    %c2_88 = arith.constant 2 : index
    %c0_89 = arith.constant 0 : index
    %c0_90 = arith.constant 0 : index
    %133 = vector.load %arg4[%c2_88, %c0_89, %c0_90] : memref<9x16x32xf32, #tpu.memory_space<vmem>>, vector<1x16x32xf32>
    %134 = vector.shape_cast %133 : vector<1x16x32xf32> to vector<16x32xf32>
    %cst_91 = arith.constant dense<0.000000e+00> : vector<256x32xf32>
    %135 = tpu.matmul %132, %134, %cst_91 {dimension_numbers = #tpu.dot_dimension_numbers<[1], [0], [0], [1], [0, 0, 1, 1], [], []>} : vector<256x16xf32>, vector<16x32xf32>, vector<256x32xf32> -> vector<256x32xf32>
    %136 = arith.addf %125, %135 : vector<256x32xf32>
    %cst_92 = arith.constant 0.000000e+00 : f32
    %137 = vector.broadcast %cst_92 : f32 to vector<1x16xf32>
    %138 = vector.extract_strided_slice %102 {offsets = [0, 0], sizes = [255, 16], strides = [1, 1]} : vector<256x16xf32> to vector<255x16xf32>
    %139 = tpu.concatenate %137, %138 in 0 : vector<1x16xf32>, vector<255x16xf32> -> vector<256x16xf32>
    %c3_93 = arith.constant 3 : index
    %c0_94 = arith.constant 0 : index
    %c0_95 = arith.constant 0 : index
    %140 = vector.load %arg1[%c3_93, %c0_94, %c0_95] : memref<9x256x1xf32, #tpu.memory_space<vmem>>, vector<1x256x1xf32>
    %141 = vector.shape_cast %140 : vector<1x256x1xf32> to vector<256x1xf32>
    %142 = vector.broadcast %141 : vector<256x1xf32> to vector<256x16xf32>
    %143 = arith.mulf %139, %142 : vector<256x16xf32>
    %c3_96 = arith.constant 3 : index
    %c0_97 = arith.constant 0 : index
    %c0_98 = arith.constant 0 : index
    %144 = vector.load %arg4[%c3_96, %c0_97, %c0_98] : memref<9x16x32xf32, #tpu.memory_space<vmem>>, vector<1x16x32xf32>
    %145 = vector.shape_cast %144 : vector<1x16x32xf32> to vector<16x32xf32>
    %cst_99 = arith.constant dense<0.000000e+00> : vector<256x32xf32>
    %146 = tpu.matmul %143, %145, %cst_99 {dimension_numbers = #tpu.dot_dimension_numbers<[1], [0], [0], [1], [0, 0, 1, 1], [], []>} : vector<256x16xf32>, vector<16x32xf32>, vector<256x32xf32> -> vector<256x32xf32>
    %147 = arith.addf %136, %146 : vector<256x32xf32>
    %c4_100 = arith.constant 4 : index
    %c0_101 = arith.constant 0 : index
    %c0_102 = arith.constant 0 : index
    %148 = vector.load %arg1[%c4_100, %c0_101, %c0_102] : memref<9x256x1xf32, #tpu.memory_space<vmem>>, vector<1x256x1xf32>
    %149 = vector.shape_cast %148 : vector<1x256x1xf32> to vector<256x1xf32>
    %150 = vector.broadcast %149 : vector<256x1xf32> to vector<256x16xf32>
    %151 = arith.mulf %102, %150 : vector<256x16xf32>
    %c4_103 = arith.constant 4 : index
    %c0_104 = arith.constant 0 : index
    %c0_105 = arith.constant 0 : index
    %152 = vector.load %arg4[%c4_103, %c0_104, %c0_105] : memref<9x16x32xf32, #tpu.memory_space<vmem>>, vector<1x16x32xf32>
    %153 = vector.shape_cast %152 : vector<1x16x32xf32> to vector<16x32xf32>
    %cst_106 = arith.constant dense<0.000000e+00> : vector<256x32xf32>
    %154 = tpu.matmul %151, %153, %cst_106 {dimension_numbers = #tpu.dot_dimension_numbers<[1], [0], [0], [1], [0, 0, 1, 1], [], []>} : vector<256x16xf32>, vector<16x32xf32>, vector<256x32xf32> -> vector<256x32xf32>
    %155 = arith.addf %147, %154 : vector<256x32xf32>
    %cst_107 = arith.constant 0.000000e+00 : f32
    %156 = vector.broadcast %cst_107 : f32 to vector<1x16xf32>
    %157 = vector.extract_strided_slice %102 {offsets = [1, 0], sizes = [255, 16], strides = [1, 1]} : vector<256x16xf32> to vector<255x16xf32>
    %158 = tpu.concatenate %157, %156 in 0 : vector<255x16xf32>, vector<1x16xf32> -> vector<256x16xf32>
    %c5_108 = arith.constant 5 : index
    %c0_109 = arith.constant 0 : index
    %c0_110 = arith.constant 0 : index
    %159 = vector.load %arg1[%c5_108, %c0_109, %c0_110] : memref<9x256x1xf32, #tpu.memory_space<vmem>>, vector<1x256x1xf32>
    %160 = vector.shape_cast %159 : vector<1x256x1xf32> to vector<256x1xf32>
    %161 = vector.broadcast %160 : vector<256x1xf32> to vector<256x16xf32>
    %162 = arith.mulf %158, %161 : vector<256x16xf32>
    %c5_111 = arith.constant 5 : index
    %c0_112 = arith.constant 0 : index
    %c0_113 = arith.constant 0 : index
    %163 = vector.load %arg4[%c5_111, %c0_112, %c0_113] : memref<9x16x32xf32, #tpu.memory_space<vmem>>, vector<1x16x32xf32>
    %164 = vector.shape_cast %163 : vector<1x16x32xf32> to vector<16x32xf32>
    %cst_114 = arith.constant dense<0.000000e+00> : vector<256x32xf32>
    %165 = tpu.matmul %162, %164, %cst_114 {dimension_numbers = #tpu.dot_dimension_numbers<[1], [0], [0], [1], [0, 0, 1, 1], [], []>} : vector<256x16xf32>, vector<16x32xf32>, vector<256x32xf32> -> vector<256x32xf32>
    %166 = arith.addf %155, %165 : vector<256x32xf32>
    %cst_115 = arith.constant 0.000000e+00 : f32
    %167 = vector.broadcast %cst_115 : f32 to vector<7x16xf32>
    %168 = vector.extract_strided_slice %102 {offsets = [7, 0], sizes = [249, 16], strides = [1, 1]} : vector<256x16xf32> to vector<249x16xf32>
    %169 = tpu.concatenate %168, %167 in 0 : vector<249x16xf32>, vector<7x16xf32> -> vector<256x16xf32>
    %c6_116 = arith.constant 6 : index
    %c0_117 = arith.constant 0 : index
    %c0_118 = arith.constant 0 : index
    %170 = vector.load %arg1[%c6_116, %c0_117, %c0_118] : memref<9x256x1xf32, #tpu.memory_space<vmem>>, vector<1x256x1xf32>
    %171 = vector.shape_cast %170 : vector<1x256x1xf32> to vector<256x1xf32>
    %172 = vector.broadcast %171 : vector<256x1xf32> to vector<256x16xf32>
    %173 = arith.mulf %169, %172 : vector<256x16xf32>
    %c6_119 = arith.constant 6 : index
    %c0_120 = arith.constant 0 : index
    %c0_121 = arith.constant 0 : index
    %174 = vector.load %arg4[%c6_119, %c0_120, %c0_121] : memref<9x16x32xf32, #tpu.memory_space<vmem>>, vector<1x16x32xf32>
    %175 = vector.shape_cast %174 : vector<1x16x32xf32> to vector<16x32xf32>
    %cst_122 = arith.constant dense<0.000000e+00> : vector<256x32xf32>
    %176 = tpu.matmul %173, %175, %cst_122 {dimension_numbers = #tpu.dot_dimension_numbers<[1], [0], [0], [1], [0, 0, 1, 1], [], []>} : vector<256x16xf32>, vector<16x32xf32>, vector<256x32xf32> -> vector<256x32xf32>
    %177 = arith.addf %166, %176 : vector<256x32xf32>
    %cst_123 = arith.constant 0.000000e+00 : f32
    %178 = vector.broadcast %cst_123 : f32 to vector<8x16xf32>
    %179 = vector.extract_strided_slice %102 {offsets = [8, 0], sizes = [248, 16], strides = [1, 1]} : vector<256x16xf32> to vector<248x16xf32>
    %180 = tpu.concatenate %179, %178 in 0 : vector<248x16xf32>, vector<8x16xf32> -> vector<256x16xf32>
    %c7_124 = arith.constant 7 : index
    %c0_125 = arith.constant 0 : index
    %c0_126 = arith.constant 0 : index
    %181 = vector.load %arg1[%c7_124, %c0_125, %c0_126] : memref<9x256x1xf32, #tpu.memory_space<vmem>>, vector<1x256x1xf32>
    %182 = vector.shape_cast %181 : vector<1x256x1xf32> to vector<256x1xf32>
    %183 = vector.broadcast %182 : vector<256x1xf32> to vector<256x16xf32>
    %184 = arith.mulf %180, %183 : vector<256x16xf32>
    %c7_127 = arith.constant 7 : index
    %c0_128 = arith.constant 0 : index
    %c0_129 = arith.constant 0 : index
    %185 = vector.load %arg4[%c7_127, %c0_128, %c0_129] : memref<9x16x32xf32, #tpu.memory_space<vmem>>, vector<1x16x32xf32>
    %186 = vector.shape_cast %185 : vector<1x16x32xf32> to vector<16x32xf32>
    %cst_130 = arith.constant dense<0.000000e+00> : vector<256x32xf32>
    %187 = tpu.matmul %184, %186, %cst_130 {dimension_numbers = #tpu.dot_dimension_numbers<[1], [0], [0], [1], [0, 0, 1, 1], [], []>} : vector<256x16xf32>, vector<16x32xf32>, vector<256x32xf32> -> vector<256x32xf32>
    %188 = arith.addf %177, %187 : vector<256x32xf32>
    %cst_131 = arith.constant 0.000000e+00 : f32
    %189 = vector.broadcast %cst_131 : f32 to vector<9x16xf32>
    %190 = vector.extract_strided_slice %102 {offsets = [9, 0], sizes = [247, 16], strides = [1, 1]} : vector<256x16xf32> to vector<247x16xf32>
    %191 = tpu.concatenate %190, %189 in 0 : vector<247x16xf32>, vector<9x16xf32> -> vector<256x16xf32>
    %c8_132 = arith.constant 8 : index
    %c0_133 = arith.constant 0 : index
    %c0_134 = arith.constant 0 : index
    %192 = vector.load %arg1[%c8_132, %c0_133, %c0_134] : memref<9x256x1xf32, #tpu.memory_space<vmem>>, vector<1x256x1xf32>
    %193 = vector.shape_cast %192 : vector<1x256x1xf32> to vector<256x1xf32>
    %194 = vector.broadcast %193 : vector<256x1xf32> to vector<256x16xf32>
    %195 = arith.mulf %191, %194 : vector<256x16xf32>
    %c8_135 = arith.constant 8 : index
    %c0_136 = arith.constant 0 : index
    %c0_137 = arith.constant 0 : index
    %196 = vector.load %arg4[%c8_135, %c0_136, %c0_137] : memref<9x16x32xf32, #tpu.memory_space<vmem>>, vector<1x16x32xf32>
    %197 = vector.shape_cast %196 : vector<1x16x32xf32> to vector<16x32xf32>
    %cst_138 = arith.constant dense<0.000000e+00> : vector<256x32xf32>
    %198 = tpu.matmul %195, %197, %cst_138 {dimension_numbers = #tpu.dot_dimension_numbers<[1], [0], [0], [1], [0, 0, 1, 1], [], []>} : vector<256x16xf32>, vector<16x32xf32>, vector<256x32xf32> -> vector<256x32xf32>
    %199 = arith.addf %188, %198 : vector<256x32xf32>
    %c0_139 = arith.constant 0 : index
    %c0_140 = arith.constant 0 : index
    %200 = vector.load %arg5[%c0_139, %c0_140] : memref<1x32xf32, #tpu.memory_space<vmem>>, vector<1x32xf32>
    %201 = vector.broadcast %200 : vector<1x32xf32> to vector<256x32xf32>
    %202 = arith.addf %199, %201 : vector<256x32xf32>
    %cst_141 = arith.constant 0.000000e+00 : f32
    %203 = vector.broadcast %cst_141 : f32 to vector<256x32xf32>
    %204 = arith.maximumf %202, %203 : vector<256x32xf32>
    %c0_142 = arith.constant 0 : index
    %c0_143 = arith.constant 0 : index
    %205 = vector.load %arg6[%c0_142, %c0_143] : memref<256x32xf32, #tpu.memory_space<vmem>>, vector<256x32xf32>
    tpu.vector_store %arg6[%c0_142, %c0_143], %204 {strides = array<i32>} : memref<256x32xf32, #tpu.memory_space<vmem>>, vector<256x32xf32>,
    return
  }
}

module attributes {stable_mosaic.version = 11 : i64} {
  func.func @_features_kernel(%arg0: memref<4x2048xf32, #tpu.memory_space<vmem>>, %arg1: memref<4x37xf32, #tpu.memory_space<vmem>>, %arg2: memref<16x4xf32, #tpu.memory_space<vmem>>, %arg3: memref<2048x128xbf16, #tpu.memory_space<vmem>>, %arg4: memref<1x128xf32, #tpu.memory_space<vmem>>, %arg5: memref<37x352xbf16, #tpu.memory_space<vmem>>, %arg6: memref<1x352xf32, #tpu.memory_space<vmem>>, %arg7: memref<256x128xbf16, #tpu.memory_space<vmem>>, %arg8: memref<1x128xf32, #tpu.memory_space<vmem>>, %arg9: memref<4x64xbf16, #tpu.memory_space<vmem>>, %arg10: memref<1x64xf32, #tpu.memory_space<vmem>>, %arg11: memref<4x352xf32, #tpu.memory_space<vmem>>, %arg12: memref<16x64xf32, #tpu.memory_space<vmem>>) attributes {dimension_semantics = [], scalar_prefetch = 0 : i64, scratch_operands = 0 : i64, tpu.core_type = #tpu.core_type<tc>} {
    %c0 = arith.constant 0 : index
    %c0_0 = arith.constant 0 : index
    %0 = vector.load %arg0[%c0, %c0_0] : memref<4x2048xf32, #tpu.memory_space<vmem>>, vector<4x2048xf32>
    %1 = arith.truncf %0 : vector<4x2048xf32> to vector<4x2048xbf16>
    %c0_1 = arith.constant 0 : index
    %c0_2 = arith.constant 0 : index
    %2 = vector.load %arg3[%c0_1, %c0_2] : memref<2048x128xbf16, #tpu.memory_space<vmem>>, vector<2048x128xbf16>
    %cst = arith.constant dense<0.000000e+00> : vector<4x128xf32>
    %3 = tpu.matmul %1, %2, %cst {dimension_numbers = #tpu.dot_dimension_numbers<[1], [0], [0], [1], [0, 0, 1, 1], [], []>} : vector<4x2048xbf16>, vector<2048x128xbf16>, vector<4x128xf32> -> vector<4x128xf32>
    %c0_3 = arith.constant 0 : index
    %c0_4 = arith.constant 0 : index
    %4 = vector.load %arg4[%c0_3, %c0_4] : memref<1x128xf32, #tpu.memory_space<vmem>>, vector<1x128xf32>
    %5 = vector.broadcast %4 : vector<1x128xf32> to vector<4x128xf32>
    %6 = arith.addf %3, %5 : vector<4x128xf32>
    %c0_5 = arith.constant 0 : index
    %c0_6 = arith.constant 0 : index
    %7 = vector.load %arg1[%c0_5, %c0_6] : memref<4x37xf32, #tpu.memory_space<vmem>>, vector<4x37xf32>
    %8 = arith.truncf %7 : vector<4x37xf32> to vector<4x37xbf16>
    %c0_7 = arith.constant 0 : index
    %c0_8 = arith.constant 0 : index
    %9 = vector.load %arg5[%c0_7, %c0_8] : memref<37x352xbf16, #tpu.memory_space<vmem>>, vector<37x352xbf16>
    %cst_9 = arith.constant dense<0.000000e+00> : vector<4x352xf32>
    %10 = tpu.matmul %8, %9, %cst_9 {dimension_numbers = #tpu.dot_dimension_numbers<[1], [0], [0], [1], [0, 0, 1, 1], [], []>} : vector<4x37xbf16>, vector<37x352xbf16>, vector<4x352xf32> -> vector<4x352xf32>
    %c0_10 = arith.constant 0 : index
    %c0_11 = arith.constant 0 : index
    %11 = vector.load %arg6[%c0_10, %c0_11] : memref<1x352xf32, #tpu.memory_space<vmem>>, vector<1x352xf32>
    %12 = vector.broadcast %11 : vector<1x352xf32> to vector<4x352xf32>
    %13 = arith.addf %10, %12 : vector<4x352xf32>
    %cst_12 = arith.constant 0.000000e+00 : f32
    %14 = vector.broadcast %cst_12 : f32 to vector<4x352xf32>
    %15 = arith.maximumf %13, %14 : vector<4x352xf32>
    %16 = vector.extract_strided_slice %15 {offsets = [0, 0], sizes = [4, 256], strides = [1, 1]} : vector<4x352xf32> to vector<4x256xf32>
    %17 = arith.truncf %16 : vector<4x256xf32> to vector<4x256xbf16>
    %c0_13 = arith.constant 0 : index
    %c0_14 = arith.constant 0 : index
    %18 = vector.load %arg7[%c0_13, %c0_14] : memref<256x128xbf16, #tpu.memory_space<vmem>>, vector<256x128xbf16>
    %cst_15 = arith.constant dense<0.000000e+00> : vector<4x128xf32>
    %19 = tpu.matmul %17, %18, %cst_15 {dimension_numbers = #tpu.dot_dimension_numbers<[1], [0], [0], [1], [0, 0, 1, 1], [], []>} : vector<4x256xbf16>, vector<256x128xbf16>, vector<4x128xf32> -> vector<4x128xf32>
    %c0_16 = arith.constant 0 : index
    %c0_17 = arith.constant 0 : index
    %20 = vector.load %arg8[%c0_16, %c0_17] : memref<1x128xf32, #tpu.memory_space<vmem>>, vector<1x128xf32>
    %21 = vector.broadcast %20 : vector<1x128xf32> to vector<4x128xf32>
    %22 = arith.addf %19, %21 : vector<4x128xf32>
    %23 = vector.extract_strided_slice %15 {offsets = [0, 256], sizes = [4, 96], strides = [1, 1]} : vector<4x352xf32> to vector<4x96xf32>
    %24 = tpu.concatenate %6, %22, %23 in 1 : vector<4x128xf32>, vector<4x128xf32>, vector<4x96xf32> -> vector<4x352xf32>
    %c0_18 = arith.constant 0 : index
    %c0_19 = arith.constant 0 : index
    %25 = vector.load %arg11[%c0_18, %c0_19] : memref<4x352xf32, #tpu.memory_space<vmem>>, vector<4x352xf32>
    tpu.vector_store %arg11[%c0_18, %c0_19], %24 {strides = array<i32>} : memref<4x352xf32, #tpu.memory_space<vmem>>, vector<4x352xf32>,
    %c0_20 = arith.constant 0 : index
    %c0_21 = arith.constant 0 : index
    %26 = vector.load %arg2[%c0_20, %c0_21] : memref<16x4xf32, #tpu.memory_space<vmem>>, vector<16x4xf32>
    %27 = arith.truncf %26 : vector<16x4xf32> to vector<16x4xbf16>
    %c0_22 = arith.constant 0 : index
    %c0_23 = arith.constant 0 : index
    %28 = vector.load %arg9[%c0_22, %c0_23] : memref<4x64xbf16, #tpu.memory_space<vmem>>, vector<4x64xbf16>
    %cst_24 = arith.constant dense<0.000000e+00> : vector<16x64xf32>
    %29 = tpu.matmul %27, %28, %cst_24 {dimension_numbers = #tpu.dot_dimension_numbers<[1], [0], [0], [1], [0, 0, 1, 1], [], []>} : vector<16x4xbf16>, vector<4x64xbf16>, vector<16x64xf32> -> vector<16x64xf32>
    %c0_25 = arith.constant 0 : index
    %c0_26 = arith.constant 0 : index
    %30 = vector.load %arg10[%c0_25, %c0_26] : memref<1x64xf32, #tpu.memory_space<vmem>>, vector<1x64xf32>
    %31 = vector.broadcast %30 : vector<1x64xf32> to vector<16x64xf32>
    %32 = arith.addf %29, %31 : vector<16x64xf32>
    %cst_27 = arith.constant 0.000000e+00 : f32
    %33 = vector.broadcast %cst_27 : f32 to vector<16x64xf32>
    %34 = arith.maximumf %32, %33 : vector<16x64xf32>
    %c0_28 = arith.constant 0 : index
    %c0_29 = arith.constant 0 : index
    %35 = vector.load %arg12[%c0_28, %c0_29] : memref<16x64xf32, #tpu.memory_space<vmem>>, vector<16x64xf32>
    tpu.vector_store %arg12[%c0_28, %c0_29], %34 {strides = array<i32>} : memref<16x64xf32, #tpu.memory_space<vmem>>, vector<16x64xf32>,
    return
  }
}

module attributes {stable_mosaic.version = 11 : i64} {
  func.func @_gru_kernel(%arg0: memref<4x352xf32, #tpu.memory_space<vmem>>, %arg1: memref<16x64xf32, #tpu.memory_space<vmem>>, %arg2: memref<4x256xf32, #tpu.memory_space<vmem>>, %arg3: memref<352x768xbf16, #tpu.memory_space<vmem>>, %arg4: memref<64x768xbf16, #tpu.memory_space<vmem>>, %arg5: memref<256x768xbf16, #tpu.memory_space<vmem>>, %arg6: memref<1x768xf32, #tpu.memory_space<vmem>>, %arg7: memref<1x768xf32, #tpu.memory_space<vmem>>, %arg8: memref<4x4x256xf32, #tpu.memory_space<vmem>>, %arg9: memref<4x256xf32, #tpu.memory_space<vmem>>) attributes {dimension_semantics = [], scalar_prefetch = 0 : i64, scratch_operands = 0 : i64, tpu.core_type = #tpu.core_type<tc>} {
    %c0 = arith.constant 0 : index
    %c0_0 = arith.constant 0 : index
    %0 = vector.load %arg0[%c0, %c0_0] : memref<4x352xf32, #tpu.memory_space<vmem>>, vector<4x352xf32>
    %1 = arith.truncf %0 : vector<4x352xf32> to vector<4x352xbf16>
    %c0_1 = arith.constant 0 : index
    %c0_2 = arith.constant 0 : index
    %2 = vector.load %arg3[%c0_1, %c0_2] : memref<352x768xbf16, #tpu.memory_space<vmem>>, vector<352x768xbf16>
    %cst = arith.constant dense<0.000000e+00> : vector<4x768xf32>
    %3 = tpu.matmul %1, %2, %cst {dimension_numbers = #tpu.dot_dimension_numbers<[1], [0], [0], [1], [0, 0, 1, 1], [], []>} : vector<4x352xbf16>, vector<352x768xbf16>, vector<4x768xf32> -> vector<4x768xf32>
    %c0_3 = arith.constant 0 : index
    %c0_4 = arith.constant 0 : index
    %4 = vector.load %arg6[%c0_3, %c0_4] : memref<1x768xf32, #tpu.memory_space<vmem>>, vector<1x768xf32>
    %5 = vector.broadcast %4 : vector<1x768xf32> to vector<4x768xf32>
    %6 = arith.addf %3, %5 : vector<4x768xf32>
    %c0_5 = arith.constant 0 : index
    %c0_6 = arith.constant 0 : index
    %7 = vector.load %arg1[%c0_5, %c0_6] : memref<16x64xf32, #tpu.memory_space<vmem>>, vector<16x64xf32>
    %8 = arith.truncf %7 : vector<16x64xf32> to vector<16x64xbf16>
    %c0_7 = arith.constant 0 : index
    %c0_8 = arith.constant 0 : index
    %9 = vector.load %arg4[%c0_7, %c0_8] : memref<64x768xbf16, #tpu.memory_space<vmem>>, vector<64x768xbf16>
    %cst_9 = arith.constant dense<0.000000e+00> : vector<16x768xf32>
    %10 = tpu.matmul %8, %9, %cst_9 {dimension_numbers = #tpu.dot_dimension_numbers<[1], [0], [0], [1], [0, 0, 1, 1], [], []>} : vector<16x64xbf16>, vector<64x768xbf16>, vector<16x768xf32> -> vector<16x768xf32>
    %c0_10 = arith.constant 0 : index
    %c0_11 = arith.constant 0 : index
    %11 = vector.load %arg2[%c0_10, %c0_11] : memref<4x256xf32, #tpu.memory_space<vmem>>, vector<4x256xf32>
    %12 = vector.extract_strided_slice %10 {offsets = [0, 0], sizes = [4, 768], strides = [1, 1]} : vector<16x768xf32> to vector<4x768xf32>
    %13 = arith.addf %6, %12 : vector<4x768xf32>
    %14 = arith.truncf %11 : vector<4x256xf32> to vector<4x256xbf16>
    %c0_12 = arith.constant 0 : index
    %c0_13 = arith.constant 0 : index
    %15 = vector.load %arg5[%c0_12, %c0_13] : memref<256x768xbf16, #tpu.memory_space<vmem>>, vector<256x768xbf16>
    %cst_14 = arith.constant dense<0.000000e+00> : vector<4x768xf32>
    %16 = tpu.matmul %14, %15, %cst_14 {dimension_numbers = #tpu.dot_dimension_numbers<[1], [0], [0], [1], [0, 0, 1, 1], [], []>} : vector<4x256xbf16>, vector<256x768xbf16>, vector<4x768xf32> -> vector<4x768xf32>
    %c0_15 = arith.constant 0 : index
    %c0_16 = arith.constant 0 : index
    %17 = vector.load %arg7[%c0_15, %c0_16] : memref<1x768xf32, #tpu.memory_space<vmem>>, vector<1x768xf32>
    %18 = vector.broadcast %17 : vector<1x768xf32> to vector<4x768xf32>
    %19 = arith.addf %16, %18 : vector<4x768xf32>
    %20 = vector.extract_strided_slice %13 {offsets = [0, 0], sizes = [4, 256], strides = [1, 1]} : vector<4x768xf32> to vector<4x256xf32>
    %21 = vector.extract_strided_slice %19 {offsets = [0, 0], sizes = [4, 256], strides = [1, 1]} : vector<4x768xf32> to vector<4x256xf32>
    %22 = arith.addf %20, %21 : vector<4x256xf32>
    %23 = arith.negf %22 : vector<4x256xf32>
    %24 = math.exp %23 : vector<4x256xf32>
    %cst_17 = arith.constant 1.000000e+00 : f32
    %25 = vector.broadcast %cst_17 : f32 to vector<4x256xf32>
    %26 = arith.addf %25, %24 : vector<4x256xf32>
    %27 = arith.divf %25, %26 : vector<4x256xf32>
    %28 = vector.extract_strided_slice %13 {offsets = [0, 256], sizes = [4, 256], strides = [1, 1]} : vector<4x768xf32> to vector<4x256xf32>
    %29 = vector.extract_strided_slice %19 {offsets = [0, 256], sizes = [4, 256], strides = [1, 1]} : vector<4x768xf32> to vector<4x256xf32>
    %30 = arith.addf %28, %29 : vector<4x256xf32>
    %31 = arith.negf %30 : vector<4x256xf32>
    %32 = math.exp %31 : vector<4x256xf32>
    %cst_18 = arith.constant 1.000000e+00 : f32
    %33 = vector.broadcast %cst_18 : f32 to vector<4x256xf32>
    %34 = arith.addf %33, %32 : vector<4x256xf32>
    %35 = arith.divf %33, %34 : vector<4x256xf32>
    %36 = vector.extract_strided_slice %13 {offsets = [0, 512], sizes = [4, 256], strides = [1, 1]} : vector<4x768xf32> to vector<4x256xf32>
    %37 = vector.extract_strided_slice %19 {offsets = [0, 512], sizes = [4, 256], strides = [1, 1]} : vector<4x768xf32> to vector<4x256xf32>
    %38 = arith.mulf %27, %37 : vector<4x256xf32>
    %39 = arith.addf %36, %38 : vector<4x256xf32>
    %40 = math.tanh %39 : vector<4x256xf32>
    %cst_19 = arith.constant 1.000000e+00 : f32
    %41 = vector.broadcast %cst_19 : f32 to vector<4x256xf32>
    %42 = arith.subf %41, %35 : vector<4x256xf32>
    %43 = arith.mulf %42, %40 : vector<4x256xf32>
    %44 = arith.mulf %35, %11 : vector<4x256xf32>
    %45 = arith.addf %43, %44 : vector<4x256xf32>
    %c0_20 = arith.constant 0 : index
    %c0_21 = arith.constant 0 : index
    %c0_22 = arith.constant 0 : index
    %46 = vector.load %arg8[%c0_20, %c0_21, %c0_22] : memref<4x4x256xf32, #tpu.memory_space<vmem>>, vector<1x4x256xf32>
    %47 = vector.shape_cast %46 : vector<1x4x256xf32> to vector<4x256xf32>
    %48 = vector.shape_cast %45 : vector<4x256xf32> to vector<1x4x256xf32>
    tpu.vector_store %arg8[%c0_20, %c0_21, %c0_22], %48 {strides = array<i32>} : memref<4x4x256xf32, #tpu.memory_space<vmem>>, vector<1x4x256xf32>,
    %49 = vector.extract_strided_slice %10 {offsets = [4, 0], sizes = [4, 768], strides = [1, 1]} : vector<16x768xf32> to vector<4x768xf32>
    %50 = arith.addf %6, %49 : vector<4x768xf32>
    %51 = arith.truncf %45 : vector<4x256xf32> to vector<4x256xbf16>
    %c0_23 = arith.constant 0 : index
    %c0_24 = arith.constant 0 : index
    %52 = vector.load %arg5[%c0_23, %c0_24] : memref<256x768xbf16, #tpu.memory_space<vmem>>, vector<256x768xbf16>
    %cst_25 = arith.constant dense<0.000000e+00> : vector<4x768xf32>
    %53 = tpu.matmul %51, %52, %cst_25 {dimension_numbers = #tpu.dot_dimension_numbers<[1], [0], [0], [1], [0, 0, 1, 1], [], []>} : vector<4x256xbf16>, vector<256x768xbf16>, vector<4x768xf32> -> vector<4x768xf32>
    %c0_26 = arith.constant 0 : index
    %c0_27 = arith.constant 0 : index
    %54 = vector.load %arg7[%c0_26, %c0_27] : memref<1x768xf32, #tpu.memory_space<vmem>>, vector<1x768xf32>
    %55 = vector.broadcast %54 : vector<1x768xf32> to vector<4x768xf32>
    %56 = arith.addf %53, %55 : vector<4x768xf32>
    %57 = vector.extract_strided_slice %50 {offsets = [0, 0], sizes = [4, 256], strides = [1, 1]} : vector<4x768xf32> to vector<4x256xf32>
    %58 = vector.extract_strided_slice %56 {offsets = [0, 0], sizes = [4, 256], strides = [1, 1]} : vector<4x768xf32> to vector<4x256xf32>
    %59 = arith.addf %57, %58 : vector<4x256xf32>
    %60 = arith.negf %59 : vector<4x256xf32>
    %61 = math.exp %60 : vector<4x256xf32>
    %cst_28 = arith.constant 1.000000e+00 : f32
    %62 = vector.broadcast %cst_28 : f32 to vector<4x256xf32>
    %63 = arith.addf %62, %61 : vector<4x256xf32>
    %64 = arith.divf %62, %63 : vector<4x256xf32>
    %65 = vector.extract_strided_slice %50 {offsets = [0, 256], sizes = [4, 256], strides = [1, 1]} : vector<4x768xf32> to vector<4x256xf32>
    %66 = vector.extract_strided_slice %56 {offsets = [0, 256], sizes = [4, 256], strides = [1, 1]} : vector<4x768xf32> to vector<4x256xf32>
    %67 = arith.addf %65, %66 : vector<4x256xf32>
    %68 = arith.negf %67 : vector<4x256xf32>
    %69 = math.exp %68 : vector<4x256xf32>
    %cst_29 = arith.constant 1.000000e+00 : f32
    %70 = vector.broadcast %cst_29 : f32 to vector<4x256xf32>
    %71 = arith.addf %70, %69 : vector<4x256xf32>
    %72 = arith.divf %70, %71 : vector<4x256xf32>
    %73 = vector.extract_strided_slice %50 {offsets = [0, 512], sizes = [4, 256], strides = [1, 1]} : vector<4x768xf32> to vector<4x256xf32>
    %74 = vector.extract_strided_slice %56 {offsets = [0, 512], sizes = [4, 256], strides = [1, 1]} : vector<4x768xf32> to vector<4x256xf32>
    %75 = arith.mulf %64, %74 : vector<4x256xf32>
    %76 = arith.addf %73, %75 : vector<4x256xf32>
    %77 = math.tanh %76 : vector<4x256xf32>
    %cst_30 = arith.constant 1.000000e+00 : f32
    %78 = vector.broadcast %cst_30 : f32 to vector<4x256xf32>
    %79 = arith.subf %78, %72 : vector<4x256xf32>
    %80 = arith.mulf %79, %77 : vector<4x256xf32>
    %81 = arith.mulf %72, %45 : vector<4x256xf32>
    %82 = arith.addf %80, %81 : vector<4x256xf32>
    %c1 = arith.constant 1 : index
    %c0_31 = arith.constant 0 : index
    %c0_32 = arith.constant 0 : index
    %83 = vector.load %arg8[%c1, %c0_31, %c0_32] : memref<4x4x256xf32, #tpu.memory_space<vmem>>, vector<1x4x256xf32>
    %84 = vector.shape_cast %83 : vector<1x4x256xf32> to vector<4x256xf32>
    %85 = vector.shape_cast %82 : vector<4x256xf32> to vector<1x4x256xf32>
    tpu.vector_store %arg8[%c1, %c0_31, %c0_32], %85 {strides = array<i32>} : memref<4x4x256xf32, #tpu.memory_space<vmem>>, vector<1x4x256xf32>,
    %86 = vector.extract_strided_slice %10 {offsets = [8, 0], sizes = [4, 768], strides = [1, 1]} : vector<16x768xf32> to vector<4x768xf32>
    %87 = arith.addf %6, %86 : vector<4x768xf32>
    %88 = arith.truncf %82 : vector<4x256xf32> to vector<4x256xbf16>
    %c0_33 = arith.constant 0 : index
    %c0_34 = arith.constant 0 : index
    %89 = vector.load %arg5[%c0_33, %c0_34] : memref<256x768xbf16, #tpu.memory_space<vmem>>, vector<256x768xbf16>
    %cst_35 = arith.constant dense<0.000000e+00> : vector<4x768xf32>
    %90 = tpu.matmul %88, %89, %cst_35 {dimension_numbers = #tpu.dot_dimension_numbers<[1], [0], [0], [1], [0, 0, 1, 1], [], []>} : vector<4x256xbf16>, vector<256x768xbf16>, vector<4x768xf32> -> vector<4x768xf32>
    %c0_36 = arith.constant 0 : index
    %c0_37 = arith.constant 0 : index
    %91 = vector.load %arg7[%c0_36, %c0_37] : memref<1x768xf32, #tpu.memory_space<vmem>>, vector<1x768xf32>
    %92 = vector.broadcast %91 : vector<1x768xf32> to vector<4x768xf32>
    %93 = arith.addf %90, %92 : vector<4x768xf32>
    %94 = vector.extract_strided_slice %87 {offsets = [0, 0], sizes = [4, 256], strides = [1, 1]} : vector<4x768xf32> to vector<4x256xf32>
    %95 = vector.extract_strided_slice %93 {offsets = [0, 0], sizes = [4, 256], strides = [1, 1]} : vector<4x768xf32> to vector<4x256xf32>
    %96 = arith.addf %94, %95 : vector<4x256xf32>
    %97 = arith.negf %96 : vector<4x256xf32>
    %98 = math.exp %97 : vector<4x256xf32>
    %cst_38 = arith.constant 1.000000e+00 : f32
    %99 = vector.broadcast %cst_38 : f32 to vector<4x256xf32>
    %100 = arith.addf %99, %98 : vector<4x256xf32>
    %101 = arith.divf %99, %100 : vector<4x256xf32>
    %102 = vector.extract_strided_slice %87 {offsets = [0, 256], sizes = [4, 256], strides = [1, 1]} : vector<4x768xf32> to vector<4x256xf32>
    %103 = vector.extract_strided_slice %93 {offsets = [0, 256], sizes = [4, 256], strides = [1, 1]} : vector<4x768xf32> to vector<4x256xf32>
    %104 = arith.addf %102, %103 : vector<4x256xf32>
    %105 = arith.negf %104 : vector<4x256xf32>
    %106 = math.exp %105 : vector<4x256xf32>
    %cst_39 = arith.constant 1.000000e+00 : f32
    %107 = vector.broadcast %cst_39 : f32 to vector<4x256xf32>
    %108 = arith.addf %107, %106 : vector<4x256xf32>
    %109 = arith.divf %107, %108 : vector<4x256xf32>
    %110 = vector.extract_strided_slice %87 {offsets = [0, 512], sizes = [4, 256], strides = [1, 1]} : vector<4x768xf32> to vector<4x256xf32>
    %111 = vector.extract_strided_slice %93 {offsets = [0, 512], sizes = [4, 256], strides = [1, 1]} : vector<4x768xf32> to vector<4x256xf32>
    %112 = arith.mulf %101, %111 : vector<4x256xf32>
    %113 = arith.addf %110, %112 : vector<4x256xf32>
    %114 = math.tanh %113 : vector<4x256xf32>
    %cst_40 = arith.constant 1.000000e+00 : f32
    %115 = vector.broadcast %cst_40 : f32 to vector<4x256xf32>
    %116 = arith.subf %115, %109 : vector<4x256xf32>
    %117 = arith.mulf %116, %114 : vector<4x256xf32>
    %118 = arith.mulf %109, %82 : vector<4x256xf32>
    %119 = arith.addf %117, %118 : vector<4x256xf32>
    %c2 = arith.constant 2 : index
    %c0_41 = arith.constant 0 : index
    %c0_42 = arith.constant 0 : index
    %120 = vector.load %arg8[%c2, %c0_41, %c0_42] : memref<4x4x256xf32, #tpu.memory_space<vmem>>, vector<1x4x256xf32>
    %121 = vector.shape_cast %120 : vector<1x4x256xf32> to vector<4x256xf32>
    %122 = vector.shape_cast %119 : vector<4x256xf32> to vector<1x4x256xf32>
    tpu.vector_store %arg8[%c2, %c0_41, %c0_42], %122 {strides = array<i32>} : memref<4x4x256xf32, #tpu.memory_space<vmem>>, vector<1x4x256xf32>,
    %123 = vector.extract_strided_slice %10 {offsets = [12, 0], sizes = [4, 768], strides = [1, 1]} : vector<16x768xf32> to vector<4x768xf32>
    %124 = arith.addf %6, %123 : vector<4x768xf32>
    %125 = arith.truncf %119 : vector<4x256xf32> to vector<4x256xbf16>
    %c0_43 = arith.constant 0 : index
    %c0_44 = arith.constant 0 : index
    %126 = vector.load %arg5[%c0_43, %c0_44] : memref<256x768xbf16, #tpu.memory_space<vmem>>, vector<256x768xbf16>
    %cst_45 = arith.constant dense<0.000000e+00> : vector<4x768xf32>
    %127 = tpu.matmul %125, %126, %cst_45 {dimension_numbers = #tpu.dot_dimension_numbers<[1], [0], [0], [1], [0, 0, 1, 1], [], []>} : vector<4x256xbf16>, vector<256x768xbf16>, vector<4x768xf32> -> vector<4x768xf32>
    %c0_46 = arith.constant 0 : index
    %c0_47 = arith.constant 0 : index
    %128 = vector.load %arg7[%c0_46, %c0_47] : memref<1x768xf32, #tpu.memory_space<vmem>>, vector<1x768xf32>
    %129 = vector.broadcast %128 : vector<1x768xf32> to vector<4x768xf32>
    %130 = arith.addf %127, %129 : vector<4x768xf32>
    %131 = vector.extract_strided_slice %124 {offsets = [0, 0], sizes = [4, 256], strides = [1, 1]} : vector<4x768xf32> to vector<4x256xf32>
    %132 = vector.extract_strided_slice %130 {offsets = [0, 0], sizes = [4, 256], strides = [1, 1]} : vector<4x768xf32> to vector<4x256xf32>
    %133 = arith.addf %131, %132 : vector<4x256xf32>
    %134 = arith.negf %133 : vector<4x256xf32>
    %135 = math.exp %134 : vector<4x256xf32>
    %cst_48 = arith.constant 1.000000e+00 : f32
    %136 = vector.broadcast %cst_48 : f32 to vector<4x256xf32>
    %137 = arith.addf %136, %135 : vector<4x256xf32>
    %138 = arith.divf %136, %137 : vector<4x256xf32>
    %139 = vector.extract_strided_slice %124 {offsets = [0, 256], sizes = [4, 256], strides = [1, 1]} : vector<4x768xf32> to vector<4x256xf32>
    %140 = vector.extract_strided_slice %130 {offsets = [0, 256], sizes = [4, 256], strides = [1, 1]} : vector<4x768xf32> to vector<4x256xf32>
    %141 = arith.addf %139, %140 : vector<4x256xf32>
    %142 = arith.negf %141 : vector<4x256xf32>
    %143 = math.exp %142 : vector<4x256xf32>
    %cst_49 = arith.constant 1.000000e+00 : f32
    %144 = vector.broadcast %cst_49 : f32 to vector<4x256xf32>
    %145 = arith.addf %144, %143 : vector<4x256xf32>
    %146 = arith.divf %144, %145 : vector<4x256xf32>
    %147 = vector.extract_strided_slice %124 {offsets = [0, 512], sizes = [4, 256], strides = [1, 1]} : vector<4x768xf32> to vector<4x256xf32>
    %148 = vector.extract_strided_slice %130 {offsets = [0, 512], sizes = [4, 256], strides = [1, 1]} : vector<4x768xf32> to vector<4x256xf32>
    %149 = arith.mulf %138, %148 : vector<4x256xf32>
    %150 = arith.addf %147, %149 : vector<4x256xf32>
    %151 = math.tanh %150 : vector<4x256xf32>
    %cst_50 = arith.constant 1.000000e+00 : f32
    %152 = vector.broadcast %cst_50 : f32 to vector<4x256xf32>
    %153 = arith.subf %152, %146 : vector<4x256xf32>
    %154 = arith.mulf %153, %151 : vector<4x256xf32>
    %155 = arith.mulf %146, %119 : vector<4x256xf32>
    %156 = arith.addf %154, %155 : vector<4x256xf32>
    %c3 = arith.constant 3 : index
    %c0_51 = arith.constant 0 : index
    %c0_52 = arith.constant 0 : index
    %157 = vector.load %arg8[%c3, %c0_51, %c0_52] : memref<4x4x256xf32, #tpu.memory_space<vmem>>, vector<1x4x256xf32>
    %158 = vector.shape_cast %157 : vector<1x4x256xf32> to vector<4x256xf32>
    %159 = vector.shape_cast %156 : vector<4x256xf32> to vector<1x4x256xf32>
    tpu.vector_store %arg8[%c3, %c0_51, %c0_52], %159 {strides = array<i32>} : memref<4x4x256xf32, #tpu.memory_space<vmem>>, vector<1x4x256xf32>,
    %c0_53 = arith.constant 0 : index
    %c0_54 = arith.constant 0 : index
    %160 = vector.load %arg9[%c0_53, %c0_54] : memref<4x256xf32, #tpu.memory_space<vmem>>, vector<4x256xf32>
    tpu.vector_store %arg9[%c0_53, %c0_54], %156 {strides = array<i32>} : memref<4x256xf32, #tpu.memory_space<vmem>>, vector<4x256xf32>,
    return
  }
}

module attributes {stable_mosaic.version = 11 : i64} {
  func.func @_heads_kernel(%arg0: memref<16x256xf32, #tpu.memory_space<vmem>>, %arg1: memref<4x32xf32, #tpu.memory_space<vmem>>, %arg2: memref<256x64xbf16, #tpu.memory_space<vmem>>, %arg3: memref<1x64xf32, #tpu.memory_space<vmem>>, %arg4: memref<64x4xbf16, #tpu.memory_space<vmem>>, %arg5: memref<1x4xf32, #tpu.memory_space<vmem>>, %arg6: memref<4x64xbf16, #tpu.memory_space<vmem>>, %arg7: memref<1x64xf32, #tpu.memory_space<vmem>>, %arg8: memref<352x256xbf16, #tpu.memory_space<vmem>>, %arg9: memref<1x256xf32, #tpu.memory_space<vmem>>, %arg10: memref<256x8xbf16, #tpu.memory_space<vmem>>, %arg11: memref<1x8xf32, #tpu.memory_space<vmem>>, %arg12: memref<352x1xbf16, #tpu.memory_space<vmem>>, %arg13: memref<1x1xf32, #tpu.memory_space<vmem>>, %arg14: memref<16x128xf32, #tpu.memory_space<vmem>>) attributes {dimension_semantics = [], scalar_prefetch = 0 : i64, scratch_operands = 0 : i64, tpu.core_type = #tpu.core_type<tc>} {
    %c0 = arith.constant 0 : index
    %c0_0 = arith.constant 0 : index
    %0 = vector.load %arg0[%c0, %c0_0] : memref<16x256xf32, #tpu.memory_space<vmem>>, vector<16x256xf32>
    %1 = arith.truncf %0 : vector<16x256xf32> to vector<16x256xbf16>
    %c0_1 = arith.constant 0 : index
    %c0_2 = arith.constant 0 : index
    %2 = vector.load %arg2[%c0_1, %c0_2] : memref<256x64xbf16, #tpu.memory_space<vmem>>, vector<256x64xbf16>
    %cst = arith.constant dense<0.000000e+00> : vector<16x64xf32>
    %3 = tpu.matmul %1, %2, %cst {dimension_numbers = #tpu.dot_dimension_numbers<[1], [0], [0], [1], [0, 0, 1, 1], [], []>} : vector<16x256xbf16>, vector<256x64xbf16>, vector<16x64xf32> -> vector<16x64xf32>
    %c0_3 = arith.constant 0 : index
    %c0_4 = arith.constant 0 : index
    %4 = vector.load %arg3[%c0_3, %c0_4] : memref<1x64xf32, #tpu.memory_space<vmem>>, vector<1x64xf32>
    %5 = vector.broadcast %4 : vector<1x64xf32> to vector<16x64xf32>
    %6 = arith.addf %3, %5 : vector<16x64xf32>
    %cst_5 = arith.constant 0.000000e+00 : f32
    %7 = vector.broadcast %cst_5 : f32 to vector<16x64xf32>
    %8 = arith.maximumf %6, %7 : vector<16x64xf32>
    %9 = arith.truncf %8 : vector<16x64xf32> to vector<16x64xbf16>
    %c0_6 = arith.constant 0 : index
    %c0_7 = arith.constant 0 : index
    %10 = vector.load %arg4[%c0_6, %c0_7] : memref<64x4xbf16, #tpu.memory_space<vmem>>, vector<64x4xbf16>
    %cst_8 = arith.constant dense<0.000000e+00> : vector<16x4xf32>
    %11 = tpu.matmul %9, %10, %cst_8 {dimension_numbers = #tpu.dot_dimension_numbers<[1], [0], [0], [1], [0, 0, 1, 1], [], []>} : vector<16x64xbf16>, vector<64x4xbf16>, vector<16x4xf32> -> vector<16x4xf32>
    %c0_9 = arith.constant 0 : index
    %c0_10 = arith.constant 0 : index
    %12 = vector.load %arg5[%c0_9, %c0_10] : memref<1x4xf32, #tpu.memory_space<vmem>>, vector<1x4xf32>
    %13 = vector.broadcast %12 : vector<1x4xf32> to vector<16x4xf32>
    %14 = arith.addf %11, %13 : vector<16x4xf32>
    %cst_11 = arith.constant dense<0xFF800000> : vector<16xf32>
    %15 = vector.multi_reduction <maximumf>, %14, %cst_11 [1] : vector<16x4xf32> to vector<16xf32>
    %16 = vector.shape_cast %15 : vector<16xf32> to vector<16x1xf32>
    %17 = vector.broadcast %16 : vector<16x1xf32> to vector<16x4xf32>
    %18 = arith.subf %14, %17 : vector<16x4xf32>
    %19 = math.exp %18 : vector<16x4xf32>
    %cst_12 = arith.constant dense<0.000000e+00> : vector<16xf32>
    %20 = vector.multi_reduction <add>, %19, %cst_12 [1] : vector<16x4xf32> to vector<16xf32>
    %21 = vector.shape_cast %20 : vector<16xf32> to vector<16x1xf32>
    %22 = tpu.reciprocal %21 {approx = true} : vector<16x1xf32> -> vector<16x1xf32>
    %23 = vector.broadcast %22 : vector<16x1xf32> to vector<16x4xf32>
    %24 = arith.mulf %19, %23 : vector<16x4xf32>
    %25 = arith.truncf %24 : vector<16x4xf32> to vector<16x4xbf16>
    %c0_13 = arith.constant 0 : index
    %c0_14 = arith.constant 0 : index
    %26 = vector.load %arg6[%c0_13, %c0_14] : memref<4x64xbf16, #tpu.memory_space<vmem>>, vector<4x64xbf16>
    %cst_15 = arith.constant dense<0.000000e+00> : vector<16x64xf32>
    %27 = tpu.matmul %25, %26, %cst_15 {dimension_numbers = #tpu.dot_dimension_numbers<[1], [0], [0], [1], [0, 0, 1, 1], [], []>} : vector<16x4xbf16>, vector<4x64xbf16>, vector<16x64xf32> -> vector<16x64xf32>
    %c0_16 = arith.constant 0 : index
    %c0_17 = arith.constant 0 : index
    %28 = vector.load %arg7[%c0_16, %c0_17] : memref<1x64xf32, #tpu.memory_space<vmem>>, vector<1x64xf32>
    %29 = vector.broadcast %28 : vector<1x64xf32> to vector<16x64xf32>
    %30 = arith.addf %27, %29 : vector<16x64xf32>
    %cst_18 = arith.constant 0.000000e+00 : f32
    %31 = vector.broadcast %cst_18 : f32 to vector<16x64xf32>
    %32 = arith.maximumf %30, %31 : vector<16x64xf32>
    %c0_19 = arith.constant 0 : index
    %c0_20 = arith.constant 0 : index
    %33 = vector.load %arg1[%c0_19, %c0_20] : memref<4x32xf32, #tpu.memory_space<vmem>>, vector<4x32xf32>
    %34 = tpu.concatenate %33, %33, %33, %33 in 0 : vector<4x32xf32>, vector<4x32xf32>, vector<4x32xf32>, vector<4x32xf32> -> vector<16x32xf32>
    %35 = tpu.concatenate %0, %32, %34 in 1 : vector<16x256xf32>, vector<16x64xf32>, vector<16x32xf32> -> vector<16x352xf32>
    %36 = arith.truncf %35 : vector<16x352xf32> to vector<16x352xbf16>
    %c0_21 = arith.constant 0 : index
    %c0_22 = arith.constant 0 : index
    %37 = vector.load %arg8[%c0_21, %c0_22] : memref<352x256xbf16, #tpu.memory_space<vmem>>, vector<352x256xbf16>
    %cst_23 = arith.constant dense<0.000000e+00> : vector<16x256xf32>
    %38 = tpu.matmul %36, %37, %cst_23 {dimension_numbers = #tpu.dot_dimension_numbers<[1], [0], [0], [1], [0, 0, 1, 1], [], []>} : vector<16x352xbf16>, vector<352x256xbf16>, vector<16x256xf32> -> vector<16x256xf32>
    %c0_24 = arith.constant 0 : index
    %c0_25 = arith.constant 0 : index
    %39 = vector.load %arg9[%c0_24, %c0_25] : memref<1x256xf32, #tpu.memory_space<vmem>>, vector<1x256xf32>
    %40 = vector.broadcast %39 : vector<1x256xf32> to vector<16x256xf32>
    %41 = arith.addf %38, %40 : vector<16x256xf32>
    %cst_26 = arith.constant 0.000000e+00 : f32
    %42 = vector.broadcast %cst_26 : f32 to vector<16x256xf32>
    %43 = arith.maximumf %41, %42 : vector<16x256xf32>
    %44 = arith.truncf %43 : vector<16x256xf32> to vector<16x256xbf16>
    %c0_27 = arith.constant 0 : index
    %c0_28 = arith.constant 0 : index
    %45 = vector.load %arg10[%c0_27, %c0_28] : memref<256x8xbf16, #tpu.memory_space<vmem>>, vector<256x8xbf16>
    %cst_29 = arith.constant dense<0.000000e+00> : vector<16x8xf32>
    %46 = tpu.matmul %44, %45, %cst_29 {dimension_numbers = #tpu.dot_dimension_numbers<[1], [0], [0], [1], [0, 0, 1, 1], [], []>} : vector<16x256xbf16>, vector<256x8xbf16>, vector<16x8xf32> -> vector<16x8xf32>
    %c0_30 = arith.constant 0 : index
    %c0_31 = arith.constant 0 : index
    %47 = vector.load %arg11[%c0_30, %c0_31] : memref<1x8xf32, #tpu.memory_space<vmem>>, vector<1x8xf32>
    %48 = vector.broadcast %47 : vector<1x8xf32> to vector<16x8xf32>
    %49 = arith.addf %46, %48 : vector<16x8xf32>
    %c0_32 = arith.constant 0 : index
    %c0_33 = arith.constant 0 : index
    %50 = vector.load %arg12[%c0_32, %c0_33] : memref<352x1xbf16, #tpu.memory_space<vmem>>, vector<352x1xbf16>
    %cst_34 = arith.constant dense<0.000000e+00> : vector<16x1xf32>
    %51 = tpu.matmul %36, %50, %cst_34 {dimension_numbers = #tpu.dot_dimension_numbers<[1], [0], [0], [1], [0, 0, 1, 1], [], []>} : vector<16x352xbf16>, vector<352x1xbf16>, vector<16x1xf32> -> vector<16x1xf32>
    %c0_35 = arith.constant 0 : index
    %c0_36 = arith.constant 0 : index
    %52 = vector.load %arg13[%c0_35, %c0_36] : memref<1x1xf32, #tpu.memory_space<vmem>>, vector<1x1xf32>
    %53 = vector.broadcast %52 : vector<1x1xf32> to vector<16x1xf32>
    %54 = arith.addf %51, %53 : vector<16x1xf32>
    %cst_37 = arith.constant 0.000000e+00 : f32
    %55 = vector.broadcast %cst_37 : f32 to vector<16x115xf32>
    %56 = tpu.concatenate %24, %49, %54, %55 in 1 : vector<16x4xf32>, vector<16x8xf32>, vector<16x1xf32>, vector<16x115xf32> -> vector<16x128xf32>
    %c0_38 = arith.constant 0 : index
    %c0_39 = arith.constant 0 : index
    %57 = vector.load %arg14[%c0_38, %c0_39] : memref<16x128xf32, #tpu.memory_space<vmem>>, vector<16x128xf32>
    tpu.vector_store %arg14[%c0_38, %c0_39], %56 {strides = array<i32>} : memref<16x128xf32, #tpu.memory_space<vmem>>, vector<16x128xf32>,
    return
  }
}

</mosaic_0001>

<bundles_post_ra>
// kernel: agent_network_forward.5
= control target key start
LH: loop header
LB: loop body
LE: loop exit
PB: predicated region body
PF: predicated region fallthrough
CT: control target
= control target key end

     0   :  { %vm1513_vm0 = vcmask 1041408   ;;  %vm1514_vm1 = vcmask 1042432   ;;  %vm1509_vm2 = vcmask 302080   ;;  %vm2415_vm3 = vmmov 0   ;;  %s3004_s3 = inlined_call_operand.vmem [shape: bf16[2048,128], index: 3, kind: input, shape index: {}]   ;;  %s3005_s0 = inlined_call_operand.vmem [shape: f32[4,2048], index: 0, kind: input, shape index: {}]   ;;  %s3006_s5 = inlined_call_operand.vmem [shape: bf16[37,352], index: 5, kind: input, shape index: {}]   ;;  %s3007_s1 = inlined_call_operand.vmem [shape: f32[4,37], index: 1, kind: input, shape index: {}]   ;;  %s3008_s7 = inlined_call_operand.vmem [shape: bf16[256,128], index: 7, kind: input, shape index: {}]   ;;  %s3009_s9 = inlined_call_operand.vmem [shape: bf16[4,64], index: 9, kind: input, shape index: {}]   ;;  %s3010_s2 = inlined_call_operand.vmem [shape: f32[16,4], index: 2, kind: input, shape index: {}]   ;;  %s3011_s6 = inlined_call_operand.vmem [shape: f32[1,352], index: 6, kind: input, shape index: {}]   ;;  %s3012_s4 = inlined_call_operand.vmem [shape: f32[1,128], index: 4, kind: input, shape index: {}]   ;;  %s3013_s11 = inlined_call_operand.vmem [shape: f32[4,352], index: 11, kind: output, shape index: {0}]   ;;  %s3014_s10 = inlined_call_operand.vmem [shape: f32[1,64], index: 10, kind: input, shape index: {}]   ;;  %s3015_s12 = inlined_call_operand.vmem [shape: f32[16,64], index: 12, kind: output, shape index: {1}]   ;;  %s3016_s8 = inlined_call_operand.vmem [shape: f32[1,128], index: 8, kind: input, shape index: {}]  }
   0x1   :  { %v2249_v0 = vld [vmem:[%s3004_s3 + $0x40] sm:$0xff]   ;;  %v2253_v4 = vld [vmem:[%s3004_s3 + $0x48] sm:$0xff]   ;;  %v2257_v8 = vld [vmem:[%s3004_s3 + $0x50] sm:$0xff]   ;;  %vm1805_vm4 = vcmask 31744   ;;  %vm1792_vm5 = vcmask 781312   ;;  %vm1855_vm6 = vcmask 523264  }
   0x2   :  { %v2250_v1 = vld [vmem:[%s3004_s3 + $0xc0] sm:$0xff]   ;;  %2025 = vmatprep.subr.bf16.mxu0 %v2249_v0  ;;  %v2254_v5 = vld [vmem:[%s3004_s3 + $0xc8] sm:$0xff]   ;;  %v2258_v9 = vld [vmem:[%s3004_s3 + $0xd0] sm:$0xff]  }
   0x3   :  { %v2251_v2 = vld [vmem:[%s3004_s3] sm:$0xff]   ;;  %2047 = vmatprep.subr.bf16.mxu1 %v2250_v1  ;;  %v2255_v6 = vld [vmem:[%s3004_s3 + $0x8] sm:$0xff]   ;;  %v2259_v10 = vld [vmem:[%s3004_s3 + $0x10] sm:$0xff]  }
   0x4   :  { %v2252_v3 = vld [vmem:[%s3004_s3 + $0x80] sm:$0xff]   ;;  %2026 = vmatpush3.bf16.msra.mxu0 %v2251_v2  ;;  %v2256_v7 = vld [vmem:[%s3004_s3 + $0x88] sm:$0xff]   ;;  %v2260_v11 = vld [vmem:[%s3004_s3 + $0x90] sm:$0xff]  }
   0x5   :  { %2048 = vmatpush3.bf16.msra.mxu1 %v2252_v3  ;;  %2027 = vmatprep.subr.bf16.mxu0 %v2253_v4  ;;  %v2261_v12 = vld [vmem:[%s3004_s3 + $0x58] sm:$0xff]   ;;  %v2265_v16 = vld [vmem:[%s3004_s3 + $0x60] sm:$0xff]   ;;  %v2269_v20 = vld [vmem:[%s3004_s3 + $0x68] sm:$0xff]  }
   0x6   :  { %2049 = vmatprep.subr.bf16.mxu1 %v2254_v5  ;;  %v2262_v13 = vld [vmem:[%s3004_s3 + $0xd8] sm:$0xff]   ;;  %v2266_v17 = vld [vmem:[%s3004_s3 + $0xe0] sm:$0xff]   ;;  %v2270_v21 = vld [vmem:[%s3004_s3 + $0xe8] sm:$0xff]  }
   0x7   :  { %v2263_v14 = vld [vmem:[%s3004_s3 + $0x18] sm:$0xff]   ;;  %v2267_v18 = vld [vmem:[%s3004_s3 + $0x20] sm:$0xff]   ;;  %v2271_v22 = vld [vmem:[%s3004_s3 + $0x28] sm:$0xff]  }
   0x8   :  { %2028 = vmatpush3.bf16.msra.mxu0 %v2255_v6  ;;  %v2264_v15 = vld [vmem:[%s3004_s3 + $0x98] sm:$0xff]   ;;  %v2268_v19 = vld [vmem:[%s3004_s3 + $0xa0] sm:$0xff]   ;;  %v2272_v23 = vld [vmem:[%s3004_s3 + $0xa8] sm:$0xff]  }
   0x9   :  { %2050 = vmatpush3.bf16.msra.mxu1 %v2256_v7  ;;  %2029 = vmatprep.subr.bf16.mxu0 %v2257_v8  ;;  %v2273_v24 = vld [vmem:[%s3004_s3 + $0x70] sm:$0xff]   ;;  %v2277_v28 = vld [vmem:[%s3004_s3 + $0x78] sm:$0xff]   ;;  %v41_v32 = vld [vmem:[%s3005_s0] sm:$0xff] }
   0xa   :  { %2051 = vmatprep.subr.bf16.mxu1 %v2258_v9  ;;  %v2274_v25 = vld [vmem:[%s3004_s3 + $0xf0] sm:$0xff]   ;;  %v2278_v29 = vld [vmem:[%s3004_s3 + $0xf8] sm:$0xff]   ;;  %v42_v33 = vld [vmem:[%s3005_s0 + $0x8] sm:$0xff]  ;;  %v57_v34 = vcombine.high %v41_v32, %v41_v32  ;;  %v73_v37 = vpack.c.bf16 %v41_v32, %v41_v32 }
   0xb   :  { %v2275_v26 = vld [vmem:[%s3004_s3 + $0x30] sm:$0xff]   ;;  %v2279_v30 = vld [vmem:[%s3004_s3 + $0x38] sm:$0xff]   ;;  %v58_v35 = vcombine.high %v42_v33, %v42_v33  ;;  %v2283_v36 = vld [vmem:[%s3004_s3 + $0x140] sm:$0xff]   ;;  %v75_v38 = vpack.c.bf16 %v42_v33, %v42_v33 }
   0xc   :  { %2030 = vmatpush3.bf16.msra.mxu0 %v2259_v10  ;;  %v2276_v27 = vld [vmem:[%s3004_s3 + $0xb0] sm:$0xff]   ;;  %v2280_v31 = vld [vmem:[%s3004_s3 + $0xb8] sm:$0xff]   ;;  %v2284_v39 = vld [vmem:[%s3004_s3 + $0x1c0] sm:$0xff]   ;;  %v74_v40 = vpack.c.bf16 %v57_v34, %v57_v34 }
   0xd   :  { %2052 = vmatpush3.bf16.msra.mxu1 %v2260_v11  ;;  %2031 = vmatprep.subr.bf16.mxu0 %v2261_v12  ;;  %v76_v41 = vpack.c.bf16 %v58_v35, %v58_v35  ;;  %v2285_v42 = vld [vmem:[%s3004_s3 + $0x100] sm:$0xff]   ;;  %v2287_v44 = vld [vmem:[%s3004_s3 + $0x148] sm:$0xff]   ;;  %v2291_v48 = vld [vmem:[%s3004_s3 + $0x150] sm:$0xff]  }
   0xe   :  { %2053 = vmatprep.subr.bf16.mxu1 %v2262_v13  ;;  %v2286_v43 = vld [vmem:[%s3004_s3 + $0x180] sm:$0xff]   ;;  %1152 = vmatprep.mubr.bf16.mxu0 %v74_v40  ;;  %v2288_v45 = vld [vmem:[%s3004_s3 + $0x1c8] sm:$0xff]   ;;  %v2292_v49 = vld [vmem:[%s3004_s3 + $0x1d0] sm:$0xff]  }
   0xf   :  { %1192 = vmatprep.mubr.bf16.mxu1 %v76_v41  ;;  %v2289_v46 = vld [vmem:[%s3004_s3 + $0x108] sm:$0xff]   ;;  %v2293_v50 = vld [vmem:[%s3004_s3 + $0x110] sm:$0xff]   ;;  %v2295_v52 = vld [vmem:[%s3004_s3 + $0x158] sm:$0xff]  }
  0x10   :  { %2032 = vmatpush3.bf16.msra.mxu0 %v2263_v14  ;;  %v2290_v47 = vld [vmem:[%s3004_s3 + $0x188] sm:$0xff]   ;;  %v2294_v51 = vld [vmem:[%s3004_s3 + $0x190] sm:$0xff]   ;;  %v2296_v53 = vld [vmem:[%s3004_s3 + $0x1d8] sm:$0xff]  }
  0x11   :  { %2054 = vmatpush3.bf16.msra.mxu1 %v2264_v15  ;;  %2033 = vmatprep.subr.bf16.mxu0 %v2265_v16  ;;  %v2297_v54 = vld [vmem:[%s3004_s3 + $0x118] sm:$0xff]   ;;  %v2299_v56 = vld [vmem:[%s3004_s3 + $0x160] sm:$0xff]   ;;  %v2303_v60 = vld [vmem:[%s3004_s3 + $0x168] sm:$0xff]  }
  0x12   :  { %2055 = vmatprep.subr.bf16.mxu1 %v2266_v17  ;;  %v2298_v55 = vld [vmem:[%s3004_s3 + $0x198] sm:$0xff]   ;;  %v2300_v57 = vld [vmem:[%s3004_s3 + $0x1e0] sm:$0xff]   ;;  %v2304_v61 = vld [vmem:[%s3004_s3 + $0x1e8] sm:$0xff]  }
  0x13   :  { %v2301_v58 = vld [vmem:[%s3004_s3 + $0x120] sm:$0xff]   ;;  %v2305_v62 = vld [vmem:[%s3004_s3 + $0x128] sm:$0xff]   ;;  %v2307_v0 = vld [vmem:[%s3004_s3 + $0x170] sm:$0xff]  }
  0x14   :  { %2034 = vmatpush3.bf16.msra.mxu0 %v2267_v18  ;;  %v2302_v59 = vld [vmem:[%s3004_s3 + $0x1a0] sm:$0xff]   ;;  %v2306_v63 = vld [vmem:[%s3004_s3 + $0x1a8] sm:$0xff]   ;;  %v2308_v1 = vld [vmem:[%s3004_s3 + $0x1f0] sm:$0xff]  }
  0x15   :  { %2056 = vmatpush3.bf16.msra.mxu1 %v2268_v19  ;;  %2035 = vmatprep.subr.bf16.mxu0 %v2269_v20  ;;  %v2309_v2 = vld [vmem:[%s3004_s3 + $0x130] sm:$0xff]   ;;  %v2311_v4 = vld [vmem:[%s3004_s3 + $0x178] sm:$0xff]   ;;  %v2317_v13 = vld [vmem:[%s3004_s3 + $0x240] sm:$0xff]  }
  0x16   :  { %2057 = vmatprep.subr.bf16.mxu1 %v2270_v21  ;;  %v2310_v3 = vld [vmem:[%s3004_s3 + $0x1b0] sm:$0xff]   ;;  %v2312_v5 = vld [vmem:[%s3004_s3 + $0x1f8] sm:$0xff]   ;;  %v2318_v16 = vld [vmem:[%s3004_s3 + $0x2c0] sm:$0xff]  }
  0x17   :  { %v2313_v6 = vld [vmem:[%s3004_s3 + $0x138] sm:$0xff]   ;;  %v43_v8 = vld [vmem:[%s3005_s0 + $0x10] sm:$0xff]  ;;  %v2319_v18 = vld [vmem:[%s3004_s3 + $0x200] sm:$0xff]  }
  0x18   :  { %2036 = vmatpush3.bf16.msra.mxu0 %v2271_v22  ;;  %v2314_v7 = vld [vmem:[%s3004_s3 + $0x1b8] sm:$0xff]   ;;  %v59_v9 = vcombine.high %v43_v8, %v43_v8  ;;  %v77_v11 = vpack.c.bf16 %v43_v8, %v43_v8  ;;  %v2320_v19 = vld [vmem:[%s3004_s3 + $0x280] sm:$0xff]   ;;  %v2321_v20 = vld [vmem:[%s3004_s3 + $0x248] sm:$0xff]  }
  0x19   :  { %2058 = vmatpush3.bf16.msra.mxu1 %v2272_v23  ;;  %2037 = vmatprep.subr.bf16.mxu0 %v2273_v24  ;;  %v44_v10 = vld [vmem:[%s3005_s0 + $0x18] sm:$0xff]  ;;  %v2322_v21 = vld [vmem:[%s3004_s3 + $0x2c8] sm:$0xff]   ;;  %v2325_v24 = vld [vmem:[%s3004_s3 + $0x250] sm:$0xff]  }
  0x1a   :  { %2059 = vmatprep.subr.bf16.mxu1 %v2274_v25  ;;  %v60_v12 = vcombine.high %v44_v10, %v44_v10  ;;  %v78_v14 = vpack.c.bf16 %v59_v9, %v59_v9  ;;  %v79_v15 = vpack.c.bf16 %v44_v10, %v44_v10  ;;  %v2323_v22 = vld [vmem:[%s3004_s3 + $0x208] sm:$0xff]   ;;  %v2326_v25 = vld [vmem:[%s3004_s3 + $0x2d0] sm:$0xff]   ;;  %v2333_v32 = vld [vmem:[%s3004_s3 + $0x260] sm:$0xff]  }
  0x1b   :  { %v2324_v23 = vld [vmem:[%s3004_s3 + $0x288] sm:$0xff]   ;;  %v2334_v33 = vld [vmem:[%s3004_s3 + $0x2e0] sm:$0xff]   ;;  %v2341_v40 = vld [vmem:[%s3004_s3 + $0x270] sm:$0xff]  }
  0x1c   :  { %2038 = vmatpush3.bf16.msra.mxu0 %v2275_v26  ;;  %v80_v17 = vpack.c.bf16 %v60_v12, %v60_v12  ;;  %v2327_v26 = vld [vmem:[%s3004_s3 + $0x210] sm:$0xff]   ;;  %v2335_v34 = vld [vmem:[%s3004_s3 + $0x220] sm:$0xff]   ;;  %v2371_v12 = vld [vmem:[%s3004_s3 + $0x368] sm:$0xff]  }
  0x1d   :  { %2060 = vmatpush3.bf16.msra.mxu1 %v2276_v27  ;;  %2039 = vmatprep.subr.bf16.mxu0 %v2277_v28  ;;  %v2328_v27 = vld [vmem:[%s3004_s3 + $0x290] sm:$0xff]   ;;  %v2329_v28 = vld [vmem:[%s3004_s3 + $0x258] sm:$0xff]   ;;  %v2336_v35 = vld [vmem:[%s3004_s3 + $0x2a0] sm:$0xff]  }
  0x1e   :  { %2061 = vmatprep.subr.bf16.mxu1 %v2278_v29  ;;  %v2330_v29 = vld [vmem:[%s3004_s3 + $0x2d8] sm:$0xff]   ;;  %v2342_v41 = vld [vmem:[%s3004_s3 + $0x2f0] sm:$0xff]   ;;  %v2367_v8 = vld [vmem:[%s3004_s3 + $0x360] sm:$0xff]  }
  0x1f   :  { %v2368_v9 = vld [vmem:[%s3004_s3 + $0x3e0] sm:$0xff]  }
  0x20   :  { %2040 = vmatpush3.bf16.msra.mxu0 %v2279_v30  ;;  %v2331_v30 = vld [vmem:[%s3004_s3 + $0x218] sm:$0xff]   ;;  %v2369_v10 = vld [vmem:[%s3004_s3 + $0x320] sm:$0xff]  }
  0x21   :  { %2062 = vmatpush3.bf16.msra.mxu1 %v2280_v31  ;;  %2069 = vmatprep.subr.bf16.mxu0 %v2283_v36  ;;  %v2332_v31 = vld [vmem:[%s3004_s3 + $0x298] sm:$0xff]   ;;  %v2337_v36 = vld [vmem:[%s3004_s3 + $0x268] sm:$0xff]  }
  0x22   :  { %2091 = vmatprep.subr.bf16.mxu1 %v2284_v39  ;;  %v2340_v39 = vld [vmem:[%s3004_s3 + $0x2a8] sm:$0xff]  }
  0x23   :  { %1153 = vmatmul.mubr.bf16.vlgmr.msra.gmra.mrb[0].mxu0 %v73_v37  ;;  %v2338_v37 = vld [vmem:[%s3004_s3 + $0x2e8] sm:$0xff]  }
  0x24   :  { %1193 = vmatmul.mubr.bf16.vlgmr.msra.gmra.mrb[0].mxu1 %v75_v38  ;;  %2070 = vmatpush3.bf16.msra.mxu0 %v2285_v42  ;;  %v2339_v38 = vld [vmem:[%s3004_s3 + $0x228] sm:$0xff]   ;;  %v2343_v42 = vld [vmem:[%s3004_s3 + $0x230] sm:$0xff]  }
  0x25   :  { %2092 = vmatpush3.bf16.msra.mxu1 %v2286_v43  ;;  %2071 = vmatprep.subr.bf16.mxu0 %v2287_v44  ;;  %v2344_v43 = vld [vmem:[%s3004_s3 + $0x2b0] sm:$0xff]   ;;  %v2345_v44 = vld [vmem:[%s3004_s3 + $0x278] sm:$0xff]  }
  0x26   :  { %2093 = vmatprep.subr.bf16.mxu1 %v2288_v45  ;;  %1232 = vmatprep.mubr.bf16.mxu0 %v78_v14  ;;  %v2346_v45 = vld [vmem:[%s3004_s3 + $0x2f8] sm:$0xff]   ;;  %v2373_v14 = vld [vmem:[%s3004_s3 + $0x328] sm:$0xff]  }
  0x27   :  { %1272 = vmatprep.mubr.bf16.mxu1 %v80_v17  ;;  %v2376_v17 = vld [vmem:[%s3004_s3 + $0x3f0] sm:$0xff]  }
  0x28   :  { %2072 = vmatpush3.bf16.msra.mxu0 %v2289_v46  ;;  %v2347_v46 = vld [vmem:[%s3004_s3 + $0x238] sm:$0xff]  }
  0x29   :  { %2094 = vmatpush3.bf16.msra.mxu1 %v2290_v47  ;;  %2073 = vmatprep.subr.bf16.mxu0 %v2291_v48  ;;  %v2348_v47 = vld [vmem:[%s3004_s3 + $0x2b8] sm:$0xff]   ;;  %v45_v48 = vld [vmem:[%s3005_s0 + $0x20] sm:$0xff] }
  0x2a   :  { %2095 = vmatprep.subr.bf16.mxu1 %v2292_v49  ;;  %v46_v49 = vld [vmem:[%s3005_s0 + $0x28] sm:$0xff] }
  0x2c   :  { %2074 = vmatpush3.bf16.msra.mxu0 %v2293_v50  ;;  %v61_v50 = vcombine.high %v45_v48, %v45_v48 }
  0x2d   :  { %2096 = vmatpush3.bf16.msra.mxu1 %v2294_v51  ;;  %2075 = vmatprep.subr.bf16.mxu0 %v2295_v52  ;;  %v62_v51 = vcombine.high %v46_v49, %v46_v49  ;;  %v2351_v52 = vld [vmem:[%s3004_s3 + $0x340] sm:$0xff]  }
  0x2e   :  { %2097 = vmatprep.subr.bf16.mxu1 %v2296_v53  ;;  %v81_v53 = vpack.c.bf16 %v45_v48, %v45_v48  ;;  %v2414_v48 = vmov 0.0  }
  0x30   :  { %2076 = vmatpush3.bf16.msra.mxu0 %v2297_v54  ;;  %v83_v54 = vpack.c.bf16 %v46_v49, %v46_v49  ;;  %v2394_v49 = vld [vmem:[%s3008_s7] sm:$0xff]  }
  0x31   :  { %2098 = vmatpush3.bf16.msra.mxu1 %v2298_v55  ;;  %2077 = vmatprep.subr.bf16.mxu0 %v2299_v56  ;;  %v2352_v55 = vld [vmem:[%s3004_s3 + $0x3c0] sm:$0xff]   ;;  %v82_v56 = vpack.c.bf16 %v61_v50, %v61_v50  ;;  %v2395_v50 = vld [vmem:[%s3008_s7 + $0x48] sm:$0xff]  }
  0x32   :  { %2099 = vmatprep.subr.bf16.mxu1 %v2300_v57  ;;  %v84_v57 = vpack.c.bf16 %v62_v51, %v62_v51  ;;  %v2396_v51 = vld [vmem:[%s3008_s7 + $0x8] sm:$0xff]  }
  0x34   :  { %2078 = vmatpush3.bf16.msra.mxu0 %v2301_v58  ;;  %v2353_v58 = vld [vmem:[%s3004_s3 + $0x300] sm:$0xff]  }
  0x35   :  { %2100 = vmatpush3.bf16.msra.mxu1 %v2302_v59  ;;  %2079 = vmatprep.subr.bf16.mxu0 %v2303_v60  ;;  %v2354_v59 = vld [vmem:[%s3004_s3 + $0x380] sm:$0xff]   ;;  %v2355_v60 = vld [vmem:[%s3004_s3 + $0x348] sm:$0xff]  }
  0x36   :  { %2101 = vmatprep.subr.bf16.mxu1 %v2304_v61  ;;  %v2356_v61 = vld [vmem:[%s3004_s3 + $0x3c8] sm:$0xff]  }
  0x38   :  { %2080 = vmatpush3.bf16.msra.mxu0 %v2305_v62  ;;  %v2357_v62 = vld [vmem:[%s3004_s3 + $0x308] sm:$0xff]  }
  0x39   :  { %2102 = vmatpush3.bf16.msra.mxu1 %v2306_v63  ;;  %2081 = vmatprep.subr.bf16.mxu0 %v2307_v0  ;;  %v2358_v63 = vld [vmem:[%s3004_s3 + $0x388] sm:$0xff]   ;;  %v2359_v0 = vld [vmem:[%s3004_s3 + $0x350] sm:$0xff]  }
  0x3a   :  { %2103 = vmatprep.subr.bf16.mxu1 %v2308_v1  ;;  %v2360_v1 = vld [vmem:[%s3004_s3 + $0x3d0] sm:$0xff]  }
  0x3c   :  { %2082 = vmatpush3.bf16.msra.mxu0 %v2309_v2  ;;  %v2361_v2 = vld [vmem:[%s3004_s3 + $0x310] sm:$0xff]  }
  0x3d   :  { %2104 = vmatpush3.bf16.msra.mxu1 %v2310_v3  ;;  %2083 = vmatprep.subr.bf16.mxu0 %v2311_v4  ;;  %v2362_v3 = vld [vmem:[%s3004_s3 + $0x390] sm:$0xff]   ;;  %v2363_v4 = vld [vmem:[%s3004_s3 + $0x358] sm:$0xff]  }
  0x3e   :  { %2105 = vmatprep.subr.bf16.mxu1 %v2312_v5  ;;  %v2364_v5 = vld [vmem:[%s3004_s3 + $0x3d8] sm:$0xff]  }
  0x40   :  { %2084 = vmatpush3.bf16.msra.mxu0 %v2313_v6  ;;  %v2365_v6 = vld [vmem:[%s3004_s3 + $0x318] sm:$0xff]  }
  0x41   :  { %2106 = vmatpush3.bf16.msra.mxu1 %v2314_v7  ;;  %2113 = vmatprep.subr.bf16.mxu0 %v2317_v13  ;;  %v2366_v7 = vld [vmem:[%s3004_s3 + $0x398] sm:$0xff]   ;;  %v2372_v13 = vld [vmem:[%s3004_s3 + $0x3e8] sm:$0xff]  }
  0x42   :  { %2135 = vmatprep.subr.bf16.mxu1 %v2318_v16  ;;  %v2375_v16 = vld [vmem:[%s3004_s3 + $0x370] sm:$0xff]  }
  0x43   :  { %1233 = vmatmul.mubr.bf16.vlgmr.msra.gmra.mrb[4].mxu0 %v77_v11  ;;  %v2370_v11 = vld [vmem:[%s3004_s3 + $0x3a0] sm:$0xff]  }
  0x44   :  { %1273 = vmatmul.mubr.bf16.vlgmr.msra.gmra.mrb[4].mxu1 %v79_v15  ;;  %2114 = vmatpush3.bf16.msra.mxu0 %v2319_v18  ;;  %v2374_v15 = vld [vmem:[%s3004_s3 + $0x3a8] sm:$0xff]   ;;  %v2377_v18 = vld [vmem:[%s3004_s3 + $0x330] sm:$0xff]  }
  0x45   :  { %2136 = vmatpush3.bf16.msra.mxu1 %v2320_v19  ;;  %2115 = vmatprep.subr.bf16.mxu0 %v2321_v20  ;;  %v2378_v19 = vld [vmem:[%s3004_s3 + $0x3b0] sm:$0xff]   ;;  %v2379_v20 = vld [vmem:[%s3004_s3 + $0x378] sm:$0xff]  }
  0x46   :  { %2137 = vmatprep.subr.bf16.mxu1 %v2322_v21  ;;  %1312 = vmatprep.mubr.bf16.mxu0 %v82_v56  ;;  %v2380_v21 = vld [vmem:[%s3004_s3 + $0x3f8] sm:$0xff]  }
  0x47   :  { %1352 = vmatprep.mubr.bf16.mxu1 %v84_v57  ;;  %v2401_v56 = vld [vmem:[%s3008_s7 + $0x18] sm:$0xff]   ;;  %v2402_v57 = vld [vmem:[%s3006_s5 + $0x20] ss:$12 sps:$4 sm:$0xff]  }
  0x48   :  { %2116 = vmatpush3.bf16.msra.mxu0 %v2323_v22  ;;  %v2381_v22 = vld [vmem:[%s3004_s3 + $0x338] sm:$0xff]  }
  0x49   :  { %2138 = vmatpush3.bf16.msra.mxu1 %v2324_v23  ;;  %2117 = vmatprep.subr.bf16.mxu0 %v2325_v24  ;;  %v2382_v23 = vld [vmem:[%s3004_s3 + $0x3b8] sm:$0xff]   ;;  %v47_v24 = vld [vmem:[%s3005_s0 + $0x30] sm:$0xff] }
  0x4a   :  { %2139 = vmatprep.subr.bf16.mxu1 %v2326_v25  ;;  %v48_v25 = vld [vmem:[%s3005_s0 + $0x38] sm:$0xff] }
  0x4c   :  { %2118 = vmatpush3.bf16.msra.mxu0 %v2327_v26  ;;  %v2412_v26 = vmov 65535  }
  0x4d   :  { %2140 = vmatpush3.bf16.msra.mxu1 %v2328_v27  ;;  %2119 = vmatprep.subr.bf16.mxu0 %v2329_v28  ;;  %v1515_v27 = vsel %vm1513_vm0, 4294967295, %v2412_v26  ;;  %v63_v28 = vcombine.high %v47_v24, %v47_v24 }
  0x4e   :  { %2141 = vmatprep.subr.bf16.mxu1 %v2330_v29  ;;  %v64_v29 = vcombine.high %v48_v25, %v48_v25 }
  0x50   :  { %2120 = vmatpush3.bf16.msra.mxu0 %v2331_v30  ;;  %v2387_v30 = vld [vmem:[%s3006_s5 + $0x4] ss:$12 sps:$4 sm:$0xff]  }
  0x51   :  { %2142 = vmatpush3.bf16.msra.mxu1 %v2332_v31  ;;  %2121 = vmatprep.subr.bf16.mxu0 %v2333_v32  ;;  %v85_v31 = vpack.c.bf16 %v47_v24, %v47_v24  ;;  %v87_v32 = vpack.c.bf16 %v48_v25, %v48_v25 }
  0x52   :  { %2143 = vmatprep.subr.bf16.mxu1 %v2334_v33  ;;  %v86_v33 = vpack.c.bf16 %v63_v28, %v63_v28 }
  0x54   :  { %2122 = vmatpush3.bf16.msra.mxu0 %v2335_v34  ;;  %v88_v34 = vpack.c.bf16 %v64_v29, %v64_v29 }
  0x55   :  { %2144 = vmatpush3.bf16.msra.mxu1 %v2336_v35  ;;  %2123 = vmatprep.subr.bf16.mxu0 %v2337_v36  ;;  %v2385_v35 = vld [vmem:[%s3006_s5] ss:$12 sps:$4 sm:$0xff]   ;;  %v1450_v36 = vld [vmem:[%s3006_s5 + $0x30] sm:$0x77] }
  0x56   :  { %2145 = vmatprep.subr.bf16.mxu1 %v2338_v37  ;;  %v1516_v37 = vsel %vm1514_vm1, %v1515_v27, 0 }
  0x58   :  { %2124 = vmatpush3.bf16.msra.mxu0 %v2339_v38  ;;  %v2390_v38 = vld [vmem:[%s3006_s5 + $0x1c] ss:$12 sps:$4 sm:$0xff]  }
  0x59   :  { %2146 = vmatpush3.bf16.msra.mxu1 %v2340_v39  ;;  %2125 = vmatprep.subr.bf16.mxu0 %v2341_v40  ;;  %v2002_v39 = vcombine.high %v1450_v36, %v1450_v36  ;;  %v2388_v40 = vld [vmem:[%s3006_s5 + $0x18] ss:$12 sps:$4 sm:$0xff]  }
  0x5a   :  { %2147 = vmatprep.subr.bf16.mxu1 %v2342_v41  ;;  %v2001_v41 = vcombine.low %v1450_v36, %v1450_v36 }
  0x5c   :  { %2126 = vmatpush3.bf16.msra.mxu0 %v2343_v42  ;;  %v2413_v42 = vmov 0  }
  0x5d   :  { %2148 = vmatpush3.bf16.msra.mxu1 %v2344_v43  ;;  %2127 = vmatprep.subr.bf16.mxu0 %v2345_v44  ;;  %v1521_v43 = vand.u32 %v2002_v39, %v1516_v37  ;;  %v1518_v44 = vand.u32 %v2001_v41, %v1516_v37 }
  0x5e   :  { %2149 = vmatprep.subr.bf16.mxu1 %v2346_v45  ;;  %v1440_v45 = vld [vmem:[%s3007_s1] sm:$0xf] }
  0x60   :  { %2128 = vmatpush3.bf16.msra.mxu0 %v2347_v46  ;;  %v1441_v46 = vpack.c.bf16 %v1440_v45, %v1440_v45 }
  0x61   :  { %2150 = vmatpush3.bf16.msra.mxu1 %v2348_v47  ;;  %2157 = vmatprep.subr.bf16.mxu0 %v2351_v52  ;;  %v2393_v47 = vld [vmem:[%s3008_s7 + $0x40] sm:$0xff]   ;;  %v2397_v52 = vld [vmem:[%s3008_s7 + $0x50] sm:$0xff]  }
  0x62   :  { %2179 = vmatprep.subr.bf16.mxu1 %v2352_v55  ;;  %v2400_v55 = vld [vmem:[%s3008_s7 + $0x58] sm:$0xff]  }
  0x63   :  { %1313 = vmatmul.mubr.bf16.vlgmr.msra.gmra.mrb[8].mxu0 %v81_v53  ;;  %v2398_v53 = vld [vmem:[%s3008_s7 + $0x10] sm:$0xff]  }
  0x64   :  { %1353 = vmatmul.mubr.bf16.vlgmr.msra.gmra.mrb[8].mxu1 %v83_v54  ;;  %2158 = vmatpush3.bf16.msra.mxu0 %v2353_v58  ;;  %v2399_v54 = vld [vmem:[%s3006_s5 + $0x8] ss:$12 sps:$4 sm:$0xff]   ;;  %v2403_v58 = vld [vmem:[%s3008_s7 + $0x60] sm:$0xff]  }
  0x65   :  { %2180 = vmatpush3.bf16.msra.mxu1 %v2354_v59  ;;  %2159 = vmatprep.subr.bf16.mxu0 %v2355_v60  ;;  %v2404_v59 = vld [vmem:[%s3008_s7 + $0x20] sm:$0xff]   ;;  %v2405_v60 = vld [vmem:[%s3006_s5 + $0x38] ss:$0 sps:$4 sm:$0x77]  }
  0x66   :  { %2181 = vmatprep.subr.bf16.mxu1 %v2356_v61  ;;  %1392 = vmatprep.mubr.bf16.mxu0 %v86_v33  ;;  %v1524_v61 = vand.u32 %v2405_v60, %v1516_v37 }
  0x67   :  { %1432 = vmatprep.mubr.bf16.mxu1 %v88_v34 }
  0x68   :  { %2160 = vmatpush3.bf16.msra.mxu0 %v2357_v62  ;;  %v2406_v62 = vld [vmem:[%s3008_s7 + $0x68] sm:$0xff]  }
  0x69   :  { %2182 = vmatpush3.bf16.msra.mxu1 %v2358_v63  ;;  %2161 = vmatprep.subr.bf16.mxu0 %v2359_v0  ;;  %v2407_v63 = vld [vmem:[%s3008_s7 + $0x28] sm:$0xff]   ;;  %v2408_v0 = vld [vmem:[%s3008_s7 + $0x70] sm:$0xff]  }
  0x6a   :  { %2183 = vmatprep.subr.bf16.mxu1 %v2360_v1  ;;  %v2409_v1 = vld [vmem:[%s3008_s7 + $0x30] sm:$0xff]  }
  0x6c   :  { %2162 = vmatpush3.bf16.msra.mxu0 %v2361_v2  ;;  %v1797_v2 = vld [vmem:[%s3009_s9] sm:$0x3] }
  0x6d   :  { %2184 = vmatpush3.bf16.msra.mxu1 %v2362_v3  ;;  %2163 = vmatprep.subr.bf16.mxu0 %v2363_v4  ;;  %v1454_v3 = vlaneseq  ;;  %v1810_v4 = vsel %vm1513_vm0, %v1797_v2, 0 }
  0x6e   :  { %2185 = vmatprep.subr.bf16.mxu1 %v2364_v5  ;;  %v2410_v5 = vld [vmem:[%s3008_s7 + $0x78] sm:$0xff]  }
  0x70   :  { %2164 = vmatpush3.bf16.msra.mxu0 %v2365_v6  ;;  %v2411_v6 = vld [vmem:[%s3008_s7 + $0x38] sm:$0xff]  }
  0x71   :  { %2186 = vmatpush3.bf16.msra.mxu1 %v2366_v7  ;;  %2165 = vmatprep.subr.bf16.mxu0 %v2367_v8  ;;  %v1794_v7 = vld [vmem:[%s3010_s2] sm:$0xff]  ;;  %v1795_v8 = vld [vmem:[%s3010_s2 + $0x8] sm:$0xff] }
  0x72   :  { %2187 = vmatprep.subr.bf16.mxu1 %v2368_v9  ;;  %v1796_v9 = vpack.c.bf16 %v1795_v8, %v1794_v7 }
  0x74   :  { %2166 = vmatpush3.bf16.msra.mxu0 %v2369_v10  ;;  %v1455_v10 = vshrl.u32 %v1454_v3, 7 }
  0x75   :  { %2188 = vmatpush3.bf16.msra.mxu1 %v2370_v11  ;;  %2167 = vmatprep.subr.bf16.mxu0 %v2371_v12  ;;  %v1452_v12 = vld [vmem:[%s3011_s6] sm:$0x7] }
  0x76   :  { %2189 = vmatprep.subr.bf16.mxu1 %v2372_v13  ;;  %v1464_v11 = vsub.s32 2, %v1455_v10 }
  0x78   :  { %2168 = vmatpush3.bf16.msra.mxu0 %v2373_v14  ;;  %v2980_v13 = vrot.slane %v1452_v12, %v1464_v11 }
  0x79   :  { %2190 = vmatpush3.bf16.msra.mxu1 %v2374_v15  ;;  %2169 = vmatprep.subr.bf16.mxu0 %v2375_v16  ;;  %v1866_v16 = vld [vmem:[%s3012_s4] ss:$0 sm:$0xff] }
  0x7a   :  { %2191 = vmatprep.subr.bf16.mxu1 %v2376_v17 }
  0x7c   :  { %2170 = vmatpush3.bf16.msra.mxu0 %v2377_v18 }
  0x7d   :  { %2192 = vmatpush3.bf16.msra.mxu1 %v2378_v19  ;;  %2171 = vmatprep.subr.bf16.mxu0 %v2379_v20 }
  0x7e   :  { %2193 = vmatprep.subr.bf16.mxu1 %v2380_v21 }
  0x80   :  { %2172 = vmatpush3.bf16.msra.mxu0 %v2381_v22 }
  0x81   :  { %2194 = vmatpush3.bf16.msra.mxu1 %v2382_v23  ;;  %2205 = vmatprep.subr.bf16.mxu0 %v2393_v47 }
  0x82   :  { %1526 = vmatprep.subr.bf16.mxu1 %v2387_v30 }
  0x83   :  { %1393 = vmatmul.mubr.bf16.vlgmr.msra.gmra.mrb[12].mxu0 %v85_v31 }
  0x84   :  { %1433 = vmatmul.mubr.bf16.vlgmr.msra.gmra.mrb[12].mxu1 %v87_v32  ;;  %2206 = vmatpush3.bf16.msra.mxu0 %v2394_v49 }
  0x85   :  { %1527 = vmatpush1.bf16.msra.mxu1 %v2385_v35  ;;  %1558 = vmatprep.mubr.bf16.mxu1 %v2413_v42 }
  0x86   :  { %1528 = vmatprep.subr.bf16.mxu1 %v2390_v38  ;;  %2207 = vmatprep.subr.bf16.mxu0 %v2395_v50 }
  0x88   :  { %2208 = vmatpush3.bf16.msra.mxu0 %v2396_v51 }
  0x89   :  { %1529 = vmatpush1.bf16.msra.mxu1 %v2388_v40  ;;  %2209 = vmatprep.subr.bf16.mxu0 %v2397_v52 }
  0x8a   :  { %1530 = vmatprep.subr.bf16.mxu1 %v1521_v43 }
  0x8c   :  { %2210 = vmatpush3.bf16.msra.mxu0 %v2398_v53 }
  0x8d   :  { %1531 = vmatpush1.bf16.msra.mxu1 %v1518_v44  ;;  %2211 = vmatprep.subr.bf16.mxu0 %v2400_v55 }
  0x8e   :  { %2229 = vmatprep.subr.bf16.mxu1 %v2414_v48 }
  0x90   :  { %2004 = vmatmul.mubr.msk.bf16.vlgmr.msra.gmra.mrb[16].mxu1 %vm1509_vm2, %v1441_v46  ;;  %2212 = vmatpush3.bf16.msra.mxu0 %v2401_v56 }
  0x91   :  { %2230 = vmatpush3.bf16.msra.mxu1 %v2399_v54  ;;  %2213 = vmatprep.subr.bf16.mxu0 %v2403_v58 }
  0x92   :  { %2231 = vmatprep.subr.bf16.mxu1 %v2414_v48  ;;  %2235 = vmatprep.mubr.msk.bf16.mxu1 %vm2415_vm3, %v2414_v48 }
  0x94   :  { %2214 = vmatpush3.bf16.msra.mxu0 %v2404_v59 }
  0x95   :  { %2232 = vmatpush3.bf16.msra.mxu1 %v2402_v57  ;;  %2215 = vmatprep.subr.bf16.mxu0 %v2406_v62  ;;  %v1456_v62 = vsub.s32 0, %v1455_v10 }
  0x96   :  { %2233 = vmatprep.subr.bf16.mxu1 %v2414_v48 }
  0x98   :  { %2216 = vmatpush3.bf16.msra.mxu0 %v2407_v63 }
  0x99   :  { %2234 = vmatpush3.bf16.msra.mxu1 %v1524_v61  ;;  %2217 = vmatprep.subr.bf16.mxu0 %v2408_v0  ;;  %v1460_v0 = vsub.s32 1, %v1455_v10 }
  0x9a   :  { %2239 = vmatprep.subr.bf16.mxu1 %v2414_v48 }
  0x9b   :  { %v1461_v2 = vrot.slane %v1452_v12, %v1460_v0 }
  0x9c   :  { %2236 = vmatmul.mubr.msk.bf16.vlgmr.msra.gmra.mrb[20].mxu1 %vm1509_vm2, %v1441_v46  ;;  %2218 = vmatpush3.bf16.msra.mxu0 %v2409_v1  ;;  %v1457_v1 = vrot.slane %v1452_v12, %v1456_v62 }
  0x9d   :  { %2241 = vmatprep.mubr.msk.bf16.mxu1 %vm2415_vm3, %v2414_v48  ;;  %2240 = vmatpush3.bf16.msra.mxu1 %v1810_v4 }
  0x9e   :  { %2219 = vmatprep.subr.bf16.mxu0 %v2410_v5 }
  0xa0   :  { %2220 = vmatpush3.bf16.msra.mxu0 %v2411_v6 }
  0xa4   :  { %2242 = vmatmul.mubr.msk.bf16.vlgmr.msra.gmra.mrb[24].mxu1 %vm1805_vm4, %v1796_v9 }
  0xf6   :  { %v2041_v14 = vpop.f32.mrb[0].mxu0 }
  0xf7   :  { %v2063_v15 = vpop.f32.mrb[0].mxu1  ;;  %v2042_v17 = vpop.f32.mrb[1].mxu0 }
  0xf8   :  { %v2064_v18 = vpop.f32.mrb[1].mxu1  ;;  %v2043_v19 = vadd.f32 %v2042_v17, %v2041_v14  ;;  %v2044_v22 = vpop.f32.mrb[2].mxu0 }
  0xf9   :  { %v2065_v20 = vadd.f32 %v2064_v18, %v2063_v15  ;;  %v2066_v21 = vpop.f32.mrb[2].mxu1  ;;  %v2045_v24 = vpop.f32.mrb[3].mxu0 }
  0xfa   :  { %v2067_v23 = vpop.f32.mrb[3].mxu1  ;;  %v1155_v25 = vadd.f32 %v2043_v19, %v1866_v16 }
  0xfc   :  { %v1195_v26 = vadd.f32 %v2065_v20, %v1155_v25  ;;  %v2023_v20 = vld [vmem:[%s3014_s10] ss:$0 sm:$0xff] }
 0x116   :  { %v2085_v27 = vpop.f32.mrb[4].mxu0 }
 0x117   :  { %v2107_v28 = vpop.f32.mrb[4].mxu1  ;;  %v2086_v29 = vpop.f32.mrb[5].mxu0 }
 0x118   :  { %v2087_v30 = vadd.f32 %v2086_v29, %v2085_v27  ;;  %v2108_v31 = vpop.f32.mrb[5].mxu1  ;;  %v2088_v32 = vpop.f32.mrb[6].mxu0  ;;  %v2006_v29 = vld [vmem:[%s3016_s8] ss:$0 sm:$0xff] }
 0x119   :  { %v2109_v33 = vadd.f32 %v2108_v31, %v2107_v28  ;;  %v2110_v34 = vpop.f32.mrb[6].mxu1  ;;  %v2089_v35 = vpop.f32.mrb[7].mxu0 }
 0x11a   :  { %v1235_v36 = vadd.f32 %v2087_v30, %v1195_v26  ;;  %v2111_v37 = vpop.f32.mrb[7].mxu1 }
 0x11c   :  { %v1275_v38 = vadd.f32 %v2109_v33, %v1235_v36 }
 0x136   :  { %v2129_v39 = vpop.f32.mrb[8].mxu0 }
 0x137   :  { %v2151_v40 = vpop.f32.mrb[8].mxu1  ;;  %v2130_v41 = vpop.f32.mrb[9].mxu0 }
 0x138   :  { %v2152_v42 = vpop.f32.mrb[9].mxu1  ;;  %v2131_v43 = vadd.f32 %v2130_v41, %v2129_v39  ;;  %v2132_v46 = vpop.f32.mrb[10].mxu0 }
 0x139   :  { %v2153_v44 = vadd.f32 %v2152_v42, %v2151_v40  ;;  %v2154_v45 = vpop.f32.mrb[10].mxu1  ;;  %v2133_v48 = vpop.f32.mrb[11].mxu0 }
 0x13a   :  { %v2155_v47 = vpop.f32.mrb[11].mxu1  ;;  %v1315_v49 = vadd.f32 %v2131_v43, %v1275_v38 }
 0x13c   :  { %v1355_v50 = vadd.f32 %v2153_v44, %v1315_v49 }
 0x156   :  { %v2173_v51 = vpop.f32.mrb[12].mxu0 }
 0x157   :  { %v2195_v52 = vpop.f32.mrb[12].mxu1  ;;  %v2174_v53 = vpop.f32.mrb[13].mxu0 }
 0x158   :  { %v2196_v54 = vpop.f32.mrb[13].mxu1  ;;  %v2175_v55 = vadd.f32 %v2174_v53, %v2173_v51  ;;  %v2176_v58 = vpop.f32.mrb[14].mxu0 }
 0x159   :  { %v2197_v56 = vadd.f32 %v2196_v54, %v2195_v52  ;;  %v2198_v57 = vpop.f32.mrb[14].mxu1  ;;  %v2177_v60 = vpop.f32.mrb[15].mxu0 }
 0x15a   :  { %v2199_v59 = vpop.f32.mrb[15].mxu1  ;;  %v1395_v61 = vadd.f32 %v2175_v55, %v1355_v50 }
 0x15c   :  { %v1435_v63 = vadd.f32 %v2197_v56, %v1395_v61 }
 0x163   :  { %v1560_v3 = vpop.f32.mrb[16].mxu1 }
 0x164   :  { %v1561_v4 = vadd.f32 %v1560_v3, %v1457_v1  ;;  %v1562_v5 = vpop.f32.mrb[17].mxu1 }
 0x165   :  { %v1563_v6 = vadd.f32 %v1562_v5, %v1461_v2  ;;  %v1564_v7 = vpop.f32.mrb[18].mxu1 }
 0x166   :  { %v1607_v8 = vmax.f32 %v1561_v4, 0.0  ;;  %v1565_v9 = vpop.f32.mrb[19].mxu1 }
 0x167   :  { %v1608_v11 = vmax.f32 %v1563_v6, 0.0 }
 0x168   :  { %v1610_v15 = vpack.c.bf16 %v1607_v8, %v1607_v8 }
 0x169   :  { %v1611_v14 = vpack.c.bf16 %v1608_v11, %v1608_v11 }
 0x16b   :  { %1779 = vmatprep.mubr.bf16.mxu0 %v1611_v14 }
 0x16c   :  { %1780 = vmatmul.mubr.bf16.vlgmr.msra.gmra.mrb[16].mxu0 %v1610_v15 }
 0x16f   :  { %v1601_v16 = vpop.f32.mrb[20].mxu1 }
 0x170   :  { %v1602_v17 = vadd.f32 %v1601_v16, %v2980_v13  ;;  %v2237_v18 = vpop.f32.mrb[21].mxu1 }
 0x171   :  { %v1604_v10 = vpop.f32.mrb[22].mxu1 }
 0x172   :  { %v1609_v19 = vmax.f32 %v1602_v17, 0.0  ;;  %v2238_v12 = vpop.f32.mrb[23].mxu1 }
 0x174   :  { %1793 = vst.msk [vmem:[%s3013_s11 + $0x8] sm:$0xf] %vm1792_vm5, %v1609_v19 }
 0x177   :  { %v1846_v21 = vpop.f32.mrb[24].mxu1 }
 0x178   :  { %v1847_v22 = vadd.f32 %v2023_v20, %v1846_v21  ;;  %v2243_v23 = vpop.f32.mrb[25].mxu1 }
 0x179   :  { %v1849_v24 = vpop.f32.mrb[26].mxu1 }
 0x17a   :  { %v1853_v25 = vmax.f32 %v1847_v22, 0.0  ;;  %v1850_v13 = vadd.f32 %v2023_v20, %v1849_v24  ;;  %v2244_v26 = vpop.f32.mrb[27].mxu1 }
 0x17c   :  { %1856 = vst.msk [vmem:[%s3015_s12] sm:$0xff] %vm1855_vm6, %v1853_v25  ;;  %v1854_v27 = vmax.f32 %v1850_v13, 0.0 }
 0x17e   :  { %1857 = vst.msk [vmem:[%s3015_s12 + $0x8] sm:$0xff] %vm1855_vm6, %v1854_v27 }
 0x23f   :  { %v2221_v28 = vpop.f32.mrb[16].mxu0 }
 0x240   :  { %v2222_v30 = vpop.f32.mrb[17].mxu0 }
 0x241   :  { %v2223_v31 = vadd.f32 %v2222_v30, %v2221_v28  ;;  %v2224_v32 = vpop.f32.mrb[18].mxu0 }
 0x242   :  { %v2225_v33 = vpop.f32.mrb[19].mxu0 }
 0x243   :  { %v1782_v34 = vadd.f32 %v2223_v31, %v2006_v29 }
 0x245   :  { %v1789_v35 = vcombine.low %v1435_v63, %v1782_v34 }
 0x247   :  { %1791 = vst [vmem:[%s3013_s11] sm:$0xff] %v1789_v35 }

// kernel: agent_network_forward.7
= control target key start
LH: loop header
LB: loop body
LE: loop exit
PB: predicated region body
PF: predicated region fallthrough
CT: control target
= control target key end

     0   :  { %v1628_v1 = vmov 0.0   ;;  %vm1629_vm0 = vmmov 0   ;;  %vm274_vm1 = vcmask 523264   ;;  %vm319_vm2 = vcmask 31744   ;;  %s1630_s18 = smov 64   ;;  %s2108_s2 = inlined_call_operand.vmem [shape: bf16[256,64], index: 2, kind: input, shape index: {}]   ;;  %s2109_s0 = inlined_call_operand.vmem [shape: f32[16,256], index: 0, kind: input, shape index: {}]   ;;  %s2110_s4 = inlined_call_operand.vmem [shape: bf16[64,4], index: 4, kind: input, shape index: {}]   ;;  %s2111_s3 = inlined_call_operand.vmem [shape: f32[1,64], index: 3, kind: input, shape index: {}]   ;;  %s2112_s5 = inlined_call_operand.vmem [shape: f32[1,4], index: 5, kind: input, shape index: {}]   ;;  %s2113_s6 = inlined_call_operand.vmem [shape: bf16[4,64], index: 6, kind: input, shape index: {}]   ;;  %s2114_s1 = inlined_call_operand.vmem [shape: f32[4,32], index: 1, kind: input, shape index: {}]   ;;  %s2115_s8 = inlined_call_operand.vmem [shape: bf16[352,256], index: 8, kind: input, shape index: {}]   ;;  %s2116_s10 = inlined_call_operand.vmem [shape: bf16[256,8], index: 10, kind: input, shape index: {}]   ;;  %s2117_s7 = inlined_call_operand.vmem [shape: f32[1,64], index: 7, kind: input, shape index: {}]   ;;  %s2118_s12 = inlined_call_operand.vmem [shape: bf16[352,1], index: 12, kind: input, shape index: {}]   ;;  %s2119_s9 = inlined_call_operand.vmem [shape: f32[1,256], index: 9, kind: input, shape index: {}]   ;;  %s2120_s13 = inlined_call_operand.<no memory space> [shape: f32[1,1], index: 13, kind: input, shape index: {}]   ;;  %s2121_s11 = inlined_call_operand.vmem [shape: f32[1,8], index: 11, kind: input, shape index: {}]   ;;  %s2122_s14 = inlined_call_operand.vmem [shape: f32[16,128], index: 14, kind: output, shape index: {}]  }
   0x1   :  { %v1496_v0 = vld [vmem:[%s2108_s2 + $0x40] sm:$0xff]   ;;  %1448 = vmatprep.subr.bf16.mxu1 %v1628_v1  ;;  %v1498_v3 = vld [vmem:[%s2108_s2 + $0x48] sm:$0xff]   ;;  %v1500_v5 = vld [vmem:[%s2108_s2 + $0x50] sm:$0xff]   ;;  %1456 = vmatprep.mubr.msk.bf16.mxu1 %vm1629_vm0, %v1628_v1  ;;  %vm354_vm3 = vcmask 1041408   ;;  %vm405_vm4 = vcmask 1043456   ;;  %vm690_vm5 = vcmask 785408  }
   0x2   :  { %v1497_v2 = vld [vmem:[%s2108_s2] sm:$0xff]   ;;  %1368 = vmatprep.subr.bf16.mxu0 %v1496_v0  ;;  %v1499_v4 = vld [vmem:[%s2108_s2 + $0x8] sm:$0xff]   ;;  %v1501_v6 = vld [vmem:[%s2108_s2 + $0x10] sm:$0xff]   ;;  %vm1245_vm6 = vcmask 97280   ;;  %vm1248_vm7 = vcmask 105472  }
   0x3   :  { %1369 = vmatpush3.bf16.msra.mxu0 %v1497_v2  ;;  %v1502_v7 = vld [vmem:[%s2108_s2 + $0x58] sm:$0xff]   ;;  %v1504_v9 = vld [vmem:[%s2108_s2 + $0x60] sm:$0xff]   ;;  %v1506_v11 = vld [vmem:[%s2108_s2 + $0x68] sm:$0xff]  }
   0x4   :  { %1370 = vmatprep.subr.bf16.mxu0 %v1498_v3  ;;  %v1503_v8 = vld [vmem:[%s2108_s2 + $0x18] sm:$0xff]   ;;  %v1505_v10 = vld [vmem:[%s2108_s2 + $0x20] sm:$0xff]   ;;  %v51_v12 = vld [vmem:[%s2109_s0 + $0x8] sm:$0xff] }
   0x5   :  { %v53_v13 = vld [vmem:[%s2109_s0 + $0x18] sm:$0xff]  ;;  %v1507_v14 = vld [vmem:[%s2108_s2 + $0x28] sm:$0xff]   ;;  %v1512_v16 = vld [vmem:[%s2110_s4] sm:$0xff]  }
   0x6   :  { %v1752_v15 = vpack.c.bf16 %v53_v13, %v51_v12  ;;  %v1508_v17 = vld [vmem:[%s2108_s2 + $0x70] sm:$0xff]   ;;  %1449 = vmatpush3.bf16.msra.mxu1 %v1512_v16  ;;  %v1510_v19 = vld [vmem:[%s2108_s2 + $0x78] sm:$0xff]   ;;  %v50_v21 = vld [vmem:[%s2109_s0] sm:$0xff] }
   0x7   :  { %1371 = vmatpush3.bf16.msra.mxu0 %v1499_v4  ;;  %1450 = vmatprep.subr.bf16.mxu1 %v1628_v1  ;;  %v1509_v18 = vld [vmem:[%s2108_s2 + $0x30] sm:$0xff]   ;;  %v1511_v20 = vld [vmem:[%s2108_s2 + $0x38] sm:$0xff]   ;;  %v1513_v24 = vld [vmem:[%s2110_s4 + $0x8] sm:$0xff]  }
   0x8   :  { %1372 = vmatprep.subr.bf16.mxu0 %v1500_v5  ;;  %223 = vmatprep.mubr.bf16.mxu0 %v1752_v15  ;;  %v52_v22 = vld [vmem:[%s2109_s0 + $0x10] sm:$0xff]  ;;  %v1515_v26 = vld [vmem:[%s2110_s4 + $0x18] sm:$0xff]   ;;  %v1257_v28 = vld [vmem:[%s2111_s3] ss:$0 sm:$0xff] }
   0x9   :  { %v1777_v23 = vpack.c.bf16 %v52_v22, %v50_v21  ;;  %v1514_v25 = vld [vmem:[%s2110_s4 + $0x10] sm:$0xff]   ;;  %v1274_v39 = vld [vmem:[%s2112_s5] ss:$0 sm:$0xff]  ;;  %v1518_v62 = vld [vmem:[%s2115_s8 + $0x4] ss:$8 sps:$4 sm:$0xff]  }
   0xa   :  { %1451 = vmatpush3.bf16.msra.mxu1 %v1513_v24  ;;  %v343_v58 = vld [vmem:[%s2113_s6] sm:$0x3]  ;;  %v1527_v13 = vld [vmem:[%s2115_s8 + $0x34] ss:$8 sps:$4 sm:$0xff]   ;;  %v1530_v16 = vld [vmem:[%s2115_s8 + $0x44] ss:$8 sps:$4 sm:$0xff]  }
   0xb   :  { %1373 = vmatpush3.bf16.msra.mxu0 %v1501_v6  ;;  %1452 = vmatprep.subr.bf16.mxu1 %v1628_v1  ;;  %v356_v59 = vsel %vm354_vm3, %v343_v58, 0  ;;  %v401_v60 = vld [vmem:[%s2114_s1] sm:$0xf]  ;;  %v1539_v22 = vld [vmem:[%s2115_s8 + $0x74] ss:$8 sps:$4 sm:$0xff]  }
   0xc   :  { %1374 = vmatprep.subr.bf16.mxu0 %v1502_v7  ;;  %v403_v61 = vrot.slane %v401_v60, 4  ;;  %v1516_v7 = vld [vmem:[%s2115_s8] ss:$8 sps:$4 sm:$0xff]   ;;  %v1537_v24 = vld [vmem:[%s2115_s8 + $0x70] ss:$8 sps:$4 sm:$0xff]  }
   0xd   :  { %v1522_v12 = vld [vmem:[%s2115_s8 + $0x20] ss:$8 sps:$4 sm:$0xff]   ;;  %v1586_v58 = vld [vmem:[%s2116_s10 + $0x50] sm:$0xff]  }
   0xe   :  { %1453 = vmatpush3.bf16.msra.mxu1 %v1514_v25  ;;  %v406_v63 = vsel %vm405_vm4, %v401_v60, %v403_v61  ;;  %v1534_v21 = vld [vmem:[%s2115_s8 + $0x60] ss:$8 sps:$4 sm:$0xff]   ;;  %v1542_v25 = vld [vmem:[%s2115_s8 + $0x84] ss:$8 sps:$4 sm:$0xff]   ;;  %v1588_v60 = vld [vmem:[%s2116_s10 + $0x58] sm:$0xff]  }
   0xf   :  { %1375 = vmatpush3.bf16.msra.mxu0 %v1503_v8  ;;  %1454 = vmatprep.subr.bf16.mxu1 %v1628_v1  ;;  %v1589_v61 = vld [vmem:[%s2116_s10 + $0x18] sm:$0xff]  }
  0x10   :  { %1376 = vmatprep.subr.bf16.mxu0 %v1504_v9  ;;  %v1521_v9 = vld [vmem:[%s2115_s8 + $0x14] ss:$8 sps:$4 sm:$0xff]  }
  0x12   :  { %1455 = vmatpush3.bf16.msra.mxu1 %v1515_v26  ;;  %v1540_v26 = vld [vmem:[%s2115_s8 + $0x80] ss:$8 sps:$4 sm:$0xff]  }
  0x13   :  { %1377 = vmatpush3.bf16.msra.mxu0 %v1505_v10  ;;  %1460 = vmatprep.subr.bf16.mxu1 %v1628_v1  ;;  %v1519_v10 = vld [vmem:[%s2115_s8 + $0x10] ss:$8 sps:$4 sm:$0xff]  }
  0x14   :  { %1378 = vmatprep.subr.bf16.mxu0 %v1506_v11  ;;  %v1524_v11 = vld [vmem:[%s2115_s8 + $0x24] ss:$8 sps:$4 sm:$0xff]  }
  0x17   :  { %1379 = vmatpush3.bf16.msra.mxu0 %v1507_v14  ;;  %v1525_v14 = vld [vmem:[%s2115_s8 + $0x30] ss:$8 sps:$4 sm:$0xff]  }
  0x18   :  { %1380 = vmatprep.subr.bf16.mxu0 %v1508_v17  ;;  %v1528_v17 = vld [vmem:[%s2115_s8 + $0x40] ss:$8 sps:$4 sm:$0xff]  }
  0x1b   :  { %1381 = vmatpush3.bf16.msra.mxu0 %v1509_v18  ;;  %v1533_v18 = vld [vmem:[%s2115_s8 + $0x54] ss:$8 sps:$4 sm:$0xff]  }
  0x1c   :  { %1382 = vmatprep.subr.bf16.mxu0 %v1510_v19  ;;  %v1531_v19 = vld [vmem:[%s2115_s8 + $0x50] ss:$8 sps:$4 sm:$0xff]  }
  0x1f   :  { %1383 = vmatpush3.bf16.msra.mxu0 %v1511_v20  ;;  %v1536_v20 = vld [vmem:[%s2115_s8 + $0x64] ss:$8 sps:$4 sm:$0xff]  }
  0x22   :  { %224 = vmatmul.mubr.bf16.vlgmr.msra.gmra.mrb[0].mxu0 %v1777_v23 }
  0xf5   :  { %v1384_v27 = vpop.f32.mrb[0].mxu0 }
  0xf6   :  { %v1385_v29 = vpop.f32.mrb[1].mxu0 }
  0xf7   :  { %v1386_v30 = vadd.f32 %v1385_v29, %v1384_v27  ;;  %v1387_v31 = vpop.f32.mrb[2].mxu0  ;;  %v1545_v27 = vld [vmem:[%s2115_s8 + $0x94] ss:$8 sps:$4 sm:$0xff]   ;;  %v1548_v29 = vld [vmem:[%s2115_s8 + $0xa4] ss:$8 sps:$4 sm:$0xff]  }
  0xf8   :  { %v1388_v32 = vpop.f32.mrb[3].mxu0 }
  0xf9   :  { %v226_v33 = vadd.f32 %v1386_v30, %v1257_v28  ;;  %v1389_v34 = vadd.f32 %v1388_v32, %v1387_v31  ;;  %v1546_v30 = vld [vmem:[%s2115_s8 + $0xa0] ss:$8 sps:$4 sm:$0xff]   ;;  %v1551_v31 = vld [vmem:[%s2115_s8 + $0xb4] ss:$8 sps:$4 sm:$0xff]   ;;  %v1549_v32 = vld [vmem:[%s2115_s8 + $0xb0] ss:$8 sps:$4 sm:$0xff]  }
  0xfb   :  { %v229_v35 = vadd.f32 %v1389_v34, %v1257_v28  ;;  %v232_v36 = vmax.f32 %v226_v33, 0.0  ;;  %v1543_v28 = vld [vmem:[%s2115_s8 + $0x90] ss:$8 sps:$4 sm:$0xff]   ;;  %v1554_v33 = vld [vmem:[%s2115_s8 + $0xc4] ss:$8 sps:$4 sm:$0xff]  }
  0xfc   :  { %v1552_v34 = vld [vmem:[%s2115_s8 + $0xc0] ss:$8 sps:$4 sm:$0xff]  }
  0xfd   :  { %v233_v37 = vmax.f32 %v229_v35, 0.0  ;;  %v1557_v35 = vld [vmem:[%s2115_s8 + $0xd4] ss:$8 sps:$4 sm:$0xff]  }
  0xff   :  { %v234_v38 = vpack.c.bf16 %v233_v37, %v232_v36  ;;  %v1555_v36 = vld [vmem:[%s2115_s8 + $0xd0] ss:$8 sps:$4 sm:$0xff]   ;;  %v1560_v37 = vld [vmem:[%s2115_s8 + $0xe4] ss:$8 sps:$4 sm:$0xff]  }
 0x101   :  { %1457 = vmatmul.mubr.msk.bf16.vlgmr.msra.gmra.mrb[0].mxu1 %vm274_vm1, %v234_v38  ;;  %v1558_v38 = vld [vmem:[%s2115_s8 + $0xe0] ss:$8 sps:$4 sm:$0xff]  }
 0x102   :  { %1462 = vmatprep.mubr.msk.bf16.mxu1 %vm1629_vm0, %v1628_v1  ;;  %1461 = vmatpush3.bf16.msra.mxu1 %v356_v59  ;;  %v1587_v59 = vld [vmem:[%s2116_s10 + $0x10] sm:$0xff]  }
 0x103   :  { %694 = vmatprep.subr.bf16.mxu1 %v1518_v62  ;;  %v1590_v62 = vld [vmem:[%s2116_s10 + $0x60] sm:$0xff]  }
 0x1d4   :  { %v312_v40 = vpop.f32.mrb[0].mxu1 }
 0x1d5   :  { %v313_v41 = vadd.f32 %v1274_v39, %v312_v40  ;;  %v1458_v42 = vpop.f32.mrb[1].mxu1  ;;  %v1561_v40 = vld [vmem:[%s2115_s8 + $0xf0] ss:$8 sps:$4 sm:$0xff]  }
 0x1d6   :  { %v315_v43 = vpop.f32.mrb[2].mxu1  ;;  %v1564_v42 = vld [vmem:[%s2115_s8 + $0x100] ss:$8 sps:$4 sm:$0xff]  }
 0x1d7   :  { %v316_v44 = vadd.f32 %v1274_v39, %v315_v43  ;;  %v1459_v45 = vpop.f32.mrb[3].mxu1  ;;  %v320_v46 = vsel %vm319_vm2, %v313_v41, -inf  ;;  %v1563_v39 = vld [vmem:[%s2115_s8 + $0xf4] ss:$8 sps:$4 sm:$0xff]  }
 0x1d8   :  { %321 = vmax.xlane.f32.xlu0 %v320_v46  ;;  %v1569_v43 = vld [vmem:[%s2115_s8 + $0x114] ss:$8 sps:$4 sm:$0xff]   ;;  %v1572_v45 = vld [vmem:[%s2115_s8 + $0x124] ss:$8 sps:$4 sm:$0xff]   ;;  %v1570_v46 = vld [vmem:[%s2115_s8 + $0x120] ss:$8 sps:$4 sm:$0xff]  }
 0x1d9   :  { %v323_v47 = vsel %vm319_vm2, %v316_v44, -inf }
 0x1dc   :  { %324 = vmax.xlane.f32.xlu0 %v323_v47  ;;  %v1575_v47 = vld [vmem:[%s2115_s8 + $0x134] ss:$8 sps:$4 sm:$0xff]  }
 0x1f2   :  { %408 = vrot.lane.b32.xlu0 %v406_v63, %s1630_s18  ;;  %v1591_v63 = vld [vmem:[%s2116_s10 + $0x20] sm:$0xff]  }
 0x265   :  { %v322_v48 = vpop.xlane.xlu0 %321 }
 0x266   :  { %v326_v49 = vsub.f32 %v313_v41, %v322_v48  ;;  %v1566_v41 = vld [vmem:[%s2115_s8 + $0x104] ss:$8 sps:$4 sm:$0xff]   ;;  %v1573_v48 = vld [vmem:[%s2115_s8 + $0x130] ss:$8 sps:$4 sm:$0xff]  }
 0x268   :  { %v328_v50 = vmul.f32 1.442695, %v326_v49  ;;  %v1578_v49 = vld [vmem:[%s2115_s8 + $0x144] ss:$8 sps:$4 sm:$0xff]  }
 0x269   :  { %v325_v51 = vpop.xlane.xlu0 %324 }
 0x26a   :  { %1620 = vpow2.f32 %v328_v50  ;;  %v327_v52 = vsub.f32 %v316_v44, %v325_v51  ;;  %v1567_v44 = vld [vmem:[%s2115_s8 + $0x110] ss:$8 sps:$4 sm:$0xff]   ;;  %v1576_v50 = vld [vmem:[%s2115_s8 + $0x140] ss:$8 sps:$4 sm:$0xff]   ;;  %v1581_v51 = vld [vmem:[%s2115_s8 + $0x154] ss:$8 sps:$4 sm:$0xff]  }
 0x26c   :  { %v330_v53 = vmul.f32 1.442695, %v327_v52  ;;  %v1579_v52 = vld [vmem:[%s2115_s8 + $0x150] ss:$8 sps:$4 sm:$0xff]  }
 0x26e   :  { %1622 = vpow2.f32 %v330_v53  ;;  %v1631_v53 = vmov 0  }
 0x274   :  { %v1621_v54 = vpop.eup %1620 }
 0x275   :  { %v332_v55 = vsel %vm319_vm2, %v1621_v54, 0.0 }
 0x276   :  { %333 = vadd.xlane.f32.xlu1 %v332_v55  ;;  %v1583_v55 = vld [vmem:[%s2116_s10] sm:$0xff]  }
 0x278   :  { %v1623_v56 = vpop.eup %1622 }
 0x279   :  { %v335_v57 = vsel %vm319_vm2, %v1623_v56, 0.0 }
 0x27a   :  { %336 = vadd.xlane.f32.xlu1 %v335_v57  ;;  %v1585_v57 = vld [vmem:[%s2116_s10 + $0x8] sm:$0xff]  }
 0x303   :  { %v334_v0 = vpop.xlane.xlu1 %333 }
 0x304   :  { %1624 = vrcp.f32 %v334_v0  ;;  %v1592_v0 = vld [vmem:[%s2116_s10 + $0x68] sm:$0xff]  }
 0x307   :  { %v337_v2 = vpop.xlane.xlu1 %336 }
 0x308   :  { %1626 = vrcp.f32 %v337_v2  ;;  %v1593_v2 = vld [vmem:[%s2116_s10 + $0x28] sm:$0xff]  }
 0x30e   :  { %v1625_v3 = vpop.eup %1624 }
 0x30f   :  { %v1816_v5 = vmul.f32 %v1625_v3, %v1621_v54  ;;  %v1582_v54 = vld [vmem:[%s2116_s10 + $0x40] sm:$0xff]  }
 0x310   :  { %1397 = vmatprep.subr.bf16.mxu0 %v1582_v54  ;;  %v1280_v3 = vld [vmem:[%s2117_s7] ss:$0 sm:$0xff]  ;;  %v1608_v54 = vld [vmem:[%s2118_s12 + $0x68] sm:$0xff]  }
 0x311   :  { %1398 = vmatpush3.bf16.msra.mxu0 %v1583_v55  ;;  %v1609_v55 = vld [vmem:[%s2118_s12 + $0x28] sm:$0xff]  }
 0x312   :  { %v1627_v4 = vpop.eup %1626 }
 0x313   :  { %v1818_v6 = vmul.f32 %v1627_v4, %v1623_v56  ;;  %v1584_v56 = vld [vmem:[%s2116_s10 + $0x48] sm:$0xff]  }
 0x314   :  { %1399 = vmatprep.subr.bf16.mxu0 %v1584_v56  ;;  %v1610_v56 = vld [vmem:[%s2118_s12 + $0x70] sm:$0xff]  }
 0x315   :  { %v342_v8 = vpack.c.bf16 %v1818_v6, %v1816_v5  ;;  %1400 = vmatpush3.bf16.msra.mxu0 %v1585_v57  ;;  %v1611_v57 = vld [vmem:[%s2118_s12 + $0x30] sm:$0xff]  }
 0x316   :  { %1401 = vmatprep.subr.bf16.mxu0 %v1586_v58  ;;  %v1612_v58 = vld [vmem:[%s2118_s12 + $0x78] sm:$0xff]  }
 0x317   :  { %1463 = vmatmul.mubr.msk.bf16.vlgmr.msra.gmra.mrb[4].mxu1 %vm319_vm2, %v342_v8 }
 0x318   :  { %695 = vmatpush1.bf16.msra.mxu1 %v1516_v7  ;;  %726 = vmatprep.mubr.bf16.mxu1 %v1752_v15 }
 0x319   :  { %696 = vmatprep.subr.bf16.mxu1 %v1521_v9  ;;  %1402 = vmatpush3.bf16.msra.mxu0 %v1587_v59  ;;  %v1613_v59 = vld [vmem:[%s2118_s12 + $0x38] sm:$0xff]  }
 0x31a   :  { %1403 = vmatprep.subr.bf16.mxu0 %v1588_v60  ;;  %v1614_v60 = vld [vmem:[%s2118_s12 + $0x80] sm:$0xff]  }
 0x31c   :  { %697 = vmatpush1.bf16.msra.mxu1 %v1519_v10 }
 0x31d   :  { %698 = vmatprep.subr.bf16.mxu1 %v1524_v11  ;;  %1404 = vmatpush3.bf16.msra.mxu0 %v1589_v61  ;;  %v1615_v61 = vld [vmem:[%s2118_s12 + $0x88] sm:$0xff]  }
 0x31e   :  { %1405 = vmatprep.subr.bf16.mxu0 %v1590_v62  ;;  %v1616_v62 = vld [vmem:[%s2118_s12 + $0x90] sm:$0xff]  }
 0x320   :  { %699 = vmatpush1.bf16.msra.mxu1 %v1522_v12 }
 0x321   :  { %700 = vmatprep.subr.bf16.mxu1 %v1527_v13  ;;  %1406 = vmatpush3.bf16.msra.mxu0 %v1591_v63  ;;  %v409_v13 = vpop.permute.xlu0 %408  ;;  %v1618_v63 = vld [vmem:[%s2118_s12 + $0xa0] sm:$0xff]  }
 0x322   :  { %1407 = vmatprep.subr.bf16.mxu0 %v1592_v0  ;;  %v1619_v0 = vld [vmem:[%s2118_s12 + $0xa8] sm:$0xff]  }
 0x324   :  { %701 = vmatpush1.bf16.msra.mxu1 %v1525_v14 }
 0x325   :  { %702 = vmatprep.subr.bf16.mxu1 %v1530_v16  ;;  %1408 = vmatpush3.bf16.msra.mxu0 %v1593_v2  ;;  %v19_v2 = vstv %s2120_s13 }
 0x326   :  { %20 = vst [vmem:[#allocation2] sm:$0x1] %v19_v2 }
 0x328   :  { %703 = vmatpush1.bf16.msra.mxu1 %v1528_v17 }
 0x329   :  { %704 = vmatprep.subr.bf16.mxu1 %v1533_v18 }
 0x32c   :  { %705 = vmatpush1.bf16.msra.mxu1 %v1531_v19  ;;  %v1594_v19 = vld [vmem:[%s2116_s10 + $0x70] sm:$0xff]  }
 0x32d   :  { %706 = vmatprep.subr.bf16.mxu1 %v1536_v20  ;;  %v1595_v20 = vld [vmem:[%s2116_s10 + $0x30] sm:$0xff]   ;;  %1409 = vmatprep.subr.bf16.mxu0 %v1594_v19 }
 0x32e   :  { %1410 = vmatpush3.bf16.msra.mxu0 %v1595_v20  ;;  %v1344_v20 = vld [vmem:[#allocation2] ss:$0 sm:$0xff] }
 0x330   :  { %707 = vmatpush1.bf16.msra.mxu1 %v1534_v21  ;;  %v1596_v21 = vld [vmem:[%s2116_s10 + $0x78] sm:$0xff]  }
 0x331   :  { %708 = vmatprep.subr.bf16.mxu1 %v1539_v22  ;;  %v1597_v22 = vld [vmem:[%s2116_s10 + $0x38] sm:$0xff]   ;;  %1411 = vmatprep.subr.bf16.mxu0 %v1596_v21 }
 0x332   :  { %1412 = vmatpush3.bf16.msra.mxu0 %v1597_v22 }
 0x334   :  { %709 = vmatpush1.bf16.msra.mxu1 %v1537_v24  ;;  %v1598_v24 = vld [vmem:[%s2118_s12 + $0x40] sm:$0xff]  }
 0x335   :  { %710 = vmatprep.subr.bf16.mxu1 %v1542_v25  ;;  %1419 = vmatprep.subr.bf16.mxu0 %v1598_v24  ;;  %v460_v25 = vlaneseq }
 0x338   :  { %711 = vmatpush1.bf16.msra.mxu1 %v1540_v26  ;;  %v461_v26 = vshrl.u32 %v460_v25, 7 }
 0x339   :  { %712 = vmatprep.subr.bf16.mxu1 %v1545_v27 }
 0x33a   :  { %v462_v27 = vsub.s32 0, %v461_v26 }
 0x33c   :  { %713 = vmatpush1.bf16.msra.mxu1 %v1543_v28  ;;  %v458_v28 = vld [vmem:[%s2119_s9] sm:$0x3] }
 0x33d   :  { %714 = vmatprep.subr.bf16.mxu1 %v1548_v29  ;;  %v466_v29 = vsub.s32 1, %v461_v26 }
 0x340   :  { %715 = vmatpush1.bf16.msra.mxu1 %v1546_v30  ;;  %v463_v30 = vrot.slane %v458_v28, %v462_v27 }
 0x341   :  { %716 = vmatprep.subr.bf16.mxu1 %v1551_v31  ;;  %v467_v31 = vrot.slane %v458_v28, %v466_v29 }
 0x344   :  { %717 = vmatpush1.bf16.msra.mxu1 %v1549_v32 }
 0x345   :  { %718 = vmatprep.subr.bf16.mxu1 %v1554_v33 }
 0x348   :  { %719 = vmatpush1.bf16.msra.mxu1 %v1552_v34 }
 0x349   :  { %720 = vmatprep.subr.bf16.mxu1 %v1557_v35 }
 0x34c   :  { %721 = vmatpush1.bf16.msra.mxu1 %v1555_v36 }
 0x34d   :  { %722 = vmatprep.subr.bf16.mxu1 %v1560_v37 }
 0x350   :  { %723 = vmatpush1.bf16.msra.mxu1 %v1558_v38 }
 0x351   :  { %724 = vmatprep.subr.bf16.mxu1 %v1563_v39 }
 0x354   :  { %725 = vmatpush1.bf16.msra.mxu1 %v1561_v40 }
 0x355   :  { %737 = vmatprep.subr.bf16.mxu1 %v1566_v41 }
 0x357   :  { %727 = vmatmul.mubr.bf16.vlgmr.msra.gmra.mrb[8].mxu1 %v1777_v23 }
 0x358   :  { %738 = vmatpush1.bf16.msra.mxu1 %v1564_v42  ;;  %769 = vmatprep.mubr.bf16.mxu1 %v1631_v53  ;;  %v1607_v53 = vld [vmem:[%s2118_s12 + $0x20] sm:$0xff]  }
 0x359   :  { %739 = vmatprep.subr.bf16.mxu1 %v1569_v43 }
 0x35c   :  { %740 = vmatpush1.bf16.msra.mxu1 %v1567_v44 }
 0x35d   :  { %741 = vmatprep.subr.bf16.mxu1 %v1572_v45 }
 0x360   :  { %742 = vmatpush1.bf16.msra.mxu1 %v1570_v46  ;;  %v1599_v46 = vld [vmem:[%s2118_s12] sm:$0xff]  }
 0x361   :  { %743 = vmatprep.subr.bf16.mxu1 %v1575_v47  ;;  %v1600_v47 = vld [vmem:[%s2118_s12 + $0x48] sm:$0xff]  }
 0x364   :  { %744 = vmatpush1.bf16.msra.mxu1 %v1573_v48  ;;  %v1601_v48 = vld [vmem:[%s2118_s12 + $0x8] sm:$0xff]  }
 0x365   :  { %745 = vmatprep.subr.bf16.mxu1 %v1578_v49  ;;  %v1602_v49 = vld [vmem:[%s2118_s12 + $0x50] sm:$0xff]  }
 0x368   :  { %746 = vmatpush1.bf16.msra.mxu1 %v1576_v50  ;;  %v1603_v50 = vld [vmem:[%s2118_s12 + $0x10] sm:$0xff]  }
 0x369   :  { %747 = vmatprep.subr.bf16.mxu1 %v1581_v51  ;;  %v1604_v51 = vld [vmem:[%s2118_s12 + $0x58] sm:$0xff]  }
 0x36c   :  { %748 = vmatpush1.bf16.msra.mxu1 %v1579_v52  ;;  %v1606_v52 = vld [vmem:[%s2118_s12 + $0x60] sm:$0xff]  }
 0x3ea   :  { %v392_v4 = vpop.f32.mrb[4].mxu1 }
 0x3eb   :  { %v393_v7 = vadd.f32 %v1280_v3, %v392_v4  ;;  %v1464_v8 = vpop.f32.mrb[5].mxu1  ;;  %v1327_v4 = vld [vmem:[%s2121_s11] ss:$0 sm:$0xff]  ;;  %s1633_s11 = smov 12  }
 0x3ec   :  { %v395_v9 = vpop.f32.mrb[6].mxu1 }
 0x3ed   :  { %v399_v10 = vmax.f32 %v393_v7, 0.0  ;;  %v396_v11 = vadd.f32 %v1280_v3, %v395_v9  ;;  %v1465_v12 = vpop.f32.mrb[7].mxu1 }
 0x3ef   :  { %v400_v14 = vmax.f32 %v396_v11, 0.0  ;;  %v411_v16 = vsel %vm274_vm1, %v399_v10, %v409_v13 }
 0x3f1   :  { %v412_v17 = vsel %vm274_vm1, %v400_v14, %v409_v13 }
 0x3f2   :  { %v1995_v18 = vpack.c.bf16 %v412_v17, %v411_v16 }
 0x3f4   :  { %1326 = vmatmul.mubr.msk.bf16.vlgmr.msra.gmra.mrb[8].mxu1 %vm690_vm5, %v1995_v18 }
 0x4c7   :  { %v771_v32 = vpop.f32.mrb[8].mxu1 }
 0x4c8   :  { %v1482_v33 = vadd.f32 %v771_v32, %v463_v30  ;;  %v773_v34 = vpop.f32.mrb[9].mxu1 }
 0x4c9   :  { %v1483_v35 = vadd.f32 %v773_v34, %v467_v31  ;;  %v775_v36 = vpop.f32.mrb[10].mxu1 }
 0x4ca   :  { %v1484_v37 = vadd.f32 %v775_v36, %v463_v30  ;;  %v777_v38 = vpop.f32.mrb[11].mxu1  ;;  %v780_v40 = vmax.f32 %v1482_v33, 0.0 }
 0x4cb   :  { %v1485_v39 = vadd.f32 %v777_v38, %v467_v31  ;;  %v781_v42 = vmax.f32 %v1483_v35, 0.0 }
 0x4cc   :  { %v782_v41 = vmax.f32 %v1484_v37, 0.0 }
 0x4cd   :  { %v783_v43 = vmax.f32 %v1485_v39, 0.0 }
 0x4ce   :  { %v784_v44 = vpack.c.bf16 %v782_v41, %v780_v40 }
 0x4cf   :  { %v785_v45 = vpack.c.bf16 %v783_v43, %v781_v42 }
 0x4d1   :  { %953 = vmatprep.mubr.bf16.mxu0 %v785_v45 }
 0x4d2   :  { %954 = vmatmul.mubr.bf16.vlgmr.msra.gmra.mrb[4].mxu0 %v784_v44 }
 0x4d3   :  { %1420 = vmatpush3.bf16.msra.mxu0 %v1599_v46  ;;  %1177 = vmatprep.mubr.bf16.mxu0 %v1752_v15  ;;  %v1605_v15 = vld [vmem:[%s2118_s12 + $0x18] sm:$0xff]  }
 0x4d4   :  { %1421 = vmatprep.subr.bf16.mxu0 %v1600_v47 }
 0x4d7   :  { %1422 = vmatpush3.bf16.msra.mxu0 %v1601_v48 }
 0x4d8   :  { %1423 = vmatprep.subr.bf16.mxu0 %v1602_v49 }
 0x4db   :  { %1424 = vmatpush3.bf16.msra.mxu0 %v1603_v50 }
 0x4dc   :  { %1425 = vmatprep.subr.bf16.mxu0 %v1604_v51 }
 0x4df   :  { %1426 = vmatpush3.bf16.msra.mxu0 %v1605_v15 }
 0x4e0   :  { %1427 = vmatprep.subr.bf16.mxu0 %v1606_v52 }
 0x4e3   :  { %1428 = vmatpush3.bf16.msra.mxu0 %v1607_v53 }
 0x4e4   :  { %1429 = vmatprep.subr.bf16.mxu0 %v1608_v54 }
 0x4e7   :  { %1430 = vmatpush3.bf16.msra.mxu0 %v1609_v55 }
 0x4e8   :  { %1431 = vmatprep.subr.bf16.mxu0 %v1610_v56 }
 0x4eb   :  { %1432 = vmatpush3.bf16.msra.mxu0 %v1611_v57 }
 0x4ec   :  { %1433 = vmatprep.subr.bf16.mxu0 %v1612_v58 }
 0x4ef   :  { %1434 = vmatpush3.bf16.msra.mxu0 %v1613_v59 }
 0x4f0   :  { %1466 = vmatprep.subr.bf16.mxu0 %v1628_v1 }
 0x4f2   :  { %1178 = vmatmul.mubr.bf16.vlgmr.msra.gmra.mrb[8].mxu0 %v1777_v23  ;;  %v1617_v23 = vld [vmem:[%s2118_s12 + $0x98] sm:$0xff]   ;;  %s1632_s12 = smov 4  }
 0x4f3   :  { %1467 = vmatpush3.bf16.msra.mxu0 %v1614_v60  ;;  %1478 = vmatprep.mubr.msk.bf16.mxu0 %vm1629_vm0, %v1628_v1 }
 0x4f4   :  { %1468 = vmatprep.subr.bf16.mxu0 %v1628_v1 }
 0x4f7   :  { %1469 = vmatpush3.bf16.msra.mxu0 %v1615_v61 }
 0x4f8   :  { %1470 = vmatprep.subr.bf16.mxu0 %v1628_v1 }
 0x4fb   :  { %1471 = vmatpush3.bf16.msra.mxu0 %v1616_v62 }
 0x4fc   :  { %1472 = vmatprep.subr.bf16.mxu0 %v1628_v1 }
 0x4ff   :  { %1473 = vmatpush3.bf16.msra.mxu0 %v1617_v23 }
 0x500   :  { %1474 = vmatprep.subr.bf16.mxu0 %v1628_v1 }
 0x503   :  { %1475 = vmatpush3.bf16.msra.mxu0 %v1618_v63 }
 0x504   :  { %1476 = vmatprep.subr.bf16.mxu0 %v1628_v1 }
 0x507   :  { %1477 = vmatpush3.bf16.msra.mxu0 %v1619_v0 }
 0x50a   :  { %1479 = vmatmul.mubr.msk.bf16.vlgmr.msra.gmra.mrb[12].mxu0 %vm690_vm5, %v1995_v18 }
 0x5a5   :  { %v1413_v3 = vpop.f32.mrb[4].mxu0 }
 0x5a6   :  { %v1414_v7 = vpop.f32.mrb[5].mxu0 }
 0x5a7   :  { %v1415_v8 = vadd.f32 %v1414_v7, %v1413_v3  ;;  %v1416_v9 = vpop.f32.mrb[6].mxu0 }
 0x5a8   :  { %v1417_v10 = vpop.f32.mrb[7].mxu0 }
 0x5a9   :  { %v956_v11 = vadd.f32 %v1415_v8, %v1327_v4  ;;  %v1418_v1 = vadd.f32 %v1417_v10, %v1416_v9 }
 0x5ab   :  { %1229 = vrot.lane.b32.xlu1 %v956_v11, %s1632_s12  ;;  %v959_v12 = vadd.f32 %v1418_v1, %v1327_v4 }
 0x5af   :  { %1231 = vrot.lane.b32.xlu1 %v959_v12, %s1632_s12 }
 0x5c5   :  { %v1435_v13 = vpop.f32.mrb[8].mxu0 }
 0x5c6   :  { %v1436_v14 = vpop.f32.mrb[9].mxu0 }
 0x5c7   :  { %v1437_v16 = vadd.f32 %v1436_v14, %v1435_v13  ;;  %v1438_v17 = vpop.f32.mrb[10].mxu0 }
 0x5c8   :  { %v1439_v18 = vpop.f32.mrb[11].mxu0 }
 0x5c9   :  { %v1440_v19 = vadd.f32 %v1439_v18, %v1438_v17  ;;  %v1180_v21 = vadd.f32 %v1437_v16, %v1344_v20 }
 0x5cb   :  { %v1183_v26 = vadd.f32 %v1440_v19, %v1344_v20 }
 0x5dd   :  { %v1220_v22 = vpop.f32.mrb[12].mxu0 }
 0x5de   :  { %v1221_v24 = vadd.f32 %v1220_v22, %v1180_v21  ;;  %v1480_v25 = vpop.f32.mrb[13].mxu0 }
 0x5df   :  { %v1223_v27 = vpop.f32.mrb[14].mxu0 }
 0x5e0   :  { %v1224_v28 = vadd.f32 %v1223_v27, %v1183_v26  ;;  %v1481_v29 = vpop.f32.mrb[15].mxu0  ;;  %1237 = vrot.lane.b32.xlu1 %v1221_v24, %s1633_s11 }
 0x5e2   :  { %1239 = vrot.lane.b32.xlu0 %v1224_v28, %s1633_s11 }
 0x61d   :  { %v1230_v30 = vpop.permute.xlu1 %1229 }
 0x61e   :  { %v1243_v32 = vsel %vm319_vm2, %v1816_v5, %v1230_v30 }
 0x621   :  { %v1232_v31 = vpop.permute.xlu1 %1231 }
 0x622   :  { %v1244_v35 = vsel %vm319_vm2, %v1818_v6, %v1232_v31 }
 0x652   :  { %v1238_v33 = vpop.permute.xlu1 %1237 }
 0x653   :  { %v1246_v34 = vsel %vm1245_vm6, %v1243_v32, %v1238_v33 }
 0x654   :  { %v1249_v36 = vsel %vm1248_vm7, %v1246_v34, 0.0  ;;  %v1240_v37 = vpop.permute.xlu0 %1239 }
 0x655   :  { %1251 = vst [vmem:[%s2122_s14] sm:$0xff] %v1249_v36  ;;  %v1247_v38 = vsel %vm1245_vm6, %v1244_v35, %v1240_v37 }
 0x656   :  { %v1250_v39 = vsel %vm1248_vm7, %v1247_v38, 0.0 }
 0x657   :  { %1252 = vst [vmem:[%s2122_s14 + $0x8] sm:$0xff] %v1250_v39 }

// kernel: agent_network_forward.6
= control target key start
LH: loop header
LB: loop body
LE: loop exit
PB: predicated region body
PF: predicated region fallthrough
CT: control target
= control target key end

     0   :  { %v5813_v2 = vmov 0   ;;  %vm865_vm0 = vcmask 785408   ;;  %vm1262_vm1 = vcmask 523264   ;;  %s7953_s0 = inlined_call_operand.vmem [shape: f32[4,352], index: 0, kind: input, shape index: {}]   ;;  %s7954_s1 = inlined_call_operand.vmem [shape: f32[16,64], index: 1, kind: input, shape index: {}]   ;;  %s7955_s2 = inlined_call_operand.vmem [shape: f32[4,256], index: 2, kind: input, shape index: {}]   ;;  %s7956_s3 = inlined_call_operand.vmem [shape: bf16[352,768], index: 3, kind: input, shape index: {}]   ;;  %s7957_s4 = inlined_call_operand.vmem [shape: bf16[64,768], index: 4, kind: input, shape index: {}]   ;;  %s7958_s5 = inlined_call_operand.vmem [shape: bf16[256,768], index: 5, kind: input, shape index: {}]   ;;  %s7959_s6 = inlined_call_operand.vmem [shape: f32[1,768], index: 6, kind: input, shape index: {}]   ;;  %s7960_s7 = inlined_call_operand.vmem [shape: f32[1,768], index: 7, kind: input, shape index: {}]   ;;  %s7961_s8 = inlined_call_operand.vmem [shape: f32[4,4,256], index: 8, kind: output, shape index: {0}]   ;;  %s7962_s9 = inlined_call_operand.hbm [shape: f32[4,256], index: 9, kind: output, shape index: {1}]  }
   0x1   :  { %v5184_v0 = vld [vmem:[%s7956_s3 + $0x4] ss:$24 sps:$4 sm:$0xff]   ;;  %942 = vmatprep.mubr.bf16.mxu1 %v5813_v2  ;;  %v5188_v3 = vld [vmem:[%s7956_s3] ss:$24 sps:$4 sm:$0xff]   ;;  %v5190_v5 = vld [vmem:[%s7956_s3 + $0x34] ss:$24 sps:$4 sm:$0xff]  }
   0x2   :  { %v5186_v1 = vld [vmem:[%s7956_s3 + $0x304] ss:$24 sps:$4 sm:$0xff]   ;;  %869 = vmatprep.subr.bf16.mxu0 %v5184_v0  ;;  %v5189_v4 = vld [vmem:[%s7956_s3 + $0x300] ss:$24 sps:$4 sm:$0xff]   ;;  %v5192_v6 = vld [vmem:[%s7956_s3 + $0x334] ss:$24 sps:$4 sm:$0xff]  }
   0x3   :  { %910 = vmatprep.subr.bf16.mxu1 %v5186_v1  ;;  %870 = vmatpush1.bf16.msra.mxu0 %v5188_v3  ;;  %v5194_v7 = vld [vmem:[%s7956_s3 + $0x30] ss:$24 sps:$4 sm:$0xff]   ;;  %v5196_v9 = vld [vmem:[%s7956_s3 + $0x64] ss:$24 sps:$4 sm:$0xff]   ;;  %v5200_v11 = vld [vmem:[%s7956_s3 + $0x60] ss:$24 sps:$4 sm:$0xff]  }
   0x4   :  { %911 = vmatpush1.bf16.msra.mxu1 %v5189_v4  ;;  %871 = vmatprep.subr.bf16.mxu0 %v5190_v5  ;;  %v5195_v8 = vld [vmem:[%s7956_s3 + $0x330] ss:$24 sps:$4 sm:$0xff]   ;;  %v5198_v10 = vld [vmem:[%s7956_s3 + $0x364] ss:$24 sps:$4 sm:$0xff]   ;;  %v5201_v12 = vld [vmem:[%s7956_s3 + $0x360] ss:$24 sps:$4 sm:$0xff]  }
   0x5   :  { %912 = vmatprep.subr.bf16.mxu1 %v5192_v6  ;;  %v5202_v13 = vld [vmem:[%s7956_s3 + $0x94] ss:$24 sps:$4 sm:$0xff]   ;;  %v5206_v15 = vld [vmem:[%s7956_s3 + $0x90] ss:$24 sps:$4 sm:$0xff]   ;;  %v5208_v17 = vld [vmem:[%s7956_s3 + $0xc4] ss:$24 sps:$4 sm:$0xff]  }
   0x6   :  { %v5204_v14 = vld [vmem:[%s7956_s3 + $0x394] ss:$24 sps:$4 sm:$0xff]   ;;  %v5207_v16 = vld [vmem:[%s7956_s3 + $0x390] ss:$24 sps:$4 sm:$0xff]   ;;  %v5210_v18 = vld [vmem:[%s7956_s3 + $0x3c4] ss:$24 sps:$4 sm:$0xff]  }
   0x7   :  { %872 = vmatpush1.bf16.msra.mxu0 %v5194_v7  ;;  %v5212_v19 = vld [vmem:[%s7956_s3 + $0xc0] ss:$24 sps:$4 sm:$0xff]   ;;  %v5214_v21 = vld [vmem:[%s7956_s3 + $0xf4] ss:$24 sps:$4 sm:$0xff]   ;;  %v5218_v23 = vld [vmem:[%s7956_s3 + $0xf0] ss:$24 sps:$4 sm:$0xff]  }
   0x8   :  { %913 = vmatpush1.bf16.msra.mxu1 %v5195_v8  ;;  %873 = vmatprep.subr.bf16.mxu0 %v5196_v9  ;;  %v5213_v20 = vld [vmem:[%s7956_s3 + $0x3c0] ss:$24 sps:$4 sm:$0xff]   ;;  %v5216_v22 = vld [vmem:[%s7956_s3 + $0x3f4] ss:$24 sps:$4 sm:$0xff]   ;;  %v5219_v24 = vld [vmem:[%s7956_s3 + $0x3f0] ss:$24 sps:$4 sm:$0xff]  }
   0x9   :  { %914 = vmatprep.subr.bf16.mxu1 %v5198_v10  ;;  %v34_v25 = vld [vmem:[%s7953_s0 + $0x8] sm:$0xf]  ;;  %v5220_v26 = vld [vmem:[%s7956_s3 + $0x124] ss:$24 sps:$4 sm:$0xff]   ;;  %v5225_v30 = vld [vmem:[%s7956_s3 + $0x120] ss:$24 sps:$4 sm:$0xff]  }
   0xa   :  { %v5224_v27 = vld [vmem:[%s7956_s3 + $0xc] ss:$24 sps:$4 sm:$0xff]   ;;  %v5947_v28 = vpack.c.bf16 %v34_v25, %v34_v25  ;;  %v5222_v29 = vld [vmem:[%s7956_s3 + $0x8] ss:$24 sps:$4 sm:$0xff]   ;;  %v5230_v32 = vld [vmem:[%s7956_s3 + $0x3c] ss:$24 sps:$4 sm:$0xff]  }
   0xb   :  { %874 = vmatpush1.bf16.msra.mxu0 %v5200_v11  ;;  %v5226_v31 = vld [vmem:[%s7956_s3 + $0x154] ss:$24 sps:$4 sm:$0xff]   ;;  %v5228_v33 = vld [vmem:[%s7956_s3 + $0x38] ss:$24 sps:$4 sm:$0xff]   ;;  %v5232_v35 = vld [vmem:[%s7956_s3 + $0x184] ss:$24 sps:$4 sm:$0xff]  }
   0xc   :  { %915 = vmatpush1.bf16.msra.mxu1 %v5201_v12  ;;  %875 = vmatprep.subr.bf16.mxu0 %v5202_v13  ;;  %v5231_v34 = vld [vmem:[%s7956_s3 + $0x150] ss:$24 sps:$4 sm:$0xff]   ;;  %v5236_v36 = vld [vmem:[%s7956_s3 + $0x6c] ss:$24 sps:$4 sm:$0xff]   ;;  %v5237_v38 = vld [vmem:[%s7956_s3 + $0x180] ss:$24 sps:$4 sm:$0xff]  }
   0xd   :  { %916 = vmatprep.subr.bf16.mxu1 %v5204_v14  ;;  %v5234_v37 = vld [vmem:[%s7956_s3 + $0x68] ss:$24 sps:$4 sm:$0xff]   ;;  %v5238_v39 = vld [vmem:[%s7956_s3 + $0x1b4] ss:$24 sps:$4 sm:$0xff]   ;;  %v5240_v41 = vld [vmem:[%s7956_s3 + $0x98] ss:$24 sps:$4 sm:$0xff]  }
   0xe   :  { %v5242_v40 = vld [vmem:[%s7956_s3 + $0x9c] ss:$24 sps:$4 sm:$0xff]   ;;  %v5243_v42 = vld [vmem:[%s7956_s3 + $0x1b0] ss:$24 sps:$4 sm:$0xff]   ;;  %v5248_v44 = vld [vmem:[%s7956_s3 + $0xcc] ss:$24 sps:$4 sm:$0xff]  }
   0xf   :  { %876 = vmatpush1.bf16.msra.mxu0 %v5206_v15  ;;  %v5244_v43 = vld [vmem:[%s7956_s3 + $0x1e4] ss:$24 sps:$4 sm:$0xff]   ;;  %v5246_v45 = vld [vmem:[%s7956_s3 + $0xc8] ss:$24 sps:$4 sm:$0xff]   ;;  %v5250_v47 = vld [vmem:[%s7956_s3 + $0x214] ss:$24 sps:$4 sm:$0xff]  }
  0x10   :  { %917 = vmatpush1.bf16.msra.mxu1 %v5207_v16  ;;  %877 = vmatprep.subr.bf16.mxu0 %v5208_v17  ;;  %v5249_v46 = vld [vmem:[%s7956_s3 + $0x1e0] ss:$24 sps:$4 sm:$0xff]   ;;  %v5254_v48 = vld [vmem:[%s7956_s3 + $0xfc] ss:$24 sps:$4 sm:$0xff]   ;;  %v5255_v51 = vld [vmem:[%s7956_s3 + $0x210] ss:$24 sps:$4 sm:$0xff]  }
  0x11   :  { %918 = vmatprep.subr.bf16.mxu1 %v5210_v18  ;;  %v33_v49 = vld [vmem:[%s7953_s0] sm:$0xff]  ;;  %v5252_v50 = vld [vmem:[%s7956_s3 + $0xf8] ss:$24 sps:$4 sm:$0xff]   ;;  %v5262_v58 = vld [vmem:[%s7956_s3 + $0x274] ss:$24 sps:$4 sm:$0xff]  }
  0x12   :  { %v36_v52 = vcombine.high %v33_v49, %v33_v49  ;;  %v5256_v53 = vld [vmem:[%s7956_s3 + $0x244] ss:$24 sps:$4 sm:$0xff]   ;;  %v5258_v56 = vld [vmem:[%s7956_s3 + $0x128] ss:$24 sps:$4 sm:$0xff]   ;;  %v5264_v60 = vld [vmem:[%s7956_s3 + $0x158] ss:$24 sps:$4 sm:$0xff]   ;;  %v6074_v9 = vpack.c.bf16 %v33_v49, %v33_v49 }
  0x13   :  { %878 = vmatpush1.bf16.msra.mxu0 %v5212_v19  ;;  %v5260_v54 = vld [vmem:[%s7956_s3 + $0x12c] ss:$24 sps:$4 sm:$0xff]   ;;  %v5261_v57 = vld [vmem:[%s7956_s3 + $0x240] ss:$24 sps:$4 sm:$0xff]   ;;  %v5266_v59 = vld [vmem:[%s7956_s3 + $0x15c] ss:$24 sps:$4 sm:$0xff]  }
  0x14   :  { %919 = vmatpush1.bf16.msra.mxu1 %v5213_v20  ;;  %879 = vmatprep.subr.bf16.mxu0 %v5214_v21  ;;  %v39_v55 = vpack.c.bf16 %v36_v52, %v36_v52  ;;  %v5267_v61 = vld [vmem:[%s7956_s3 + $0x270] ss:$24 sps:$4 sm:$0xff]   ;;  %v5268_v62 = vld [vmem:[%s7956_s3 + $0x2a4] ss:$24 sps:$4 sm:$0xff]   ;;  %v5273_v1 = vld [vmem:[%s7956_s3 + $0x2a0] ss:$24 sps:$4 sm:$0xff]  }
  0x15   :  { %920 = vmatprep.subr.bf16.mxu1 %v5216_v22  ;;  %v5272_v63 = vld [vmem:[%s7956_s3 + $0x18c] ss:$24 sps:$4 sm:$0xff]   ;;  %v5270_v0 = vld [vmem:[%s7956_s3 + $0x188] ss:$24 sps:$4 sm:$0xff]   ;;  %v5278_v4 = vld [vmem:[%s7956_s3 + $0x1bc] ss:$24 sps:$4 sm:$0xff]  }
  0x16   :  { %901 = vmatprep.mubr.bf16.mxu0 %v39_v55  ;;  %v5274_v3 = vld [vmem:[%s7956_s3 + $0x2d4] ss:$24 sps:$4 sm:$0xff]   ;;  %v5276_v5 = vld [vmem:[%s7956_s3 + $0x1b8] ss:$24 sps:$4 sm:$0xff]   ;;  %v5281_v10 = vld [vmem:[%s7956_s3 + $0x1e8] ss:$24 sps:$4 sm:$0xff]  }
  0x17   :  { %880 = vmatpush1.bf16.msra.mxu0 %v5218_v23  ;;  %v5279_v6 = vld [vmem:[%s7956_s3 + $0x2d0] ss:$24 sps:$4 sm:$0xff]   ;;  %v5283_v7 = vld [vmem:[%s7956_s3 + $0x1ec] ss:$24 sps:$4 sm:$0xff]   ;;  %v5289_v12 = vld [vmem:[%s7956_s3 + $0x21c] ss:$24 sps:$4 sm:$0xff]  }
  0x18   :  { %921 = vmatpush1.bf16.msra.mxu1 %v5219_v24  ;;  %881 = vmatprep.subr.bf16.mxu0 %v5220_v26  ;;  %v5286_v8 = vld [vmem:[%s7956_s3 + $0x14] ss:$24 sps:$4 sm:$0xff]   ;;  %v5284_v11 = vld [vmem:[%s7956_s3 + $0x10] ss:$24 sps:$4 sm:$0xff]   ;;  %v5292_v13 = vld [vmem:[%s7956_s3 + $0x44] ss:$24 sps:$4 sm:$0xff]  }
  0x19   :  { %951 = vmatprep.subr.bf16.mxu1 %v5224_v27  ;;  %v5287_v14 = vld [vmem:[%s7956_s3 + $0x218] ss:$24 sps:$4 sm:$0xff]   ;;  %v5295_v16 = vld [vmem:[%s7956_s3 + $0x24c] ss:$24 sps:$4 sm:$0xff]   ;;  %v5293_v18 = vld [vmem:[%s7956_s3 + $0x248] ss:$24 sps:$4 sm:$0xff]  }
  0x1a   :  { %v5290_v15 = vld [vmem:[%s7956_s3 + $0x40] ss:$24 sps:$4 sm:$0xff]   ;;  %v5298_v17 = vld [vmem:[%s7956_s3 + $0x74] ss:$24 sps:$4 sm:$0xff]   ;;  %v5296_v19 = vld [vmem:[%s7956_s3 + $0x70] ss:$24 sps:$4 sm:$0xff]  }
  0x1b   :  { %4733 = vmatmul.mubr.msk.bf16.vlgmr.msra.gmra.mrb[0].mxu1 %vm865_vm0, %v5947_v28  ;;  %882 = vmatpush1.bf16.msra.mxu0 %v5225_v30  ;;  %v5301_v20 = vld [vmem:[%s7956_s3 + $0x27c] ss:$24 sps:$4 sm:$0xff]   ;;  %v5299_v22 = vld [vmem:[%s7956_s3 + $0x278] ss:$24 sps:$4 sm:$0xff]   ;;  %v5307_v24 = vld [vmem:[%s7956_s3 + $0x2ac] ss:$24 sps:$4 sm:$0xff]  }
  0x1c   :  { %952 = vmatpush1.bf16.msra.mxu1 %v5222_v29  ;;  %883 = vmatprep.subr.bf16.mxu0 %v5226_v31  ;;  %v5304_v21 = vld [vmem:[%s7956_s3 + $0xa4] ss:$24 sps:$4 sm:$0xff]   ;;  %v5302_v23 = vld [vmem:[%s7956_s3 + $0xa0] ss:$24 sps:$4 sm:$0xff]   ;;  %v5310_v25 = vld [vmem:[%s7956_s3 + $0xd4] ss:$24 sps:$4 sm:$0xff]  }
  0x1d   :  { %953 = vmatprep.subr.bf16.mxu1 %v5230_v32  ;;  %983 = vmatprep.mubr.bf16.mxu1 %v39_v55  ;;  %v5305_v26 = vld [vmem:[%s7956_s3 + $0x2a8] ss:$24 sps:$4 sm:$0xff]   ;;  %v5313_v29 = vld [vmem:[%s7956_s3 + $0x2dc] ss:$24 sps:$4 sm:$0xff]   ;;  %v5311_v31 = vld [vmem:[%s7956_s3 + $0x2d8] ss:$24 sps:$4 sm:$0xff]  }
  0x1e   :  { %v5308_v27 = vld [vmem:[%s7956_s3 + $0xd0] ss:$24 sps:$4 sm:$0xff]   ;;  %v5316_v30 = vld [vmem:[%s7956_s3 + $0x104] ss:$24 sps:$4 sm:$0xff]   ;;  %v5314_v32 = vld [vmem:[%s7956_s3 + $0x100] ss:$24 sps:$4 sm:$0xff]  }
  0x1f   :  { %884 = vmatpush1.bf16.msra.mxu0 %v5231_v34  ;;  %v5322_v34 = vld [vmem:[%s7956_s3 + $0x134] ss:$24 sps:$4 sm:$0xff]   ;;  %v5344_v52 = vld [vmem:[%s7956_s3 + $0x1f0] ss:$24 sps:$4 sm:$0xff]  }
  0x20   :  { %954 = vmatpush1.bf16.msra.mxu1 %v5228_v33  ;;  %885 = vmatprep.subr.bf16.mxu0 %v5232_v35  ;;  %v5319_v33 = vld [vmem:[%s7956_s3 + $0x30c] ss:$24 sps:$4 sm:$0xff]   ;;  %v5317_v35 = vld [vmem:[%s7956_s3 + $0x308] ss:$24 sps:$4 sm:$0xff]  }
  0x21   :  { %955 = vmatprep.subr.bf16.mxu1 %v5236_v36  ;;  %v5320_v36 = vld [vmem:[%s7956_s3 + $0x130] ss:$24 sps:$4 sm:$0xff]   ;;  %v5343_v49 = vld [vmem:[%s7956_s3 + $0x3cc] ss:$24 sps:$4 sm:$0xff]  }
  0x23   :  { %886 = vmatpush1.bf16.msra.mxu0 %v5237_v38  ;;  %v5328_v38 = vld [vmem:[%s7956_s3 + $0x164] ss:$24 sps:$4 sm:$0xff]  }
  0x24   :  { %956 = vmatpush1.bf16.msra.mxu1 %v5234_v37  ;;  %887 = vmatprep.subr.bf16.mxu0 %v5238_v39  ;;  %v5325_v37 = vld [vmem:[%s7956_s3 + $0x33c] ss:$24 sps:$4 sm:$0xff]   ;;  %v5323_v39 = vld [vmem:[%s7956_s3 + $0x338] ss:$24 sps:$4 sm:$0xff]  }
  0x25   :  { %957 = vmatprep.subr.bf16.mxu1 %v5242_v40  ;;  %v5326_v40 = vld [vmem:[%s7956_s3 + $0x160] ss:$24 sps:$4 sm:$0xff]  }
  0x27   :  { %888 = vmatpush1.bf16.msra.mxu0 %v5243_v42  ;;  %v5334_v42 = vld [vmem:[%s7956_s3 + $0x194] ss:$24 sps:$4 sm:$0xff]  }
  0x28   :  { %958 = vmatpush1.bf16.msra.mxu1 %v5240_v41  ;;  %889 = vmatprep.subr.bf16.mxu0 %v5244_v43  ;;  %v5331_v41 = vld [vmem:[%s7956_s3 + $0x36c] ss:$24 sps:$4 sm:$0xff]   ;;  %v5329_v43 = vld [vmem:[%s7956_s3 + $0x368] ss:$24 sps:$4 sm:$0xff]  }
  0x29   :  { %959 = vmatprep.subr.bf16.mxu1 %v5248_v44  ;;  %v5332_v44 = vld [vmem:[%s7956_s3 + $0x190] ss:$24 sps:$4 sm:$0xff]  }
  0x2b   :  { %890 = vmatpush1.bf16.msra.mxu0 %v5249_v46  ;;  %v5340_v46 = vld [vmem:[%s7956_s3 + $0x1c4] ss:$24 sps:$4 sm:$0xff]  }
  0x2c   :  { %960 = vmatpush1.bf16.msra.mxu1 %v5246_v45  ;;  %891 = vmatprep.subr.bf16.mxu0 %v5250_v47  ;;  %v5337_v45 = vld [vmem:[%s7956_s3 + $0x39c] ss:$24 sps:$4 sm:$0xff]   ;;  %v5335_v47 = vld [vmem:[%s7956_s3 + $0x398] ss:$24 sps:$4 sm:$0xff]  }
  0x2d   :  { %961 = vmatprep.subr.bf16.mxu1 %v5254_v48  ;;  %v5338_v48 = vld [vmem:[%s7956_s3 + $0x1c0] ss:$24 sps:$4 sm:$0xff]  }
  0x2f   :  { %892 = vmatpush1.bf16.msra.mxu0 %v5255_v51  ;;  %v5341_v51 = vld [vmem:[%s7956_s3 + $0x3c8] ss:$24 sps:$4 sm:$0xff]  }
  0x30   :  { %962 = vmatpush1.bf16.msra.mxu1 %v5252_v50  ;;  %893 = vmatprep.subr.bf16.mxu0 %v5256_v53  ;;  %v5346_v50 = vld [vmem:[%s7956_s3 + $0x1f4] ss:$24 sps:$4 sm:$0xff]  }
  0x31   :  { %963 = vmatprep.subr.bf16.mxu1 %v5260_v54  ;;  %v5349_v53 = vld [vmem:[%s7956_s3 + $0x3fc] ss:$24 sps:$4 sm:$0xff]  }
  0x32   :  { %v5352_v54 = vld [vmem:[%s7956_s3 + $0x224] ss:$24 sps:$4 sm:$0xff]  }
  0x33   :  { %894 = vmatpush1.bf16.msra.mxu0 %v5261_v57  ;;  %v5355_v57 = vld [vmem:[%s7956_s3 + $0x254] ss:$24 sps:$4 sm:$0xff]  }
  0x34   :  { %964 = vmatpush1.bf16.msra.mxu1 %v5258_v56  ;;  %895 = vmatprep.subr.bf16.mxu0 %v5262_v58  ;;  %v5350_v56 = vld [vmem:[%s7956_s3 + $0x220] ss:$24 sps:$4 sm:$0xff]   ;;  %v5358_v58 = vld [vmem:[%s7957_s4 + $0x4] ss:$24 sps:$4 sm:$0xff]  }
  0x35   :  { %965 = vmatprep.subr.bf16.mxu1 %v5266_v59  ;;  %v5353_v59 = vld [vmem:[%s7956_s3 + $0x250] ss:$24 sps:$4 sm:$0xff]  }
  0x37   :  { %896 = vmatpush1.bf16.msra.mxu0 %v5267_v61  ;;  %v5361_v61 = vld [vmem:[%s7956_s3 + $0x284] ss:$24 sps:$4 sm:$0xff]  }
  0x38   :  { %966 = vmatpush1.bf16.msra.mxu1 %v5264_v60  ;;  %897 = vmatprep.subr.bf16.mxu0 %v5268_v62  ;;  %v5356_v60 = vld [vmem:[%s7957_s4] ss:$24 sps:$4 sm:$0xff]   ;;  %v5364_v62 = vld [vmem:[%s7957_s4 + $0x34] ss:$24 sps:$4 sm:$0xff]  }
  0x39   :  { %967 = vmatprep.subr.bf16.mxu1 %v5272_v63  ;;  %v5359_v63 = vld [vmem:[%s7956_s3 + $0x280] ss:$24 sps:$4 sm:$0xff]  }
  0x3b   :  { %898 = vmatpush1.bf16.msra.mxu0 %v5273_v1  ;;  %v5367_v1 = vld [vmem:[%s7956_s3 + $0x2b4] ss:$24 sps:$4 sm:$0xff]  }
  0x3c   :  { %968 = vmatpush1.bf16.msra.mxu1 %v5270_v0  ;;  %899 = vmatprep.subr.bf16.mxu0 %v5274_v3  ;;  %v5362_v0 = vld [vmem:[%s7957_s4 + $0x30] ss:$24 sps:$4 sm:$0xff]   ;;  %v5370_v3 = vld [vmem:[%s7957_s4 + $0x64] ss:$24 sps:$4 sm:$0xff]  }
  0x3d   :  { %969 = vmatprep.subr.bf16.mxu1 %v5278_v4  ;;  %v5365_v4 = vld [vmem:[%s7956_s3 + $0x2b0] ss:$24 sps:$4 sm:$0xff]  }
  0x3f   :  { %900 = vmatpush1.bf16.msra.mxu0 %v5279_v6  ;;  %v5373_v6 = vld [vmem:[%s7956_s3 + $0x2e4] ss:$24 sps:$4 sm:$0xff]  }
  0x40   :  { %970 = vmatpush1.bf16.msra.mxu1 %v5276_v5  ;;  %1033 = vmatprep.subr.bf16.mxu0 %v5286_v8  ;;  %v5368_v5 = vld [vmem:[%s7957_s4 + $0x60] ss:$24 sps:$4 sm:$0xff]  }
  0x41   :  { %971 = vmatprep.subr.bf16.mxu1 %v5283_v7  ;;  %v5376_v7 = vld [vmem:[%s7957_s4 + $0x94] ss:$24 sps:$4 sm:$0xff]   ;;  %v5371_v8 = vld [vmem:[%s7956_s3 + $0x2e0] ss:$24 sps:$4 sm:$0xff]  }
  0x42   :  { %902 = vmatmul.mubr.bf16.vlgmr.msra.gmra.mrb[0].mxu0 %v6074_v9 }
  0x43   :  { %1034 = vmatpush1.bf16.msra.mxu0 %v5284_v11  ;;  %1065 = vmatprep.mubr.bf16.mxu0 %v39_v55  ;;  %v5347_v55 = vld [vmem:[%s7956_s3 + $0x3f8] ss:$24 sps:$4 sm:$0xff]   ;;  %v5379_v11 = vld [vmem:[%s7956_s3 + $0x314] ss:$24 sps:$4 sm:$0xff]  }
  0x44   :  { %972 = vmatpush1.bf16.msra.mxu1 %v5281_v10  ;;  %1035 = vmatprep.subr.bf16.mxu0 %v5292_v13  ;;  %v5374_v10 = vld [vmem:[%s7957_s4 + $0x90] ss:$24 sps:$4 sm:$0xff]  }
  0x45   :  { %973 = vmatprep.subr.bf16.mxu1 %v5289_v12  ;;  %v1115_v12 = vld [vmem:[%s7954_s1] sm:$0xff]  ;;  %v1116_v13 = vld [vmem:[%s7954_s1 + $0x8] sm:$0xff] }
  0x47   :  { %1036 = vmatpush1.bf16.msra.mxu0 %v5290_v15  ;;  %v5377_v15 = vld [vmem:[%s7956_s3 + $0x310] ss:$24 sps:$4 sm:$0xff]  }
  0x48   :  { %974 = vmatpush1.bf16.msra.mxu1 %v5287_v14  ;;  %1037 = vmatprep.subr.bf16.mxu0 %v5298_v17  ;;  %v5382_v14 = vld [vmem:[%s7957_s4 + $0xc] ss:$24 sps:$4 sm:$0xff]   ;;  %v5380_v17 = vld [vmem:[%s7957_s4 + $0x8] ss:$24 sps:$4 sm:$0xff]  }
  0x49   :  { %975 = vmatprep.subr.bf16.mxu1 %v5295_v16  ;;  %v6283_v16 = vpack.c.bf16 %v1116_v13, %v1115_v12  ;;  %v6571_v12 = vld [vmem:[%s7958_s5 + $0x188] ss:$24 sps:$4 sm:$0xff]   ;;  %v6576_v13 = vld [vmem:[%s7958_s5 + $0x154] ss:$24 sps:$4 sm:$0xff]  }
  0x4b   :  { %1038 = vmatpush1.bf16.msra.mxu0 %v5296_v19  ;;  %v5388_v19 = vld [vmem:[%s7957_s4 + $0x3c] ss:$24 sps:$4 sm:$0xff]  }
  0x4c   :  { %976 = vmatpush1.bf16.msra.mxu1 %v5293_v18  ;;  %1039 = vmatprep.subr.bf16.mxu0 %v5304_v21  ;;  %v5385_v18 = vld [vmem:[%s7956_s3 + $0x344] ss:$24 sps:$4 sm:$0xff]   ;;  %v5386_v21 = vld [vmem:[%s7957_s4 + $0x38] ss:$24 sps:$4 sm:$0xff]  }
  0x4d   :  { %977 = vmatprep.subr.bf16.mxu1 %v5301_v20  ;;  %v5383_v20 = vld [vmem:[%s7956_s3 + $0x340] ss:$24 sps:$4 sm:$0xff]  }
  0x4f   :  { %1040 = vmatpush1.bf16.msra.mxu0 %v5302_v23  ;;  %v5389_v23 = vld [vmem:[%s7956_s3 + $0x370] ss:$24 sps:$4 sm:$0xff]  }
  0x50   :  { %978 = vmatpush1.bf16.msra.mxu1 %v5299_v22  ;;  %1041 = vmatprep.subr.bf16.mxu0 %v5310_v25  ;;  %v5391_v22 = vld [vmem:[%s7956_s3 + $0x374] ss:$24 sps:$4 sm:$0xff]   ;;  %v5397_v25 = vld [vmem:[%s7956_s3 + $0x3a4] ss:$24 sps:$4 sm:$0xff]  }
  0x51   :  { %979 = vmatprep.subr.bf16.mxu1 %v5307_v24  ;;  %v5392_v24 = vld [vmem:[%s7957_s4 + $0x68] ss:$24 sps:$4 sm:$0xff]  }
  0x53   :  { %1042 = vmatpush1.bf16.msra.mxu0 %v5308_v27  ;;  %v5395_v27 = vld [vmem:[%s7956_s3 + $0x3a0] ss:$24 sps:$4 sm:$0xff]  }
  0x54   :  { %980 = vmatpush1.bf16.msra.mxu1 %v5305_v26  ;;  %1043 = vmatprep.subr.bf16.mxu0 %v5316_v30  ;;  %v5400_v26 = vld [vmem:[%s7957_s4 + $0x9c] ss:$24 sps:$4 sm:$0xff]  }
  0x55   :  { %981 = vmatprep.subr.bf16.mxu1 %v5313_v29  ;;  %v5398_v29 = vld [vmem:[%s7957_s4 + $0x98] ss:$24 sps:$4 sm:$0xff]   ;;  %v5403_v30 = vld [vmem:[%s7956_s3 + $0x3d4] ss:$24 sps:$4 sm:$0xff]  }
  0x57   :  { %1044 = vmatpush1.bf16.msra.mxu0 %v5314_v32  ;;  %v5401_v32 = vld [vmem:[%s7956_s3 + $0x3d0] ss:$24 sps:$4 sm:$0xff]  }
  0x58   :  { %982 = vmatpush1.bf16.msra.mxu1 %v5311_v31  ;;  %1045 = vmatprep.subr.bf16.mxu0 %v5322_v34  ;;  %v5406_v31 = vld [vmem:[%s7957_s4 + $0x14] ss:$24 sps:$4 sm:$0xff]   ;;  %v5409_v34 = vld [vmem:[%s7956_s3 + $0x404] ss:$24 sps:$4 sm:$0xff]  }
  0x59   :  { %992 = vmatprep.subr.bf16.mxu1 %v5319_v33  ;;  %v5404_v33 = vld [vmem:[%s7957_s4 + $0x10] ss:$24 sps:$4 sm:$0xff]  }
  0x5b   :  { %984 = vmatmul.mubr.bf16.vlgmr.msra.gmra.mrb[4].mxu1 %v6074_v9  ;;  %1046 = vmatpush1.bf16.msra.mxu0 %v5320_v36  ;;  %v5407_v36 = vld [vmem:[%s7956_s3 + $0x400] ss:$24 sps:$4 sm:$0xff]  }
  0x5c   :  { %993 = vmatpush1.bf16.msra.mxu1 %v5317_v35  ;;  %1047 = vmatprep.subr.bf16.mxu0 %v5328_v38  ;;  %v5412_v35 = vld [vmem:[%s7957_s4 + $0x44] ss:$24 sps:$4 sm:$0xff]   ;;  %v5410_v38 = vld [vmem:[%s7957_s4 + $0x40] ss:$24 sps:$4 sm:$0xff]  }
  0x5d   :  { %994 = vmatprep.subr.bf16.mxu1 %v5325_v37  ;;  %1024 = vmatprep.mubr.bf16.mxu1 %v5813_v2  ;;  %v6355_v37 = vld [vmem:[%s7955_s2] sm:$0xff] }
  0x5f   :  { %1048 = vmatpush1.bf16.msra.mxu0 %v5326_v40  ;;  %v6366_v40 = vld [vmem:[%s7958_s5 + $0xc] ss:$24 sps:$4 sm:$0xff]  }
  0x60   :  { %995 = vmatpush1.bf16.msra.mxu1 %v5323_v39  ;;  %1049 = vmatprep.subr.bf16.mxu0 %v5334_v42  ;;  %v5415_v39 = vld [vmem:[%s7957_s4 + $0x74] ss:$24 sps:$4 sm:$0xff]   ;;  %v5413_v42 = vld [vmem:[%s7957_s4 + $0x70] ss:$24 sps:$4 sm:$0xff]  }
  0x61   :  { %996 = vmatprep.subr.bf16.mxu1 %v5331_v41  ;;  %v6371_v41 = vcombine.high %v6355_v37, %v6355_v37 }
  0x63   :  { %1050 = vmatpush1.bf16.msra.mxu0 %v5332_v44  ;;  %8021 = vst [vmem:[#allocation5_spill] sm:$0xff] %v6371_v41  ;;  %v6388_v44 = vld [vmem:[%s7958_s5 + $0x3c] ss:$24 sps:$4 sm:$0xff]  }
  0x64   :  { %997 = vmatpush1.bf16.msra.mxu1 %v5329_v43  ;;  %1051 = vmatprep.subr.bf16.mxu0 %v5340_v46  ;;  %v6379_v43 = vld [vmem:[%s7958_s5 + $0x8] ss:$24 sps:$4 sm:$0xff]  }
  0x65   :  { %998 = vmatprep.subr.bf16.mxu1 %v5337_v45  ;;  %v6392_v45 = vpack.c.bf16 %v6371_v41, %v6371_v41  ;;  %v5419_v46 = vld [vmem:[%s7957_s4 + $0xa0] ss:$24 sps:$4 sm:$0xff]  }
  0x67   :  { %1052 = vmatpush1.bf16.msra.mxu0 %v5338_v48  ;;  %v6409_v48 = vld [vmem:[%s7958_s5 + $0x4] ss:$24 sps:$4 sm:$0xff]  }
  0x68   :  { %999 = vmatpush1.bf16.msra.mxu1 %v5335_v47  ;;  %1053 = vmatprep.subr.bf16.mxu0 %v5346_v50  ;;  %v6403_v47 = vld [vmem:[%s7958_s5 + $0x38] ss:$24 sps:$4 sm:$0xff]   ;;  %v6426_v50 = vld [vmem:[%s7958_s5 + $0x68] ss:$24 sps:$4 sm:$0xff]  }
  0x69   :  { %1000 = vmatprep.subr.bf16.mxu1 %v5343_v49  ;;  %v6420_v49 = vld [vmem:[%s7958_s5] ss:$24 sps:$4 sm:$0xff]  }
  0x6b   :  { %1054 = vmatpush1.bf16.msra.mxu0 %v5344_v52  ;;  %v6438_v52 = vld [vmem:[%s7958_s5 + $0x9c] ss:$24 sps:$4 sm:$0xff]  }
  0x6c   :  { %1001 = vmatpush1.bf16.msra.mxu1 %v5341_v51  ;;  %1055 = vmatprep.subr.bf16.mxu0 %v5352_v54  ;;  %v6433_v51 = vld [vmem:[%s7958_s5 + $0x34] ss:$24 sps:$4 sm:$0xff]   ;;  %v6452_v54 = vld [vmem:[%s7958_s5 + $0x98] ss:$24 sps:$4 sm:$0xff]  }
  0x6d   :  { %1002 = vmatprep.subr.bf16.mxu1 %v5349_v53  ;;  %v6445_v53 = vld [vmem:[%s7958_s5 + $0x30] ss:$24 sps:$4 sm:$0xff]  }
  0x6f   :  { %1056 = vmatpush1.bf16.msra.mxu0 %v5350_v56  ;;  %v6464_v56 = vld [vmem:[%s7958_s5 + $0xcc] ss:$24 sps:$4 sm:$0xff]  }
  0x70   :  { %1003 = vmatpush1.bf16.msra.mxu1 %v5347_v55  ;;  %1057 = vmatprep.subr.bf16.mxu0 %v5355_v57  ;;  %v6459_v55 = vld [vmem:[%s7958_s5 + $0x64] ss:$24 sps:$4 sm:$0xff]   ;;  %v6472_v57 = vld [vmem:[%s7958_s5 + $0x60] ss:$24 sps:$4 sm:$0xff]  }
  0x71   :  { %1266 = vmatprep.subr.bf16.mxu1 %v5358_v58  ;;  %v6477_v58 = vld [vmem:[%s7958_s5 + $0xc8] ss:$24 sps:$4 sm:$0xff]  }
  0x73   :  { %4734 = vmatmul.mubr.msk.bf16.vlgmr.msra.gmra.mrb[4].mxu1 %vm865_vm0, %v5947_v28  ;;  %1058 = vmatpush1.bf16.msra.mxu0 %v5353_v59  ;;  %v6484_v59 = vld [vmem:[%s7958_s5 + $0x94] ss:$24 sps:$4 sm:$0xff]  }
  0x74   :  { %1267 = vmatpush1.bf16.msra.mxu1 %v5356_v60  ;;  %1059 = vmatprep.subr.bf16.mxu0 %v5361_v61  ;;  %v6489_v60 = vld [vmem:[%s7958_s5 + $0xfc] ss:$24 sps:$4 sm:$0xff]   ;;  %v6494_v61 = vld [vmem:[%s7958_s5 + $0x90] ss:$24 sps:$4 sm:$0xff]  }
  0x75   :  { %1268 = vmatprep.subr.bf16.mxu1 %v5364_v62  ;;  %1298 = vmatprep.mubr.bf16.mxu1 %v5813_v2  ;;  %v6499_v62 = vld [vmem:[%s7958_s5 + $0xf8] ss:$24 sps:$4 sm:$0xff]  }
  0x77   :  { %1060 = vmatpush1.bf16.msra.mxu0 %v5359_v63  ;;  %v6504_v63 = vld [vmem:[%s7958_s5 + $0xc4] ss:$24 sps:$4 sm:$0xff]  }
  0x78   :  { %1269 = vmatpush1.bf16.msra.mxu1 %v5362_v0  ;;  %1061 = vmatprep.subr.bf16.mxu0 %v5367_v1  ;;  %v6509_v0 = vld [vmem:[%s7958_s5 + $0x12c] ss:$24 sps:$4 sm:$0xff]   ;;  %v6518_v1 = vld [vmem:[%s7958_s5 + $0xc0] ss:$24 sps:$4 sm:$0xff]  }
  0x79   :  { %1270 = vmatprep.subr.bf16.mxu1 %v5370_v3  ;;  %v6523_v3 = vld [vmem:[%s7958_s5 + $0x128] ss:$24 sps:$4 sm:$0xff]  }
  0x7b   :  { %1062 = vmatpush1.bf16.msra.mxu0 %v5365_v4  ;;  %v6528_v4 = vld [vmem:[%s7958_s5 + $0xf4] ss:$24 sps:$4 sm:$0xff]  }
  0x7c   :  { %1271 = vmatpush1.bf16.msra.mxu1 %v5368_v5  ;;  %1063 = vmatprep.subr.bf16.mxu0 %v5373_v6  ;;  %v6533_v5 = vld [vmem:[%s7958_s5 + $0x15c] ss:$24 sps:$4 sm:$0xff]   ;;  %v6542_v6 = vld [vmem:[%s7958_s5 + $0xf0] ss:$24 sps:$4 sm:$0xff]  }
  0x7d   :  { %1272 = vmatprep.subr.bf16.mxu1 %v5376_v7  ;;  %v6547_v7 = vld [vmem:[%s7958_s5 + $0x158] ss:$24 sps:$4 sm:$0xff]  }
  0x7f   :  { %1064 = vmatpush1.bf16.msra.mxu0 %v5371_v8  ;;  %v6552_v8 = vld [vmem:[%s7958_s5 + $0x124] ss:$24 sps:$4 sm:$0xff]  }
  0x80   :  { %1273 = vmatpush1.bf16.msra.mxu1 %v5374_v10  ;;  %1074 = vmatprep.subr.bf16.mxu0 %v5379_v11  ;;  %v6557_v10 = vld [vmem:[%s7958_s5 + $0x18c] ss:$24 sps:$4 sm:$0xff]   ;;  %v6566_v11 = vld [vmem:[%s7958_s5 + $0x120] ss:$24 sps:$4 sm:$0xff]  }
  0x81   :  { %1309 = vmatprep.subr.bf16.mxu1 %v5382_v14  ;;  %v6581_v14 = vld [vmem:[%s7958_s5 + $0x1bc] ss:$24 sps:$4 sm:$0xff]  }
  0x82   :  { %1066 = vmatmul.mubr.bf16.vlgmr.msra.gmra.mrb[4].mxu0 %v6074_v9  ;;  %v5394_v9 = vld [vmem:[%s7957_s4 + $0x6c] ss:$24 sps:$4 sm:$0xff]  }
  0x83   :  { %4760 = vmatmul.mubr.msk.bf16.vlgmr.msra.gmra.mrb[8].mxu1 %vm1262_vm1, %v6283_v16  ;;  %1075 = vmatpush1.bf16.msra.mxu0 %v5377_v15  ;;  %v6590_v15 = vld [vmem:[%s7958_s5 + $0x150] ss:$24 sps:$4 sm:$0xff]  }
  0x84   :  { %1310 = vmatpush1.bf16.msra.mxu1 %v5380_v17  ;;  %1076 = vmatprep.subr.bf16.mxu0 %v5385_v18  ;;  %v6600_v17 = vld [vmem:[%s7958_s5 + $0x184] ss:$24 sps:$4 sm:$0xff]  }
  0x85   :  { %1311 = vmatprep.subr.bf16.mxu1 %v5388_v19  ;;  %1341 = vmatprep.mubr.bf16.mxu1 %v5813_v2  ;;  %v6605_v18 = vld [vmem:[%s7958_s5 + $0x1ec] ss:$24 sps:$4 sm:$0xff]   ;;  %v6614_v19 = vld [vmem:[%s7958_s5 + $0x180] ss:$24 sps:$4 sm:$0xff]  }
  0x86   :  { %1106 = vmatprep.mubr.bf16.mxu0 %v5813_v2 }
  0x87   :  { %1077 = vmatpush1.bf16.msra.mxu0 %v5383_v20  ;;  %v6619_v20 = vld [vmem:[%s7958_s5 + $0x1e8] ss:$24 sps:$4 sm:$0xff]  }
  0x88   :  { %1312 = vmatpush1.bf16.msra.mxu1 %v5386_v21  ;;  %1078 = vmatprep.subr.bf16.mxu0 %v5391_v22  ;;  %v6624_v21 = vld [vmem:[%s7958_s5 + $0x1b4] ss:$24 sps:$4 sm:$0xff]  }
  0x89   :  { %1313 = vmatprep.subr.bf16.mxu1 %v5394_v9  ;;  %v6629_v22 = vld [vmem:[%s7958_s5 + $0x21c] ss:$24 sps:$4 sm:$0xff]   ;;  %v6638_v9 = vld [vmem:[%s7958_s5 + $0x1b0] ss:$24 sps:$4 sm:$0xff]  }
  0x8b   :  { %1079 = vmatpush1.bf16.msra.mxu0 %v5389_v23  ;;  %v6643_v23 = vld [vmem:[%s7958_s5 + $0x218] ss:$24 sps:$4 sm:$0xff]  }
  0x8c   :  { %1314 = vmatpush1.bf16.msra.mxu1 %v5392_v24  ;;  %1080 = vmatprep.subr.bf16.mxu0 %v5397_v25  ;;  %v6648_v24 = vld [vmem:[%s7958_s5 + $0x1e4] ss:$24 sps:$4 sm:$0xff]  }
  0x8d   :  { %1315 = vmatprep.subr.bf16.mxu1 %v5400_v26  ;;  %v6653_v25 = vld [vmem:[%s7958_s5 + $0x24c] ss:$24 sps:$4 sm:$0xff]   ;;  %v6662_v26 = vld [vmem:[%s7958_s5 + $0x1e0] ss:$24 sps:$4 sm:$0xff]  }
  0x8f   :  { %1081 = vmatpush1.bf16.msra.mxu0 %v5395_v27  ;;  %v6667_v27 = vld [vmem:[%s7958_s5 + $0x248] ss:$24 sps:$4 sm:$0xff]  }
  0x90   :  { %1316 = vmatpush1.bf16.msra.mxu1 %v5398_v29  ;;  %1082 = vmatprep.subr.bf16.mxu0 %v5403_v30  ;;  %v6672_v29 = vld [vmem:[%s7958_s5 + $0x214] ss:$24 sps:$4 sm:$0xff]  }
  0x91   :  { %1352 = vmatprep.subr.bf16.mxu1 %v5406_v31  ;;  %v6677_v30 = vld [vmem:[%s7958_s5 + $0x27c] ss:$24 sps:$4 sm:$0xff]  }
  0x93   :  { %4761 = vmatmul.mubr.msk.bf16.vlgmr.msra.gmra.mrb[12].mxu1 %vm1262_vm1, %v6283_v16  ;;  %1083 = vmatpush1.bf16.msra.mxu0 %v5401_v32 }
  0x94   :  { %1353 = vmatpush1.bf16.msra.mxu1 %v5404_v33  ;;  %1084 = vmatprep.subr.bf16.mxu0 %v5409_v34 }
  0x95   :  { %1354 = vmatprep.subr.bf16.mxu1 %v5412_v35  ;;  %1384 = vmatprep.mubr.bf16.mxu1 %v5813_v2  ;;  %v5421_v2 = vld [vmem:[%s7957_s4 + $0xa4] ss:$24 sps:$4 sm:$0xff]  }
  0x97   :  { %1085 = vmatpush1.bf16.msra.mxu0 %v5407_v36 }
  0x98   :  { %1355 = vmatpush1.bf16.msra.mxu1 %v5410_v38  ;;  %2056 = vmatprep.subr.bf16.mxu0 %v6366_v40 }
  0x99   :  { %1356 = vmatprep.subr.bf16.mxu1 %v5415_v39 }
  0x9a   :  { %4735 = vmatmul.mubr.msk.bf16.vlgmr.msra.gmra.mrb[4].mxu0 %vm865_vm0, %v5947_v28  ;;  %v6414_v28 = vld [vmem:[%s7958_s5 + $0x6c] ss:$24 sps:$4 sm:$0xff]  }
  0x9b   :  { %2057 = vmatpush1.bf16.msra.mxu0 %v6379_v43  ;;  %2088 = vmatprep.mubr.bf16.mxu0 %v6392_v45 }
  0x9c   :  { %1357 = vmatpush1.bf16.msra.mxu1 %v5413_v42  ;;  %2058 = vmatprep.subr.bf16.mxu0 %v6388_v44 }
  0x9d   :  { %1358 = vmatprep.subr.bf16.mxu1 %v5421_v2 }
  0x9f   :  { %2059 = vmatpush1.bf16.msra.mxu0 %v6403_v47 }
  0xa0   :  { %1359 = vmatpush1.bf16.msra.mxu1 %v5419_v46  ;;  %2060 = vmatprep.subr.bf16.mxu0 %v6414_v28 }
  0xa1   :  { %2015 = vmatprep.subr.bf16.mxu1 %v6409_v48 }
  0xa3   :  { %4762 = vmatmul.mubr.msk.bf16.vlgmr.msra.gmra.mrb[16].mxu1 %vm1262_vm1, %v6283_v16  ;;  %2061 = vmatpush1.bf16.msra.mxu0 %v6426_v50  ;;  %v6595_v16 = vld [vmem:[%s7958_s5 + $0x1b8] ss:$24 sps:$4 sm:$0xff]  }
  0xa4   :  { %2016 = vmatpush1.bf16.msra.mxu1 %v6420_v49  ;;  %2062 = vmatprep.subr.bf16.mxu0 %v6438_v52 }
  0xa5   :  { %2017 = vmatprep.subr.bf16.mxu1 %v6433_v51  ;;  %2047 = vmatprep.mubr.bf16.mxu1 %v6392_v45 }
  0xa7   :  { %2063 = vmatpush1.bf16.msra.mxu0 %v6452_v54 }
  0xa8   :  { %2018 = vmatpush1.bf16.msra.mxu1 %v6445_v53  ;;  %2064 = vmatprep.subr.bf16.mxu0 %v6464_v56 }
  0xa9   :  { %2019 = vmatprep.subr.bf16.mxu1 %v6459_v55 }
  0xab   :  { %2065 = vmatpush1.bf16.msra.mxu0 %v6477_v58 }
  0xac   :  { %2020 = vmatpush1.bf16.msra.mxu1 %v6472_v57  ;;  %2066 = vmatprep.subr.bf16.mxu0 %v6489_v60 }
  0xad   :  { %2021 = vmatprep.subr.bf16.mxu1 %v6484_v59 }
  0xaf   :  { %2067 = vmatpush1.bf16.msra.mxu0 %v6499_v62 }
  0xb0   :  { %2022 = vmatpush1.bf16.msra.mxu1 %v6494_v61  ;;  %2068 = vmatprep.subr.bf16.mxu0 %v6509_v0 }
  0xb1   :  { %2023 = vmatprep.subr.bf16.mxu1 %v6504_v63 }
  0xb3   :  { %2069 = vmatpush1.bf16.msra.mxu0 %v6523_v3 }
  0xb4   :  { %2024 = vmatpush1.bf16.msra.mxu1 %v6518_v1  ;;  %2070 = vmatprep.subr.bf16.mxu0 %v6533_v5 }
  0xb5   :  { %2025 = vmatprep.subr.bf16.mxu1 %v6528_v4 }
  0xb7   :  { %2071 = vmatpush1.bf16.msra.mxu0 %v6547_v7 }
  0xb8   :  { %2026 = vmatpush1.bf16.msra.mxu1 %v6542_v6  ;;  %2072 = vmatprep.subr.bf16.mxu0 %v6557_v10 }
  0xb9   :  { %2027 = vmatprep.subr.bf16.mxu1 %v6552_v8 }
  0xbb   :  { %2073 = vmatpush1.bf16.msra.mxu0 %v6571_v12 }
  0xbc   :  { %2028 = vmatpush1.bf16.msra.mxu1 %v6566_v11  ;;  %2074 = vmatprep.subr.bf16.mxu0 %v6581_v14 }
  0xbd   :  { %2029 = vmatprep.subr.bf16.mxu1 %v6576_v13 }
  0xbf   :  { %2075 = vmatpush1.bf16.msra.mxu0 %v6595_v16 }
  0xc0   :  { %2030 = vmatpush1.bf16.msra.mxu1 %v6590_v15  ;;  %2076 = vmatprep.subr.bf16.mxu0 %v6605_v18 }
  0xc1   :  { %2031 = vmatprep.subr.bf16.mxu1 %v6600_v17 }
  0xc3   :  { %2077 = vmatpush1.bf16.msra.mxu0 %v6619_v20 }
  0xc4   :  { %2032 = vmatpush1.bf16.msra.mxu1 %v6614_v19  ;;  %2078 = vmatprep.subr.bf16.mxu0 %v6629_v22 }
  0xc5   :  { %2033 = vmatprep.subr.bf16.mxu1 %v6624_v21 }
  0xc7   :  { %2079 = vmatpush1.bf16.msra.mxu0 %v6643_v23 }
  0xc8   :  { %2034 = vmatpush1.bf16.msra.mxu1 %v6638_v9  ;;  %2080 = vmatprep.subr.bf16.mxu0 %v6653_v25 }
  0xc9   :  { %2035 = vmatprep.subr.bf16.mxu1 %v6648_v24 }
  0xca   :  { %15 = vsyncpa [#allocation3], 0  ;;  %v6688_v31 = vld [vmem:[%s7958_s5 + $0x210] ss:$24 sps:$4 sm:$0xff]   ;;  %v6700_v33 = vld [vmem:[%s7958_s5 + $0x244] ss:$24 sps:$4 sm:$0xff]   ;;  %v6752_v41 = vpack.c.bf16 %v6355_v37, %v6355_v37 }
  0xcb   :  { %2081 = vmatpush1.bf16.msra.mxu0 %v6667_v27  ;;  %v6693_v32 = vld [vmem:[%s7958_s5 + $0x278] ss:$24 sps:$4 sm:$0xff]   ;;  %v6705_v34 = vld [vmem:[%s7958_s5 + $0x2ac] ss:$24 sps:$4 sm:$0xff]   ;;  %v6717_v36 = vld [vmem:[%s7958_s5 + $0x2a8] ss:$24 sps:$4 sm:$0xff]  }
  0xcc   :  { %2036 = vmatpush1.bf16.msra.mxu1 %v6662_v26  ;;  %2082 = vmatprep.subr.bf16.mxu0 %v6677_v30  ;;  %v6712_v35 = vld [vmem:[%s7958_s5 + $0x240] ss:$24 sps:$4 sm:$0xff]   ;;  %8022 = vst [vmem:[#allocation6_spill] sm:$0xff] %v6717_v36  ;;  %v6724_v38 = vld [vmem:[%s7958_s5 + $0x274] ss:$24 sps:$4 sm:$0xff]  }
  0xcd   :  { %2037 = vmatprep.subr.bf16.mxu1 %v6672_v29  ;;  %v6729_v39 = vld [vmem:[%s7958_s5 + $0x2dc] ss:$24 sps:$4 sm:$0xff]   ;;  %v6736_v42 = vld [vmem:[%s7958_s5 + $0x270] ss:$24 sps:$4 sm:$0xff]  }
  0xce   :  { %8023 = vst [vmem:[#allocation7_spill] sm:$0xff] %v6729_v39  ;;  %v6741_v2 = vld [vmem:[%s7958_s5 + $0x2d8] ss:$24 sps:$4 sm:$0xff]   ;;  %v6748_v46 = vld [vmem:[%s7958_s5 + $0x2a4] ss:$24 sps:$4 sm:$0xff]  }
  0xcf   :  { %2083 = vmatpush1.bf16.msra.mxu0 %v6693_v32  ;;  %8024 = vst [vmem:[#allocation8_spill] sm:$0xff] %v6741_v2  ;;  %v6773_v37 = vld [vmem:[%s7958_s5 + $0x2d0] ss:$24 sps:$4 sm:$0xff]  }
  0xd0   :  { %2038 = vmatpush1.bf16.msra.mxu1 %v6688_v31  ;;  %2084 = vmatprep.subr.bf16.mxu0 %v6705_v34 }
  0xd1   :  { %2039 = vmatprep.subr.bf16.mxu1 %v6700_v33 }
  0xd3   :  { %2085 = vmatpush1.bf16.msra.mxu0 %v6717_v36  ;;  %v6759_v36 = vld [vmem:[%s7958_s5 + $0x2a0] ss:$24 sps:$4 sm:$0xff]  }
  0xd4   :  { %2040 = vmatpush1.bf16.msra.mxu1 %v6712_v35  ;;  %2086 = vmatprep.subr.bf16.mxu0 %v6729_v39  ;;  %v6765_v39 = vld [vmem:[%s7958_s5 + $0x2d4] ss:$24 sps:$4 sm:$0xff]  }
  0xd5   :  { %2041 = vmatprep.subr.bf16.mxu1 %v6724_v38 }
  0xd7   :  { %2087 = vmatpush1.bf16.msra.mxu0 %v6741_v2  ;;  %v6780_v2 = vld [vmem:[%s7958_s5 + $0x14] ss:$24 sps:$4 sm:$0xff]  }
  0xd8   :  { %2042 = vmatpush1.bf16.msra.mxu1 %v6736_v42  ;;  %2819 = vmatprep.subr.bf16.mxu0 %v6409_v48  ;;  %v6787_v48 = vld [vmem:[%s7958_s5 + $0x10] ss:$24 sps:$4 sm:$0xff]  }
  0xd9   :  { %2043 = vmatprep.subr.bf16.mxu1 %v6748_v46 }
  0xda   :  { %2089 = vmatmul.mubr.bf16.vlgmr.msra.gmra.mrb[8].mxu0 %v6752_v41 }
  0xdb   :  { %2820 = vmatpush1.bf16.msra.mxu0 %v6420_v49  ;;  %v6794_v49 = vld [vmem:[%s7958_s5 + $0x44] ss:$24 sps:$4 sm:$0xff]  }
  0xdc   :  { %2044 = vmatpush1.bf16.msra.mxu1 %v6759_v36  ;;  %2821 = vmatprep.subr.bf16.mxu0 %v6433_v51  ;;  %v6802_v51 = vld [vmem:[%s7958_s5 + $0x40] ss:$24 sps:$4 sm:$0xff]  }
  0xdd   :  { %2045 = vmatprep.subr.bf16.mxu1 %v6765_v39 }
  0xdf   :  { %2822 = vmatpush1.bf16.msra.mxu0 %v6445_v53  ;;  %v6809_v53 = vld [vmem:[%s7958_s5 + $0x74] ss:$24 sps:$4 sm:$0xff]  }
  0xe0   :  { %2046 = vmatpush1.bf16.msra.mxu1 %v6773_v37  ;;  %2823 = vmatprep.subr.bf16.mxu0 %v6459_v55  ;;  %8025 = vst [vmem:[#allocation9_spill] sm:$0xff] %v6809_v53  ;;  %v6817_v55 = vld [vmem:[%s7958_s5 + $0x70] ss:$24 sps:$4 sm:$0xff]  }
  0xe1   :  { %2097 = vmatprep.subr.bf16.mxu1 %v6780_v2  ;;  %8026 = vst [vmem:[#allocation10_spill] sm:$0xff] %v6817_v55 }
  0xe3   :  { %2048 = vmatmul.mubr.bf16.vlgmr.msra.gmra.mrb[20].mxu1 %v6752_v41  ;;  %2824 = vmatpush1.bf16.msra.mxu0 %v6472_v57  ;;  %v6831_v57 = vld [vmem:[%s7958_s5 + $0xa0] ss:$24 sps:$4 sm:$0xff]  }
  0xe4   :  { %2098 = vmatpush1.bf16.msra.mxu1 %v6787_v48  ;;  %2129 = vmatprep.mubr.bf16.mxu1 %v6392_v45  ;;  %v6823_v45 = vld [vmem:[%s7958_s5 + $0xa4] ss:$24 sps:$4 sm:$0xff]  }
  0xe5   :  { %2099 = vmatprep.subr.bf16.mxu1 %v6794_v49  ;;  %2825 = vmatprep.subr.bf16.mxu0 %v6484_v59  ;;  %8027 = vst [vmem:[#allocation11_spill] sm:$0xff] %v6823_v45  ;;  %v6837_v59 = vld [vmem:[%s7958_s5 + $0xd4] ss:$24 sps:$4 sm:$0xff]  }
  0xe7   :  { %2826 = vmatpush1.bf16.msra.mxu0 %v6494_v61 }
  0xe8   :  { %2100 = vmatpush1.bf16.msra.mxu1 %v6802_v51  ;;  %2827 = vmatprep.subr.bf16.mxu0 %v6504_v63 }
  0xe9   :  { %2101 = vmatprep.subr.bf16.mxu1 %v6809_v53 }
  0xeb   :  { %2828 = vmatpush1.bf16.msra.mxu0 %v6518_v1  ;;  %v6855_v1 = vld [vmem:[%s7958_s5 + $0x104] ss:$24 sps:$4 sm:$0xff]  }
  0xec   :  { %2102 = vmatpush1.bf16.msra.mxu1 %v6817_v55  ;;  %2829 = vmatprep.subr.bf16.mxu0 %v6528_v4  ;;  %v6863_v4 = vld [vmem:[%s7958_s5 + $0x100] ss:$24 sps:$4 sm:$0xff]  }
  0xed   :  { %2103 = vmatprep.subr.bf16.mxu1 %v6823_v45  ;;  %v6849_v45 = vld [vmem:[%s7958_s5 + $0xd0] ss:$24 sps:$4 sm:$0xff]  }
  0xee   :  { %v6840_v53 = vpop.f32.mrb[0].mxu1 }
  0xef   :  { %v6843_v61 = vpop.f32.mrb[1].mxu1  ;;  %2830 = vmatpush1.bf16.msra.mxu0 %v6542_v6  ;;  %v6877_v6 = vld [vmem:[%s7958_s5 + $0x130] ss:$24 sps:$4 sm:$0xff]  }
  0xf0   :  { %v948_v63 = vpop.f32.mrb[2].mxu1  ;;  %2104 = vmatpush1.bf16.msra.mxu1 %v6831_v57  ;;  %2831 = vmatprep.subr.bf16.mxu0 %v6552_v8  ;;  %v6883_v8 = vld [vmem:[%s7958_s5 + $0x164] ss:$24 sps:$4 sm:$0xff]  }
  0xf1   :  { %v949_v55 = vpop.f32.mrb[3].mxu1  ;;  %2105 = vmatprep.subr.bf16.mxu1 %v6837_v59  ;;  %v6939_v63 = vld [vmem:[%s7958_s5 + $0x224] ss:$24 sps:$4 sm:$0xff]  }
  0xf2   :  { %v6869_v55 = vld [vmem:[%s7958_s5 + $0x134] ss:$24 sps:$4 sm:$0xff]   ;;  %8033 = vst [vmem:[#allocation17_spill] sm:$0xff] %v6939_v63 }
  0xf3   :  { %2832 = vmatpush1.bf16.msra.mxu0 %v6566_v11  ;;  %v6891_v11 = vld [vmem:[%s7958_s5 + $0x160] ss:$24 sps:$4 sm:$0xff]  }
  0xf4   :  { %2106 = vmatpush1.bf16.msra.mxu1 %v6849_v45  ;;  %2833 = vmatprep.subr.bf16.mxu0 %v6576_v13  ;;  %v6897_v13 = vld [vmem:[%s7958_s5 + $0x194] ss:$24 sps:$4 sm:$0xff]  }
  0xf5   :  { %2107 = vmatprep.subr.bf16.mxu1 %v6855_v1 }
  0xf7   :  { %2834 = vmatpush1.bf16.msra.mxu0 %v6590_v15  ;;  %v6905_v15 = vld [vmem:[%s7958_s5 + $0x190] ss:$24 sps:$4 sm:$0xff]  }
  0xf8   :  { %2108 = vmatpush1.bf16.msra.mxu1 %v6863_v4  ;;  %2835 = vmatprep.subr.bf16.mxu0 %v6600_v17  ;;  %8028 = vst [vmem:[#allocation12_spill] sm:$0xff] %v6905_v15  ;;  %v6911_v17 = vld [vmem:[%s7958_s5 + $0x1c4] ss:$24 sps:$4 sm:$0xff]  }
  0xf9   :  { %2109 = vmatprep.subr.bf16.mxu1 %v6869_v55  ;;  %8029 = vst [vmem:[#allocation13_spill] sm:$0xff] %v6911_v17 }
  0xfb   :  { %2836 = vmatpush1.bf16.msra.mxu0 %v6614_v19  ;;  %v6919_v19 = vld [vmem:[%s7958_s5 + $0x1c0] ss:$24 sps:$4 sm:$0xff]  }
  0xfc   :  { %2110 = vmatpush1.bf16.msra.mxu1 %v6877_v6  ;;  %2837 = vmatprep.subr.bf16.mxu0 %v6624_v21  ;;  %8030 = vst [vmem:[#allocation14_spill] sm:$0xff] %v6919_v19  ;;  %v6925_v21 = vld [vmem:[%s7958_s5 + $0x1f4] ss:$24 sps:$4 sm:$0xff]  }
  0xfd   :  { %2111 = vmatprep.subr.bf16.mxu1 %v6883_v8  ;;  %8031 = vst [vmem:[#allocation15_spill] sm:$0xff] %v6925_v21 }
  0xff   :  { %2838 = vmatpush1.bf16.msra.mxu0 %v6638_v9  ;;  %v175_v9 = vlaneseq }
 0x100   :  { %2112 = vmatpush1.bf16.msra.mxu1 %v6891_v11  ;;  %2839 = vmatprep.subr.bf16.mxu0 %v6648_v24  ;;  %v6933_v24 = vld [vmem:[%s7958_s5 + $0x1f0] ss:$24 sps:$4 sm:$0xff]  }
 0x101   :  { %2113 = vmatprep.subr.bf16.mxu1 %v6897_v13  ;;  %8032 = vst [vmem:[#allocation16_spill] sm:$0xff] %v6933_v24 }
 0x103   :  { %2840 = vmatpush1.bf16.msra.mxu0 %v6662_v26  ;;  %v6943_v26 = vshrl.u32 %v175_v9, 7  ;;  %v6971_v9 = vld [vmem:[%s7959_s6] sm:$0x3f] }
 0x104   :  { %2114 = vmatpush1.bf16.msra.mxu1 %v6905_v15  ;;  %2841 = vmatprep.subr.bf16.mxu0 %v6672_v29  ;;  %v6949_v29 = vld [vmem:[%s7958_s5 + $0x220] ss:$24 sps:$4 sm:$0xff]  }
 0x105   :  { %2115 = vmatprep.subr.bf16.mxu1 %v6911_v17  ;;  %8034 = vst [vmem:[#allocation18_spill] sm:$0xff] %v6949_v29  ;;  %v7006_v17 = vld [vmem:[%s7958_s5 + $0x2b0] ss:$24 sps:$4 sm:$0xff]  }
 0x107   :  { %2842 = vmatpush1.bf16.msra.mxu0 %v6688_v31  ;;  %v6960_v31 = vsub.s32 0, %v6943_v26 }
 0x108   :  { %2116 = vmatpush1.bf16.msra.mxu1 %v6919_v19  ;;  %2843 = vmatprep.subr.bf16.mxu0 %v6700_v33  ;;  %v6966_v33 = vld [vmem:[%s7958_s5 + $0x250] ss:$24 sps:$4 sm:$0xff]  }
 0x109   :  { %2117 = vmatprep.subr.bf16.mxu1 %v6925_v21  ;;  %v6955_v21 = vld [vmem:[%s7958_s5 + $0x254] ss:$24 sps:$4 sm:$0xff]   ;;  %8036 = vst [vmem:[#allocation20_spill] sm:$0xff] %v6960_v31  ;;  %8037 = vst [vmem:[#allocation21_spill] sm:$0xff] %v6966_v33 }
 0x10a   :  { %8035 = vst [vmem:[#allocation19_spill] sm:$0xff] %v6955_v21 }
 0x10b   :  { %2844 = vmatpush1.bf16.msra.mxu0 %v6712_v35  ;;  %v6980_v35 = vld [vmem:[%s7958_s5 + $0x284] ss:$24 sps:$4 sm:$0xff]  }
 0x10c   :  { %2118 = vmatpush1.bf16.msra.mxu1 %v6933_v24  ;;  %2845 = vmatprep.subr.bf16.mxu0 %v6724_v38  ;;  %8039 = vst [vmem:[#allocation23_spill] sm:$0xff] %v6980_v35  ;;  %v178_v38 = vrot.slane %v6971_v9, %v6960_v31 }
 0x10d   :  { %2119 = vmatprep.subr.bf16.mxu1 %v6939_v63  ;;  %v6974_v63 = vsub.s32 1, %v6943_v26 }
 0x10f   :  { %8038 = vst [vmem:[#allocation22_spill] sm:$0xff] %v6974_v63  ;;  %2846 = vmatpush1.bf16.msra.mxu0 %v6736_v42  ;;  %v6998_v42 = vld [vmem:[%s7958_s5 + $0x2b4] ss:$24 sps:$4 sm:$0xff]  }
 0x110   :  { %2120 = vmatpush1.bf16.msra.mxu1 %v6949_v29  ;;  %2847 = vmatprep.subr.bf16.mxu0 %v6748_v46  ;;  %v182_v29 = vrot.slane %v6971_v9, %v6974_v63 }
 0x111   :  { %2121 = vmatprep.subr.bf16.mxu1 %v6955_v21  ;;  %v6992_v21 = vld [vmem:[%s7958_s5 + $0x280] ss:$24 sps:$4 sm:$0xff]  }
 0x113   :  { %2848 = vmatpush1.bf16.msra.mxu0 %v6759_v36  ;;  %v7013_v36 = vld [vmem:[%s7958_s5 + $0x2e4] ss:$24 sps:$4 sm:$0xff]  }
 0x114   :  { %2122 = vmatpush1.bf16.msra.mxu1 %v6966_v33  ;;  %2849 = vmatprep.subr.bf16.mxu0 %v6765_v39 }
 0x115   :  { %2123 = vmatprep.subr.bf16.mxu1 %v6980_v35  ;;  %v903_v46 = vpop.f32.mrb[0].mxu0 }
 0x116   :  { %v904_v33 = vadd.f32 %v903_v46, %v178_v38  ;;  %v905_v24 = vpop.f32.mrb[1].mxu0 }
 0x117   :  { %v906_v19 = vadd.f32 %v905_v24, %v182_v29  ;;  %v907_v35 = vpop.f32.mrb[2].mxu0  ;;  %2850 = vmatpush1.bf16.msra.mxu0 %v6773_v37 }
 0x118   :  { %2124 = vmatpush1.bf16.msra.mxu1 %v6992_v21  ;;  %v945_v15 = vadd.f32 %v6840_v53, %v904_v33  ;;  %v908_v39 = vpop.f32.mrb[3].mxu0  ;;  %2901 = vmatprep.subr.bf16.mxu0 %v6780_v2  ;;  %v7022_v53 = vld [vmem:[%s7958_s5 + $0x2e0] ss:$24 sps:$4 sm:$0xff]  }
 0x119   :  { %2125 = vmatprep.subr.bf16.mxu1 %v6998_v42  ;;  %v947_v24 = vadd.f32 %v6843_v61, %v906_v19 }
 0x11c   :  { %2126 = vmatpush1.bf16.msra.mxu1 %v7006_v17 }
 0x11d   :  { %2127 = vmatprep.subr.bf16.mxu1 %v7013_v36 }
 0x120   :  { %2128 = vmatpush1.bf16.msra.mxu1 %v7022_v53 }
 0x121   :  { %2860 = vmatprep.subr.bf16.mxu1 %v6366_v40 }
 0x123   :  { %2130 = vmatmul.mubr.bf16.vlgmr.msra.gmra.mrb[24].mxu1 %v6752_v41 }
 0x124   :  { %2861 = vmatpush1.bf16.msra.mxu1 %v6379_v43 }
 0x125   :  { %2862 = vmatprep.subr.bf16.mxu1 %v6388_v44 }
 0x128   :  { %2863 = vmatpush1.bf16.msra.mxu1 %v6403_v47 }
 0x129   :  { %2864 = vmatprep.subr.bf16.mxu1 %v6414_v28 }
 0x12c   :  { %2865 = vmatpush1.bf16.msra.mxu1 %v6426_v50 }
 0x12d   :  { %2866 = vmatprep.subr.bf16.mxu1 %v6438_v52 }
 0x130   :  { %2867 = vmatpush1.bf16.msra.mxu1 %v6452_v54 }
 0x131   :  { %2868 = vmatprep.subr.bf16.mxu1 %v6464_v56 }
 0x134   :  { %2869 = vmatpush1.bf16.msra.mxu1 %v6477_v58 }
 0x135   :  { %2870 = vmatprep.subr.bf16.mxu1 %v6489_v60 }
 0x138   :  { %2871 = vmatpush1.bf16.msra.mxu1 %v6499_v62 }
 0x139   :  { %2872 = vmatprep.subr.bf16.mxu1 %v6509_v0 }
 0x13c   :  { %2873 = vmatpush1.bf16.msra.mxu1 %v6523_v3 }
 0x13d   :  { %2874 = vmatprep.subr.bf16.mxu1 %v6533_v5 }
 0x140   :  { %2875 = vmatpush1.bf16.msra.mxu1 %v6547_v7 }
 0x141   :  { %2876 = vmatprep.subr.bf16.mxu1 %v6557_v10 }
 0x144   :  { %2877 = vmatpush1.bf16.msra.mxu1 %v6571_v12 }
 0x145   :  { %2878 = vmatprep.subr.bf16.mxu1 %v6581_v14 }
 0x146   :  { %v1026_v40 = vpop.f32.mrb[4].mxu1 }
 0x147   :  { %v1028_v41 = vpop.f32.mrb[5].mxu1 }
 0x148   :  { %v1030_v43 = vpop.f32.mrb[6].mxu1  ;;  %2879 = vmatpush1.bf16.msra.mxu1 %v6595_v16  ;;  %v8044_v16 = vld [vmem:[#allocation6_spill] sm:$0xff] }
 0x149   :  { %v1031_v44 = vpop.f32.mrb[7].mxu1  ;;  %2880 = vmatprep.subr.bf16.mxu1 %v6605_v18  ;;  %v7074_v18 = vsub.s32 2, %v6943_v26 }
 0x14b   :  { %8045 = vst [vmem:[#allocation6_spill] sm:$0xff] %v7074_v18 }
 0x14c   :  { %2881 = vmatpush1.bf16.msra.mxu1 %v6619_v20  ;;  %v8046_v20 = vld [vmem:[#allocation7_spill] sm:$0xff] }
 0x14d   :  { %2882 = vmatprep.subr.bf16.mxu1 %v6629_v22  ;;  %v7078_v22 = vsub.s32 3, %v6943_v26 }
 0x14f   :  { %8047 = vst [vmem:[#allocation7_spill] sm:$0xff] %v7078_v22 }
 0x150   :  { %2883 = vmatpush1.bf16.msra.mxu1 %v6643_v23  ;;  %v8048_v23 = vld [vmem:[#allocation8_spill] sm:$0xff] }
 0x151   :  { %2884 = vmatprep.subr.bf16.mxu1 %v6653_v25  ;;  %v186_v25 = vrot.slane %v6971_v9, %v7074_v18 }
 0x154   :  { %2885 = vmatpush1.bf16.msra.mxu1 %v6667_v27  ;;  %v190_v27 = vrot.slane %v6971_v9, %v7078_v22 }
 0x155   :  { %2886 = vmatprep.subr.bf16.mxu1 %v6677_v30  ;;  %v5170_v30 = vadd.f32 %v1026_v40, %v186_v25 }
 0x156   :  { %v1300_v47 = vpop.f32.mrb[8].mxu1 }
 0x157   :  { %v7054_v28 = vadd.f32 %v1300_v47, %v945_v15  ;;  %v2191_v50 = vrot.slane %v1300_v47, 4  ;;  %v1302_v52 = vpop.f32.mrb[9].mxu1  ;;  %v7101_v47 = vsub.s32 5, %v6943_v26 }
 0x158   :  { %v7056_v54 = vadd.f32 %v1302_v52, %v947_v24  ;;  %v2192_v56 = vrot.slane %v1302_v52, 4  ;;  %v1304_v58 = vpop.f32.mrb[10].mxu1  ;;  %2887 = vmatpush1.bf16.msra.mxu1 %v6693_v32  ;;  %v5171_v32 = vadd.f32 %v1028_v41, %v190_v27  ;;  %v7096_v41 = vsub.s32 4, %v6943_v26 }
 0x159   :  { %v7059_v60 = vadd.f32 %v2191_v50, %v945_v15  ;;  %v7061_v62 = vadd.f32 %v1304_v58, %v945_v15  ;;  %v3783_v0 = vrot.slane %v1304_v58, 4  ;;  %v1306_v3 = vpop.f32.mrb[11].mxu1  ;;  %2888 = vmatprep.subr.bf16.mxu1 %v6705_v34  ;;  %v198_v58 = vrot.slane %v6971_v9, %v7101_v47 }
 0x15a   :  { %v7064_v5 = vadd.f32 %v2192_v56, %v947_v24  ;;  %v7066_v7 = vadd.f32 %v1306_v3, %v947_v24  ;;  %v3784_v10 = vrot.slane %v1306_v3, 4  ;;  %v194_v52 = vrot.slane %v6971_v9, %v7096_v41 }
 0x15b   :  { %8040 = vst [vmem:[#allocation24_spill] sm:$0xff] %v7061_v62  ;;  %v7068_v12 = vadd.f32 %v3783_v0, %v945_v15  ;;  %v7480_v62 = vld [vmem:[%s7958_s5 + $0x244] ss:$24 sps:$4 sm:$0xff]  }
 0x15c   :  { %8041 = vst [vmem:[#allocation25_spill] sm:$0xff] %v7066_v7  ;;  %v7070_v14 = vadd.f32 %v3784_v10, %v947_v24  ;;  %2889 = vmatpush1.bf16.msra.mxu1 %v8044_v16  ;;  %v7467_v7 = vld [vmem:[%s7958_s5 + $0x218] ss:$24 sps:$4 sm:$0xff]  }
 0x15d   :  { %8042 = vst [vmem:[#allocation26_spill] sm:$0xff] %v7068_v12  ;;  %2890 = vmatprep.subr.bf16.mxu1 %v8046_v20  ;;  %v7443_v12 = vld [vmem:[%s7958_s5 + $0x1e8] ss:$24 sps:$4 sm:$0xff]   ;;  %8093 = vst [vmem:[#allocation43_spill] sm:$0xff] %v7467_v7 }
 0x15e   :  { %8043 = vst [vmem:[#allocation27_spill] sm:$0xff] %v7070_v14  ;;  %8091 = vst [vmem:[#allocation41_spill] sm:$0xff] %v7443_v12 }
 0x160   :  { %2891 = vmatpush1.bf16.msra.mxu1 %v8048_v23 }
 0x166   :  { %v1343_v34 = vpop.f32.mrb[12].mxu1 }
 0x167   :  { %v1398_v2 = vadd.f32 %v5170_v30, %v1343_v34  ;;  %v2193_v37 = vrot.slane %v1343_v34, 4  ;;  %v1345_v61 = vpop.f32.mrb[13].mxu1 }
 0x168   :  { %v1399_v15 = vadd.f32 %v5171_v32, %v1345_v61  ;;  %v2194_v19 = vrot.slane %v1345_v61, 4  ;;  %v1347_v29 = vpop.f32.mrb[14].mxu1 }
 0x169   :  { %v7085_v33 = vadd.f32 %v5170_v30, %v2193_v37  ;;  %v7087_v35 = vadd.f32 %v5170_v30, %v1347_v29  ;;  %v3785_v38 = vrot.slane %v1347_v29, 4  ;;  %v1349_v46 = vpop.f32.mrb[15].mxu1 }
 0x16a   :  { %v7089_v39 = vadd.f32 %v5171_v32, %v2194_v19  ;;  %v7091_v24 = vadd.f32 %v5171_v32, %v1349_v46  ;;  %v3786_v43 = vrot.slane %v1349_v46, 4 }
 0x16b   :  { %8049 = vst [vmem:[#allocation8_spill] sm:$0xff] %v7087_v35  ;;  %v7093_v40 = vadd.f32 %v5170_v30, %v3785_v38  ;;  %v7475_v35 = vld [vmem:[%s7958_s5 + $0x240] ss:$24 sps:$4 sm:$0xff]  }
 0x16c   :  { %8050 = vst [vmem:[#allocation28_spill] sm:$0xff] %v7091_v24  ;;  %v7098_v44 = vadd.f32 %v5171_v32, %v3786_v43  ;;  %v7461_v24 = vld [vmem:[%s7958_s5 + $0x21c] ss:$24 sps:$4 sm:$0xff]  }
 0x16d   :  { %8051 = vst [vmem:[#allocation29_spill] sm:$0xff] %v7093_v40  ;;  %v1108_v50 = vpop.f32.mrb[4].mxu0  ;;  %v7437_v40 = vld [vmem:[%s7958_s5 + $0x1ec] ss:$24 sps:$4 sm:$0xff]   ;;  %8092 = vst [vmem:[#allocation42_spill] sm:$0xff] %v7461_v24 }
 0x16e   :  { %8052 = vst [vmem:[#allocation30_spill] sm:$0xff] %v7098_v44  ;;  %v1110_v56 = vpop.f32.mrb[5].mxu0  ;;  %v5172_v10 = vadd.f32 %v1108_v50, %v194_v52  ;;  %v1503_v50 = vld [vmem:[%s7960_s7] sm:$0x3f]  ;;  %8090 = vst [vmem:[#allocation40_spill] sm:$0xff] %v7437_v40 }
 0x16f   :  { %v1112_v0 = vpop.f32.mrb[6].mxu0  ;;  %v5173_v16 = vadd.f32 %v1110_v56, %v198_v58  ;;  %v1516_v52 = vrot.slane %v1503_v50, %v7074_v18  ;;  %v1520_v56 = vrot.slane %v1503_v50, %v7078_v22 }
 0x170   :  { %v1113_v3 = vpop.f32.mrb[7].mxu0 }
 0x176   :  { %v1386_v20 = vpop.f32.mrb[16].mxu1 }
 0x177   :  { %v7107_v23 = vadd.f32 %v5172_v10, %v1386_v20  ;;  %v2195_v25 = vrot.slane %v1386_v20, 4  ;;  %v1388_v27 = vpop.f32.mrb[17].mxu1 }
 0x178   :  { %v7109_v30 = vadd.f32 %v5173_v16, %v1388_v27  ;;  %v2196_v26 = vrot.slane %v1388_v27, 4  ;;  %v1390_v32 = vpop.f32.mrb[18].mxu1 }
 0x179   :  { %v7111_v34 = vadd.f32 %v5172_v10, %v2195_v25  ;;  %v7113_v37 = vadd.f32 %v5172_v10, %v1390_v32  ;;  %v3787_v61 = vrot.slane %v1390_v32, 4  ;;  %v1392_v19 = vpop.f32.mrb[19].mxu1 }
 0x17a   :  { %v7115_v9 = vadd.f32 %v5173_v16, %v2196_v26  ;;  %v7117_v29 = vadd.f32 %v5173_v16, %v1392_v19  ;;  %v3788_v38 = vrot.slane %v1392_v19, 4 }
 0x17b   :  { %8053 = vst [vmem:[#allocation31_spill] sm:$0xff] %v7113_v37  ;;  %v7119_v46 = vadd.f32 %v5172_v10, %v3787_v61  ;;  %v1508_v10 = vrot.slane %v1503_v50, %v6960_v31  ;;  %v7456_v37 = vld [vmem:[%s7958_s5 + $0x210] ss:$24 sps:$4 sm:$0xff]  }
 0x17c   :  { %8054 = vst [vmem:[#allocation32_spill] sm:$0xff] %v7117_v29  ;;  %v7121_v43 = vadd.f32 %v5173_v16, %v3788_v38  ;;  %v1512_v16 = vrot.slane %v1503_v50, %v6974_v63  ;;  %v7451_v29 = vld [vmem:[%s7958_s5 + $0x214] ss:$24 sps:$4 sm:$0xff]  }
 0x17d   :  { %8055 = vst [vmem:[#allocation33_spill] sm:$0xff] %v7119_v46 }
 0x17e   :  { %8056 = vst [vmem:[#allocation34_spill] sm:$0xff] %v7121_v43 }
 0x1ad   :  { %v2090_v58 = vpop.f32.mrb[8].mxu0 }
 0x1ae   :  { %v2091_v0 = vadd.f32 %v2090_v58, %v1516_v52  ;;  %v2092_v3 = vpop.f32.mrb[9].mxu0 }
 0x1af   :  { %v2093_v20 = vadd.f32 %v2092_v3, %v1520_v56  ;;  %v2094_v25 = vpop.f32.mrb[10].mxu0 }
 0x1b0   :  { %v2152_v27 = vadd.f32 %v2091_v0, %v1398_v2  ;;  %v2095_v26 = vpop.f32.mrb[11].mxu0 }
 0x1b1   :  { %v2153_v32 = vadd.f32 %v2093_v20, %v1399_v15 }
 0x1b2   :  { %v4861_v2 = vmul.f32 -1.442695, %v2152_v27 }
 0x1b3   :  { %v4862_v15 = vmul.f32 -1.442695, %v2153_v32 }
 0x1b6   :  { %v2049_v61 = vpop.f32.mrb[20].mxu1 }
 0x1b7   :  { %v2050_v19 = vadd.f32 %v2049_v61, %v1508_v10  ;;  %v2051_v38 = vpop.f32.mrb[21].mxu1 }
 0x1b8   :  { %v2052_v43 = vadd.f32 %v2051_v38, %v1512_v16  ;;  %v2053_v46 = vpop.f32.mrb[22].mxu1 }
 0x1b9   :  { %v2138_v44 = vadd.f32 %v2050_v19, %v7054_v28  ;;  %v2054_v14 = vpop.f32.mrb[23].mxu1  ;;  %v1524_v28 = vrot.slane %v1503_v50, %v7096_v41 }
 0x1ba   :  { %v2139_v52 = vadd.f32 %v2052_v43, %v7056_v54  ;;  %v1528_v54 = vrot.slane %v1503_v50, %v7101_v47 }
 0x1bb   :  { %v4859_v58 = vmul.f32 -1.442695, %v2138_v44 }
 0x1bc   :  { %v4860_v56 = vmul.f32 -1.442695, %v2139_v52 }
 0x1bd   :  { %5708 = vpow2.f32 %v4859_v58 }
 0x1be   :  { %5710 = vpow2.f32 %v4860_v56 }
 0x1bf   :  { %5712 = vpow2.f32 %v4861_v2 }
 0x1c0   :  { %5714 = vpow2.f32 %v4862_v15 }
 0x1c7   :  { %v5709_v0 = vpop.eup %5708 }
 0x1c8   :  { %v5711_v3 = vpop.eup %5710  ;;  %v2146_v20 = vadd.f32 1.0, %v5709_v0 }
 0x1c9   :  { %v2147_v25 = vadd.f32 1.0, %v5711_v3  ;;  %v5713_v46 = vpop.eup %5712 }
 0x1ca   :  { %5716 = vrcp.f32 %v2146_v20  ;;  %v5715_v26 = vpop.eup %5714  ;;  %v2160_v14 = vadd.f32 1.0, %v5713_v46 }
 0x1cb   :  { %5718 = vrcp.f32 %v2147_v25  ;;  %v2161_v44 = vadd.f32 1.0, %v5715_v26  ;;  %v5788_v26 = vld [vmem:[%s7955_s2] sm:$0xff] }
 0x1cc   :  { %5720 = vrcp.f32 %v2160_v14  ;;  %v8057_v14 = vld [vmem:[#allocation5_spill] sm:$0xff] }
 0x1cd   :  { %5722 = vrcp.f32 %v2161_v44 }
 0x1d4   :  { %v5717_v32 = vpop.eup %5716 }
 0x1d5   :  { %v5719_v19 = vpop.eup %5718 }
 0x1d6   :  { %v5721_v50 = vpop.eup %5720 }
 0x1d7   :  { %v5723_v15 = vpop.eup %5722  ;;  %v2172_v0 = vsub.f32 1.0, %v5721_v50 }
 0x1d8   :  { %v2173_v20 = vsub.f32 1.0, %v5723_v15  ;;  %v2177_v44 = vmul.f32 %v5723_v15, %v8057_v14  ;;  %v7275_v15 = vld [vmem:[%s7958_s5 + $0x98] ss:$24 sps:$4 sm:$0xff]   ;;  %v7328_v14 = vld [vmem:[%s7958_s5 + $0x124] ss:$24 sps:$4 sm:$0xff]  }
 0x1f6   :  { %v2131_v43 = vpop.f32.mrb[24].mxu1 }
 0x1f7   :  { %v2132_v10 = vadd.f32 %v2131_v43, %v1524_v28  ;;  %v2133_v27 = vpop.f32.mrb[25].mxu1  ;;  %v2176_v28 = vmul.f32 %v5788_v26, %v5721_v50  ;;  %v7268_v50 = vld [vmem:[%s7958_s5 + $0x90] ss:$24 sps:$4 sm:$0xff]   ;;  %v7310_v26 = vld [vmem:[%s7958_s5 + $0xfc] ss:$24 sps:$4 sm:$0xff]  }
 0x1f8   :  { %v2134_v16 = vadd.f32 %v2133_v27, %v1528_v54  ;;  %v2135_v61 = vpop.f32.mrb[26].mxu1 }
 0x1f9   :  { %v2166_v38 = vmul.f32 %v5717_v32, %v2132_v10  ;;  %v2136_v52 = vpop.f32.mrb[27].mxu1  ;;  %v8058_v32 = vld [vmem:[#allocation9_spill] sm:$0xff]  ;;  %v8060_v61 = vld [vmem:[#allocation11_spill] sm:$0xff] }
 0x1fa   :  { %v2167_v58 = vmul.f32 %v5719_v19, %v2134_v16  ;;  %v8059_v16 = vld [vmem:[#allocation10_spill] sm:$0xff]  ;;  %v7232_v19 = vld [vmem:[%s7958_s5 + $0x64] ss:$24 sps:$4 sm:$0xff]   ;;  %v7244_v52 = vld [vmem:[%s7958_s5 + $0x60] ss:$24 sps:$4 sm:$0xff]  }
 0x1fb   :  { %v2168_v56 = vadd.f32 %v2166_v38, %v7107_v23  ;;  %v7238_v38 = vld [vmem:[%s7958_s5 + $0x6c] ss:$24 sps:$4 sm:$0xff]  }
 0x1fc   :  { %v2169_v2 = vadd.f32 %v2167_v58, %v7109_v30  ;;  %8074 = vst [vmem:[#allocation11_spill] sm:$0xff] %v7238_v38  ;;  %v7251_v58 = vld [vmem:[%s7958_s5 + $0x68] ss:$24 sps:$4 sm:$0xff]  }
 0x1fd   :  { %5724 = vtanh.f32 %v2168_v56  ;;  %v7256_v56 = vld [vmem:[%s7958_s5 + $0x94] ss:$24 sps:$4 sm:$0xff]  }
 0x1fe   :  { %5726 = vtanh.f32 %v2169_v2  ;;  %v7262_v2 = vld [vmem:[%s7958_s5 + $0x9c] ss:$24 sps:$4 sm:$0xff]  }
 0x207   :  { %v5725_v3 = vpop.eup %5724 }
 0x208   :  { %v5727_v25 = vpop.eup %5726  ;;  %v2174_v46 = vmul.f32 %v5725_v3, %v2172_v0  ;;  %v7280_v0 = vld [vmem:[%s7958_s5 + $0xc4] ss:$24 sps:$4 sm:$0xff]  }
 0x209   :  { %v2175_v54 = vmul.f32 %v5727_v25, %v2173_v20  ;;  %v7286_v3 = vld [vmem:[%s7958_s5 + $0xcc] ss:$24 sps:$4 sm:$0xff]   ;;  %v7292_v20 = vld [vmem:[%s7958_s5 + $0xc0] ss:$24 sps:$4 sm:$0xff]  }
 0x20a   :  { %v7140_v23 = vadd.f32 %v2176_v28, %v2174_v46  ;;  %v7299_v25 = vld [vmem:[%s7958_s5 + $0xc8] ss:$24 sps:$4 sm:$0xff]   ;;  %v7304_v46 = vld [vmem:[%s7958_s5 + $0xf4] ss:$24 sps:$4 sm:$0xff]  }
 0x20b   :  { %v7142_v30 = vadd.f32 %v2177_v44, %v2175_v54  ;;  %v7316_v28 = vld [vmem:[%s7958_s5 + $0xf0] ss:$24 sps:$4 sm:$0xff]   ;;  %v7334_v44 = vld [vmem:[%s7958_s5 + $0x12c] ss:$24 sps:$4 sm:$0xff]  }
 0x20c   :  { %v2209_v27 = vpack.c.bf16 %v7140_v23, %v7140_v23  ;;  %v7323_v54 = vld [vmem:[%s7958_s5 + $0xf8] ss:$24 sps:$4 sm:$0xff]  }
 0x20d   :  { %v2210_v43 = vpack.c.bf16 %v7142_v30, %v7142_v30  ;;  %v2182_v10 = vcombine.low %v7140_v23, %v7142_v30 }
 0x20f   :  { %2851 = vmatprep.mubr.bf16.mxu0 %v2210_v43  ;;  %2892 = vmatprep.mubr.bf16.mxu1 %v2210_v43  ;;  %2184 = vst [vmem:[%s7961_s8] sm:$0xff] %v2182_v10  ;;  %v7347_v10 = vld [vmem:[%s7958_s5 + $0x128] ss:$24 sps:$4 sm:$0xff]  }
 0x210   :  { %2852 = vmatmul.mubr.bf16.vlgmr.msra.gmra.mrb[12].mxu0 %v2209_v27  ;;  %2893 = vmatmul.mubr.bf16.vlgmr.msra.gmra.mrb[28].mxu1 %v2209_v27 }
 0x211   :  { %2902 = vmatpush1.bf16.msra.mxu0 %v6787_v48  ;;  %2933 = vmatprep.mubr.bf16.mxu0 %v2210_v43  ;;  %v8061_v48 = vld [vmem:[#allocation12_spill] sm:$0xff] }
 0x212   :  { %2903 = vmatprep.subr.bf16.mxu0 %v6794_v49  ;;  %v8062_v49 = vld [vmem:[#allocation13_spill] sm:$0xff]  ;;  %8075 = vst [vmem:[#allocation12_spill] sm:$0xff] %v7251_v58  ;;  %v7340_v43 = vld [vmem:[%s7958_s5 + $0x120] ss:$24 sps:$4 sm:$0xff]  }
 0x213   :  { %8076 = vst [vmem:[#allocation13_spill] sm:$0xff] %v7262_v2 }
 0x215   :  { %2904 = vmatpush1.bf16.msra.mxu0 %v6802_v51  ;;  %v8063_v51 = vld [vmem:[#allocation14_spill] sm:$0xff] }
 0x216   :  { %2905 = vmatprep.subr.bf16.mxu0 %v8058_v32  ;;  %8077 = vst [vmem:[#allocation14_spill] sm:$0xff] %v7275_v15  ;;  %v7358_v32 = vld [vmem:[%s7958_s5 + $0x15c] ss:$24 sps:$4 sm:$0xff]  }
 0x219   :  { %2906 = vmatpush1.bf16.msra.mxu0 %v8059_v16  ;;  %v7364_v16 = vld [vmem:[%s7958_s5 + $0x150] ss:$24 sps:$4 sm:$0xff]  }
 0x21a   :  { %2907 = vmatprep.subr.bf16.mxu0 %v8060_v61  ;;  %v7371_v61 = vld [vmem:[%s7958_s5 + $0x158] ss:$24 sps:$4 sm:$0xff]  }
 0x21b   :  { %8085 = vst [vmem:[#allocation35_spill] sm:$0xff] %v7371_v61 }
 0x21d   :  { %2908 = vmatpush1.bf16.msra.mxu0 %v6831_v57  ;;  %v8065_v57 = vld [vmem:[#allocation16_spill] sm:$0xff] }
 0x21e   :  { %2909 = vmatprep.subr.bf16.mxu0 %v6837_v59  ;;  %v8066_v59 = vld [vmem:[#allocation17_spill] sm:$0xff]  ;;  %8079 = vst [vmem:[#allocation16_spill] sm:$0xff] %v7299_v25 }
 0x21f   :  { %8080 = vst [vmem:[#allocation17_spill] sm:$0xff] %v7310_v26 }
 0x221   :  { %2910 = vmatpush1.bf16.msra.mxu0 %v6849_v45  ;;  %v8064_v45 = vld [vmem:[#allocation15_spill] sm:$0xff] }
 0x222   :  { %2911 = vmatprep.subr.bf16.mxu0 %v6855_v1  ;;  %v8067_v1 = vld [vmem:[#allocation18_spill] sm:$0xff]  ;;  %8078 = vst [vmem:[#allocation15_spill] sm:$0xff] %v7286_v3 }
 0x223   :  { %8081 = vst [vmem:[#allocation18_spill] sm:$0xff] %v7323_v54 }
 0x225   :  { %2912 = vmatpush1.bf16.msra.mxu0 %v6863_v4  ;;  %v8068_v4 = vld [vmem:[#allocation19_spill] sm:$0xff] }
 0x226   :  { %2913 = vmatprep.subr.bf16.mxu0 %v6869_v55  ;;  %v8069_v55 = vld [vmem:[#allocation21_spill] sm:$0xff]  ;;  %8082 = vst [vmem:[#allocation19_spill] sm:$0xff] %v7334_v44 }
 0x227   :  { %8083 = vst [vmem:[#allocation21_spill] sm:$0xff] %v7347_v10 }
 0x229   :  { %2914 = vmatpush1.bf16.msra.mxu0 %v6877_v6  ;;  %v8070_v6 = vld [vmem:[#allocation23_spill] sm:$0xff] }
 0x22a   :  { %2915 = vmatprep.subr.bf16.mxu0 %v6883_v8  ;;  %v7187_v8 = vld [vmem:[%s7958_s5] ss:$24 sps:$4 sm:$0xff]   ;;  %8084 = vst [vmem:[#allocation23_spill] sm:$0xff] %v7358_v32 }
 0x22d   :  { %2916 = vmatpush1.bf16.msra.mxu0 %v6891_v11  ;;  %v7192_v11 = vld [vmem:[%s7958_s5 + $0x4] ss:$24 sps:$4 sm:$0xff]  }
 0x22e   :  { %2917 = vmatprep.subr.bf16.mxu0 %v6897_v13  ;;  %v7197_v13 = vld [vmem:[%s7958_s5 + $0x8] ss:$24 sps:$4 sm:$0xff]   ;;  %3606 = vmatprep.subr.bf16.mxu1 %v7192_v11 }
 0x22f   :  { %8071 = vst [vmem:[#allocation5_spill] sm:$0xff] %v7197_v13  ;;  %3607 = vmatpush1.bf16.msra.mxu1 %v7187_v8 }
 0x231   :  { %2918 = vmatpush1.bf16.msra.mxu0 %v8061_v48  ;;  %v7376_v48 = vld [vmem:[%s7958_s5 + $0x184] ss:$24 sps:$4 sm:$0xff]  }
 0x232   :  { %2919 = vmatprep.subr.bf16.mxu0 %v8062_v49  ;;  %v7382_v49 = vld [vmem:[%s7958_s5 + $0x18c] ss:$24 sps:$4 sm:$0xff]  }
 0x233   :  { %8086 = vst [vmem:[#allocation36_spill] sm:$0xff] %v7382_v49 }
 0x235   :  { %2920 = vmatpush1.bf16.msra.mxu0 %v8063_v51  ;;  %v7388_v51 = vld [vmem:[%s7958_s5 + $0x180] ss:$24 sps:$4 sm:$0xff]  }
 0x236   :  { %2921 = vmatprep.subr.bf16.mxu0 %v8064_v45  ;;  %v7395_v45 = vld [vmem:[%s7958_s5 + $0x188] ss:$24 sps:$4 sm:$0xff]  }
 0x237   :  { %8087 = vst [vmem:[#allocation37_spill] sm:$0xff] %v7395_v45 }
 0x239   :  { %2922 = vmatpush1.bf16.msra.mxu0 %v8065_v57  ;;  %v7400_v57 = vld [vmem:[%s7958_s5 + $0x1b4] ss:$24 sps:$4 sm:$0xff]  }
 0x23a   :  { %2923 = vmatprep.subr.bf16.mxu0 %v8066_v59  ;;  %v7406_v59 = vld [vmem:[%s7958_s5 + $0x1bc] ss:$24 sps:$4 sm:$0xff]  }
 0x23b   :  { %8088 = vst [vmem:[#allocation38_spill] sm:$0xff] %v7406_v59 }
 0x23d   :  { %2924 = vmatpush1.bf16.msra.mxu0 %v8067_v1  ;;  %v7412_v1 = vld [vmem:[%s7958_s5 + $0x1b0] ss:$24 sps:$4 sm:$0xff]  }
 0x23e   :  { %2925 = vmatprep.subr.bf16.mxu0 %v8068_v4  ;;  %v7419_v4 = vld [vmem:[%s7958_s5 + $0x1b8] ss:$24 sps:$4 sm:$0xff]  }
 0x23f   :  { %8089 = vst [vmem:[#allocation39_spill] sm:$0xff] %v7419_v4 }
 0x241   :  { %2926 = vmatpush1.bf16.msra.mxu0 %v8069_v55  ;;  %v7427_v55 = vld [vmem:[%s7958_s5 + $0x1e4] ss:$24 sps:$4 sm:$0xff]  }
 0x242   :  { %2927 = vmatprep.subr.bf16.mxu0 %v8070_v6  ;;  %v7432_v6 = vld [vmem:[%s7958_s5 + $0x1e0] ss:$24 sps:$4 sm:$0xff]  }
 0x245   :  { %2928 = vmatpush1.bf16.msra.mxu0 %v6992_v21  ;;  %v7207_v21 = vld [vmem:[%s7958_s5 + $0x34] ss:$24 sps:$4 sm:$0xff]  }
 0x246   :  { %2929 = vmatprep.subr.bf16.mxu0 %v6998_v42  ;;  %v7213_v42 = vld [vmem:[%s7958_s5 + $0x3c] ss:$24 sps:$4 sm:$0xff]   ;;  %3608 = vmatprep.subr.bf16.mxu1 %v7207_v21 }
 0x247   :  { %8072 = vst [vmem:[#allocation9_spill] sm:$0xff] %v7213_v42 }
 0x249   :  { %2930 = vmatpush1.bf16.msra.mxu0 %v7006_v17  ;;  %v7202_v17 = vld [vmem:[%s7958_s5 + $0xc] ss:$24 sps:$4 sm:$0xff]  }
 0x24a   :  { %2931 = vmatprep.subr.bf16.mxu0 %v7013_v36  ;;  %v7220_v36 = vld [vmem:[%s7958_s5 + $0x30] ss:$24 sps:$4 sm:$0xff]  }
 0x24b   :  { %3609 = vmatpush1.bf16.msra.mxu1 %v7220_v36 }
 0x24c   :  { %3610 = vmatprep.subr.bf16.mxu1 %v7232_v19 }
 0x24d   :  { %2932 = vmatpush1.bf16.msra.mxu0 %v7022_v53  ;;  %v7227_v53 = vld [vmem:[%s7958_s5 + $0x38] ss:$24 sps:$4 sm:$0xff]  }
 0x24e   :  { %3647 = vmatprep.subr.bf16.mxu0 %v7202_v17  ;;  %8073 = vst [vmem:[#allocation10_spill] sm:$0xff] %v7227_v53 }
 0x24f   :  { %3611 = vmatpush1.bf16.msra.mxu1 %v7244_v52 }
 0x250   :  { %2934 = vmatmul.mubr.bf16.vlgmr.msra.gmra.mrb[16].mxu0 %v2209_v27  ;;  %3612 = vmatprep.subr.bf16.mxu1 %v7256_v56  ;;  %v7352_v27 = vld [vmem:[%s7958_s5 + $0x154] ss:$24 sps:$4 sm:$0xff]  }
 0x251   :  { %3648 = vmatpush1.bf16.msra.mxu0 %v7197_v13 }
 0x252   :  { %3649 = vmatprep.subr.bf16.mxu0 %v7213_v42 }
 0x253   :  { %3613 = vmatpush1.bf16.msra.mxu1 %v7268_v50 }
 0x254   :  { %3614 = vmatprep.subr.bf16.mxu1 %v7280_v0 }
 0x255   :  { %3650 = vmatpush1.bf16.msra.mxu0 %v7227_v53 }
 0x256   :  { %3651 = vmatprep.subr.bf16.mxu0 %v7238_v38 }
 0x257   :  { %3615 = vmatpush1.bf16.msra.mxu1 %v7292_v20 }
 0x258   :  { %3616 = vmatprep.subr.bf16.mxu1 %v7304_v46 }
 0x259   :  { %3652 = vmatpush1.bf16.msra.mxu0 %v7251_v58 }
 0x25a   :  { %3653 = vmatprep.subr.bf16.mxu0 %v7262_v2 }
 0x25b   :  { %3617 = vmatpush1.bf16.msra.mxu1 %v7316_v28 }
 0x25c   :  { %3618 = vmatprep.subr.bf16.mxu1 %v7328_v14 }
 0x25d   :  { %3654 = vmatpush1.bf16.msra.mxu0 %v7275_v15 }
 0x25e   :  { %3655 = vmatprep.subr.bf16.mxu0 %v7286_v3 }
 0x25f   :  { %3619 = vmatpush1.bf16.msra.mxu1 %v7340_v43 }
 0x260   :  { %3620 = vmatprep.subr.bf16.mxu1 %v7352_v27 }
 0x261   :  { %3656 = vmatpush1.bf16.msra.mxu0 %v7299_v25 }
 0x262   :  { %3657 = vmatprep.subr.bf16.mxu0 %v7310_v26 }
 0x263   :  { %3621 = vmatpush1.bf16.msra.mxu1 %v7364_v16 }
 0x264   :  { %3622 = vmatprep.subr.bf16.mxu1 %v7376_v48 }
 0x265   :  { %3658 = vmatpush1.bf16.msra.mxu0 %v7323_v54 }
 0x266   :  { %3659 = vmatprep.subr.bf16.mxu0 %v7334_v44 }
 0x267   :  { %3623 = vmatpush1.bf16.msra.mxu1 %v7388_v51 }
 0x268   :  { %3624 = vmatprep.subr.bf16.mxu1 %v7400_v57 }
 0x269   :  { %3660 = vmatpush1.bf16.msra.mxu0 %v7347_v10 }
 0x26a   :  { %3661 = vmatprep.subr.bf16.mxu0 %v7358_v32  ;;  %v7571_v32 = vld [vmem:[%s7958_s5 + $0x14] ss:$24 sps:$4 sm:$0xff]  }
 0x26b   :  { %3625 = vmatpush1.bf16.msra.mxu1 %v7412_v1  ;;  %8103 = vst [vmem:[#allocation53_spill] sm:$0xff] %v7571_v32 }
 0x26c   :  { %3626 = vmatprep.subr.bf16.mxu1 %v7427_v55 }
 0x26d   :  { %3662 = vmatpush1.bf16.msra.mxu0 %v7371_v61  ;;  %v7550_v61 = vld [vmem:[%s7958_s5 + $0x2dc] ss:$24 sps:$4 sm:$0xff]  }
 0x26e   :  { %3663 = vmatprep.subr.bf16.mxu0 %v7382_v49  ;;  %v7544_v49 = vld [vmem:[%s7958_s5 + $0x2d4] ss:$24 sps:$4 sm:$0xff]   ;;  %8100 = vst [vmem:[#allocation50_spill] sm:$0xff] %v7550_v61 }
 0x26f   :  { %3627 = vmatpush1.bf16.msra.mxu1 %v7432_v6 }
 0x270   :  { %3628 = vmatprep.subr.bf16.mxu1 %v7451_v29 }
 0x271   :  { %3664 = vmatpush1.bf16.msra.mxu0 %v7395_v45  ;;  %v7520_v45 = vld [vmem:[%s7958_s5 + $0x2a4] ss:$24 sps:$4 sm:$0xff]  }
 0x272   :  { %3665 = vmatprep.subr.bf16.mxu0 %v7406_v59  ;;  %v7515_v59 = vld [vmem:[%s7958_s5 + $0x278] ss:$24 sps:$4 sm:$0xff]  }
 0x273   :  { %3629 = vmatpush1.bf16.msra.mxu1 %v7456_v37  ;;  %8097 = vst [vmem:[#allocation47_spill] sm:$0xff] %v7515_v59 }
 0x274   :  { %3630 = vmatprep.subr.bf16.mxu1 %v7480_v62 }
 0x275   :  { %3666 = vmatpush1.bf16.msra.mxu0 %v7419_v4  ;;  %v7508_v4 = vld [vmem:[%s7958_s5 + $0x270] ss:$24 sps:$4 sm:$0xff]  }
 0x276   :  { %3667 = vmatprep.subr.bf16.mxu0 %v7437_v40  ;;  %v7501_v40 = vld [vmem:[%s7958_s5 + $0x27c] ss:$24 sps:$4 sm:$0xff]  }
 0x277   :  { %8096 = vst [vmem:[#allocation46_spill] sm:$0xff] %v7501_v40  ;;  %3631 = vmatpush1.bf16.msra.mxu1 %v7475_v35 }
 0x279   :  { %3668 = vmatpush1.bf16.msra.mxu0 %v7443_v12  ;;  %v7485_v12 = vld [vmem:[%s7958_s5 + $0x248] ss:$24 sps:$4 sm:$0xff]  }
 0x27a   :  { %3669 = vmatprep.subr.bf16.mxu0 %v7461_v24  ;;  %8094 = vst [vmem:[#allocation44_spill] sm:$0xff] %v7485_v12  ;;  %v7490_v24 = vld [vmem:[%s7958_s5 + $0x24c] ss:$24 sps:$4 sm:$0xff]  }
 0x27b   :  { %8095 = vst [vmem:[#allocation45_spill] sm:$0xff] %v7490_v24 }
 0x27d   :  { %3670 = vmatpush1.bf16.msra.mxu0 %v7467_v7  ;;  %v7495_v7 = vld [vmem:[%s7958_s5 + $0x274] ss:$24 sps:$4 sm:$0xff]  }
 0x27e   :  { %3671 = vmatprep.subr.bf16.mxu0 %v7490_v24  ;;  %3632 = vmatprep.subr.bf16.mxu1 %v7495_v7  ;;  %v7526_v24 = vld [vmem:[%s7958_s5 + $0x2ac] ss:$24 sps:$4 sm:$0xff]  }
 0x27f   :  { %8098 = vst [vmem:[#allocation48_spill] sm:$0xff] %v7526_v24  ;;  %3633 = vmatpush1.bf16.msra.mxu1 %v7508_v4 }
 0x280   :  { %3634 = vmatprep.subr.bf16.mxu1 %v7520_v45 }
 0x281   :  { %3672 = vmatpush1.bf16.msra.mxu0 %v7485_v12  ;;  %v7532_v12 = vld [vmem:[%s7958_s5 + $0x2a0] ss:$24 sps:$4 sm:$0xff]  }
 0x282   :  { %3673 = vmatprep.subr.bf16.mxu0 %v7501_v40  ;;  %v7539_v40 = vld [vmem:[%s7958_s5 + $0x2a8] ss:$24 sps:$4 sm:$0xff]  }
 0x283   :  { %8099 = vst [vmem:[#allocation49_spill] sm:$0xff] %v7539_v40  ;;  %3635 = vmatpush1.bf16.msra.mxu1 %v7532_v12 }
 0x284   :  { %3636 = vmatprep.subr.bf16.mxu1 %v7544_v49 }
 0x285   :  { %3674 = vmatpush1.bf16.msra.mxu0 %v7515_v59  ;;  %v7556_v59 = vld [vmem:[%s7958_s5 + $0x2d0] ss:$24 sps:$4 sm:$0xff]  }
 0x286   :  { %3675 = vmatprep.subr.bf16.mxu0 %v7526_v24  ;;  %8101 = vst [vmem:[#allocation51_spill] sm:$0xff] %v7556_v59  ;;  %v7563_v24 = vld [vmem:[%s7958_s5 + $0x2d8] ss:$24 sps:$4 sm:$0xff]  }
 0x287   :  { %8102 = vst [vmem:[#allocation52_spill] sm:$0xff] %v7563_v24  ;;  %3637 = vmatpush1.bf16.msra.mxu1 %v7556_v59 }
 0x288   :  { %3688 = vmatprep.subr.bf16.mxu1 %v7571_v32 }
 0x289   :  { %3676 = vmatpush1.bf16.msra.mxu0 %v7539_v40  ;;  %v2307_v40 = vld [vmem:[%s7960_s7] sm:$0x3f] }
 0x28a   :  { %3677 = vmatprep.subr.bf16.mxu0 %v7550_v61  ;;  %v2312_v10 = vrot.slane %v2307_v40, %v6960_v31  ;;  %v2320_v61 = vrot.slane %v2307_v40, %v7074_v18  ;;  %v2316_v44 = vrot.slane %v2307_v40, %v6974_v63 }
 0x28d   :  { %3678 = vmatpush1.bf16.msra.mxu0 %v7563_v24  ;;  %v2324_v24 = vrot.slane %v2307_v40, %v7078_v22 }
 0x28e   :  { %4411 = vmatprep.subr.bf16.mxu0 %v7192_v11 }
 0x2e3   :  { %v2853_v54 = vpop.f32.mrb[12].mxu0  ;;  %v2894_v26 = vpop.f32.mrb[28].mxu1 }
 0x2e4   :  { %v2854_v25 = vadd.f32 %v2853_v54, %v2312_v10  ;;  %v2895_v3 = vadd.f32 %v2894_v26, %v2320_v61  ;;  %v2855_v15 = vpop.f32.mrb[13].mxu0  ;;  %v2896_v11 = vpop.f32.mrb[29].mxu1 }
 0x2e5   :  { %v2856_v2 = vadd.f32 %v2855_v15, %v2316_v44  ;;  %v2897_v58 = vadd.f32 %v2896_v11, %v2324_v24  ;;  %v2857_v38 = vpop.f32.mrb[14].mxu0  ;;  %v2898_v53 = vpop.f32.mrb[30].mxu1 }
 0x2e6   :  { %v2942_v42 = vadd.f32 %v2854_v25, %v7059_v60  ;;  %v2956_v31 = vadd.f32 %v2895_v3, %v7085_v33  ;;  %v2858_v13 = vpop.f32.mrb[15].mxu0  ;;  %v2899_v18 = vpop.f32.mrb[31].mxu1 }
 0x2e7   :  { %v2943_v63 = vadd.f32 %v2856_v2, %v7064_v5  ;;  %v2957_v22 = vadd.f32 %v2897_v58, %v7089_v39  ;;  %v2328_v5 = vrot.slane %v2307_v40, %v7096_v41  ;;  %v2332_v39 = vrot.slane %v2307_v40, %v7101_v47 }
 0x2e8   :  { %v4959_v32 = vmul.f32 -1.442695, %v2942_v42  ;;  %v4961_v26 = vmul.f32 -1.442695, %v2956_v31 }
 0x2e9   :  { %v4960_v59 = vmul.f32 -1.442695, %v2943_v63  ;;  %v4962_v54 = vmul.f32 -1.442695, %v2957_v22 }
 0x2ea   :  { %5728 = vpow2.f32 %v4959_v32 }
 0x2eb   :  { %5730 = vpow2.f32 %v4960_v59 }
 0x2ec   :  { %5732 = vpow2.f32 %v4961_v26 }
 0x2ed   :  { %5734 = vpow2.f32 %v4962_v54 }
 0x2f4   :  { %v5729_v15 = vpop.eup %5728 }
 0x2f5   :  { %v5731_v24 = vpop.eup %5730  ;;  %v2950_v53 = vadd.f32 1.0, %v5729_v15 }
 0x2f6   :  { %v2951_v60 = vadd.f32 1.0, %v5731_v24  ;;  %v5733_v33 = vpop.eup %5732 }
 0x2f7   :  { %5736 = vrcp.f32 %v2950_v53  ;;  %v5735_v18 = vpop.eup %5734  ;;  %v2964_v13 = vadd.f32 1.0, %v5733_v33 }
 0x2f8   :  { %5738 = vrcp.f32 %v2951_v60  ;;  %v2965_v63 = vadd.f32 1.0, %v5735_v18 }
 0x2f9   :  { %5740 = vrcp.f32 %v2964_v13  ;;  %v7623_v13 = vld [vmem:[%s7958_s5 + $0x40] ss:$24 sps:$4 sm:$0xff]  }
 0x2fa   :  { %5742 = vrcp.f32 %v2965_v63  ;;  %v7629_v63 = vld [vmem:[%s7958_s5 + $0x74] ss:$24 sps:$4 sm:$0xff]  }
 0x301   :  { %v5737_v22 = vpop.eup %5736 }
 0x302   :  { %v5739_v3 = vpop.eup %5738 }
 0x303   :  { %v5741_v40 = vpop.eup %5740 }
 0x304   :  { %v5743_v59 = vpop.eup %5742  ;;  %v2976_v11 = vsub.f32 1.0, %v5741_v40  ;;  %v2980_v53 = vmul.f32 %v5741_v40, %v7140_v23  ;;  %v8120_v40 = vld [vmem:[#allocation35_spill] sm:$0xff] }
 0x305   :  { %v2977_v54 = vsub.f32 1.0, %v5743_v59  ;;  %v2981_v33 = vmul.f32 %v5743_v59, %v7142_v30  ;;  %v7612_v30 = vld [vmem:[%s7958_s5 + $0x44] ss:$24 sps:$4 sm:$0xff]  }
 0x306   :  { %v8121_v59 = vld [vmem:[#allocation36_spill] sm:$0xff] }
 0x323   :  { %v2935_v42 = vpop.f32.mrb[16].mxu0 }
 0x324   :  { %v2936_v38 = vadd.f32 %v2935_v42, %v2328_v5  ;;  %v2937_v31 = vpop.f32.mrb[17].mxu0  ;;  %v7637_v42 = vld [vmem:[%s7958_s5 + $0x70] ss:$24 sps:$4 sm:$0xff]  }
 0x325   :  { %v2938_v58 = vadd.f32 %v2937_v31, %v2332_v39  ;;  %v2939_v2 = vpop.f32.mrb[18].mxu0  ;;  %v8107_v31 = vld [vmem:[#allocation9_spill] sm:$0xff] }
 0x326   :  { %v2970_v25 = vmul.f32 %v5737_v22, %v2936_v38  ;;  %v2940_v44 = vpop.f32.mrb[19].mxu0  ;;  %v7643_v38 = vld [vmem:[%s7958_s5 + $0xa4] ss:$24 sps:$4 sm:$0xff]   ;;  %v8108_v22 = vld [vmem:[#allocation10_spill] sm:$0xff] }
 0x327   :  { %v2971_v10 = vmul.f32 %v5739_v3, %v2938_v58  ;;  %v8109_v58 = vld [vmem:[#allocation11_spill] sm:$0xff]  ;;  %v8112_v2 = vld [vmem:[#allocation14_spill] sm:$0xff]  ;;  %v8114_v3 = vld [vmem:[#allocation16_spill] sm:$0xff] }
 0x328   :  { %v2972_v32 = vadd.f32 %v2970_v25, %v7111_v34  ;;  %v8115_v25 = vld [vmem:[#allocation17_spill] sm:$0xff]  ;;  %v8116_v44 = vld [vmem:[#allocation18_spill] sm:$0xff] }
 0x329   :  { %v2973_v61 = vadd.f32 %v2971_v10, %v7115_v9  ;;  %v7601_v9 = vld [vmem:[%s7958_s5 + $0x10] ss:$24 sps:$4 sm:$0xff]   ;;  %v8117_v10 = vld [vmem:[#allocation19_spill] sm:$0xff] }
 0x32a   :  { %5744 = vtanh.f32 %v2972_v32  ;;  %v8118_v32 = vld [vmem:[#allocation21_spill] sm:$0xff] }
 0x32b   :  { %5746 = vtanh.f32 %v2973_v61  ;;  %v8119_v61 = vld [vmem:[#allocation23_spill] sm:$0xff] }
 0x334   :  { %v5745_v26 = vpop.eup %5744 }
 0x335   :  { %v5747_v15 = vpop.eup %5746  ;;  %v2978_v24 = vmul.f32 %v5745_v26, %v2976_v11  ;;  %v8122_v11 = vld [vmem:[#allocation37_spill] sm:$0xff]  ;;  %v8123_v26 = vld [vmem:[#allocation38_spill] sm:$0xff] }
 0x336   :  { %v2979_v60 = vmul.f32 %v5747_v15, %v2977_v54  ;;  %v8124_v54 = vld [vmem:[#allocation39_spill] sm:$0xff]  ;;  %v8125_v15 = vld [vmem:[#allocation40_spill] sm:$0xff] }
 0x337   :  { %v7592_v18 = vadd.f32 %v2980_v53, %v2978_v24  ;;  %v8126_v24 = vld [vmem:[#allocation41_spill] sm:$0xff]  ;;  %v8127_v53 = vld [vmem:[#allocation42_spill] sm:$0xff] }
 0x338   :  { %v7594_v5 = vadd.f32 %v2981_v33, %v2979_v60  ;;  %v8128_v60 = vld [vmem:[#allocation43_spill] sm:$0xff]  ;;  %v8129_v33 = vld [vmem:[#allocation45_spill] sm:$0xff] }
 0x339   :  { %v7607_v23 = vpack.c.bf16 %v7592_v18, %v7592_v18 }
 0x33a   :  { %v2997_v34 = vpack.c.bf16 %v7594_v5, %v7594_v5  ;;  %v2986_v39 = vcombine.low %v7592_v18, %v7594_v5 }
 0x33c   :  { %3638 = vmatprep.mubr.bf16.mxu1 %v2997_v34  ;;  %3679 = vmatprep.mubr.bf16.mxu0 %v2997_v34  ;;  %4963 = vst [vmem:[%s7961_s8 + $0x8] sm:$0xff] %v2986_v39  ;;  %v8131_v39 = vld [vmem:[#allocation46_spill] sm:$0xff] }
 0x33d   :  { %3639 = vmatmul.mubr.bf16.vlgmr.msra.gmra.mrb[32].mxu1 %v7607_v23  ;;  %3680 = vmatmul.mubr.bf16.vlgmr.msra.gmra.mrb[20].mxu0 %v7607_v23 }
 0x33e   :  { %3689 = vmatpush1.bf16.msra.mxu1 %v7601_v9  ;;  %3720 = vmatprep.mubr.bf16.mxu1 %v2997_v34  ;;  %v8130_v34 = vld [vmem:[#allocation44_spill] sm:$0xff] }
 0x33f   :  { %3690 = vmatprep.subr.bf16.mxu1 %v7612_v30  ;;  %4412 = vmatpush1.bf16.msra.mxu0 %v7187_v8  ;;  %v7651_v8 = vld [vmem:[%s7958_s5 + $0xa0] ss:$24 sps:$4 sm:$0xff]  }
 0x340   :  { %4413 = vmatprep.subr.bf16.mxu0 %v7207_v21  ;;  %v7657_v21 = vld [vmem:[%s7958_s5 + $0xd4] ss:$24 sps:$4 sm:$0xff]  }
 0x342   :  { %3691 = vmatpush1.bf16.msra.mxu1 %v7623_v13 }
 0x343   :  { %3692 = vmatprep.subr.bf16.mxu1 %v7629_v63  ;;  %4414 = vmatpush1.bf16.msra.mxu0 %v7220_v36  ;;  %v7665_v36 = vld [vmem:[%s7958_s5 + $0xd0] ss:$24 sps:$4 sm:$0xff]  }
 0x344   :  { %4415 = vmatprep.subr.bf16.mxu0 %v7232_v19  ;;  %v7671_v19 = vld [vmem:[%s7958_s5 + $0x104] ss:$24 sps:$4 sm:$0xff]  }
 0x346   :  { %3693 = vmatpush1.bf16.msra.mxu1 %v7637_v42 }
 0x347   :  { %3694 = vmatprep.subr.bf16.mxu1 %v7643_v38  ;;  %4416 = vmatpush1.bf16.msra.mxu0 %v7244_v52  ;;  %v7679_v52 = vld [vmem:[%s7958_s5 + $0x100] ss:$24 sps:$4 sm:$0xff]  }
 0x348   :  { %4417 = vmatprep.subr.bf16.mxu0 %v7256_v56  ;;  %v7685_v56 = vld [vmem:[%s7958_s5 + $0x134] ss:$24 sps:$4 sm:$0xff]  }
 0x34a   :  { %3695 = vmatpush1.bf16.msra.mxu1 %v7651_v8 }
 0x34b   :  { %3696 = vmatprep.subr.bf16.mxu1 %v7657_v21  ;;  %4418 = vmatpush1.bf16.msra.mxu0 %v7268_v50  ;;  %v7693_v50 = vld [vmem:[%s7958_s5 + $0x130] ss:$24 sps:$4 sm:$0xff]  }
 0x34c   :  { %4419 = vmatprep.subr.bf16.mxu0 %v7280_v0  ;;  %v7699_v0 = vld [vmem:[%s7958_s5 + $0x164] ss:$24 sps:$4 sm:$0xff]  }
 0x34e   :  { %3697 = vmatpush1.bf16.msra.mxu1 %v7665_v36 }
 0x34f   :  { %3698 = vmatprep.subr.bf16.mxu1 %v7671_v19  ;;  %4420 = vmatpush1.bf16.msra.mxu0 %v7292_v20  ;;  %v7707_v20 = vld [vmem:[%s7958_s5 + $0x160] ss:$24 sps:$4 sm:$0xff]  }
 0x350   :  { %4421 = vmatprep.subr.bf16.mxu0 %v7304_v46  ;;  %v7713_v46 = vld [vmem:[%s7958_s5 + $0x194] ss:$24 sps:$4 sm:$0xff]  }
 0x352   :  { %3699 = vmatpush1.bf16.msra.mxu1 %v7679_v52 }
 0x353   :  { %3700 = vmatprep.subr.bf16.mxu1 %v7685_v56  ;;  %4422 = vmatpush1.bf16.msra.mxu0 %v7316_v28  ;;  %v7721_v28 = vld [vmem:[%s7958_s5 + $0x190] ss:$24 sps:$4 sm:$0xff]  }
 0x354   :  { %4423 = vmatprep.subr.bf16.mxu0 %v7328_v14  ;;  %v7727_v14 = vld [vmem:[%s7958_s5 + $0x1c4] ss:$24 sps:$4 sm:$0xff]  }
 0x356   :  { %3701 = vmatpush1.bf16.msra.mxu1 %v7693_v50 }
 0x357   :  { %3702 = vmatprep.subr.bf16.mxu1 %v7699_v0  ;;  %4424 = vmatpush1.bf16.msra.mxu0 %v7340_v43  ;;  %v7735_v43 = vld [vmem:[%s7958_s5 + $0x1c0] ss:$24 sps:$4 sm:$0xff]  }
 0x358   :  { %4425 = vmatprep.subr.bf16.mxu0 %v7352_v27  ;;  %v7741_v27 = vld [vmem:[%s7958_s5 + $0x1f4] ss:$24 sps:$4 sm:$0xff]  }
 0x35a   :  { %3703 = vmatpush1.bf16.msra.mxu1 %v7707_v20 }
 0x35b   :  { %3704 = vmatprep.subr.bf16.mxu1 %v7713_v46  ;;  %4426 = vmatpush1.bf16.msra.mxu0 %v7364_v16  ;;  %v7749_v16 = vld [vmem:[%s7958_s5 + $0x1f0] ss:$24 sps:$4 sm:$0xff]  }
 0x35c   :  { %4427 = vmatprep.subr.bf16.mxu0 %v7376_v48  ;;  %v7755_v48 = vld [vmem:[%s7958_s5 + $0x224] ss:$24 sps:$4 sm:$0xff]  }
 0x35e   :  { %3705 = vmatpush1.bf16.msra.mxu1 %v7721_v28 }
 0x35f   :  { %3706 = vmatprep.subr.bf16.mxu1 %v7727_v14  ;;  %4428 = vmatpush1.bf16.msra.mxu0 %v7388_v51  ;;  %v7763_v51 = vld [vmem:[%s7958_s5 + $0x220] ss:$24 sps:$4 sm:$0xff]  }
 0x360   :  { %4429 = vmatprep.subr.bf16.mxu0 %v7400_v57  ;;  %v7769_v57 = vld [vmem:[%s7958_s5 + $0x254] ss:$24 sps:$4 sm:$0xff]  }
 0x362   :  { %3707 = vmatpush1.bf16.msra.mxu1 %v7735_v43 }
 0x363   :  { %3708 = vmatprep.subr.bf16.mxu1 %v7741_v27  ;;  %4430 = vmatpush1.bf16.msra.mxu0 %v7412_v1  ;;  %v7777_v1 = vld [vmem:[%s7958_s5 + $0x250] ss:$24 sps:$4 sm:$0xff]  }
 0x364   :  { %4431 = vmatprep.subr.bf16.mxu0 %v7427_v55  ;;  %v7783_v55 = vld [vmem:[%s7958_s5 + $0x284] ss:$24 sps:$4 sm:$0xff]  }
 0x366   :  { %3709 = vmatpush1.bf16.msra.mxu1 %v7749_v16 }
 0x367   :  { %3710 = vmatprep.subr.bf16.mxu1 %v7755_v48  ;;  %4432 = vmatpush1.bf16.msra.mxu0 %v7432_v6  ;;  %v7797_v6 = vld [vmem:[%s7958_s5 + $0x2b4] ss:$24 sps:$4 sm:$0xff]  }
 0x368   :  { %4433 = vmatprep.subr.bf16.mxu0 %v7451_v29  ;;  %v7791_v29 = vld [vmem:[%s7958_s5 + $0x280] ss:$24 sps:$4 sm:$0xff]  }
 0x36a   :  { %3711 = vmatpush1.bf16.msra.mxu1 %v7763_v51 }
 0x36b   :  { %3712 = vmatprep.subr.bf16.mxu1 %v7769_v57  ;;  %4434 = vmatpush1.bf16.msra.mxu0 %v7456_v37  ;;  %v7811_v37 = vld [vmem:[%s7958_s5 + $0x2e4] ss:$24 sps:$4 sm:$0xff]  }
 0x36c   :  { %4435 = vmatprep.subr.bf16.mxu0 %v7480_v62  ;;  %v7805_v62 = vld [vmem:[%s7958_s5 + $0x2b0] ss:$24 sps:$4 sm:$0xff]  }
 0x36e   :  { %3713 = vmatpush1.bf16.msra.mxu1 %v7777_v1 }
 0x36f   :  { %3714 = vmatprep.subr.bf16.mxu1 %v7783_v55  ;;  %4436 = vmatpush1.bf16.msra.mxu0 %v7475_v35  ;;  %v8104_v35 = vld [vmem:[#allocation51_spill] sm:$0xff] }
 0x370   :  { %4437 = vmatprep.subr.bf16.mxu0 %v7495_v7  ;;  %v7819_v7 = vld [vmem:[%s7958_s5 + $0x2e0] ss:$24 sps:$4 sm:$0xff]  }
 0x372   :  { %3715 = vmatpush1.bf16.msra.mxu1 %v7791_v29 }
 0x373   :  { %3716 = vmatprep.subr.bf16.mxu1 %v7797_v6  ;;  %4438 = vmatpush1.bf16.msra.mxu0 %v7508_v4  ;;  %v8106_v4 = vld [vmem:[#allocation5_spill] sm:$0xff] }
 0x374   :  { %4439 = vmatprep.subr.bf16.mxu0 %v7520_v45  ;;  %v8105_v45 = vld [vmem:[#allocation53_spill] sm:$0xff] }
 0x376   :  { %3717 = vmatpush1.bf16.msra.mxu1 %v7805_v62 }
 0x377   :  { %3718 = vmatprep.subr.bf16.mxu1 %v7811_v37  ;;  %4440 = vmatpush1.bf16.msra.mxu0 %v7532_v12  ;;  %v8110_v12 = vld [vmem:[#allocation12_spill] sm:$0xff] }
 0x378   :  { %4441 = vmatprep.subr.bf16.mxu0 %v7544_v49  ;;  %v8111_v49 = vld [vmem:[#allocation13_spill] sm:$0xff] }
 0x37a   :  { %3719 = vmatpush1.bf16.msra.mxu1 %v7819_v7 }
 0x37b   :  { %4452 = vmatprep.subr.bf16.mxu1 %v7202_v17  ;;  %4442 = vmatpush1.bf16.msra.mxu0 %v8104_v35  ;;  %v8113_v17 = vld [vmem:[#allocation15_spill] sm:$0xff]  ;;  %v8133_v35 = vld [vmem:[#allocation48_spill] sm:$0xff] }
 0x37c   :  { %4493 = vmatprep.subr.bf16.mxu0 %v8105_v45  ;;  %v8134_v45 = vld [vmem:[#allocation49_spill] sm:$0xff] }
 0x37d   :  { %3721 = vmatmul.mubr.bf16.vlgmr.msra.gmra.mrb[36].mxu1 %v7607_v23  ;;  %v8132_v23 = vld [vmem:[#allocation47_spill] sm:$0xff] }
 0x37e   :  { %4453 = vmatpush1.bf16.msra.mxu1 %v8106_v4  ;;  %v8135_v4 = vld [vmem:[#allocation50_spill] sm:$0xff] }
 0x37f   :  { %4454 = vmatprep.subr.bf16.mxu1 %v8107_v31  ;;  %v8136_v31 = vld [vmem:[#allocation52_spill] sm:$0xff] }
 0x382   :  { %4455 = vmatpush1.bf16.msra.mxu1 %v8108_v22  ;;  %v3094_v22 = vld [vmem:[%s7960_s7] sm:$0x3f] }
 0x383   :  { %4456 = vmatprep.subr.bf16.mxu1 %v8109_v58  ;;  %v8137_v58 = vld [vmem:[#allocation20_spill] sm:$0xff] }
 0x386   :  { %4457 = vmatpush1.bf16.msra.mxu1 %v8110_v12  ;;  %v3099_v12 = vrot.slane %v3094_v22, %v8137_v58 }
 0x387   :  { %4458 = vmatprep.subr.bf16.mxu1 %v8111_v49  ;;  %v8138_v49 = vld [vmem:[#allocation6_spill] sm:$0xff] }
 0x38a   :  { %4459 = vmatpush1.bf16.msra.mxu1 %v8112_v2  ;;  %v3107_v2 = vrot.slane %v3094_v22, %v8138_v49 }
 0x38b   :  { %4460 = vmatprep.subr.bf16.mxu1 %v8113_v17  ;;  %v8139_v17 = vld [vmem:[#allocation22_spill] sm:$0xff] }
 0x38e   :  { %4461 = vmatpush1.bf16.msra.mxu1 %v8114_v3  ;;  %v3103_v3 = vrot.slane %v3094_v22, %v8139_v17 }
 0x38f   :  { %4462 = vmatprep.subr.bf16.mxu1 %v8115_v25  ;;  %v8140_v25 = vld [vmem:[#allocation7_spill] sm:$0xff] }
 0x392   :  { %4463 = vmatpush1.bf16.msra.mxu1 %v8116_v44  ;;  %v3111_v44 = vrot.slane %v3094_v22, %v8140_v25 }
 0x393   :  { %4464 = vmatprep.subr.bf16.mxu1 %v8117_v10 }
 0x396   :  { %4465 = vmatpush1.bf16.msra.mxu1 %v8118_v32 }
 0x397   :  { %4466 = vmatprep.subr.bf16.mxu1 %v8119_v61 }
 0x39a   :  { %4467 = vmatpush1.bf16.msra.mxu1 %v8120_v40 }
 0x39b   :  { %4468 = vmatprep.subr.bf16.mxu1 %v8121_v59 }
 0x39e   :  { %4469 = vmatpush1.bf16.msra.mxu1 %v8122_v11 }
 0x39f   :  { %4470 = vmatprep.subr.bf16.mxu1 %v8123_v26 }
 0x3a2   :  { %4471 = vmatpush1.bf16.msra.mxu1 %v8124_v54 }
 0x3a3   :  { %4472 = vmatprep.subr.bf16.mxu1 %v8125_v15 }
 0x3a6   :  { %4473 = vmatpush1.bf16.msra.mxu1 %v8126_v24 }
 0x3a7   :  { %4474 = vmatprep.subr.bf16.mxu1 %v8127_v53  ;;  %v8141_v53 = vld [vmem:[#allocation24_spill] sm:$0xff] }
 0x3aa   :  { %4475 = vmatpush1.bf16.msra.mxu1 %v8128_v60 }
 0x3ab   :  { %4476 = vmatprep.subr.bf16.mxu1 %v8129_v33  ;;  %v8142_v33 = vld [vmem:[#allocation8_spill] sm:$0xff] }
 0x3ae   :  { %4477 = vmatpush1.bf16.msra.mxu1 %v8130_v34 }
 0x3af   :  { %4478 = vmatprep.subr.bf16.mxu1 %v8131_v39 }
 0x3b2   :  { %4479 = vmatpush1.bf16.msra.mxu1 %v8132_v23 }
 0x3b3   :  { %4480 = vmatprep.subr.bf16.mxu1 %v8133_v35  ;;  %v8143_v35 = vld [vmem:[#allocation25_spill] sm:$0xff] }
 0x3b6   :  { %4481 = vmatpush1.bf16.msra.mxu1 %v8134_v45 }
 0x3b7   :  { %4482 = vmatprep.subr.bf16.mxu1 %v8135_v4  ;;  %v8144_v4 = vld [vmem:[#allocation28_spill] sm:$0xff] }
 0x3ba   :  { %4483 = vmatpush1.bf16.msra.mxu1 %v8136_v31 }
 0x410   :  { %v3640_v10 = vpop.f32.mrb[32].mxu1  ;;  %v3681_v32 = vpop.f32.mrb[20].mxu0 }
 0x411   :  { %v3641_v61 = vadd.f32 %v3640_v10, %v3099_v12  ;;  %v3682_v40 = vadd.f32 %v3681_v32, %v3107_v2  ;;  %v3642_v59 = vpop.f32.mrb[33].mxu1  ;;  %v3683_v11 = vpop.f32.mrb[21].mxu0 }
 0x412   :  { %v3643_v26 = vadd.f32 %v3642_v59, %v3103_v3  ;;  %v3684_v54 = vadd.f32 %v3683_v11, %v3111_v44  ;;  %v3644_v15 = vpop.f32.mrb[34].mxu1  ;;  %v3685_v24 = vpop.f32.mrb[22].mxu0  ;;  %v3115_v59 = vrot.slane %v3094_v22, %v7096_v41  ;;  %v3119_v11 = vrot.slane %v3094_v22, %v7101_v47 }
 0x413   :  { %v3729_v60 = vadd.f32 %v3641_v61, %v8141_v53  ;;  %v3743_v34 = vadd.f32 %v3682_v40, %v8142_v33  ;;  %v3645_v39 = vpop.f32.mrb[35].mxu1  ;;  %v3686_v23 = vpop.f32.mrb[23].mxu0 }
 0x414   :  { %v3730_v45 = vadd.f32 %v3643_v26, %v8143_v35  ;;  %v3744_v31 = vadd.f32 %v3684_v54, %v8144_v4  ;;  %v8145_v35 = vld [vmem:[#allocation31_spill] sm:$0xff]  ;;  %v8146_v4 = vld [vmem:[#allocation32_spill] sm:$0xff] }
 0x415   :  { %v5060_v25 = vmul.f32 -1.442695, %v3729_v60  ;;  %v5062_v12 = vmul.f32 -1.442695, %v3743_v34 }
 0x416   :  { %v5061_v17 = vmul.f32 -1.442695, %v3730_v45  ;;  %v5063_v2 = vmul.f32 -1.442695, %v3744_v31 }
 0x417   :  { %5748 = vpow2.f32 %v5060_v25 }
 0x418   :  { %5750 = vpow2.f32 %v5061_v17 }
 0x419   :  { %5752 = vpow2.f32 %v5062_v12 }
 0x41a   :  { %5754 = vpow2.f32 %v5063_v2 }
 0x421   :  { %v5749_v3 = vpop.eup %5748 }
 0x422   :  { %v5751_v44 = vpop.eup %5750  ;;  %v3737_v10 = vadd.f32 1.0, %v5749_v3 }
 0x423   :  { %v3738_v32 = vadd.f32 1.0, %v5751_v44  ;;  %v5753_v61 = vpop.eup %5752 }
 0x424   :  { %5756 = vrcp.f32 %v3737_v10  ;;  %v5755_v40 = vpop.eup %5754  ;;  %v3751_v26 = vadd.f32 1.0, %v5753_v61 }
 0x425   :  { %5758 = vrcp.f32 %v3738_v32  ;;  %v3752_v54 = vadd.f32 1.0, %v5755_v40 }
 0x426   :  { %5760 = vrcp.f32 %v3751_v26 }
 0x427   :  { %5762 = vrcp.f32 %v3752_v54 }
 0x42e   :  { %v5757_v24 = vpop.eup %5756 }
 0x42f   :  { %v5759_v33 = vpop.eup %5758 }
 0x430   :  { %v5761_v22 = vpop.eup %5760 }
 0x431   :  { %v5763_v12 = vpop.eup %5762  ;;  %v3763_v2 = vsub.f32 1.0, %v5761_v22  ;;  %v3767_v61 = vmul.f32 %v5761_v22, %v7592_v18  ;;  %v3899_v18 = vld [vmem:[%s7960_s7] sm:$0x3f]  ;;  %s5814_s7 = smov [#allocation2]  }
 0x432   :  { %v3764_v44 = vsub.f32 1.0, %v5763_v12  ;;  %s4591_s10 = sshll.u32 %s5814_s7, 4  ;;  %s4592_s10 = int_to_ptr.vmem [resolvable:$true] %s4591_s10 }
 0x433   :  { %s5789_s4 = scalar_lea.vmem %s4592_s10, 128  ;;  %p5794_p1 = scmp.lt.s32.totalorder %s4592_s10, %s4592_s10 }
 0x434   :  { %p5790_p0 = scmp.ne.s32.totalorder %s4592_s10, %s5789_s4  ;;  %p5795_p2 = scmp.lt.s32.totalorder %s5789_s4, %s5789_s4 }
 0x436   :  { %p5796_p3 = por %p5795_p2, %p5794_p1 }
 0x438   :  { %p5797_p4 = pnand %p5796_p3, %p5790_p0 }
 0x450   :  { %v3722_v25 = vpop.f32.mrb[36].mxu1 }
 0x451   :  { %v3723_v17 = vadd.f32 %v3722_v25, %v3115_v59  ;;  %v3724_v15 = vpop.f32.mrb[37].mxu1  ;;  %v3768_v59 = vmul.f32 %v5763_v12, %v7594_v5  ;;  %v3904_v5 = vrot.slane %v3899_v18, %v8137_v58 }
 0x452   :  { %v3725_v53 = vadd.f32 %v3724_v15, %v3119_v11  ;;  %v3726_v60 = vpop.f32.mrb[38].mxu1 }
 0x453   :  { %v3757_v34 = vmul.f32 %v5757_v24, %v3723_v17  ;;  %v3727_v39 = vpop.f32.mrb[39].mxu1  ;;  %v3924_v60 = vrot.slane %v3899_v18, %v7101_v47 }
 0x454   :  { %v3758_v23 = vmul.f32 %v5759_v33, %v3725_v53  ;;  %v3920_v53 = vrot.slane %v3899_v18, %v7096_v41 }
 0x455   :  { %v3759_v45 = vadd.f32 %v3757_v34, %v8145_v35 }
 0x456   :  { %v3760_v31 = vadd.f32 %v3758_v23, %v8146_v4 }
 0x457   :  { %5764 = vtanh.f32 %v3759_v45 }
 0x458   :  { %5766 = vtanh.f32 %v3760_v31 }
 0x461   :  { %v5765_v3 = vpop.eup %5764 }
 0x462   :  { %v5767_v10 = vpop.eup %5766  ;;  %v3765_v32 = vmul.f32 %v5765_v3, %v3763_v2 }
 0x463   :  { %v3766_v40 = vmul.f32 %v5767_v10, %v3764_v44  ;;  %v8153_v44 = vld [vmem:[#allocation33_spill] sm:$0xff] }
 0x464   :  { %v7877_v11 = vadd.f32 %v3767_v61, %v3765_v32  ;;  %v8154_v32 = vld [vmem:[#allocation34_spill] sm:$0xff] }
 0x465   :  { %v7879_v26 = vadd.f32 %v3768_v59, %v3766_v40 }
 0x466   :  { %v3801_v17 = vpack.c.bf16 %v7877_v11, %v7877_v11 }
 0x467   :  { %v3802_v54 = vpack.c.bf16 %v7879_v26, %v7879_v26  ;;  %v3773_v25 = vcombine.low %v7877_v11, %v7879_v26 }
 0x469   :  { %4443 = vmatprep.mubr.bf16.mxu0 %v3802_v54  ;;  %4484 = vmatprep.mubr.bf16.mxu1 %v3802_v54  ;;  %5064 = vst [vmem:[%s7961_s8 + $0x10] sm:$0xff] %v3773_v25 }
 0x46a   :  { %4444 = vmatmul.mubr.bf16.vlgmr.msra.gmra.mrb[24].mxu0 %v3801_v17  ;;  %4485 = vmatmul.mubr.bf16.vlgmr.msra.gmra.mrb[40].mxu1 %v3801_v17 }
 0x46b   :  { %4494 = vmatpush1.bf16.msra.mxu0 %v7601_v9  ;;  %4525 = vmatprep.mubr.bf16.mxu0 %v3802_v54  ;;  %v3912_v9 = vrot.slane %v3899_v18, %v8138_v49 }
 0x46c   :  { %4495 = vmatprep.subr.bf16.mxu0 %v7612_v30  ;;  %v8147_v30 = vld [vmem:[#allocation22_spill] sm:$0xff] }
 0x46f   :  { %4496 = vmatpush1.bf16.msra.mxu0 %v7623_v13  ;;  %v3908_v13 = vrot.slane %v3899_v18, %v8147_v30 }
 0x470   :  { %4497 = vmatprep.subr.bf16.mxu0 %v7629_v63  ;;  %v8148_v63 = vld [vmem:[#allocation7_spill] sm:$0xff] }
 0x473   :  { %4498 = vmatpush1.bf16.msra.mxu0 %v7637_v42  ;;  %v3916_v42 = vrot.slane %v3899_v18, %v8148_v63 }
 0x474   :  { %4499 = vmatprep.subr.bf16.mxu0 %v7643_v38 }
 0x477   :  { %4500 = vmatpush1.bf16.msra.mxu0 %v7651_v8 }
 0x478   :  { %4501 = vmatprep.subr.bf16.mxu0 %v7657_v21 }
 0x47b   :  { %4502 = vmatpush1.bf16.msra.mxu0 %v7665_v36 }
 0x47c   :  { %4503 = vmatprep.subr.bf16.mxu0 %v7671_v19 }
 0x47f   :  { %4504 = vmatpush1.bf16.msra.mxu0 %v7679_v52 }
 0x480   :  { %4505 = vmatprep.subr.bf16.mxu0 %v7685_v56 }
 0x483   :  { %4506 = vmatpush1.bf16.msra.mxu0 %v7693_v50 }
 0x484   :  { %4507 = vmatprep.subr.bf16.mxu0 %v7699_v0 }
 0x487   :  { %4508 = vmatpush1.bf16.msra.mxu0 %v7707_v20 }
 0x488   :  { %4509 = vmatprep.subr.bf16.mxu0 %v7713_v46  ;;  %v8149_v46 = vld [vmem:[#allocation26_spill] sm:$0xff] }
 0x48b   :  { %4510 = vmatpush1.bf16.msra.mxu0 %v7721_v28 }
 0x48c   :  { %4511 = vmatprep.subr.bf16.mxu0 %v7727_v14  ;;  %v8150_v14 = vld [vmem:[#allocation29_spill] sm:$0xff] }
 0x48f   :  { %4512 = vmatpush1.bf16.msra.mxu0 %v7735_v43 }
 0x490   :  { %4513 = vmatprep.subr.bf16.mxu0 %v7741_v27 }
 0x493   :  { %4514 = vmatpush1.bf16.msra.mxu0 %v7749_v16 }
 0x494   :  { %4515 = vmatprep.subr.bf16.mxu0 %v7755_v48  ;;  %v8151_v48 = vld [vmem:[#allocation27_spill] sm:$0xff] }
 0x497   :  { %4516 = vmatpush1.bf16.msra.mxu0 %v7763_v51 }
 0x498   :  { %4517 = vmatprep.subr.bf16.mxu0 %v7769_v57  ;;  %v8152_v57 = vld [vmem:[#allocation30_spill] sm:$0xff] }
 0x49b   :  { %4518 = vmatpush1.bf16.msra.mxu0 %v7777_v1 }
 0x49c   :  { %4519 = vmatprep.subr.bf16.mxu0 %v7783_v55 }
 0x49f   :  { %4520 = vmatpush1.bf16.msra.mxu0 %v7791_v29 }
 0x4a0   :  { %4521 = vmatprep.subr.bf16.mxu0 %v7797_v6 }
 0x4a3   :  { %4522 = vmatpush1.bf16.msra.mxu0 %v7805_v62 }
 0x4a4   :  { %4523 = vmatprep.subr.bf16.mxu0 %v7811_v37 }
 0x4a7   :  { %4524 = vmatpush1.bf16.msra.mxu0 %v7819_v7 }
 0x4aa   :  { %4526 = vmatmul.mubr.bf16.vlgmr.msra.gmra.mrb[28].mxu0 %v3801_v17 }
 0x53d   :  { %v4445_v38 = vpop.f32.mrb[24].mxu0  ;;  %v4486_v8 = vpop.f32.mrb[40].mxu1 }
 0x53e   :  { %v4446_v21 = vadd.f32 %v4445_v38, %v3904_v5  ;;  %v4487_v36 = vadd.f32 %v4486_v8, %v3912_v9  ;;  %v4447_v19 = vpop.f32.mrb[25].mxu0  ;;  %v4488_v52 = vpop.f32.mrb[41].mxu1 }
 0x53f   :  { %v4448_v56 = vadd.f32 %v4447_v19, %v3908_v13  ;;  %v4489_v50 = vadd.f32 %v4488_v52, %v3916_v42  ;;  %v4449_v0 = vpop.f32.mrb[26].mxu0  ;;  %v4490_v20 = vpop.f32.mrb[42].mxu1 }
 0x540   :  { %v4534_v28 = vadd.f32 %v4446_v21, %v8149_v46  ;;  %v4548_v43 = vadd.f32 %v4487_v36, %v8150_v14  ;;  %v4450_v27 = vpop.f32.mrb[27].mxu0  ;;  %v4491_v16 = vpop.f32.mrb[43].mxu1 }
 0x541   :  { %v4535_v51 = vadd.f32 %v4448_v56, %v8151_v48  ;;  %v4549_v1 = vadd.f32 %v4489_v50, %v8152_v57 }
 0x542   :  { %v5161_v55 = vmul.f32 -1.442695, %v4534_v28  ;;  %v5163_v6 = vmul.f32 -1.442695, %v4548_v43 }
 0x543   :  { %v5162_v29 = vmul.f32 -1.442695, %v4535_v51  ;;  %v5164_v62 = vmul.f32 -1.442695, %v4549_v1 }
 0x544   :  { %5768 = vpow2.f32 %v5161_v55 }
 0x545   :  { %5770 = vpow2.f32 %v5162_v29 }
 0x546   :  { %5772 = vpow2.f32 %v5163_v6 }
 0x547   :  { %5774 = vpow2.f32 %v5164_v62 }
 0x54e   :  { %v5769_v37 = vpop.eup %5768 }
 0x54f   :  { %v5771_v7 = vpop.eup %5770  ;;  %v4542_v58 = vadd.f32 1.0, %v5769_v37 }
 0x550   :  { %v4543_v49 = vadd.f32 1.0, %v5771_v7  ;;  %v5773_v15 = vpop.eup %5772 }
 0x551   :  { %5776 = vrcp.f32 %v4542_v58  ;;  %v5775_v24 = vpop.eup %5774  ;;  %v4556_v33 = vadd.f32 1.0, %v5773_v15 }
 0x552   :  { %5778 = vrcp.f32 %v4543_v49  ;;  %v4557_v34 = vadd.f32 1.0, %v5775_v24 }
 0x553   :  { %5780 = vrcp.f32 %v4556_v33 }
 0x554   :  { %5782 = vrcp.f32 %v4557_v34 }
 0x55b   :  { %v5777_v45 = vpop.eup %5776 }
 0x55c   :  { %v5779_v22 = vpop.eup %5778 }
 0x55d   :  { %v5781_v47 = vpop.eup %5780 }
 0x55e   :  { %v5783_v61 = vpop.eup %5782  ;;  %v4568_v40 = vsub.f32 1.0, %v5781_v47  ;;  %v4572_v18 = vmul.f32 %v5781_v47, %v7877_v11 }
 0x55f   :  { %v4569_v54 = vsub.f32 1.0, %v5783_v61  ;;  %v4573_v9 = vmul.f32 %v5783_v61, %v7879_v26 }
 0x57d   :  { %v4527_v39 = vpop.f32.mrb[28].mxu0 }
 0x57e   :  { %v4528_v23 = vadd.f32 %v4527_v39, %v3920_v53  ;;  %v4529_v35 = vpop.f32.mrb[29].mxu0 }
 0x57f   :  { %v4530_v4 = vadd.f32 %v4529_v35, %v3924_v60  ;;  %v4531_v31 = vpop.f32.mrb[30].mxu0 }
 0x580   :  { %v4562_v12 = vmul.f32 %v5777_v45, %v4528_v23  ;;  %v4532_v2 = vpop.f32.mrb[31].mxu0 }
 0x581   :  { %v4563_v3 = vmul.f32 %v5779_v22, %v4530_v4 }
 0x582   :  { %v4564_v10 = vadd.f32 %v4562_v12, %v8153_v44 }
 0x583   :  { %v4565_v41 = vadd.f32 %v4563_v3, %v8154_v32 }
 0x584   :  { %5784 = vtanh.f32 %v4564_v10 }
 0x585   :  { %5786 = vtanh.f32 %v4565_v41 }
 0x58e   :  { %v5785_v59 = vpop.eup %5784 }
 0x58f   :  { %v5787_v25 = vpop.eup %5786  ;;  %v4570_v17 = vmul.f32 %v5785_v59, %v4568_v40 }
 0x590   :  { %v4571_v5 = vmul.f32 %v5787_v25, %v4569_v54 }
 0x591   :  { %v4574_v30 = vadd.f32 %v4572_v18, %v4570_v17 }
 0x592   :  { %v4575_v13 = vadd.f32 %v4573_v9, %v4571_v5 }
 0x594   :  { %v4578_v63 = vcombine.low %v4574_v30, %v4575_v13 }
 0x596   :  { %5165 = vst [vmem:[%s7961_s8 + $0x18] sm:$0xff] %v4578_v63  ;;  %4582 = vst [vmem:[#allocation2] sm:$0xff] %v4578_v63 }
 0x597   :  { %5800 = shalt.err (!%p5797_p4)
}
 0x598   :  { %s5801_s15 = scalar_lea.hbm %s7962_s9, 128 }
 0x599   :  { %p5802_p5 = scmp.ne.s32.totalorder %s7962_s9, %s5801_s15  ;;  %p5805_p6 = scmp.lt.u32.totalorder %s5801_s15, %s7962_s9 }
 0x59b   :  { %p5807_p7 = pnand %p5805_p6, %p5802_p5 }
 0x59d   :  { %5810 = shalt.err (!%p5807_p7)
}
 0x59e   :  { %4594 = dma.vmem_to_hbm [thread:$0]  %s4592_s10, 128, %s7962_s9, [#allocation3]  }
 0x59f   :  { %5811 = dma.done.wait [#allocation3], 128  }
 0x5a0   :  { %5812 = vsyncadd [#allocation3], 4294967168 }
 0x5a1   :  { %4600 = vsyncpa [#allocation3], 1 }

// kernel: agent_network_forward.4
= control target key start
LH: loop header
LB: loop body
LE: loop exit
PB: predicated region body
PF: predicated region fallthrough
CT: control target
= control target key end

     0   :  { %11 = vsyncpa [#allocation3], 0  ;;  %s15771_s0 = inlined_call_operand.vmem [shape: f32[256,3], index: 0, kind: input, shape index: {}]   ;;  %s15772_s1 = inlined_call_operand.hbm [shape: f32[9,256,1], index: 1, kind: input, shape index: {}]   ;;  %s15773_s2 = inlined_call_operand.hbm [shape: f32[9,3,16], index: 2, kind: input, shape index: {}]   ;;  %s15774_s3 = inlined_call_operand.hbm [shape: f32[1,16], index: 3, kind: input, shape index: {}]   ;;  %s15775_s4 = inlined_call_operand.hbm [shape: f32[9,16,32], index: 4, kind: input, shape index: {}]   ;;  %s15776_s5 = inlined_call_operand.hbm [shape: f32[1,32], index: 5, kind: input, shape index: {}]   ;;  %s15777_s6 = inlined_call_operand.vmem [shape: f32[256,32], index: 6, kind: output, shape index: {}]  }
   0x1   :  { %12 = vsyncpa [#allocation5], 0 }
   0x2   :  { %13 = vsyncpa [#allocation8], 0  ;;  %s12178_s21 = smov [#allocation4]   ;;  %s12062_s25 = scalar_lea.hbm %s15773_s2, 576 }
   0x3   :  { %s33_s22 = sshll.u32 %s12178_s21, 4  ;;  %p12063_p0 = scmp.ne.s32.totalorder %s15773_s2, %s12062_s25  ;;  %s34_s22 = int_to_ptr.vmem [resolvable:$true] %s33_s22 }
   0x4   :  { %p12066_p1 = scmp.lt.u32.totalorder %s12062_s25, %s15773_s2 }
   0x6   :  { %p12068_p2 = pnand %p12066_p1, %p12063_p0 }
   0x8   :  { %12071 = shalt.err (!%p12068_p2)
}
   0x9   :  { %s12072_s30 = scalar_lea.vmem %s34_s22, 576  ;;  %p12077_p4 = scmp.lt.s32.totalorder %s34_s22, %s34_s22 }
   0xa   :  { %p12073_p3 = scmp.ne.s32.totalorder %s34_s22, %s12072_s30  ;;  %p12078_p5 = scmp.lt.s32.totalorder %s12072_s30, %s12072_s30 }
   0xc   :  { %p12079_p6 = por %p12078_p5, %p12077_p4 }
   0xe   :  { %p12080_p7 = pnand %p12079_p6, %p12073_p3 }
  0x10   :  { %12083 = shalt.err (!%p12080_p7)
}
  0x11   :  { %s12179_s7 = smov 64   ;;  %s12180_s8 = smov 4  }
  0x12   :  { %39 = dma.hbm_to_vmem [thread:$0]  %s15773_s2, 576, %s34_s22, [#allocation5], %s12179_s7, %s12179_s7, %s12180_s8  }
  0x13   :  { %s12181_s11 = smov [#allocation7]   ;;  %s12182_s13 = smov [#allocation2]  }
  0x14   :  { %s55_s12 = sshll.u32 %s12181_s11, 4  ;;  %s21_s14 = sshll.u32 %s12182_s13, 4  ;;  %s56_s12 = int_to_ptr.vmem [resolvable:$true] %s55_s12  ;;  %s22_s14 = int_to_ptr.vmem [resolvable:$true] %s21_s14 }
  0x15   :  { %s12084_s17 = scalar_lea.hbm %s15775_s4, 2304 }
  0x16   :  { %p12085_p8 = scmp.ne.s32.totalorder %s15775_s4, %s12084_s17  ;;  %p12088_p9 = scmp.lt.u32.totalorder %s12084_s17, %s15775_s4 }
  0x18   :  { %p12090_p10 = pnand %p12088_p9, %p12085_p8 }
  0x1a   :  { %12093 = shalt.err (!%p12090_p10)
}
  0x1b   :  { %s12094_s2 = scalar_lea.vmem %s56_s12, 2304  ;;  %p12099_p12 = scmp.lt.s32.totalorder %s56_s12, %s56_s12 }
  0x1c   :  { %p12095_p11 = scmp.ne.s32.totalorder %s56_s12, %s12094_s2  ;;  %p12100_p13 = scmp.lt.s32.totalorder %s12094_s2, %s12094_s2 }
  0x1e   :  { %p12101_p0 = por %p12100_p13, %p12099_p12 }
  0x20   :  { %p12102_p1 = pnand %p12101_p0, %p12095_p11 }
  0x22   :  { %12105 = shalt.err (!%p12102_p1)
}
  0x23   :  { %s12183_s22 = smov 128   ;;  %s12184_s23 = smov 8  }
  0x24   :  { %61 = dma.hbm_to_vmem [thread:$0]  %s15775_s4, 2304, %s56_s12, [#allocation8], %s12183_s22, %s12183_s22, %s12184_s23  }
  0x25   :  { %s12106_s28 = scalar_lea.hbm %s15772_s1, 36864 }
  0x26   :  { %p12107_p2 = scmp.ne.s32.totalorder %s15772_s1, %s12106_s28  ;;  %p12110_p3 = scmp.lt.u32.totalorder %s12106_s28, %s15772_s1 }
  0x28   :  { %p12112_p4 = pnand %p12110_p3, %p12107_p2 }
  0x2a   :  { %12115 = shalt.err (!%p12112_p4)
}
  0x2b   :  { %s12116_s9 = scalar_lea.vmem %s22_s14, 36864  ;;  %p12121_p6 = scmp.lt.s32.totalorder %s22_s14, %s22_s14 }
  0x2c   :  { %p12117_p5 = scmp.ne.s32.totalorder %s22_s14, %s12116_s9  ;;  %p12122_p7 = scmp.lt.s32.totalorder %s12116_s9, %s12116_s9 }
  0x2e   :  { %p12123_p8 = por %p12122_p7, %p12121_p6 }
  0x30   :  { %p12124_p9 = pnand %p12123_p8, %p12117_p5 }
  0x32   :  { %12127 = shalt.err (!%p12124_p9)
}
  0x33   :  { %27 = dma.hbm_to_vmem [thread:$0]  %s15772_s1, 36864, %s22_s14, [#allocation3], %s12183_s22, %s12183_s22, %s12184_s23  }
  0x34   :  { %s12185_s11 = smov [#allocation6]   ;;  %s12186_s13 = smov [#allocation9]  }
  0x35   :  { %s46_s12 = sshll.u32 %s12185_s11, 4  ;;  %s68_s15 = sshll.u32 %s12186_s13, 4  ;;  %s47_s12 = int_to_ptr.vmem [resolvable:$true] %s46_s12  ;;  %s69_s15 = int_to_ptr.vmem [resolvable:$true] %s68_s15 }
  0x36   :  { %s12128_s18 = scalar_lea.hbm %s15774_s3, 16 }
  0x37   :  { %p12129_p10 = scmp.ne.s32.totalorder %s15774_s3, %s12128_s18  ;;  %p12132_p11 = scmp.lt.u32.totalorder %s12128_s18, %s15774_s3 }
  0x39   :  { %p12134_p12 = pnand %p12132_p11, %p12129_p10 }
  0x3b   :  { %12137 = shalt.err (!%p12134_p12)
}
  0x3c   :  { %s12138_s1 = scalar_lea.vmem %s47_s12, 16  ;;  %s12142_s14 = scalar_lea.vmem %s47_s12, 32 }
  0x3d   :  { %p12139_p13 = scmp.ne.s32.totalorder %s47_s12, %s12138_s1  ;;  %p12143_p0 = scmp.lt.s32.totalorder %s47_s12, %s47_s12 }
  0x3e   :  { %p12144_p1 = scmp.lt.s32.totalorder %s12142_s14, %s12138_s1 }
  0x40   :  { %p12145_p2 = por %p12144_p1, %p12143_p0 }
  0x42   :  { %p12146_p3 = pnand %p12145_p2, %p12139_p13 }
  0x44   :  { %12149 = shalt.err (!%p12146_p3)
}
  0x45   :  { %49 = dma.hbm_to_vmem [thread:$0]  %s15774_s3, 16, %s47_s12, [#allocation5]  }
  0x46   :  { %s12150_s26 = scalar_lea.hbm %s15776_s5, 16 }
  0x47   :  { %p12151_p4 = scmp.ne.s32.totalorder %s15776_s5, %s12150_s26  ;;  %p12154_p5 = scmp.lt.u32.totalorder %s12150_s26, %s15776_s5 }
  0x49   :  { %p12156_p6 = pnand %p12154_p5, %p12151_p4 }
  0x4b   :  { %12159 = shalt.err (!%p12156_p6)
}
  0x4c   :  { %s12160_s7 = scalar_lea.vmem %s69_s15, 16  ;;  %s12164_s8 = scalar_lea.vmem %s69_s15, 32 }
  0x4d   :  { %p12161_p7 = scmp.ne.s32.totalorder %s69_s15, %s12160_s7  ;;  %p12165_p8 = scmp.lt.s32.totalorder %s69_s15, %s69_s15 }
  0x4e   :  { %p12166_p9 = scmp.lt.s32.totalorder %s12164_s8, %s12160_s7 }
  0x50   :  { %p12167_p10 = por %p12166_p9, %p12165_p8 }
  0x52   :  { %p12168_p11 = pnand %p12167_p10, %p12161_p7 }
  0x54   :  { %12171 = shalt.err (!%p12168_p11)
}
  0x55   :  { %71 = dma.hbm_to_vmem [thread:$0]  %s15776_s5, 16, %s69_s15, [#allocation8]  }
  0x56   :  { %12172 = dma.done.wait [#allocation3], 36864  }
  0x57   :  { %12173 = vsyncadd [#allocation3], 4294930432 }
  0x58   :  { %12174 = dma.done.wait [#allocation5], 592  }
  0x59   :  { %12175 = vsyncadd [#allocation5], 4294966704 }
  0x5a   :  { %12176 = dma.done.wait [#allocation8], 2320  }
  0x5b   :  { %12177 = vsyncadd [#allocation8], 4294964976  ;;  %v12187_v0 = vmov 0   ;;  %v472_v1 = vld [vmem:[#allocation2 + $0x110] sm:$0xff]  ;;  %v470_v2 = vld [vmem:[#allocation2 + $0x100] sm:$0xff]  ;;  %vm793_vm0 = vcmask 1042432  }
  0x5c   :  { %12029 = vset.pattern.permute.xlu1 %v12187_v0  ;;  %12028 = vset.pattern.permute.xlu0 %v12187_v0  ;;  %v473_v3 = vld [vmem:[#allocation2 + $0x118] sm:$0xff]  ;;  %v471_v4 = vld [vmem:[#allocation2 + $0x108] sm:$0xff]  ;;  %v474_v6 = vld [vmem:[#allocation2 + $0x120] sm:$0xff]  ;;  %vm696_vm1 = vcmask 23552   ;;  %vm5794_vm2 = vcmask 130048   ;;  %vm150_vm3 = vcmask 1040384  }
  0x5d   :  { %514 = vperm.xlu1 %12029, %v472_v1   ;;  %504 = vperm.xlu0 %12028, %v470_v2   ;;  %v475_v5 = vld [vmem:[#allocation2 + $0x128] sm:$0xff]  ;;  %v477_v7 = vld [vmem:[#allocation2 + $0x138] sm:$0xff]  ;;  %v476_v8 = vld [vmem:[#allocation2 + $0x130] sm:$0xff]  ;;  %vm1347_vm4 = vcmask 1046528   ;;  %vm9322_vm5 = vcmask 261120  }
  0x5e   :  { %v479_v9 = vld [vmem:[#allocation2 + $0x148] sm:$0xff]  ;;  %v478_v10 = vld [vmem:[#allocation2 + $0x140] sm:$0xff]  ;;  %v481_v11 = vld [vmem:[#allocation2 + $0x158] sm:$0xff] }
  0x5f   :  { %v480_v12 = vld [vmem:[#allocation2 + $0x150] sm:$0xff]  ;;  %v483_v13 = vld [vmem:[#allocation2 + $0x168] sm:$0xff]  ;;  %v482_v14 = vld [vmem:[#allocation2 + $0x160] sm:$0xff] }
  0x60   :  { %v695_v15 = vld [vmem:[#allocation4 + $0x4] sm:$0x7]  ;;  %v12285_v16 = vld [vmem:[#allocation4] sm:$0x7]  ;;  %v485_v17 = vld [vmem:[#allocation2 + $0x178] sm:$0xff] }
  0x61   :  { %519 = vperm.xlu1 %12029, %v473_v3   ;;  %509 = vperm.xlu0 %12028, %v471_v4   ;;  %v484_v18 = vld [vmem:[#allocation2 + $0x170] sm:$0xff]  ;;  %v487_v19 = vld [vmem:[#allocation2 + $0x188] sm:$0xff]  ;;  %v486_v20 = vld [vmem:[#allocation2 + $0x180] sm:$0xff] }
  0x62   :  { %10552 = vmatprep.subr.msk.mxu0 %vm793_vm0, %v695_v15  ;;  %v489_v21 = vld [vmem:[#allocation2 + $0x198] sm:$0xff]  ;;  %v488_v22 = vld [vmem:[#allocation2 + $0x190] sm:$0xff]  ;;  %v491_v23 = vld [vmem:[#allocation2 + $0x1a8] sm:$0xff] }
  0x63   :  { %10553 = vmatpush3.msk.msra.mxu0 %vm793_vm0, %v695_v15  ;;  %v490_v24 = vld [vmem:[#allocation2 + $0x1a0] sm:$0xff]  ;;  %v493_v25 = vld [vmem:[#allocation2 + $0x1b8] sm:$0xff]  ;;  %v492_v26 = vld [vmem:[#allocation2 + $0x1b0] sm:$0xff] }
  0x64   :  { %10602 = vmatprep.subr.msk.mxu0 %vm793_vm0, %v12285_v16  ;;  %v495_v27 = vld [vmem:[#allocation2 + $0x1c8] sm:$0xff]  ;;  %v494_v28 = vld [vmem:[#allocation2 + $0x1c0] sm:$0xff]  ;;  %v497_v29 = vld [vmem:[#allocation2 + $0x1d8] sm:$0xff] }
  0x65   :  { %529 = vperm.xlu1 %12029, %v475_v5   ;;  %524 = vperm.xlu0 %12028, %v474_v6   ;;  %v496_v30 = vld [vmem:[#allocation2 + $0x1d0] sm:$0xff]  ;;  %v499_v31 = vld [vmem:[#allocation2 + $0x1e8] sm:$0xff]  ;;  %v498_v32 = vld [vmem:[#allocation2 + $0x1e0] sm:$0xff] }
  0x66   :  { %v501_v33 = vld [vmem:[#allocation2 + $0x1f8] sm:$0xff]  ;;  %v500_v34 = vld [vmem:[#allocation2 + $0x1f0] sm:$0xff]  ;;  %v245_v35 = vld [vmem:[#allocation2 + $0x8] sm:$0xff] }
  0x67   :  { %v244_v36 = vld [vmem:[#allocation2] sm:$0xff]  ;;  %v247_v37 = vld [vmem:[#allocation2 + $0x18] sm:$0xff]  ;;  %v246_v38 = vld [vmem:[#allocation2 + $0x10] sm:$0xff] }
  0x68   :  { %v249_v39 = vld [vmem:[#allocation2 + $0x28] sm:$0xff]  ;;  %v248_v40 = vld [vmem:[#allocation2 + $0x20] sm:$0xff]  ;;  %v251_v41 = vld [vmem:[#allocation2 + $0x38] sm:$0xff] }
  0x69   :  { %539 = vperm.xlu1 %12029, %v477_v7   ;;  %534 = vperm.xlu0 %12028, %v476_v8   ;;  %v250_v42 = vld [vmem:[#allocation2 + $0x30] sm:$0xff]  ;;  %v253_v43 = vld [vmem:[#allocation2 + $0x48] sm:$0xff]  ;;  %v252_v44 = vld [vmem:[#allocation2 + $0x40] sm:$0xff] }
  0x6a   :  { %v255_v45 = vld [vmem:[#allocation2 + $0x58] sm:$0xff]  ;;  %v254_v46 = vld [vmem:[#allocation2 + $0x50] sm:$0xff]  ;;  %v257_v47 = vld [vmem:[#allocation2 + $0x68] sm:$0xff] }
  0x6b   :  { %v256_v48 = vld [vmem:[#allocation2 + $0x60] sm:$0xff]  ;;  %v259_v49 = vld [vmem:[#allocation2 + $0x78] sm:$0xff]  ;;  %v258_v50 = vld [vmem:[#allocation2 + $0x70] sm:$0xff] }
  0x6c   :  { %v261_v51 = vld [vmem:[#allocation2 + $0x88] sm:$0xff]  ;;  %v260_v52 = vld [vmem:[#allocation2 + $0x80] sm:$0xff]  ;;  %v263_v53 = vld [vmem:[#allocation2 + $0x98] sm:$0xff] }
  0x6d   :  { %549 = vperm.xlu1 %12029, %v479_v9   ;;  %544 = vperm.xlu0 %12028, %v478_v10   ;;  %v262_v54 = vld [vmem:[#allocation2 + $0x90] sm:$0xff]  ;;  %v265_v55 = vld [vmem:[#allocation2 + $0xa8] sm:$0xff]  ;;  %v264_v56 = vld [vmem:[#allocation2 + $0xa0] sm:$0xff] }
  0x6e   :  { %v267_v57 = vld [vmem:[#allocation2 + $0xb8] sm:$0xff]  ;;  %v266_v58 = vld [vmem:[#allocation2 + $0xb0] sm:$0xff]  ;;  %v269_v59 = vld [vmem:[#allocation2 + $0xc8] sm:$0xff] }
  0x6f   :  { %v268_v60 = vld [vmem:[#allocation2 + $0xc0] sm:$0xff]  ;;  %v271_v61 = vld [vmem:[#allocation2 + $0xd8] sm:$0xff]  ;;  %v270_v62 = vld [vmem:[#allocation2 + $0xd0] sm:$0xff] }
  0x70   :  { %v273_v63 = vld [vmem:[#allocation2 + $0xe8] sm:$0xff]  ;;  %v272_v0 = vld [vmem:[#allocation2 + $0xe0] sm:$0xff]  ;;  %v275_v1 = vld [vmem:[#allocation2 + $0xf8] sm:$0xff] }
  0x71   :  { %559 = vperm.xlu1 %12029, %v481_v11   ;;  %554 = vperm.xlu0 %12028, %v480_v12   ;;  %v274_v2 = vld [vmem:[#allocation2 + $0xf0] sm:$0xff]  ;;  %v1446_v3 = vld [vmem:[#allocation2 + $0x208] sm:$0xff]  ;;  %v1445_v4 = vld [vmem:[#allocation2 + $0x200] sm:$0xff] }
  0x72   :  { %v12294_v7 = vld [vmem:[%s15771_s0 + $0x8] sm:$0xff]  ;;  %v12299_v9 = vld [vmem:[%s15771_s0] sm:$0xff]  ;;  %v1448_v10 = vld [vmem:[#allocation2 + $0x218] sm:$0xff] }
  0x73   :  { %v1447_v11 = vld [vmem:[#allocation2 + $0x210] sm:$0xff] }
  0x74   :  { %v12312_v15 = vld [vmem:[%s15771_s0 + $0x10] sm:$0xff] }
  0x75   :  { %569 = vperm.xlu1 %12029, %v483_v13   ;;  %564 = vperm.xlu0 %12028, %v482_v14  }
  0x79   :  { %579 = vperm.xlu1 %12029, %v485_v17   ;;  %574 = vperm.xlu0 %12028, %v484_v18   ;;  %v12319_v18 = vld [vmem:[%s15771_s0 + $0x18] sm:$0xff] }
  0x7d   :  { %589 = vperm.xlu1 %12029, %v487_v19   ;;  %584 = vperm.xlu0 %12028, %v486_v20   ;;  %v1450_v19 = vld [vmem:[#allocation2 + $0x228] sm:$0xff]  ;;  %v1449_v20 = vld [vmem:[#allocation2 + $0x220] sm:$0xff] }
  0x81   :  { %599 = vperm.xlu1 %12029, %v489_v21   ;;  %594 = vperm.xlu0 %12028, %v488_v22   ;;  %v12322_v21 = vld [vmem:[#allocation4 + $0x8] sm:$0x7] }
  0x85   :  { %609 = vperm.xlu1 %12029, %v491_v23   ;;  %604 = vperm.xlu0 %12028, %v490_v24  }
  0x89   :  { %619 = vperm.xlu1 %12029, %v493_v25   ;;  %614 = vperm.xlu0 %12028, %v492_v26   ;;  %v12336_v25 = vld [vmem:[%s15771_s0 + $0x20] sm:$0xff] }
  0x8d   :  { %629 = vperm.xlu1 %12029, %v495_v27   ;;  %624 = vperm.xlu0 %12028, %v494_v28   ;;  %v1452_v27 = vld [vmem:[#allocation2 + $0x238] sm:$0xff]  ;;  %v1451_v28 = vld [vmem:[#allocation2 + $0x230] sm:$0xff] }
  0x91   :  { %639 = vperm.xlu1 %12029, %v497_v29   ;;  %634 = vperm.xlu0 %12028, %v496_v30  }
  0x95   :  { %649 = vperm.xlu1 %12029, %v499_v31   ;;  %644 = vperm.xlu0 %12028, %v498_v32   ;;  %v12358_v32 = vld [vmem:[%s15771_s0 + $0x30] sm:$0xff] }
  0x99   :  { %659 = vperm.xlu1 %12029, %v501_v33   ;;  %654 = vperm.xlu0 %12028, %v500_v34   ;;  %v12365_v34 = vld [vmem:[%s15771_s0 + $0x38] sm:$0xff] }
  0x9d   :  { %283 = vperm.xlu1 %12029, %v245_v35   ;;  %278 = vperm.xlu0 %12028, %v244_v36   ;;  %v1454_v35 = vld [vmem:[#allocation2 + $0x248] sm:$0xff]  ;;  %v1453_v36 = vld [vmem:[#allocation2 + $0x240] sm:$0xff] }
  0xa1   :  { %293 = vperm.xlu1 %12029, %v247_v37   ;;  %288 = vperm.xlu0 %12028, %v246_v38  }
  0xa5   :  { %303 = vperm.xlu1 %12029, %v249_v39   ;;  %298 = vperm.xlu0 %12028, %v248_v40   ;;  %v12378_v40 = vld [vmem:[%s15771_s0 + $0x40] sm:$0xff] }
  0xa9   :  { %313 = vperm.xlu1 %12029, %v251_v41   ;;  %308 = vperm.xlu0 %12028, %v250_v42   ;;  %v12385_v42 = vld [vmem:[%s15771_s0 + $0x48] sm:$0xff] }
  0xad   :  { %323 = vperm.xlu1 %12029, %v253_v43   ;;  %318 = vperm.xlu0 %12028, %v252_v44   ;;  %v1456_v43 = vld [vmem:[#allocation2 + $0x258] sm:$0xff]  ;;  %v1455_v44 = vld [vmem:[#allocation2 + $0x250] sm:$0xff] }
  0xb1   :  { %333 = vperm.xlu1 %12029, %v255_v45   ;;  %328 = vperm.xlu0 %12028, %v254_v46  }
  0xb5   :  { %343 = vperm.xlu1 %12029, %v257_v47   ;;  %338 = vperm.xlu0 %12028, %v256_v48   ;;  %v12398_v48 = vld [vmem:[%s15771_s0 + $0x50] sm:$0xff] }
  0xb9   :  { %353 = vperm.xlu1 %12029, %v259_v49   ;;  %348 = vperm.xlu0 %12028, %v258_v50   ;;  %v12405_v50 = vld [vmem:[%s15771_s0 + $0x58] sm:$0xff] }
  0xbd   :  { %363 = vperm.xlu1 %12029, %v261_v51   ;;  %358 = vperm.xlu0 %12028, %v260_v52   ;;  %v1458_v51 = vld [vmem:[#allocation2 + $0x268] sm:$0xff]  ;;  %v1457_v52 = vld [vmem:[#allocation2 + $0x260] sm:$0xff] }
  0xc1   :  { %373 = vperm.xlu1 %12029, %v263_v53   ;;  %368 = vperm.xlu0 %12028, %v262_v54  }
  0xc5   :  { %383 = vperm.xlu1 %12029, %v265_v55   ;;  %378 = vperm.xlu0 %12028, %v264_v56   ;;  %v12418_v56 = vld [vmem:[%s15771_s0 + $0x60] sm:$0xff] }
  0xc9   :  { %393 = vperm.xlu1 %12029, %v267_v57   ;;  %388 = vperm.xlu0 %12028, %v266_v58   ;;  %v12425_v58 = vld [vmem:[%s15771_s0 + $0x68] sm:$0xff] }
  0xcd   :  { %403 = vperm.xlu1 %12029, %v269_v59   ;;  %398 = vperm.xlu0 %12028, %v268_v60   ;;  %v1460_v59 = vld [vmem:[#allocation2 + $0x278] sm:$0xff]  ;;  %v1459_v60 = vld [vmem:[#allocation2 + $0x270] sm:$0xff] }
  0xd1   :  { %413 = vperm.xlu1 %12029, %v271_v61   ;;  %408 = vperm.xlu0 %12028, %v270_v62  }
  0xd5   :  { %423 = vperm.xlu1 %12029, %v273_v63   ;;  %418 = vperm.xlu0 %12028, %v272_v0   ;;  %v12438_v0 = vld [vmem:[%s15771_s0 + $0x70] sm:$0xff] }
  0xd9   :  { %433 = vperm.xlu1 %12029, %v275_v1   ;;  %428 = vperm.xlu0 %12028, %v274_v2   ;;  %v12445_v2 = vld [vmem:[%s15771_s0 + $0x78] sm:$0xff] }
  0xdc   :  { %v12289_v5 = vpop.permute.xlu1 %514  ;;  %v505_v6 = vpop.permute.xlu0 %504 }
  0xdd   :  { %16228 = vst [vmem:[#allocation13_spill] sm:$0xff] %v12289_v5  ;;  %1484 = vperm.xlu1 %12029, %v1446_v3   ;;  %1479 = vperm.xlu0 %12028, %v1445_v4   ;;  %v662_v8 = vmul.f32 0.0, %v505_v6  ;;  %v664_v12 = vmul.f32 %v12289_v5, %v12294_v7  ;;  %v1462_v3 = vld [vmem:[#allocation2 + $0x288] sm:$0xff]  ;;  %v1461_v4 = vld [vmem:[#allocation2 + $0x280] sm:$0xff] }
  0xdf   :  { %10554 = vmatprep.mubr.msk.f32.mxu0 %vm696_vm1, %v662_v8  ;;  %11006 = vmatprep.mubr.msk.f32.mxu1 %vm5794_vm2, %v662_v8 }
  0xe0   :  { %v12305_v13 = vpop.permute.xlu1 %519  ;;  %v12307_v14 = vpop.permute.xlu0 %509 }
  0xe1   :  { %16229 = vst [vmem:[#allocation14_spill] sm:$0xff] %v12305_v13  ;;  %16230 = vst [vmem:[#allocation15_spill] sm:$0xff] %v12307_v14  ;;  %v663_v17 = vmul.f32 %v12307_v14, %v12299_v9  ;;  %1494 = vperm.xlu1 %12029, %v1448_v10   ;;  %1489 = vperm.xlu0 %12028, %v1447_v11   ;;  %v665_v24 = vmul.f32 %v12305_v13, %v12312_v15  ;;  %v12458_v11 = vld [vmem:[%s15771_s0 + $0x80] sm:$0xff]  ;;  %v2049_v14 = vld [vmem:[#allocation2 + $0x390] sm:$0xff] }
  0xe2   :  { %v2047_v13 = vld [vmem:[#allocation2 + $0x380] sm:$0xff] }
  0xe3   :  { %10555 = vmatmul.mubr.msk.f32.vlgmr.msra.gmra.mrb[0].mxu0 %vm696_vm1, %v663_v17  ;;  %v12465_v17 = vld [vmem:[%s15771_s0 + $0x88] sm:$0xff] }
  0xe4   :  { %10603 = vmatpush3.msk.msra.mxu0 %vm793_vm0, %v12285_v16  ;;  %v12326_v22 = vpop.permute.xlu1 %529  ;;  %v12328_v23 = vpop.permute.xlu0 %524  ;;  %10557 = vmatprep.mubr.msk.f32.mxu0 %vm696_vm1, %v664_v12  ;;  %v12343_v16 = vld [vmem:[%s15771_s0 + $0x28] sm:$0xff] }
  0xe5   :  { %16231 = vst [vmem:[#allocation16_spill] sm:$0xff] %v12326_v22  ;;  %16232 = vst [vmem:[#allocation17_spill] sm:$0xff] %v12328_v23  ;;  %v666_v26 = vmul.f32 %v12328_v23, %v12319_v18  ;;  %1504 = vperm.xlu1 %12029, %v1450_v19   ;;  %1499 = vperm.xlu0 %12028, %v1449_v20   ;;  %v667_v31 = vmul.f32 %v12326_v22, %v12336_v25  ;;  %v1464_v19 = vld [vmem:[#allocation2 + $0x298] sm:$0xff]  ;;  %v1463_v20 = vld [vmem:[#allocation2 + $0x290] sm:$0xff] }
  0xe6   :  { %10652 = vmatprep.subr.msk.mxu0 %vm793_vm0, %v12322_v21  ;;  %v2045_v22 = vld [vmem:[#allocation2 + $0x370] sm:$0xff] }
  0xe7   :  { %10558 = vmatmul.mubr.msk.f32.gmra.mrb[2].mxu0 %vm696_vm1, %v665_v24 }
  0xe8   :  { %v12348_v29 = vpop.permute.xlu1 %539  ;;  %v12350_v30 = vpop.permute.xlu0 %534  ;;  %10560 = vmatprep.mubr.msk.f32.mxu0 %vm696_vm1, %v666_v26 }
  0xe9   :  { %16233 = vst [vmem:[#allocation18_spill] sm:$0xff] %v12348_v29  ;;  %16234 = vst [vmem:[#allocation19_spill] sm:$0xff] %v12350_v30  ;;  %v668_v33 = vmul.f32 %v12350_v30, %v12343_v16  ;;  %1514 = vperm.xlu1 %12029, %v1452_v27   ;;  %1509 = vperm.xlu0 %12028, %v1451_v28   ;;  %v669_v39 = vmul.f32 %v12348_v29, %v12358_v32  ;;  %v12478_v28 = vld [vmem:[%s15771_s0 + $0x90] sm:$0xff]  ;;  %v2043_v29 = vld [vmem:[#allocation2 + $0x360] sm:$0xff] }
  0xeb   :  { %10561 = vmatmul.mubr.msk.f32.gmra.mrb[4].mxu0 %vm696_vm1, %v667_v31 }
  0xec   :  { %v12368_v37 = vpop.permute.xlu1 %549  ;;  %v12370_v38 = vpop.permute.xlu0 %544  ;;  %10563 = vmatprep.mubr.msk.f32.mxu0 %vm696_vm1, %v668_v33  ;;  %v12485_v33 = vld [vmem:[%s15771_s0 + $0x98] sm:$0xff] }
  0xed   :  { %16235 = vst [vmem:[#allocation20_spill] sm:$0xff] %v12368_v37  ;;  %16236 = vst [vmem:[#allocation21_spill] sm:$0xff] %v12370_v38  ;;  %v670_v41 = vmul.f32 %v12370_v38, %v12365_v34  ;;  %1524 = vperm.xlu1 %12029, %v1454_v35   ;;  %1519 = vperm.xlu0 %12028, %v1453_v36   ;;  %v671_v47 = vmul.f32 %v12368_v37, %v12378_v40  ;;  %v1466_v35 = vld [vmem:[#allocation2 + $0x2a8] sm:$0xff]  ;;  %v1465_v36 = vld [vmem:[#allocation2 + $0x2a0] sm:$0xff] }
  0xee   :  { %v2041_v37 = vld [vmem:[#allocation2 + $0x350] sm:$0xff] }
  0xef   :  { %10564 = vmatmul.mubr.msk.f32.gmra.mrb[6].mxu0 %vm696_vm1, %v669_v39 }
  0xf0   :  { %v12388_v45 = vpop.permute.xlu1 %559  ;;  %v12390_v46 = vpop.permute.xlu0 %554  ;;  %10566 = vmatprep.mubr.msk.f32.mxu0 %vm696_vm1, %v670_v41 }
  0xf1   :  { %16237 = vst [vmem:[#allocation22_spill] sm:$0xff] %v12388_v45  ;;  %16238 = vst [vmem:[#allocation23_spill] sm:$0xff] %v12390_v46  ;;  %v672_v49 = vmul.f32 %v12390_v46, %v12385_v42  ;;  %1534 = vperm.xlu1 %12029, %v1456_v43   ;;  %1529 = vperm.xlu0 %12028, %v1455_v44   ;;  %v673_v55 = vmul.f32 %v12388_v45, %v12398_v48  ;;  %v12498_v44 = vld [vmem:[%s15771_s0 + $0xa0] sm:$0xff] }
  0xf2   :  { %v2039_v45 = vld [vmem:[#allocation2 + $0x340] sm:$0xff] }
  0xf3   :  { %10567 = vmatmul.mubr.msk.f32.gmra.mrb[8].mxu0 %vm696_vm1, %v671_v47 }
  0xf4   :  { %v12408_v53 = vpop.permute.xlu1 %569  ;;  %v12410_v54 = vpop.permute.xlu0 %564  ;;  %10569 = vmatprep.mubr.msk.f32.mxu0 %vm696_vm1, %v672_v49  ;;  %v12505_v49 = vld [vmem:[%s15771_s0 + $0xa8] sm:$0xff] }
  0xf5   :  { %16239 = vst [vmem:[#allocation24_spill] sm:$0xff] %v12408_v53  ;;  %16240 = vst [vmem:[#allocation25_spill] sm:$0xff] %v12410_v54  ;;  %v674_v57 = vmul.f32 %v12410_v54, %v12405_v50  ;;  %1544 = vperm.xlu1 %12029, %v1458_v51   ;;  %1539 = vperm.xlu0 %12028, %v1457_v52   ;;  %v675_v63 = vmul.f32 %v12408_v53, %v12418_v56  ;;  %v1468_v51 = vld [vmem:[#allocation2 + $0x2b8] sm:$0xff]  ;;  %v1467_v52 = vld [vmem:[#allocation2 + $0x2b0] sm:$0xff] }
  0xf6   :  { %v2037_v53 = vld [vmem:[#allocation2 + $0x330] sm:$0xff]  ;;  %v2040_v54 = vld [vmem:[#allocation2 + $0x348] sm:$0xff] }
  0xf7   :  { %10570 = vmatmul.mubr.msk.f32.gmra.mrb[10].mxu0 %vm696_vm1, %v673_v55 }
  0xf8   :  { %v12428_v61 = vpop.permute.xlu1 %579  ;;  %v12430_v62 = vpop.permute.xlu0 %574  ;;  %10572 = vmatprep.mubr.msk.f32.mxu0 %vm696_vm1, %v674_v57 }
  0xf9   :  { %16241 = vst [vmem:[#allocation26_spill] sm:$0xff] %v12428_v61  ;;  %16242 = vst [vmem:[#allocation27_spill] sm:$0xff] %v12430_v62  ;;  %v676_v1 = vmul.f32 %v12430_v62, %v12425_v58  ;;  %1554 = vperm.xlu1 %12029, %v1460_v59   ;;  %1549 = vperm.xlu0 %12028, %v1459_v60   ;;  %v677_v10 = vmul.f32 %v12428_v61, %v12438_v0  ;;  %v12518_v60 = vld [vmem:[%s15771_s0 + $0xb0] sm:$0xff]  ;;  %v2035_v61 = vld [vmem:[#allocation2 + $0x320] sm:$0xff] }
  0xfa   :  { %v2038_v62 = vld [vmem:[#allocation2 + $0x338] sm:$0xff] }
  0xfb   :  { %10573 = vmatmul.mubr.msk.f32.gmra.mrb[12].mxu0 %vm696_vm1, %v675_v63 }
  0xfc   :  { %v12448_v6 = vpop.permute.xlu1 %589  ;;  %v12450_v8 = vpop.permute.xlu0 %584  ;;  %10575 = vmatprep.mubr.msk.f32.mxu0 %vm696_vm1, %v676_v1  ;;  %v12525_v1 = vld [vmem:[%s15771_s0 + $0xb8] sm:$0xff] }
  0xfd   :  { %16243 = vst [vmem:[#allocation28_spill] sm:$0xff] %v12448_v6  ;;  %16244 = vst [vmem:[#allocation29_spill] sm:$0xff] %v12450_v8  ;;  %v678_v12 = vmul.f32 %v12450_v8, %v12445_v2  ;;  %1564 = vperm.xlu1 %12029, %v1462_v3   ;;  %1559 = vperm.xlu0 %12028, %v1461_v4   ;;  %v679_v27 = vmul.f32 %v12448_v6, %v12458_v11  ;;  %v1470_v3 = vld [vmem:[#allocation2 + $0x2c8] sm:$0xff]  ;;  %v1469_v4 = vld [vmem:[#allocation2 + $0x2c0] sm:$0xff]  ;;  %v156_v6 = vrot.slane %v12319_v18, 7 }
  0xfe   :  { %v2036_v8 = vld [vmem:[#allocation2 + $0x328] sm:$0xff] }
  0xff   :  { %10576 = vmatmul.mubr.msk.f32.gmra.mrb[14].mxu0 %vm696_vm1, %v677_v10 }
 0x100   :  { %v12468_v24 = vpop.permute.xlu1 %599  ;;  %v12470_v26 = vpop.permute.xlu0 %594  ;;  %10578 = vmatprep.mubr.msk.f32.mxu0 %vm696_vm1, %v678_v12 }
 0x101   :  { %16245 = vst [vmem:[#allocation30_spill] sm:$0xff] %v12468_v24  ;;  %16246 = vst [vmem:[#allocation31_spill] sm:$0xff] %v12470_v26  ;;  %v680_v31 = vmul.f32 %v12470_v26, %v12465_v17  ;;  %1574 = vperm.xlu1 %12029, %v1464_v19   ;;  %1569 = vperm.xlu0 %12028, %v1463_v20   ;;  %v681_v43 = vmul.f32 %v12468_v24, %v12478_v28  ;;  %v12538_v20 = vld [vmem:[%s15771_s0 + $0xc0] sm:$0xff]  ;;  %v2034_v24 = vld [vmem:[#allocation2 + $0x318] sm:$0xff] }
 0x102   :  { %v2033_v26 = vld [vmem:[#allocation2 + $0x310] sm:$0xff] }
 0x103   :  { %10579 = vmatmul.mubr.msk.f32.gmra.mrb[16].mxu0 %vm696_vm1, %v679_v27 }
 0x104   :  { %v12488_v39 = vpop.permute.xlu1 %609  ;;  %v12490_v41 = vpop.permute.xlu0 %604  ;;  %10581 = vmatprep.mubr.msk.f32.mxu0 %vm696_vm1, %v680_v31  ;;  %v12545_v31 = vld [vmem:[%s15771_s0 + $0xc8] sm:$0xff] }
 0x105   :  { %16247 = vst [vmem:[#allocation32_spill] sm:$0xff] %v12488_v39  ;;  %16248 = vst [vmem:[#allocation33_spill] sm:$0xff] %v12490_v41  ;;  %v682_v47 = vmul.f32 %v12490_v41, %v12485_v33  ;;  %1584 = vperm.xlu1 %12029, %v1466_v35   ;;  %1579 = vperm.xlu0 %12028, %v1465_v36   ;;  %v683_v59 = vmul.f32 %v12488_v39, %v12498_v44  ;;  %v1472_v35 = vld [vmem:[#allocation2 + $0x2d8] sm:$0xff]  ;;  %v1471_v36 = vld [vmem:[#allocation2 + $0x2d0] sm:$0xff]  ;;  %v152_v39 = vrot.slane %v12294_v7, 7 }
 0x106   :  { %v154_v41 = vrot.slane %v12312_v15, 7 }
 0x107   :  { %10582 = vmatmul.mubr.msk.f32.gmra.mrb[18].mxu0 %vm696_vm1, %v681_v43 }
 0x108   :  { %v12508_v55 = vpop.permute.xlu1 %619  ;;  %v12510_v57 = vpop.permute.xlu0 %614  ;;  %10584 = vmatprep.mubr.msk.f32.mxu0 %vm696_vm1, %v682_v47 }
 0x109   :  { %16249 = vst [vmem:[#allocation34_spill] sm:$0xff] %v12508_v55  ;;  %16250 = vst [vmem:[#allocation35_spill] sm:$0xff] %v12510_v57  ;;  %v684_v63 = vmul.f32 %v12510_v57, %v12505_v49  ;;  %1594 = vperm.xlu1 %12029, %v1468_v51   ;;  %1589 = vperm.xlu0 %12028, %v1467_v52   ;;  %v685_v19 = vmul.f32 %v12508_v55, %v12518_v60  ;;  %v12558_v52 = vld [vmem:[%s15771_s0 + $0xd0] sm:$0xff]  ;;  %v2032_v55 = vld [vmem:[#allocation2 + $0x308] sm:$0xff] }
 0x10a   :  { %v2031_v57 = vld [vmem:[#allocation2 + $0x300] sm:$0xff] }
 0x10b   :  { %10585 = vmatmul.mubr.msk.f32.gmra.mrb[20].mxu0 %vm696_vm1, %v683_v59 }
 0x10c   :  { %v12528_v10 = vpop.permute.xlu1 %629  ;;  %v12530_v12 = vpop.permute.xlu0 %624  ;;  %10587 = vmatprep.mubr.msk.f32.mxu0 %vm696_vm1, %v684_v63  ;;  %v12565_v63 = vld [vmem:[%s15771_s0 + $0xd8] sm:$0xff] }
 0x10d   :  { %16251 = vst [vmem:[#allocation36_spill] sm:$0xff] %v12528_v10  ;;  %16252 = vst [vmem:[#allocation37_spill] sm:$0xff] %v12530_v12  ;;  %v686_v27 = vmul.f32 %v12530_v12, %v12525_v1  ;;  %1604 = vperm.xlu1 %12029, %v1470_v3   ;;  %1599 = vperm.xlu0 %12028, %v1469_v4   ;;  %v687_v51 = vmul.f32 %v12528_v10, %v12538_v20  ;;  %v1474_v3 = vld [vmem:[#allocation2 + $0x2e8] sm:$0xff]  ;;  %v1473_v4 = vld [vmem:[#allocation2 + $0x2e0] sm:$0xff] }
 0x10e   :  { %v1476_v10 = vld [vmem:[#allocation2 + $0x2f8] sm:$0xff] }
 0x10f   :  { %10588 = vmatmul.mubr.msk.f32.gmra.mrb[22].mxu0 %vm696_vm1, %v685_v19 }
 0x110   :  { %v12548_v43 = vpop.permute.xlu1 %639  ;;  %v12550_v47 = vpop.permute.xlu0 %634  ;;  %10590 = vmatprep.mubr.msk.f32.mxu0 %vm696_vm1, %v686_v27 }
 0x111   :  { %16253 = vst [vmem:[#allocation38_spill] sm:$0xff] %v12548_v43  ;;  %16254 = vst [vmem:[#allocation39_spill] sm:$0xff] %v12550_v47  ;;  %v688_v59 = vmul.f32 %v12550_v47, %v12545_v31  ;;  %1614 = vperm.xlu1 %12029, %v1472_v35   ;;  %1609 = vperm.xlu0 %12028, %v1471_v36   ;;  %v689_v47 = vmul.f32 %v12548_v43, %v12558_v52  ;;  %v12578_v35 = vld [vmem:[%s15771_s0 + $0xe0] sm:$0xff] }
 0x113   :  { %10591 = vmatmul.mubr.msk.f32.gmra.mrb[24].mxu0 %vm696_vm1, %v687_v51  ;;  %v12585_v51 = vld [vmem:[%s15771_s0 + $0xe8] sm:$0xff] }
 0x114   :  { %v12568_v19 = vpop.permute.xlu1 %649  ;;  %v12570_v27 = vpop.permute.xlu0 %644  ;;  %10593 = vmatprep.mubr.msk.f32.mxu0 %vm696_vm1, %v688_v59  ;;  %v1475_v59 = vld [vmem:[#allocation2 + $0x2f0] sm:$0xff] }
 0x115   :  { %16255 = vst [vmem:[#allocation40_spill] sm:$0xff] %v12568_v19  ;;  %16256 = vst [vmem:[#allocation41_spill] sm:$0xff] %v12570_v27  ;;  %v690_v36 = vmul.f32 %v12570_v27, %v12565_v63  ;;  %1624 = vperm.xlu1 %12029, %v1474_v3   ;;  %1619 = vperm.xlu0 %12028, %v1473_v4   ;;  %v691_v27 = vmul.f32 %v12568_v19, %v12578_v35  ;;  %v12600_v4 = vld [vmem:[%s15771_s0 + $0xf0] sm:$0xff] }
 0x117   :  { %10594 = vmatmul.mubr.msk.f32.gmra.mrb[26].mxu0 %vm696_vm1, %v689_v47  ;;  %v151_v47 = vrot.slane %v12299_v9, 7 }
 0x118   :  { %v12588_v43 = vpop.permute.xlu1 %659  ;;  %v12590_v12 = vpop.permute.xlu0 %654  ;;  %10596 = vmatprep.mubr.msk.f32.mxu0 %vm696_vm1, %v690_v36 }
 0x119   :  { %16257 = vst [vmem:[#allocation42_spill] sm:$0xff] %v12588_v43  ;;  %16258 = vst [vmem:[#allocation43_spill] sm:$0xff] %v12590_v12  ;;  %v692_v3 = vmul.f32 %v12590_v12, %v12585_v51  ;;  %1634 = vperm.xlu1 %12029, %v1476_v10   ;;  %1629 = vperm.xlu0 %12028, %v1475_v59   ;;  %v693_v10 = vmul.f32 %v12588_v43, %v12600_v4  ;;  %v12613_v12 = vsel %vm150_vm3, 0.0, %v151_v47 }
 0x11a   :  { %v12636_v43 = vsel %vm150_vm3, %v154_v41, %v156_v6 }
 0x11b   :  { %10597 = vmatmul.mubr.msk.f32.gmra.mrb[28].mxu0 %vm696_vm1, %v691_v27  ;;  %v12617_v27 = vsel %vm150_vm3, %v151_v47, %v152_v39  ;;  %v12632_v47 = vsel %vm150_vm3, %v152_v39, %v154_v41 }
 0x11c   :  { %v12605_v36 = vpop.permute.xlu1 %283  ;;  %v279_v19 = vpop.permute.xlu0 %278  ;;  %10599 = vmatprep.mubr.msk.f32.mxu0 %vm696_vm1, %v692_v3 }
 0x11d   :  { %16259 = vst [vmem:[#allocation44_spill] sm:$0xff] %v12605_v36  ;;  %v12610_v59 = vmul.f32 0.0, %v279_v19  ;;  %2070 = vperm.xlu1 %12029, %v2032_v55   ;;  %2065 = vperm.xlu0 %12028, %v2031_v57   ;;  %v437_v55 = vmul.f32 %v12605_v36, %v12613_v12  ;;  %v12640_v36 = vld [vmem:[#allocation4 + $0xc] sm:$0x7] }
 0x11f   :  { %16260 = vst [vmem:[#allocation45_spill] sm:$0xff] %v12610_v59  ;;  %10600 = vmatmul.mubr.msk.f32.gmra.mrb[30].mxu0 %vm696_vm1, %v693_v10  ;;  %v158_v10 = vrot.slane %v12336_v25, 7 }
 0x120   :  { %v12621_v3 = vpop.permute.xlu1 %293  ;;  %v12623_v19 = vpop.permute.xlu0 %288  ;;  %10604 = vmatprep.mubr.msk.f32.mxu0 %vm696_vm1, %v12610_v59  ;;  %v160_v59 = vrot.slane %v12343_v16, 7 }
 0x121   :  { %16261 = vst [vmem:[#allocation46_spill] sm:$0xff] %v12621_v3  ;;  %16262 = vst [vmem:[#allocation47_spill] sm:$0xff] %v12623_v19  ;;  %v438_v57 = vmul.f32 %v12623_v19, %v12617_v27  ;;  %2080 = vperm.xlu1 %12029, %v2034_v24   ;;  %2075 = vperm.xlu0 %12028, %v2033_v26   ;;  %v439_v39 = vmul.f32 %v12621_v3, %v12632_v47  ;;  %v162_v19 = vrot.slane %v12358_v32, 7 }
 0x122   :  { %v166_v3 = vrot.slane %v12378_v40, 7 }
 0x123   :  { %10605 = vmatmul.mubr.msk.f32.vlgmr.msra.gmra.mrb[0].mxu0 %vm696_vm1, %v437_v55  ;;  %v12654_v55 = vsel %vm150_vm3, %v156_v6, %v158_v10 }
 0x124   :  { %10653 = vmatpush3.msk.msra.mxu0 %vm793_vm0, %v12322_v21  ;;  %v12644_v24 = vpop.permute.xlu1 %303  ;;  %v12646_v26 = vpop.permute.xlu0 %298  ;;  %10607 = vmatprep.mubr.msk.f32.mxu0 %vm696_vm1, %v438_v57  ;;  %v12658_v21 = vsel %vm150_vm3, %v158_v10, %v160_v59  ;;  %v164_v57 = vrot.slane %v12365_v34, 7  ;;  %v12674_v10 = vsel %vm150_vm3, %v160_v59, %v162_v19 }
 0x125   :  { %16263 = vst [vmem:[#allocation48_spill] sm:$0xff] %v12644_v24  ;;  %16264 = vst [vmem:[#allocation49_spill] sm:$0xff] %v12646_v26  ;;  %v440_v41 = vmul.f32 %v12646_v26, %v12636_v43  ;;  %2090 = vperm.xlu1 %12029, %v2036_v8   ;;  %2085 = vperm.xlu0 %12028, %v2035_v61   ;;  %v441_v6 = vmul.f32 %v12644_v24, %v12654_v55 }
 0x126   :  { %10702 = vmatprep.subr.msk.mxu0 %vm793_vm0, %v12640_v36  ;;  %v12692_v59 = vsel %vm150_vm3, %v164_v57, %v166_v3 }
 0x127   :  { %10608 = vmatmul.mubr.msk.f32.gmra.mrb[2].mxu0 %vm696_vm1, %v439_v39  ;;  %v12678_v39 = vsel %vm150_vm3, %v162_v19, %v164_v57  ;;  %v170_v19 = vrot.slane %v12398_v48, 7  ;;  %v174_v57 = vrot.slane %v12418_v56, 7 }
 0x128   :  { %v12664_v26 = vpop.permute.xlu1 %313  ;;  %v12666_v61 = vpop.permute.xlu0 %308  ;;  %10610 = vmatprep.mubr.msk.f32.mxu0 %vm696_vm1, %v440_v41  ;;  %v168_v41 = vrot.slane %v12385_v42, 7 }
 0x129   :  { %16265 = vst [vmem:[#allocation50_spill] sm:$0xff] %v12664_v26  ;;  %16266 = vst [vmem:[#allocation51_spill] sm:$0xff] %v12666_v61  ;;  %v442_v8 = vmul.f32 %v12666_v61, %v12658_v21  ;;  %2100 = vperm.xlu1 %12029, %v2038_v62   ;;  %2095 = vperm.xlu0 %12028, %v2037_v53   ;;  %v443_v53 = vmul.f32 %v12664_v26, %v12674_v10  ;;  %v2042_v61 = vld [vmem:[#allocation2 + $0x358] sm:$0xff] }
 0x12b   :  { %10611 = vmatmul.mubr.msk.f32.gmra.mrb[4].mxu0 %vm696_vm1, %v441_v6  ;;  %v12696_v6 = vsel %vm150_vm3, %v166_v3, %v168_v41  ;;  %v12710_v3 = vsel %vm150_vm3, %v168_v41, %v170_v19 }
 0x12c   :  { %v12682_v24 = vpop.permute.xlu1 %323  ;;  %v12684_v46 = vpop.permute.xlu0 %318  ;;  %10613 = vmatprep.mubr.msk.f32.mxu0 %vm696_vm1, %v442_v8  ;;  %v172_v8 = vrot.slane %v12405_v50, 7 }
 0x12d   :  { %16267 = vst [vmem:[#allocation52_spill] sm:$0xff] %v12682_v24  ;;  %16268 = vst [vmem:[#allocation53_spill] sm:$0xff] %v12684_v46  ;;  %v444_v62 = vmul.f32 %v12684_v46, %v12678_v39  ;;  %2110 = vperm.xlu1 %12029, %v2040_v54   ;;  %2105 = vperm.xlu0 %12028, %v2039_v45   ;;  %v445_v45 = vmul.f32 %v12682_v24, %v12692_v59  ;;  %v2044_v46 = vld [vmem:[#allocation2 + $0x368] sm:$0xff] }
 0x12e   :  { %v12728_v41 = vsel %vm150_vm3, %v172_v8, %v174_v57 }
 0x12f   :  { %10614 = vmatmul.mubr.msk.f32.gmra.mrb[6].mxu0 %vm696_vm1, %v443_v53  ;;  %v12714_v53 = vsel %vm150_vm3, %v170_v19, %v172_v8  ;;  %16273 = vst [vmem:[#allocation58_spill] sm:$0xff] %v12728_v41  ;;  %v178_v19 = vrot.slane %v12438_v0, 7 }
 0x130   :  { %v12700_v26 = vpop.permute.xlu1 %333  ;;  %v12702_v38 = vpop.permute.xlu0 %328  ;;  %10616 = vmatprep.mubr.msk.f32.mxu0 %vm696_vm1, %v444_v62  ;;  %v176_v62 = vrot.slane %v12425_v58, 7 }
 0x131   :  { %16269 = vst [vmem:[#allocation54_spill] sm:$0xff] %v12700_v26  ;;  %16270 = vst [vmem:[#allocation55_spill] sm:$0xff] %v12702_v38  ;;  %v446_v54 = vmul.f32 %v12702_v38, %v12696_v6  ;;  %2120 = vperm.xlu1 %12029, %v2042_v61   ;;  %2115 = vperm.xlu0 %12028, %v2041_v37   ;;  %v447_v37 = vmul.f32 %v12700_v26, %v12710_v3  ;;  %v2046_v38 = vld [vmem:[#allocation2 + $0x378] sm:$0xff] }
 0x132   :  { %v12746_v8 = vsel %vm150_vm3, %v176_v62, %v178_v19 }
 0x133   :  { %10617 = vmatmul.mubr.msk.f32.gmra.mrb[8].mxu0 %vm696_vm1, %v445_v45  ;;  %v12732_v45 = vsel %vm150_vm3, %v174_v57, %v176_v62  ;;  %16277 = vst [vmem:[#allocation62_spill] sm:$0xff] %v12746_v8  ;;  %v182_v57 = vrot.slane %v12458_v11, 7 }
 0x134   :  { %v12718_v24 = vpop.permute.xlu1 %343  ;;  %v12720_v30 = vpop.permute.xlu0 %338  ;;  %10619 = vmatprep.mubr.msk.f32.mxu0 %vm696_vm1, %v446_v54  ;;  %16274 = vst [vmem:[#allocation59_spill] sm:$0xff] %v12732_v45  ;;  %v180_v54 = vrot.slane %v12445_v2, 7 }
 0x135   :  { %16271 = vst [vmem:[#allocation56_spill] sm:$0xff] %v12718_v24  ;;  %16272 = vst [vmem:[#allocation57_spill] sm:$0xff] %v12720_v30  ;;  %v448_v61 = vmul.f32 %v12720_v30, %v12714_v53  ;;  %2130 = vperm.xlu1 %12029, %v2044_v46   ;;  %2125 = vperm.xlu0 %12028, %v2043_v29   ;;  %v449_v29 = vmul.f32 %v12718_v24, %v12728_v41  ;;  %v2048_v30 = vld [vmem:[#allocation2 + $0x388] sm:$0xff] }
 0x136   :  { %v12764_v62 = vsel %vm150_vm3, %v180_v54, %v182_v57 }
 0x137   :  { %10620 = vmatmul.mubr.msk.f32.gmra.mrb[10].mxu0 %vm696_vm1, %v447_v37  ;;  %v12750_v37 = vsel %vm150_vm3, %v178_v19, %v180_v54  ;;  %16281 = vst [vmem:[#allocation66_spill] sm:$0xff] %v12764_v62  ;;  %v186_v19 = vrot.slane %v12478_v28, 7 }
 0x138   :  { %v12736_v26 = vpop.permute.xlu1 %353  ;;  %v12738_v23 = vpop.permute.xlu0 %348  ;;  %10622 = vmatprep.mubr.msk.f32.mxu0 %vm696_vm1, %v448_v61  ;;  %16278 = vst [vmem:[#allocation63_spill] sm:$0xff] %v12750_v37  ;;  %v184_v61 = vrot.slane %v12465_v17, 7 }
 0x139   :  { %16275 = vst [vmem:[#allocation60_spill] sm:$0xff] %v12736_v26  ;;  %16276 = vst [vmem:[#allocation61_spill] sm:$0xff] %v12738_v23  ;;  %v450_v46 = vmul.f32 %v12738_v23, %v12732_v45  ;;  %2140 = vperm.xlu1 %12029, %v2046_v38   ;;  %2135 = vperm.xlu0 %12028, %v2045_v22   ;;  %v451_v22 = vmul.f32 %v12736_v26, %v12746_v8  ;;  %v2050_v23 = vld [vmem:[#allocation2 + $0x398] sm:$0xff] }
 0x13a   :  { %v12782_v54 = vsel %vm150_vm3, %v184_v61, %v186_v19 }
 0x13b   :  { %10623 = vmatmul.mubr.msk.f32.gmra.mrb[12].mxu0 %vm696_vm1, %v449_v29  ;;  %v12768_v29 = vsel %vm150_vm3, %v182_v57, %v184_v61  ;;  %16285 = vst [vmem:[#allocation70_spill] sm:$0xff] %v12782_v54  ;;  %v190_v57 = vrot.slane %v12498_v44, 7 }
 0x13c   :  { %v12754_v24 = vpop.permute.xlu1 %363  ;;  %v12756_v5 = vpop.permute.xlu0 %358  ;;  %10625 = vmatprep.mubr.msk.f32.mxu0 %vm696_vm1, %v450_v46  ;;  %16282 = vst [vmem:[#allocation67_spill] sm:$0xff] %v12768_v29  ;;  %v188_v46 = vrot.slane %v12485_v33, 7 }
 0x13d   :  { %16279 = vst [vmem:[#allocation64_spill] sm:$0xff] %v12754_v24  ;;  %16280 = vst [vmem:[#allocation65_spill] sm:$0xff] %v12756_v5  ;;  %v452_v38 = vmul.f32 %v12756_v5, %v12750_v37  ;;  %2150 = vperm.xlu1 %12029, %v2048_v30   ;;  %2145 = vperm.xlu0 %12028, %v2047_v13   ;;  %v453_v13 = vmul.f32 %v12754_v24, %v12764_v62  ;;  %v2052_v5 = vld [vmem:[#allocation2 + $0x3a8] sm:$0xff]  ;;  %v2051_v37 = vld [vmem:[#allocation2 + $0x3a0] sm:$0xff] }
 0x13e   :  { %v12800_v61 = vsel %vm150_vm3, %v188_v46, %v190_v57 }
 0x13f   :  { %10626 = vmatmul.mubr.msk.f32.gmra.mrb[14].mxu0 %vm696_vm1, %v451_v22  ;;  %v12786_v22 = vsel %vm150_vm3, %v186_v19, %v188_v46  ;;  %16289 = vst [vmem:[#allocation74_spill] sm:$0xff] %v12800_v61  ;;  %v194_v19 = vrot.slane %v12518_v60, 7 }
 0x140   :  { %v12772_v26 = vpop.permute.xlu1 %373  ;;  %v12774_v8 = vpop.permute.xlu0 %368  ;;  %10628 = vmatprep.mubr.msk.f32.mxu0 %vm696_vm1, %v452_v38  ;;  %16286 = vst [vmem:[#allocation71_spill] sm:$0xff] %v12786_v22  ;;  %v192_v38 = vrot.slane %v12505_v49, 7 }
 0x141   :  { %16283 = vst [vmem:[#allocation68_spill] sm:$0xff] %v12772_v26  ;;  %16284 = vst [vmem:[#allocation69_spill] sm:$0xff] %v12774_v8  ;;  %v454_v30 = vmul.f32 %v12774_v8, %v12768_v29  ;;  %2160 = vperm.xlu1 %12029, %v2050_v23   ;;  %2155 = vperm.xlu0 %12028, %v2049_v14   ;;  %v455_v14 = vmul.f32 %v12772_v26, %v12782_v54  ;;  %v2054_v8 = vld [vmem:[#allocation2 + $0x3b8] sm:$0xff]  ;;  %v2053_v29 = vld [vmem:[#allocation2 + $0x3b0] sm:$0xff] }
 0x142   :  { %v12818_v46 = vsel %vm150_vm3, %v192_v38, %v194_v19 }
 0x143   :  { %10629 = vmatmul.mubr.msk.f32.gmra.mrb[16].mxu0 %vm696_vm1, %v453_v13  ;;  %v12804_v13 = vsel %vm150_vm3, %v190_v57, %v192_v38  ;;  %16293 = vst [vmem:[#allocation78_spill] sm:$0xff] %v12818_v46  ;;  %v198_v57 = vrot.slane %v12538_v20, 7 }
 0x144   :  { %v12790_v24 = vpop.permute.xlu1 %383  ;;  %v12792_v62 = vpop.permute.xlu0 %378  ;;  %10631 = vmatprep.mubr.msk.f32.mxu0 %vm696_vm1, %v454_v30  ;;  %16290 = vst [vmem:[#allocation75_spill] sm:$0xff] %v12804_v13  ;;  %v196_v30 = vrot.slane %v12525_v1, 7 }
 0x145   :  { %16287 = vst [vmem:[#allocation72_spill] sm:$0xff] %v12790_v24  ;;  %16288 = vst [vmem:[#allocation73_spill] sm:$0xff] %v12792_v62  ;;  %v456_v23 = vmul.f32 %v12792_v62, %v12786_v22  ;;  %2170 = vperm.xlu1 %12029, %v2052_v5   ;;  %2165 = vperm.xlu0 %12028, %v2051_v37   ;;  %v457_v5 = vmul.f32 %v12790_v24, %v12800_v61  ;;  %v2056_v62 = vld [vmem:[#allocation2 + $0x3c8] sm:$0xff]  ;;  %v2055_v22 = vld [vmem:[#allocation2 + $0x3c0] sm:$0xff] }
 0x146   :  { %v12836_v38 = vsel %vm150_vm3, %v196_v30, %v198_v57 }
 0x147   :  { %10632 = vmatmul.mubr.msk.f32.gmra.mrb[18].mxu0 %vm696_vm1, %v455_v14  ;;  %v12822_v14 = vsel %vm150_vm3, %v194_v19, %v196_v30  ;;  %16297 = vst [vmem:[#allocation82_spill] sm:$0xff] %v12836_v38  ;;  %v202_v19 = vrot.slane %v12558_v52, 7 }
 0x148   :  { %v12808_v26 = vpop.permute.xlu1 %393  ;;  %v12810_v54 = vpop.permute.xlu0 %388  ;;  %10634 = vmatprep.mubr.msk.f32.mxu0 %vm696_vm1, %v456_v23  ;;  %16294 = vst [vmem:[#allocation79_spill] sm:$0xff] %v12822_v14  ;;  %v200_v23 = vrot.slane %v12545_v31, 7 }
 0x149   :  { %16291 = vst [vmem:[#allocation76_spill] sm:$0xff] %v12808_v26  ;;  %16292 = vst [vmem:[#allocation77_spill] sm:$0xff] %v12810_v54  ;;  %v458_v37 = vmul.f32 %v12810_v54, %v12804_v13  ;;  %2180 = vperm.xlu1 %12029, %v2054_v8   ;;  %2175 = vperm.xlu0 %12028, %v2053_v29   ;;  %v459_v8 = vmul.f32 %v12808_v26, %v12818_v46  ;;  %v2058_v54 = vld [vmem:[#allocation2 + $0x3d8] sm:$0xff]  ;;  %v2057_v13 = vld [vmem:[#allocation2 + $0x3d0] sm:$0xff] }
 0x14a   :  { %v12854_v30 = vsel %vm150_vm3, %v200_v23, %v202_v19 }
 0x14b   :  { %10635 = vmatmul.mubr.msk.f32.gmra.mrb[20].mxu0 %vm696_vm1, %v457_v5  ;;  %v12840_v5 = vsel %vm150_vm3, %v198_v57, %v200_v23  ;;  %16301 = vst [vmem:[#allocation86_spill] sm:$0xff] %v12854_v30  ;;  %v206_v57 = vrot.slane %v12578_v35, 7 }
 0x14c   :  { %v12826_v24 = vpop.permute.xlu1 %403  ;;  %v12828_v61 = vpop.permute.xlu0 %398  ;;  %10637 = vmatprep.mubr.msk.f32.mxu0 %vm696_vm1, %v458_v37  ;;  %16298 = vst [vmem:[#allocation83_spill] sm:$0xff] %v12840_v5  ;;  %v204_v37 = vrot.slane %v12565_v63, 7 }
 0x14d   :  { %16295 = vst [vmem:[#allocation80_spill] sm:$0xff] %v12826_v24  ;;  %16296 = vst [vmem:[#allocation81_spill] sm:$0xff] %v12828_v61  ;;  %v460_v29 = vmul.f32 %v12828_v61, %v12822_v14  ;;  %2190 = vperm.xlu1 %12029, %v2056_v62   ;;  %2185 = vperm.xlu0 %12028, %v2055_v22   ;;  %v461_v62 = vmul.f32 %v12826_v24, %v12836_v38  ;;  %v2060_v61 = vld [vmem:[#allocation2 + $0x3e8] sm:$0xff]  ;;  %v2059_v14 = vld [vmem:[#allocation2 + $0x3e0] sm:$0xff] }
 0x14e   :  { %v12872_v23 = vsel %vm150_vm3, %v204_v37, %v206_v57 }
 0x14f   :  { %10638 = vmatmul.mubr.msk.f32.gmra.mrb[22].mxu0 %vm696_vm1, %v459_v8  ;;  %v12858_v8 = vsel %vm150_vm3, %v202_v19, %v204_v37  ;;  %16305 = vst [vmem:[#allocation90_spill] sm:$0xff] %v12872_v23  ;;  %v15866_v19 = vrot.slane %v12600_v4, 7  ;;  %v1349_v37 = vrot.slane %v12294_v7, 1 }
 0x150   :  { %v12844_v26 = vpop.permute.xlu1 %413  ;;  %v12846_v46 = vpop.permute.xlu0 %408  ;;  %10640 = vmatprep.mubr.msk.f32.mxu0 %vm696_vm1, %v460_v29  ;;  %16302 = vst [vmem:[#allocation87_spill] sm:$0xff] %v12858_v8  ;;  %v208_v29 = vrot.slane %v12585_v51, 7 }
 0x151   :  { %16299 = vst [vmem:[#allocation84_spill] sm:$0xff] %v12844_v26  ;;  %16300 = vst [vmem:[#allocation85_spill] sm:$0xff] %v12846_v46  ;;  %v462_v22 = vmul.f32 %v12846_v46, %v12840_v5  ;;  %2200 = vperm.xlu1 %12029, %v2058_v54   ;;  %2195 = vperm.xlu0 %12028, %v2057_v13   ;;  %v463_v54 = vmul.f32 %v12844_v26, %v12854_v30  ;;  %v2062_v46 = vld [vmem:[#allocation2 + $0x3f8] sm:$0xff]  ;;  %v2061_v5 = vld [vmem:[#allocation2 + $0x3f0] sm:$0xff] }
 0x153   :  { %10641 = vmatmul.mubr.msk.f32.gmra.mrb[24].mxu0 %vm696_vm1, %v461_v62  ;;  %v12876_v62 = vsel %vm150_vm3, %v206_v57, %v208_v29 }
 0x154   :  { %v12862_v24 = vpop.permute.xlu1 %423  ;;  %v12864_v38 = vpop.permute.xlu0 %418  ;;  %10643 = vmatprep.mubr.msk.f32.mxu0 %vm696_vm1, %v462_v22  ;;  %16306 = vst [vmem:[#allocation91_spill] sm:$0xff] %v12876_v62  ;;  %v1348_v22 = vrot.slane %v12299_v9, 1  ;;  %v12892_v9 = vsel %vm150_vm3, %v208_v29, %v15866_v19  ;;  %v2616_v19 = vld [vmem:[#allocation2 + $0x410] sm:$0xff] }
 0x155   :  { %16303 = vst [vmem:[#allocation88_spill] sm:$0xff] %v12862_v24  ;;  %16304 = vst [vmem:[#allocation89_spill] sm:$0xff] %v12864_v38  ;;  %v464_v13 = vmul.f32 %v12864_v38, %v12858_v8  ;;  %2210 = vperm.xlu1 %12029, %v2060_v61   ;;  %2205 = vperm.xlu0 %12028, %v2059_v14   ;;  %v465_v61 = vmul.f32 %v12862_v24, %v12872_v23  ;;  %v2614_v8 = vld [vmem:[#allocation2 + $0x400] sm:$0xff] }
 0x156   :  { %v1443_v57 = vsel %vm1347_vm4, 0.0, %v1348_v22  ;;  %v12907_v7 = vsel %vm1347_vm4, %v1348_v22, %v1349_v37 }
 0x157   :  { %10644 = vmatmul.mubr.msk.f32.gmra.mrb[26].mxu0 %vm696_vm1, %v463_v54  ;;  %v2615_v54 = vld [vmem:[#allocation2 + $0x408] sm:$0xff] }
 0x158   :  { %v12880_v26 = vpop.permute.xlu1 %433  ;;  %v12882_v38 = vpop.permute.xlu0 %428  ;;  %10646 = vmatprep.mubr.msk.f32.mxu0 %vm696_vm1, %v464_v13  ;;  %v1351_v13 = vrot.slane %v12312_v15, 1  ;;  %v1353_v15 = vrot.slane %v12319_v18, 1 }
 0x159   :  { %16307 = vst [vmem:[#allocation92_spill] sm:$0xff] %v12880_v26  ;;  %16308 = vst [vmem:[#allocation93_spill] sm:$0xff] %v12882_v38  ;;  %v466_v14 = vmul.f32 %v12882_v38, %v12876_v62  ;;  %2220 = vperm.xlu1 %12029, %v2062_v46   ;;  %2215 = vperm.xlu0 %12028, %v2061_v5   ;;  %v467_v46 = vmul.f32 %v12880_v26, %v12892_v9  ;;  %v1355_v62 = vrot.slane %v12336_v25, 1 }
 0x15a   :  { %v12911_v29 = vsel %vm1347_vm4, %v1349_v37, %v1351_v13  ;;  %v12925_v22 = vsel %vm1347_vm4, %v1351_v13, %v1353_v15  ;;  %v1357_v25 = vrot.slane %v12343_v16, 1 }
 0x15b   :  { %10647 = vmatmul.mubr.msk.f32.gmra.mrb[28].mxu0 %vm696_vm1, %v465_v61  ;;  %v2617_v61 = vld [vmem:[#allocation2 + $0x418] sm:$0xff]  ;;  %v12929_v37 = vsel %vm1347_vm4, %v1353_v15, %v1355_v62 }
 0x15c   :  { %v12898_v24 = vpop.permute.xlu1 %1484  ;;  %v12900_v38 = vpop.permute.xlu0 %1479  ;;  %10649 = vmatprep.mubr.msk.f32.mxu0 %vm696_vm1, %v466_v14 }
 0x15d   :  { %16309 = vst [vmem:[#allocation94_spill] sm:$0xff] %v12898_v24  ;;  %16310 = vst [vmem:[#allocation95_spill] sm:$0xff] %v12900_v38  ;;  %v1637_v5 = vmul.f32 %v12900_v38, %v1443_v57  ;;  %2653 = vperm.xlu1 %12029, %v2615_v54   ;;  %2648 = vperm.xlu0 %12028, %v2614_v8   ;;  %v1638_v8 = vmul.f32 %v12898_v24, %v12907_v7  ;;  %v2619_v57 = vld [vmem:[#allocation2 + $0x428] sm:$0xff]  ;;  %v2618_v54 = vld [vmem:[#allocation2 + $0x420] sm:$0xff] }
 0x15e   :  { %v2644_v38 = vld [vmem:[#allocation2 + $0x4f0] sm:$0xff] }
 0x15f   :  { %10650 = vmatmul.mubr.msk.f32.gmra.mrb[30].mxu0 %vm696_vm1, %v467_v46  ;;  %v1359_v46 = vrot.slane %v12358_v32, 1  ;;  %v12947_v32 = vsel %vm1347_vm4, %v1355_v62, %v1357_v25 }
 0x160   :  { %v12915_v14 = vpop.permute.xlu1 %1494  ;;  %v12917_v26 = vpop.permute.xlu0 %1489  ;;  %10654 = vmatprep.mubr.msk.f32.mxu0 %vm696_vm1, %v1637_v5  ;;  %v12933_v5 = vld [vmem:[#allocation4 + $0x10] sm:$0x7] }
 0x161   :  { %16311 = vst [vmem:[#allocation96_spill] sm:$0xff] %v12915_v14  ;;  %16312 = vst [vmem:[#allocation97_spill] sm:$0xff] %v12917_v26  ;;  %v1639_v18 = vmul.f32 %v12917_v26, %v12911_v29  ;;  %2663 = vperm.xlu1 %12029, %v2617_v61   ;;  %2658 = vperm.xlu0 %12028, %v2616_v19   ;;  %v1640_v16 = vmul.f32 %v12915_v14, %v12925_v22  ;;  %v1361_v61 = vrot.slane %v12365_v34, 1  ;;  %v2620_v26 = vld [vmem:[#allocation2 + $0x430] sm:$0xff]  ;;  %v2622_v14 = vld [vmem:[#allocation2 + $0x440] sm:$0xff] }
 0x163   :  { %10655 = vmatmul.mubr.msk.f32.vlgmr.msra.gmra.mrb[0].mxu0 %vm696_vm1, %v1638_v8  ;;  %v2621_v8 = vld [vmem:[#allocation2 + $0x438] sm:$0xff] }
 0x164   :  { %10703 = vmatpush3.msk.msra.mxu0 %vm793_vm0, %v12640_v36  ;;  %v12937_v19 = vpop.permute.xlu1 %1504  ;;  %v12939_v13 = vpop.permute.xlu0 %1499  ;;  %10657 = vmatprep.mubr.msk.f32.mxu0 %vm696_vm1, %v1639_v18  ;;  %v12951_v36 = vsel %vm1347_vm4, %v1357_v25, %v1359_v46  ;;  %v1363_v18 = vrot.slane %v12378_v40, 1  ;;  %v12967_v40 = vsel %vm1347_vm4, %v1359_v46, %v1361_v61  ;;  %v1365_v25 = vrot.slane %v12385_v42, 1 }
 0x165   :  { %16313 = vst [vmem:[#allocation98_spill] sm:$0xff] %v12937_v19  ;;  %16314 = vst [vmem:[#allocation99_spill] sm:$0xff] %v12939_v13  ;;  %v1641_v15 = vmul.f32 %v12939_v13, %v12929_v37  ;;  %2673 = vperm.xlu1 %12029, %v2619_v57   ;;  %2668 = vperm.xlu0 %12028, %v2618_v54   ;;  %v1642_v34 = vmul.f32 %v12937_v19, %v12947_v32 }
 0x166   :  { %10752 = vmatprep.subr.msk.mxu0 %vm793_vm0, %v12933_v5  ;;  %v12971_v54 = vsel %vm1347_vm4, %v1361_v61, %v1363_v18  ;;  %v12985_v46 = vsel %vm1347_vm4, %v1363_v18, %v1365_v25 }
 0x167   :  { %10658 = vmatmul.mubr.msk.f32.gmra.mrb[2].mxu0 %vm696_vm1, %v1640_v16  ;;  %v2623_v16 = vld [vmem:[#allocation2 + $0x448] sm:$0xff] }
 0x168   :  { %v12957_v13 = vpop.permute.xlu1 %1514  ;;  %v12959_v57 = vpop.permute.xlu0 %1509  ;;  %10660 = vmatprep.mubr.msk.f32.mxu0 %vm696_vm1, %v1641_v15  ;;  %v1367_v15 = vrot.slane %v12398_v48, 1  ;;  %v1369_v48 = vrot.slane %v12405_v50, 1 }
 0x169   :  { %16315 = vst [vmem:[#allocation100_spill] sm:$0xff] %v12957_v13  ;;  %16316 = vst [vmem:[#allocation101_spill] sm:$0xff] %v12959_v57  ;;  %v1643_v62 = vmul.f32 %v12959_v57, %v12951_v36  ;;  %2683 = vperm.xlu1 %12029, %v2621_v8   ;;  %2678 = vperm.xlu0 %12028, %v2620_v26   ;;  %v1644_v26 = vmul.f32 %v12957_v13, %v12967_v40  ;;  %v2625_v8 = vld [vmem:[#allocation2 + $0x458] sm:$0xff] }
 0x16a   :  { %v12989_v61 = vsel %vm1347_vm4, %v1365_v25, %v1367_v15  ;;  %v13003_v18 = vsel %vm1347_vm4, %v1367_v15, %v1369_v48 }
 0x16b   :  { %10661 = vmatmul.mubr.msk.f32.gmra.mrb[4].mxu0 %vm696_vm1, %v1642_v34  ;;  %v2624_v34 = vld [vmem:[#allocation2 + $0x450] sm:$0xff] }
 0x16c   :  { %v12975_v19 = vpop.permute.xlu1 %1524  ;;  %v12977_v24 = vpop.permute.xlu0 %1519  ;;  %10663 = vmatprep.mubr.msk.f32.mxu0 %vm696_vm1, %v1643_v62  ;;  %v1371_v62 = vrot.slane %v12418_v56, 1  ;;  %v1373_v56 = vrot.slane %v12425_v58, 1 }
 0x16d   :  { %16317 = vst [vmem:[#allocation102_spill] sm:$0xff] %v12975_v19  ;;  %16318 = vst [vmem:[#allocation103_spill] sm:$0xff] %v12977_v24  ;;  %v1645_v42 = vmul.f32 %v12977_v24, %v12971_v54  ;;  %2693 = vperm.xlu1 %12029, %v2623_v16   ;;  %2688 = vperm.xlu0 %12028, %v2622_v14   ;;  %v1646_v14 = vmul.f32 %v12975_v19, %v12985_v46  ;;  %v2627_v16 = vld [vmem:[#allocation2 + $0x468] sm:$0xff] }
 0x16e   :  { %v13007_v25 = vsel %vm1347_vm4, %v1369_v48, %v1371_v62  ;;  %v13021_v48 = vsel %vm1347_vm4, %v1371_v62, %v1373_v56 }
 0x16f   :  { %10664 = vmatmul.mubr.msk.f32.gmra.mrb[6].mxu0 %vm696_vm1, %v1644_v26  ;;  %v2626_v26 = vld [vmem:[#allocation2 + $0x460] sm:$0xff] }
 0x170   :  { %v12993_v13 = vpop.permute.xlu1 %1534  ;;  %v12995_v57 = vpop.permute.xlu0 %1529  ;;  %10666 = vmatprep.mubr.msk.f32.mxu0 %vm696_vm1, %v1645_v42  ;;  %v1375_v42 = vrot.slane %v12438_v0, 1  ;;  %v1377_v0 = vrot.slane %v12445_v2, 1 }
 0x171   :  { %16319 = vst [vmem:[#allocation104_spill] sm:$0xff] %v12993_v13  ;;  %16320 = vst [vmem:[#allocation105_spill] sm:$0xff] %v12995_v57  ;;  %v1647_v50 = vmul.f32 %v12995_v57, %v12989_v61  ;;  %2703 = vperm.xlu1 %12029, %v2625_v8   ;;  %2698 = vperm.xlu0 %12028, %v2624_v34   ;;  %v1648_v15 = vmul.f32 %v12993_v13, %v13003_v18  ;;  %v2629_v34 = vld [vmem:[#allocation2 + $0x478] sm:$0xff] }
 0x172   :  { %v13025_v8 = vsel %vm1347_vm4, %v1373_v56, %v1375_v42  ;;  %v13039_v56 = vsel %vm1347_vm4, %v1375_v42, %v1377_v0 }
 0x173   :  { %10667 = vmatmul.mubr.msk.f32.gmra.mrb[8].mxu0 %vm696_vm1, %v1646_v14  ;;  %v2628_v14 = vld [vmem:[#allocation2 + $0x470] sm:$0xff] }
 0x174   :  { %v13011_v19 = vpop.permute.xlu1 %1544  ;;  %v13013_v24 = vpop.permute.xlu0 %1539  ;;  %10669 = vmatprep.mubr.msk.f32.mxu0 %vm696_vm1, %v1647_v50  ;;  %v1379_v50 = vrot.slane %v12458_v11, 1  ;;  %v1381_v11 = vrot.slane %v12465_v17, 1 }
 0x175   :  { %16321 = vst [vmem:[#allocation106_spill] sm:$0xff] %v13011_v19  ;;  %16322 = vst [vmem:[#allocation107_spill] sm:$0xff] %v13013_v24  ;;  %v1649_v58 = vmul.f32 %v13013_v24, %v13007_v25  ;;  %2713 = vperm.xlu1 %12029, %v2627_v16   ;;  %2708 = vperm.xlu0 %12028, %v2626_v26   ;;  %v1650_v62 = vmul.f32 %v13011_v19, %v13021_v48  ;;  %v2631_v26 = vld [vmem:[#allocation2 + $0x488] sm:$0xff] }
 0x176   :  { %v13043_v16 = vsel %vm1347_vm4, %v1377_v0, %v1379_v50  ;;  %v13057_v0 = vsel %vm1347_vm4, %v1379_v50, %v1381_v11 }
 0x177   :  { %10670 = vmatmul.mubr.msk.f32.gmra.mrb[10].mxu0 %vm696_vm1, %v1648_v15  ;;  %v2630_v15 = vld [vmem:[#allocation2 + $0x480] sm:$0xff] }
 0x178   :  { %v13029_v13 = vpop.permute.xlu1 %1554  ;;  %v13031_v57 = vpop.permute.xlu0 %1549  ;;  %10672 = vmatprep.mubr.msk.f32.mxu0 %vm696_vm1, %v1649_v58  ;;  %v1383_v58 = vrot.slane %v12478_v28, 1  ;;  %v1385_v28 = vrot.slane %v12485_v33, 1 }
 0x179   :  { %16323 = vst [vmem:[#allocation108_spill] sm:$0xff] %v13029_v13  ;;  %16324 = vst [vmem:[#allocation109_spill] sm:$0xff] %v13031_v57  ;;  %v1651_v2 = vmul.f32 %v13031_v57, %v13025_v8  ;;  %2723 = vperm.xlu1 %12029, %v2629_v34   ;;  %2718 = vperm.xlu0 %12028, %v2628_v14   ;;  %v1652_v42 = vmul.f32 %v13029_v13, %v13039_v56  ;;  %v2633_v14 = vld [vmem:[#allocation2 + $0x498] sm:$0xff] }
 0x17a   :  { %v13061_v34 = vsel %vm1347_vm4, %v1381_v11, %v1383_v58  ;;  %v13075_v11 = vsel %vm1347_vm4, %v1383_v58, %v1385_v28 }
 0x17b   :  { %10673 = vmatmul.mubr.msk.f32.gmra.mrb[12].mxu0 %vm696_vm1, %v1650_v62  ;;  %v2632_v62 = vld [vmem:[#allocation2 + $0x490] sm:$0xff] }
 0x17c   :  { %v13047_v19 = vpop.permute.xlu1 %1564  ;;  %v13049_v24 = vpop.permute.xlu0 %1559  ;;  %10675 = vmatprep.mubr.msk.f32.mxu0 %vm696_vm1, %v1651_v2  ;;  %v1387_v2 = vrot.slane %v12498_v44, 1  ;;  %v1389_v44 = vrot.slane %v12505_v49, 1 }
 0x17d   :  { %16325 = vst [vmem:[#allocation110_spill] sm:$0xff] %v13047_v19  ;;  %16326 = vst [vmem:[#allocation111_spill] sm:$0xff] %v13049_v24  ;;  %v1653_v17 = vmul.f32 %v13049_v24, %v13043_v16  ;;  %2733 = vperm.xlu1 %12029, %v2631_v26   ;;  %2728 = vperm.xlu0 %12028, %v2630_v15   ;;  %v1654_v50 = vmul.f32 %v13047_v19, %v13057_v0  ;;  %v2635_v15 = vld [vmem:[#allocation2 + $0x4a8] sm:$0xff] }
 0x17e   :  { %v13079_v26 = vsel %vm1347_vm4, %v1385_v28, %v1387_v2  ;;  %v13093_v28 = vsel %vm1347_vm4, %v1387_v2, %v1389_v44 }
 0x17f   :  { %10676 = vmatmul.mubr.msk.f32.gmra.mrb[14].mxu0 %vm696_vm1, %v1652_v42  ;;  %v2634_v42 = vld [vmem:[#allocation2 + $0x4a0] sm:$0xff] }
 0x180   :  { %v13065_v13 = vpop.permute.xlu1 %1574  ;;  %v13067_v57 = vpop.permute.xlu0 %1569  ;;  %10678 = vmatprep.mubr.msk.f32.mxu0 %vm696_vm1, %v1653_v17  ;;  %v1391_v17 = vrot.slane %v12518_v60, 1  ;;  %v1393_v60 = vrot.slane %v12525_v1, 1 }
 0x181   :  { %16327 = vst [vmem:[#allocation112_spill] sm:$0xff] %v13065_v13  ;;  %16328 = vst [vmem:[#allocation113_spill] sm:$0xff] %v13067_v57  ;;  %v1655_v33 = vmul.f32 %v13067_v57, %v13061_v34  ;;  %2743 = vperm.xlu1 %12029, %v2633_v14   ;;  %2738 = vperm.xlu0 %12028, %v2632_v62   ;;  %v1656_v58 = vmul.f32 %v13065_v13, %v13075_v11  ;;  %v2637_v62 = vld [vmem:[#allocation2 + $0x4b8] sm:$0xff] }
 0x182   :  { %v13097_v14 = vsel %vm1347_vm4, %v1389_v44, %v1391_v17  ;;  %v13111_v44 = vsel %vm1347_vm4, %v1391_v17, %v1393_v60 }
 0x183   :  { %10679 = vmatmul.mubr.msk.f32.gmra.mrb[16].mxu0 %vm696_vm1, %v1654_v50  ;;  %v2636_v50 = vld [vmem:[#allocation2 + $0x4b0] sm:$0xff] }
 0x184   :  { %v13083_v19 = vpop.permute.xlu1 %1584  ;;  %v13085_v24 = vpop.permute.xlu0 %1579  ;;  %10681 = vmatprep.mubr.msk.f32.mxu0 %vm696_vm1, %v1655_v33  ;;  %v1395_v33 = vrot.slane %v12538_v20, 1  ;;  %v1397_v20 = vrot.slane %v12545_v31, 1 }
 0x185   :  { %16329 = vst [vmem:[#allocation114_spill] sm:$0xff] %v13083_v19  ;;  %16330 = vst [vmem:[#allocation115_spill] sm:$0xff] %v13085_v24  ;;  %v1657_v49 = vmul.f32 %v13085_v24, %v13079_v26  ;;  %2753 = vperm.xlu1 %12029, %v2635_v15   ;;  %2748 = vperm.xlu0 %12028, %v2634_v42   ;;  %v1658_v2 = vmul.f32 %v13083_v19, %v13093_v28  ;;  %v2639_v42 = vld [vmem:[#allocation2 + $0x4c8] sm:$0xff] }
 0x186   :  { %v13115_v15 = vsel %vm1347_vm4, %v1393_v60, %v1395_v33  ;;  %v13129_v60 = vsel %vm1347_vm4, %v1395_v33, %v1397_v20 }
 0x187   :  { %10682 = vmatmul.mubr.msk.f32.gmra.mrb[18].mxu0 %vm696_vm1, %v1656_v58  ;;  %v2638_v58 = vld [vmem:[#allocation2 + $0x4c0] sm:$0xff] }
 0x188   :  { %v13101_v13 = vpop.permute.xlu1 %1594  ;;  %v13103_v57 = vpop.permute.xlu0 %1589  ;;  %10684 = vmatprep.mubr.msk.f32.mxu0 %vm696_vm1, %v1657_v49  ;;  %v1399_v49 = vrot.slane %v12558_v52, 1  ;;  %v1401_v52 = vrot.slane %v12565_v63, 1 }
 0x189   :  { %16331 = vst [vmem:[#allocation116_spill] sm:$0xff] %v13101_v13  ;;  %16332 = vst [vmem:[#allocation117_spill] sm:$0xff] %v13103_v57  ;;  %v1659_v1 = vmul.f32 %v13103_v57, %v13097_v14  ;;  %2763 = vperm.xlu1 %12029, %v2637_v62   ;;  %2758 = vperm.xlu0 %12028, %v2636_v50   ;;  %v1660_v17 = vmul.f32 %v13101_v13, %v13111_v44  ;;  %v2641_v50 = vld [vmem:[#allocation2 + $0x4d8] sm:$0xff] }
 0x18a   :  { %v13133_v62 = vsel %vm1347_vm4, %v1397_v20, %v1399_v49  ;;  %v13147_v20 = vsel %vm1347_vm4, %v1399_v49, %v1401_v52 }
 0x18b   :  { %10685 = vmatmul.mubr.msk.f32.gmra.mrb[20].mxu0 %vm696_vm1, %v1658_v2  ;;  %v2640_v2 = vld [vmem:[#allocation2 + $0x4d0] sm:$0xff] }
 0x18c   :  { %v13119_v19 = vpop.permute.xlu1 %1604  ;;  %v13121_v24 = vpop.permute.xlu0 %1599  ;;  %10687 = vmatprep.mubr.msk.f32.mxu0 %vm696_vm1, %v1659_v1  ;;  %v1403_v1 = vrot.slane %v12578_v35, 1  ;;  %v1405_v35 = vrot.slane %v12585_v51, 1 }
 0x18d   :  { %16333 = vst [vmem:[#allocation118_spill] sm:$0xff] %v13119_v19  ;;  %16334 = vst [vmem:[#allocation119_spill] sm:$0xff] %v13121_v24  ;;  %v1661_v31 = vmul.f32 %v13121_v24, %v13115_v15  ;;  %2773 = vperm.xlu1 %12029, %v2639_v42   ;;  %2768 = vperm.xlu0 %12028, %v2638_v58   ;;  %v1662_v33 = vmul.f32 %v13119_v19, %v13129_v60  ;;  %v2643_v58 = vld [vmem:[#allocation2 + $0x4e8] sm:$0xff]  ;;  %v2645_v24 = vld [vmem:[#allocation2 + $0x4f8] sm:$0xff] }
 0x18e   :  { %v13151_v42 = vsel %vm1347_vm4, %v1401_v52, %v1403_v1 }
 0x18f   :  { %10688 = vmatmul.mubr.msk.f32.gmra.mrb[22].mxu0 %vm696_vm1, %v1660_v17  ;;  %v2642_v17 = vld [vmem:[#allocation2 + $0x4e0] sm:$0xff] }
 0x190   :  { %v13137_v13 = vpop.permute.xlu1 %1614  ;;  %v13139_v57 = vpop.permute.xlu0 %1609  ;;  %10690 = vmatprep.mubr.msk.f32.mxu0 %vm696_vm1, %v1661_v31  ;;  %v1407_v31 = vrot.slane %v12600_v4, 1 }
 0x191   :  { %16335 = vst [vmem:[#allocation120_spill] sm:$0xff] %v13137_v13  ;;  %16336 = vst [vmem:[#allocation121_spill] sm:$0xff] %v13139_v57  ;;  %v1663_v63 = vmul.f32 %v13139_v57, %v13133_v62  ;;  %2783 = vperm.xlu1 %12029, %v2641_v50   ;;  %2778 = vperm.xlu0 %12028, %v2640_v2   ;;  %v13158_v57 = vld [vmem:[%s15771_s0 + $0xf8] sm:$0xff]  ;;  %v1664_v51 = vmul.f32 %v13137_v13, %v13147_v20 }
 0x192   :  { %v13170_v2 = vsel %vm1347_vm4, %v1403_v1, %v1405_v35  ;;  %v13174_v19 = vsel %vm1347_vm4, %v1405_v35, %v1407_v31 }
 0x193   :  { %10691 = vmatmul.mubr.msk.f32.gmra.mrb[24].mxu0 %vm696_vm1, %v1662_v33  ;;  %v15900_v33 = vrot.slane %v13158_v57, 1 }
 0x194   :  { %v13160_v50 = vpop.permute.xlu1 %1624  ;;  %v13162_v49 = vpop.permute.xlu0 %1619  ;;  %10693 = vmatprep.mubr.msk.f32.mxu0 %vm696_vm1, %v1663_v63 }
 0x195   :  { %16337 = vst [vmem:[#allocation122_spill] sm:$0xff] %v13160_v50  ;;  %16338 = vst [vmem:[#allocation123_spill] sm:$0xff] %v13162_v49  ;;  %v1665_v52 = vmul.f32 %v13162_v49, %v13151_v42  ;;  %2793 = vperm.xlu1 %12029, %v2643_v58   ;;  %2788 = vperm.xlu0 %12028, %v2642_v17   ;;  %v1666_v58 = vmul.f32 %v13160_v50, %v13170_v2  ;;  %v3200_v17 = vld [vmem:[#allocation2 + $0x508] sm:$0xff] }
 0x196   :  { %v13189_v35 = vsel %vm1347_vm4, %v1407_v31, %v15900_v33  ;;  %v3201_v31 = vld [vmem:[#allocation2 + $0x510] sm:$0xff]  ;;  %v16360_v50 = vld [vmem:[#allocation63_spill] sm:$0xff] }
 0x197   :  { %10694 = vmatmul.mubr.msk.f32.gmra.mrb[26].mxu0 %vm696_vm1, %v1664_v51  ;;  %v3199_v51 = vld [vmem:[#allocation2 + $0x500] sm:$0xff] }
 0x198   :  { %v13177_v63 = vpop.permute.xlu1 %1634  ;;  %v13179_v13 = vpop.permute.xlu0 %1629  ;;  %10696 = vmatprep.mubr.msk.f32.mxu0 %vm696_vm1, %v1665_v52 }
 0x199   :  { %16339 = vst [vmem:[#allocation124_spill] sm:$0xff] %v13177_v63  ;;  %16340 = vst [vmem:[#allocation125_spill] sm:$0xff] %v13179_v13  ;;  %v1667_v1 = vmul.f32 %v13179_v13, %v13174_v19  ;;  %2803 = vperm.xlu1 %12029, %v2645_v24   ;;  %2798 = vperm.xlu0 %12028, %v2644_v38   ;;  %v1668_v13 = vmul.f32 %v13177_v63, %v13189_v35  ;;  %v3202_v38 = vld [vmem:[#allocation2 + $0x518] sm:$0xff] }
 0x19b   :  { %10697 = vmatmul.mubr.msk.f32.gmra.mrb[28].mxu0 %vm696_vm1, %v1666_v58 }
 0x19c   :  { %v13192_v49 = vpop.permute.xlu1 %2070  ;;  %v13194_v52 = vpop.permute.xlu0 %2065  ;;  %10699 = vmatprep.mubr.msk.f32.mxu0 %vm696_vm1, %v1667_v1 }
 0x19d   :  { %16341 = vst [vmem:[#allocation126_spill] sm:$0xff] %v13192_v49  ;;  %16342 = vst [vmem:[#allocation127_spill] sm:$0xff] %v13194_v52  ;;  %v2223_v24 = vmul.f32 %v13194_v52, %v12613_v12  ;;  %3238 = vperm.xlu1 %12029, %v3200_v17   ;;  %3233 = vperm.xlu0 %12028, %v3199_v51   ;;  %v2224_v1 = vmul.f32 %v13192_v49, %v12617_v27  ;;  %v3204_v12 = vld [vmem:[#allocation2 + $0x528] sm:$0xff]  ;;  %v3203_v17 = vld [vmem:[#allocation2 + $0x520] sm:$0xff] }
 0x19e   :  { %v13212_v51 = vld [vmem:[#allocation4 + $0x14] sm:$0x7]  ;;  %v16357_v52 = vld [vmem:[#allocation62_spill] sm:$0xff] }
 0x19f   :  { %10700 = vmatmul.mubr.msk.f32.gmra.mrb[30].mxu0 %vm696_vm1, %v1668_v13 }
 0x1a0   :  { %v13202_v33 = vpop.permute.xlu1 %2080  ;;  %v13204_v58 = vpop.permute.xlu0 %2075  ;;  %10704 = vmatprep.mubr.msk.f32.mxu0 %vm696_vm1, %v2223_v24 }
 0x1a1   :  { %16343 = vst [vmem:[#allocation128_spill] sm:$0xff] %v13202_v33  ;;  %16344 = vst [vmem:[#allocation129_spill] sm:$0xff] %v13204_v58  ;;  %v2225_v63 = vmul.f32 %v13204_v58, %v12632_v47  ;;  %3248 = vperm.xlu1 %12029, %v3202_v38   ;;  %3243 = vperm.xlu0 %12028, %v3201_v31   ;;  %v2226_v58 = vmul.f32 %v13202_v33, %v12636_v43  ;;  %v3206_v31 = vld [vmem:[#allocation2 + $0x538] sm:$0xff] }
 0x1a3   :  { %10705 = vmatmul.mubr.msk.f32.vlgmr.msra.gmra.mrb[0].mxu0 %vm696_vm1, %v2224_v1  ;;  %v3205_v1 = vld [vmem:[#allocation2 + $0x530] sm:$0xff] }
 0x1a4   :  { %10753 = vmatpush3.msk.msra.mxu0 %vm793_vm0, %v12933_v5  ;;  %v13216_v13 = vpop.permute.xlu1 %2090  ;;  %v13218_v24 = vpop.permute.xlu0 %2085  ;;  %10707 = vmatprep.mubr.msk.f32.mxu0 %vm696_vm1, %v2225_v63 }
 0x1a5   :  { %16345 = vst [vmem:[#allocation130_spill] sm:$0xff] %v13216_v13  ;;  %16346 = vst [vmem:[#allocation131_spill] sm:$0xff] %v13218_v24  ;;  %v2227_v38 = vmul.f32 %v13218_v24, %v12654_v55  ;;  %3258 = vperm.xlu1 %12029, %v3204_v12   ;;  %3253 = vperm.xlu0 %12028, %v3203_v17   ;;  %v2228_v63 = vmul.f32 %v13216_v13, %v12658_v21  ;;  %v3208_v17 = vld [vmem:[#allocation2 + $0x548] sm:$0xff]  ;;  %v3207_v24 = vld [vmem:[#allocation2 + $0x540] sm:$0xff] }
 0x1a6   :  { %10802 = vmatprep.subr.msk.mxu0 %vm793_vm0, %v13212_v51 }
 0x1a7   :  { %10708 = vmatmul.mubr.msk.f32.gmra.mrb[2].mxu0 %vm696_vm1, %v2226_v58 }
 0x1a8   :  { %v13228_v5 = vpop.permute.xlu1 %2100  ;;  %v13230_v49 = vpop.permute.xlu0 %2095  ;;  %10710 = vmatprep.mubr.msk.f32.mxu0 %vm696_vm1, %v2227_v38 }
 0x1a9   :  { %16347 = vst [vmem:[#allocation132_spill] sm:$0xff] %v13228_v5  ;;  %16348 = vst [vmem:[#allocation133_spill] sm:$0xff] %v13230_v49  ;;  %v2229_v12 = vmul.f32 %v13230_v49, %v12674_v10  ;;  %3268 = vperm.xlu1 %12029, %v3206_v31   ;;  %3263 = vperm.xlu0 %12028, %v3205_v1   ;;  %v2230_v38 = vmul.f32 %v13228_v5, %v12678_v39  ;;  %v3210_v31 = vld [vmem:[#allocation2 + $0x558] sm:$0xff]  ;;  %v3209_v1 = vld [vmem:[#allocation2 + $0x550] sm:$0xff] }
 0x1ab   :  { %10711 = vmatmul.mubr.msk.f32.gmra.mrb[4].mxu0 %vm696_vm1, %v2228_v63 }
 0x1ac   :  { %v13238_v33 = vpop.permute.xlu1 %2110  ;;  %v13240_v58 = vpop.permute.xlu0 %2105  ;;  %10713 = vmatprep.mubr.msk.f32.mxu0 %vm696_vm1, %v2229_v12 }
 0x1ad   :  { %16349 = vst [vmem:[#allocation134_spill] sm:$0xff] %v13238_v33  ;;  %16350 = vst [vmem:[#allocation135_spill] sm:$0xff] %v13240_v58  ;;  %v2231_v13 = vmul.f32 %v13240_v58, %v12692_v59  ;;  %3278 = vperm.xlu1 %12029, %v3208_v17   ;;  %3273 = vperm.xlu0 %12028, %v3207_v24   ;;  %v2232_v12 = vmul.f32 %v13238_v33, %v12696_v6  ;;  %v3212_v17 = vld [vmem:[#allocation2 + $0x568] sm:$0xff]  ;;  %v3211_v24 = vld [vmem:[#allocation2 + $0x560] sm:$0xff] }
 0x1af   :  { %10714 = vmatmul.mubr.msk.f32.gmra.mrb[6].mxu0 %vm696_vm1, %v2230_v38 }
 0x1b0   :  { %v13248_v49 = vpop.permute.xlu1 %2120  ;;  %v13250_v63 = vpop.permute.xlu0 %2115  ;;  %10716 = vmatprep.mubr.msk.f32.mxu0 %vm696_vm1, %v2231_v13 }
 0x1b1   :  { %16351 = vst [vmem:[#allocation136_spill] sm:$0xff] %v13248_v49  ;;  %16352 = vst [vmem:[#allocation137_spill] sm:$0xff] %v13250_v63  ;;  %v2233_v5 = vmul.f32 %v13250_v63, %v12710_v3  ;;  %3288 = vperm.xlu1 %12029, %v3210_v31   ;;  %3283 = vperm.xlu0 %12028, %v3209_v1   ;;  %v2234_v13 = vmul.f32 %v13248_v49, %v12714_v53  ;;  %v3214_v31 = vld [vmem:[#allocation2 + $0x578] sm:$0xff]  ;;  %v3213_v1 = vld [vmem:[#allocation2 + $0x570] sm:$0xff] }
 0x1b3   :  { %10717 = vmatmul.mubr.msk.f32.gmra.mrb[8].mxu0 %vm696_vm1, %v2232_v12 }
 0x1b4   :  { %v13258_v58 = vpop.permute.xlu1 %2130  ;;  %v13260_v38 = vpop.permute.xlu0 %2125  ;;  %10719 = vmatprep.mubr.msk.f32.mxu0 %vm696_vm1, %v2233_v5 }
 0x1b5   :  { %16353 = vst [vmem:[#allocation138_spill] sm:$0xff] %v13258_v58  ;;  %16354 = vst [vmem:[#allocation139_spill] sm:$0xff] %v13260_v38  ;;  %v2235_v33 = vmul.f32 %v13260_v38, %v12728_v41  ;;  %3298 = vperm.xlu1 %12029, %v3212_v17   ;;  %3293 = vperm.xlu0 %12028, %v3211_v24   ;;  %v2236_v5 = vmul.f32 %v13258_v58, %v12732_v45  ;;  %v3216_v17 = vld [vmem:[#allocation2 + $0x588] sm:$0xff]  ;;  %v3215_v24 = vld [vmem:[#allocation2 + $0x580] sm:$0xff] }
 0x1b6   :  { %v16361_v41 = vld [vmem:[#allocation66_spill] sm:$0xff] }
 0x1b7   :  { %10720 = vmatmul.mubr.msk.f32.gmra.mrb[10].mxu0 %vm696_vm1, %v2234_v13  ;;  %v16365_v45 = vld [vmem:[#allocation70_spill] sm:$0xff] }
 0x1b8   :  { %v13268_v63 = vpop.permute.xlu1 %2140  ;;  %v13270_v12 = vpop.permute.xlu0 %2135  ;;  %10722 = vmatprep.mubr.msk.f32.mxu0 %vm696_vm1, %v2235_v33 }
 0x1b9   :  { %16355 = vst [vmem:[#allocation140_spill] sm:$0xff] %v13268_v63  ;;  %16356 = vst [vmem:[#allocation141_spill] sm:$0xff] %v13270_v12  ;;  %v2237_v49 = vmul.f32 %v13270_v12, %v16357_v52  ;;  %3308 = vperm.xlu1 %12029, %v3214_v31   ;;  %3303 = vperm.xlu0 %12028, %v3213_v1   ;;  %v2238_v33 = vmul.f32 %v13268_v63, %v16360_v50  ;;  %v3218_v31 = vld [vmem:[#allocation2 + $0x598] sm:$0xff]  ;;  %v3217_v1 = vld [vmem:[#allocation2 + $0x590] sm:$0xff] }
 0x1ba   :  { %v16364_v52 = vld [vmem:[#allocation67_spill] sm:$0xff]  ;;  %v16369_v50 = vld [vmem:[#allocation74_spill] sm:$0xff] }
 0x1bb   :  { %10723 = vmatmul.mubr.msk.f32.gmra.mrb[12].mxu0 %vm696_vm1, %v2236_v5 }
 0x1bc   :  { %v13278_v38 = vpop.permute.xlu1 %2150  ;;  %v13280_v13 = vpop.permute.xlu0 %2145  ;;  %10725 = vmatprep.mubr.msk.f32.mxu0 %vm696_vm1, %v2237_v49 }
 0x1bd   :  { %16358 = vst [vmem:[#allocation142_spill] sm:$0xff] %v13278_v38  ;;  %16359 = vst [vmem:[#allocation143_spill] sm:$0xff] %v13280_v13  ;;  %v2239_v58 = vmul.f32 %v13280_v13, %v16361_v41  ;;  %3318 = vperm.xlu1 %12029, %v3216_v17   ;;  %3313 = vperm.xlu0 %12028, %v3215_v24   ;;  %v2240_v49 = vmul.f32 %v13278_v38, %v16364_v52  ;;  %v3220_v17 = vld [vmem:[#allocation2 + $0x5a8] sm:$0xff]  ;;  %v3219_v24 = vld [vmem:[#allocation2 + $0x5a0] sm:$0xff] }
 0x1be   :  { %v16368_v41 = vld [vmem:[#allocation71_spill] sm:$0xff]  ;;  %v16373_v52 = vld [vmem:[#allocation78_spill] sm:$0xff] }
 0x1bf   :  { %10726 = vmatmul.mubr.msk.f32.gmra.mrb[14].mxu0 %vm696_vm1, %v2238_v33 }
 0x1c0   :  { %v13288_v12 = vpop.permute.xlu1 %2160  ;;  %v13290_v5 = vpop.permute.xlu0 %2155  ;;  %10728 = vmatprep.mubr.msk.f32.mxu0 %vm696_vm1, %v2239_v58 }
 0x1c1   :  { %16362 = vst [vmem:[#allocation144_spill] sm:$0xff] %v13288_v12  ;;  %16363 = vst [vmem:[#allocation145_spill] sm:$0xff] %v13290_v5  ;;  %v2241_v63 = vmul.f32 %v13290_v5, %v16365_v45  ;;  %3328 = vperm.xlu1 %12029, %v3218_v31   ;;  %3323 = vperm.xlu0 %12028, %v3217_v1   ;;  %v2242_v58 = vmul.f32 %v13288_v12, %v16368_v41  ;;  %v3222_v31 = vld [vmem:[#allocation2 + $0x5b8] sm:$0xff]  ;;  %v3221_v1 = vld [vmem:[#allocation2 + $0x5b0] sm:$0xff] }
 0x1c2   :  { %v16372_v45 = vld [vmem:[#allocation75_spill] sm:$0xff]  ;;  %v16377_v41 = vld [vmem:[#allocation82_spill] sm:$0xff] }
 0x1c3   :  { %10729 = vmatmul.mubr.msk.f32.gmra.mrb[16].mxu0 %vm696_vm1, %v2240_v49 }
 0x1c4   :  { %v13298_v13 = vpop.permute.xlu1 %2170  ;;  %v13300_v33 = vpop.permute.xlu0 %2165  ;;  %10731 = vmatprep.mubr.msk.f32.mxu0 %vm696_vm1, %v2241_v63 }
 0x1c5   :  { %16366 = vst [vmem:[#allocation146_spill] sm:$0xff] %v13298_v13  ;;  %16367 = vst [vmem:[#allocation147_spill] sm:$0xff] %v13300_v33  ;;  %v2243_v38 = vmul.f32 %v13300_v33, %v16369_v50  ;;  %3338 = vperm.xlu1 %12029, %v3220_v17   ;;  %3333 = vperm.xlu0 %12028, %v3219_v24   ;;  %v2244_v63 = vmul.f32 %v13298_v13, %v16372_v45  ;;  %v3224_v17 = vld [vmem:[#allocation2 + $0x5c8] sm:$0xff]  ;;  %v3223_v24 = vld [vmem:[#allocation2 + $0x5c0] sm:$0xff] }
 0x1c6   :  { %v16376_v50 = vld [vmem:[#allocation79_spill] sm:$0xff] }
 0x1c7   :  { %10732 = vmatmul.mubr.msk.f32.gmra.mrb[18].mxu0 %vm696_vm1, %v2242_v58 }
 0x1c8   :  { %v13308_v5 = vpop.permute.xlu1 %2180  ;;  %v13310_v49 = vpop.permute.xlu0 %2175  ;;  %10734 = vmatprep.mubr.msk.f32.mxu0 %vm696_vm1, %v2243_v38 }
 0x1c9   :  { %16370 = vst [vmem:[#allocation148_spill] sm:$0xff] %v13308_v5  ;;  %16371 = vst [vmem:[#allocation149_spill] sm:$0xff] %v13310_v49  ;;  %v2245_v12 = vmul.f32 %v13310_v49, %v16373_v52  ;;  %3348 = vperm.xlu1 %12029, %v3222_v31   ;;  %3343 = vperm.xlu0 %12028, %v3221_v1   ;;  %v2246_v38 = vmul.f32 %v13308_v5, %v16376_v50  ;;  %v3226_v31 = vld [vmem:[#allocation2 + $0x5d8] sm:$0xff]  ;;  %v3225_v1 = vld [vmem:[#allocation2 + $0x5d0] sm:$0xff] }
 0x1ca   :  { %v16380_v52 = vld [vmem:[#allocation83_spill] sm:$0xff] }
 0x1cb   :  { %10735 = vmatmul.mubr.msk.f32.gmra.mrb[20].mxu0 %vm696_vm1, %v2244_v63 }
 0x1cc   :  { %v13318_v33 = vpop.permute.xlu1 %2190  ;;  %v13320_v58 = vpop.permute.xlu0 %2185  ;;  %10737 = vmatprep.mubr.msk.f32.mxu0 %vm696_vm1, %v2245_v12 }
 0x1cd   :  { %16374 = vst [vmem:[#allocation75_spill] sm:$0xff] %v13318_v33  ;;  %16375 = vst [vmem:[#allocation150_spill] sm:$0xff] %v13320_v58  ;;  %v2247_v13 = vmul.f32 %v13320_v58, %v16377_v41  ;;  %3358 = vperm.xlu1 %12029, %v3224_v17   ;;  %3353 = vperm.xlu0 %12028, %v3223_v24   ;;  %v2248_v12 = vmul.f32 %v13318_v33, %v16380_v52  ;;  %v3228_v17 = vld [vmem:[#allocation2 + $0x5e8] sm:$0xff]  ;;  %v3227_v24 = vld [vmem:[#allocation2 + $0x5e0] sm:$0xff] }
 0x1ce   :  { %v16383_v41 = vld [vmem:[#allocation87_spill] sm:$0xff] }
 0x1cf   :  { %10738 = vmatmul.mubr.msk.f32.gmra.mrb[22].mxu0 %vm696_vm1, %v2246_v38 }
 0x1d0   :  { %v13328_v49 = vpop.permute.xlu1 %2200  ;;  %v13330_v63 = vpop.permute.xlu0 %2195  ;;  %10740 = vmatprep.mubr.msk.f32.mxu0 %vm696_vm1, %v2247_v13 }
 0x1d1   :  { %16378 = vst [vmem:[#allocation79_spill] sm:$0xff] %v13328_v49  ;;  %16379 = vst [vmem:[#allocation151_spill] sm:$0xff] %v13330_v63  ;;  %v2249_v5 = vmul.f32 %v13330_v63, %v12854_v30  ;;  %3368 = vperm.xlu1 %12029, %v3226_v31   ;;  %3363 = vperm.xlu0 %12028, %v3225_v1   ;;  %v2250_v13 = vmul.f32 %v13328_v49, %v16383_v41  ;;  %v15936_v31 = vrot.slane %v13158_v57, 7  ;;  %v3230_v1 = vld [vmem:[#allocation2 + $0x5f8] sm:$0xff]  ;;  %v3229_v63 = vld [vmem:[#allocation2 + $0x5f0] sm:$0xff] }
 0x1d3   :  { %10741 = vmatmul.mubr.msk.f32.gmra.mrb[24].mxu0 %vm696_vm1, %v2248_v12 }
 0x1d4   :  { %v13338_v58 = vpop.permute.xlu1 %2210  ;;  %v13340_v38 = vpop.permute.xlu0 %2205  ;;  %10743 = vmatprep.mubr.msk.f32.mxu0 %vm696_vm1, %v2249_v5  ;;  %v16386_v5 = vld [vmem:[#allocation91_spill] sm:$0xff] }
 0x1d5   :  { %16381 = vst [vmem:[#allocation83_spill] sm:$0xff] %v13338_v58  ;;  %16382 = vst [vmem:[#allocation152_spill] sm:$0xff] %v13340_v38  ;;  %v2251_v33 = vmul.f32 %v13340_v38, %v12872_v23  ;;  %3378 = vperm.xlu1 %12029, %v3228_v17   ;;  %3373 = vperm.xlu0 %12028, %v3227_v24   ;;  %v2252_v49 = vmul.f32 %v13338_v58, %v16386_v5  ;;  %v16387_v17 = vrot.slane %v12600_v4, 7  ;;  %v3784_v23 = vld [vmem:[#allocation2 + $0x600] sm:$0xff] }
 0x1d6   :  { %v12030_v4 = vld [vmem:[%s15771_s0] sm:$0xff] }
 0x1d7   :  { %10744 = vmatmul.mubr.msk.f32.gmra.mrb[26].mxu0 %vm696_vm1, %v2250_v13  ;;  %v13363_v24 = vsel %vm150_vm3, %v16387_v17, %v15936_v31  ;;  %v3785_v13 = vld [vmem:[#allocation2 + $0x608] sm:$0xff]  ;;  %v3787_v17 = vld [vmem:[#allocation2 + $0x618] sm:$0xff]  ;;  %v3786_v31 = vld [vmem:[#allocation2 + $0x610] sm:$0xff] }
 0x1d8   :  { %v13349_v12 = vpop.permute.xlu1 %2220  ;;  %v13351_v30 = vpop.permute.xlu0 %2215  ;;  %10746 = vmatprep.mubr.msk.f32.mxu0 %vm696_vm1, %v2251_v33 }
 0x1d9   :  { %16384 = vst [vmem:[#allocation153_spill] sm:$0xff] %v13349_v12  ;;  %16385 = vst [vmem:[#allocation154_spill] sm:$0xff] %v13351_v30  ;;  %v2253_v38 = vmul.f32 %v13351_v30, %v12892_v9  ;;  %3388 = vperm.xlu1 %12029, %v3230_v1   ;;  %3383 = vperm.xlu0 %12028, %v3229_v63   ;;  %v2254_v63 = vmul.f32 %v13349_v12, %v13363_v24 }
 0x1db   :  { %10747 = vmatmul.mubr.msk.f32.gmra.mrb[28].mxu0 %vm696_vm1, %v2252_v49 }
 0x1dc   :  { %v13366_v33 = vpop.permute.xlu1 %2653  ;;  %v13368_v41 = vpop.permute.xlu0 %2648  ;;  %10749 = vmatprep.mubr.msk.f32.mxu0 %vm696_vm1, %v2253_v38  ;;  %v13386_v38 = vld [vmem:[%s15771_s0 + $0x8] sm:$0xff] }
 0x1dd   :  { %16388 = vst [vmem:[#allocation91_spill] sm:$0xff] %v13366_v33  ;;  %16389 = vst [vmem:[#allocation155_spill] sm:$0xff] %v13368_v41  ;;  %v2806_v1 = vmul.f32 %v12030_v4, %v13368_v41  ;;  %3823 = vperm.xlu1 %12029, %v3785_v13   ;;  %3818 = vperm.xlu0 %12028, %v3784_v23   ;;  %v2807_v4 = vmul.f32 %v13386_v38, %v13366_v33  ;;  %v13393_v23 = vld [vmem:[%s15771_s0 + $0x10] sm:$0xff]  ;;  %v13398_v41 = vld [vmem:[#allocation4 + $0x18] sm:$0x7] }
 0x1de   :  { %16392 = vst [vmem:[#allocation158_spill] sm:$0xff] %v13393_v23 }
 0x1df   :  { %10750 = vmatmul.mubr.msk.f32.gmra.mrb[30].mxu0 %vm696_vm1, %v2254_v63  ;;  %v3789_v63 = vld [vmem:[#allocation2 + $0x628] sm:$0xff] }
 0x1e0   :  { %v13378_v49 = vpop.permute.xlu1 %2663  ;;  %v13380_v30 = vpop.permute.xlu0 %2658  ;;  %10754 = vmatprep.mubr.msk.f32.mxu0 %vm696_vm1, %v2806_v1  ;;  %v3788_v1 = vld [vmem:[#allocation2 + $0x620] sm:$0xff] }
 0x1e1   :  { %16390 = vst [vmem:[#allocation156_spill] sm:$0xff] %v13378_v49  ;;  %16391 = vst [vmem:[#allocation157_spill] sm:$0xff] %v13380_v30  ;;  %v2808_v13 = vmul.f32 %v13393_v23, %v13380_v30  ;;  %3833 = vperm.xlu1 %12029, %v3787_v17   ;;  %3828 = vperm.xlu0 %12028, %v3786_v31   ;;  %v13410_v17 = vld [vmem:[%s15771_s0 + $0x18] sm:$0xff] }
 0x1e2   :  { %16395 = vst [vmem:[#allocation161_spill] sm:$0xff] %v13410_v17  ;;  %v2809_v31 = vmul.f32 %v13410_v17, %v13378_v49  ;;  %v3791_v30 = vld [vmem:[#allocation2 + $0x638] sm:$0xff]  ;;  %v13432_v17 = vld [vmem:[%s15771_s0 + $0x28] sm:$0xff] }
 0x1e3   :  { %10755 = vmatmul.mubr.msk.f32.vlgmr.msra.gmra.mrb[0].mxu0 %vm696_vm1, %v2807_v4  ;;  %v13417_v4 = vld [vmem:[%s15771_s0 + $0x20] sm:$0xff]  ;;  %16399 = vst [vmem:[#allocation165_spill] sm:$0xff] %v13432_v17 }
 0x1e4   :  { %10803 = vmatpush3.msk.msra.mxu0 %vm793_vm0, %v13212_v51  ;;  %v13402_v33 = vpop.permute.xlu1 %2673  ;;  %v13404_v12 = vpop.permute.xlu0 %2668  ;;  %10757 = vmatprep.mubr.msk.f32.mxu0 %vm696_vm1, %v2808_v13  ;;  %16396 = vst [vmem:[#allocation162_spill] sm:$0xff] %v13417_v4  ;;  %v3790_v13 = vld [vmem:[#allocation2 + $0x630] sm:$0xff] }
 0x1e5   :  { %16393 = vst [vmem:[#allocation159_spill] sm:$0xff] %v13402_v33  ;;  %16394 = vst [vmem:[#allocation160_spill] sm:$0xff] %v13404_v12  ;;  %v2810_v51 = vmul.f32 %v13417_v4, %v13404_v12  ;;  %3843 = vperm.xlu1 %12029, %v3789_v63   ;;  %3838 = vperm.xlu0 %12028, %v3788_v1   ;;  %v2811_v63 = vmul.f32 %v13432_v17, %v13402_v33  ;;  %v13439_v1 = vld [vmem:[%s15771_s0 + $0x30] sm:$0xff]  ;;  %v3793_v12 = vld [vmem:[#allocation2 + $0x648] sm:$0xff] }
 0x1e6   :  { %10852 = vmatprep.subr.msk.mxu0 %vm793_vm0, %v13398_v41  ;;  %16400 = vst [vmem:[#allocation166_spill] sm:$0xff] %v13439_v1  ;;  %v13452_v33 = vld [vmem:[%s15771_s0 + $0x38] sm:$0xff] }
 0x1e7   :  { %10758 = vmatmul.mubr.msk.f32.gmra.mrb[2].mxu0 %vm696_vm1, %v2809_v31  ;;  %16403 = vst [vmem:[#allocation169_spill] sm:$0xff] %v13452_v33 }
 0x1e8   :  { %v13424_v58 = vpop.permute.xlu1 %2683  ;;  %v13426_v49 = vpop.permute.xlu0 %2678  ;;  %10760 = vmatprep.mubr.msk.f32.mxu0 %vm696_vm1, %v2810_v51  ;;  %v3792_v51 = vld [vmem:[#allocation2 + $0x640] sm:$0xff] }
 0x1e9   :  { %16397 = vst [vmem:[#allocation163_spill] sm:$0xff] %v13424_v58  ;;  %16398 = vst [vmem:[#allocation164_spill] sm:$0xff] %v13426_v49  ;;  %v2812_v31 = vmul.f32 %v13439_v1, %v13426_v49  ;;  %3853 = vperm.xlu1 %12029, %v3791_v30   ;;  %3848 = vperm.xlu0 %12028, %v3790_v13   ;;  %v2813_v49 = vmul.f32 %v13452_v33, %v13424_v58  ;;  %v13459_v30 = vld [vmem:[%s15771_s0 + $0x40] sm:$0xff]  ;;  %v13472_v58 = vld [vmem:[%s15771_s0 + $0x48] sm:$0xff] }
 0x1ea   :  { %16404 = vst [vmem:[#allocation170_spill] sm:$0xff] %v13459_v30  ;;  %16407 = vst [vmem:[#allocation173_spill] sm:$0xff] %v13472_v58 }
 0x1eb   :  { %10761 = vmatmul.mubr.msk.f32.gmra.mrb[4].mxu0 %vm696_vm1, %v2811_v63  ;;  %v3795_v63 = vld [vmem:[#allocation2 + $0x658] sm:$0xff] }
 0x1ec   :  { %v13444_v4 = vpop.permute.xlu1 %2693  ;;  %v13446_v23 = vpop.permute.xlu0 %2688  ;;  %10763 = vmatprep.mubr.msk.f32.mxu0 %vm696_vm1, %v2812_v31  ;;  %v3794_v31 = vld [vmem:[#allocation2 + $0x650] sm:$0xff] }
 0x1ed   :  { %16401 = vst [vmem:[#allocation167_spill] sm:$0xff] %v13444_v4  ;;  %16402 = vst [vmem:[#allocation168_spill] sm:$0xff] %v13446_v23  ;;  %v2814_v13 = vmul.f32 %v13459_v30, %v13446_v23  ;;  %3863 = vperm.xlu1 %12029, %v3793_v12   ;;  %3858 = vperm.xlu0 %12028, %v3792_v51   ;;  %v2815_v23 = vmul.f32 %v13472_v58, %v13444_v4  ;;  %v13479_v12 = vld [vmem:[%s15771_s0 + $0x50] sm:$0xff]  ;;  %v3797_v51 = vld [vmem:[#allocation2 + $0x668] sm:$0xff] }
 0x1ee   :  { %16408 = vst [vmem:[#allocation174_spill] sm:$0xff] %v13479_v12  ;;  %v13492_v4 = vld [vmem:[%s15771_s0 + $0x58] sm:$0xff] }
 0x1ef   :  { %10764 = vmatmul.mubr.msk.f32.gmra.mrb[6].mxu0 %vm696_vm1, %v2813_v49  ;;  %16411 = vst [vmem:[#allocation177_spill] sm:$0xff] %v13492_v4 }
 0x1f0   :  { %v13464_v1 = vpop.permute.xlu1 %2703  ;;  %v13466_v17 = vpop.permute.xlu0 %2698  ;;  %10766 = vmatprep.mubr.msk.f32.mxu0 %vm696_vm1, %v2814_v13  ;;  %v3796_v13 = vld [vmem:[#allocation2 + $0x660] sm:$0xff] }
 0x1f1   :  { %16405 = vst [vmem:[#allocation171_spill] sm:$0xff] %v13464_v1  ;;  %16406 = vst [vmem:[#allocation172_spill] sm:$0xff] %v13466_v17  ;;  %v2816_v49 = vmul.f32 %v13479_v12, %v13466_v17  ;;  %3873 = vperm.xlu1 %12029, %v3795_v63   ;;  %3868 = vperm.xlu0 %12028, %v3794_v31   ;;  %v2817_v17 = vmul.f32 %v13492_v4, %v13464_v1  ;;  %v13499_v63 = vld [vmem:[%s15771_s0 + $0x60] sm:$0xff]  ;;  %v3799_v31 = vld [vmem:[#allocation2 + $0x678] sm:$0xff] }
 0x1f2   :  { %16412 = vst [vmem:[#allocation178_spill] sm:$0xff] %v13499_v63  ;;  %v13512_v1 = vld [vmem:[%s15771_s0 + $0x68] sm:$0xff] }
 0x1f3   :  { %10767 = vmatmul.mubr.msk.f32.gmra.mrb[8].mxu0 %vm696_vm1, %v2815_v23  ;;  %16415 = vst [vmem:[#allocation181_spill] sm:$0xff] %v13512_v1 }
 0x1f4   :  { %v13484_v30 = vpop.permute.xlu1 %2713  ;;  %v13486_v33 = vpop.permute.xlu0 %2708  ;;  %10769 = vmatprep.mubr.msk.f32.mxu0 %vm696_vm1, %v2816_v49  ;;  %v3798_v49 = vld [vmem:[#allocation2 + $0x670] sm:$0xff] }
 0x1f5   :  { %16409 = vst [vmem:[#allocation175_spill] sm:$0xff] %v13484_v30  ;;  %16410 = vst [vmem:[#allocation176_spill] sm:$0xff] %v13486_v33  ;;  %v2818_v23 = vmul.f32 %v13499_v63, %v13486_v33  ;;  %3883 = vperm.xlu1 %12029, %v3797_v51   ;;  %3878 = vperm.xlu0 %12028, %v3796_v13   ;;  %v2819_v33 = vmul.f32 %v13512_v1, %v13484_v30  ;;  %v13519_v51 = vld [vmem:[%s15771_s0 + $0x70] sm:$0xff]  ;;  %v3801_v13 = vld [vmem:[#allocation2 + $0x688] sm:$0xff] }
 0x1f6   :  { %16416 = vst [vmem:[#allocation182_spill] sm:$0xff] %v13519_v51  ;;  %v13532_v30 = vld [vmem:[%s15771_s0 + $0x78] sm:$0xff] }
 0x1f7   :  { %10770 = vmatmul.mubr.msk.f32.gmra.mrb[10].mxu0 %vm696_vm1, %v2817_v17  ;;  %16419 = vst [vmem:[#allocation185_spill] sm:$0xff] %v13532_v30 }
 0x1f8   :  { %v13504_v12 = vpop.permute.xlu1 %2723  ;;  %v13506_v58 = vpop.permute.xlu0 %2718  ;;  %10772 = vmatprep.mubr.msk.f32.mxu0 %vm696_vm1, %v2818_v23  ;;  %v3800_v23 = vld [vmem:[#allocation2 + $0x680] sm:$0xff] }
 0x1f9   :  { %16413 = vst [vmem:[#allocation179_spill] sm:$0xff] %v13504_v12  ;;  %16414 = vst [vmem:[#allocation180_spill] sm:$0xff] %v13506_v58  ;;  %v2820_v17 = vmul.f32 %v13519_v51, %v13506_v58  ;;  %3893 = vperm.xlu1 %12029, %v3799_v31   ;;  %3888 = vperm.xlu0 %12028, %v3798_v49   ;;  %v2821_v58 = vmul.f32 %v13532_v30, %v13504_v12  ;;  %v13539_v31 = vld [vmem:[%s15771_s0 + $0x80] sm:$0xff]  ;;  %v3803_v49 = vld [vmem:[#allocation2 + $0x698] sm:$0xff] }
 0x1fa   :  { %16420 = vst [vmem:[#allocation186_spill] sm:$0xff] %v13539_v31  ;;  %v13552_v12 = vld [vmem:[%s15771_s0 + $0x88] sm:$0xff] }
 0x1fb   :  { %10773 = vmatmul.mubr.msk.f32.gmra.mrb[12].mxu0 %vm696_vm1, %v2819_v33  ;;  %16423 = vst [vmem:[#allocation189_spill] sm:$0xff] %v13552_v12 }
 0x1fc   :  { %v13524_v63 = vpop.permute.xlu1 %2733  ;;  %v13526_v4 = vpop.permute.xlu0 %2728  ;;  %10775 = vmatprep.mubr.msk.f32.mxu0 %vm696_vm1, %v2820_v17  ;;  %v3802_v17 = vld [vmem:[#allocation2 + $0x690] sm:$0xff] }
 0x1fd   :  { %16417 = vst [vmem:[#allocation183_spill] sm:$0xff] %v13524_v63  ;;  %16418 = vst [vmem:[#allocation184_spill] sm:$0xff] %v13526_v4  ;;  %v2822_v33 = vmul.f32 %v13539_v31, %v13526_v4  ;;  %3903 = vperm.xlu1 %12029, %v3801_v13   ;;  %3898 = vperm.xlu0 %12028, %v3800_v23   ;;  %v2823_v4 = vmul.f32 %v13552_v12, %v13524_v63  ;;  %v13559_v13 = vld [vmem:[%s15771_s0 + $0x90] sm:$0xff]  ;;  %v3805_v23 = vld [vmem:[#allocation2 + $0x6a8] sm:$0xff] }
 0x1fe   :  { %16424 = vst [vmem:[#allocation190_spill] sm:$0xff] %v13559_v13  ;;  %v13572_v63 = vld [vmem:[%s15771_s0 + $0x98] sm:$0xff] }
 0x1ff   :  { %10776 = vmatmul.mubr.msk.f32.gmra.mrb[14].mxu0 %vm696_vm1, %v2821_v58  ;;  %16427 = vst [vmem:[#allocation193_spill] sm:$0xff] %v13572_v63 }
 0x200   :  { %v13544_v51 = vpop.permute.xlu1 %2743  ;;  %v13546_v1 = vpop.permute.xlu0 %2738  ;;  %10778 = vmatprep.mubr.msk.f32.mxu0 %vm696_vm1, %v2822_v33  ;;  %v3804_v33 = vld [vmem:[#allocation2 + $0x6a0] sm:$0xff] }
 0x201   :  { %16421 = vst [vmem:[#allocation187_spill] sm:$0xff] %v13544_v51  ;;  %16422 = vst [vmem:[#allocation188_spill] sm:$0xff] %v13546_v1  ;;  %v2824_v58 = vmul.f32 %v13559_v13, %v13546_v1  ;;  %3913 = vperm.xlu1 %12029, %v3803_v49   ;;  %3908 = vperm.xlu0 %12028, %v3802_v17   ;;  %v2825_v1 = vmul.f32 %v13572_v63, %v13544_v51  ;;  %v13579_v49 = vld [vmem:[%s15771_s0 + $0xa0] sm:$0xff]  ;;  %v3807_v17 = vld [vmem:[#allocation2 + $0x6b8] sm:$0xff] }
 0x202   :  { %16428 = vst [vmem:[#allocation194_spill] sm:$0xff] %v13579_v49  ;;  %v13592_v51 = vld [vmem:[%s15771_s0 + $0xa8] sm:$0xff] }
 0x203   :  { %10779 = vmatmul.mubr.msk.f32.gmra.mrb[16].mxu0 %vm696_vm1, %v2823_v4  ;;  %16431 = vst [vmem:[#allocation197_spill] sm:$0xff] %v13592_v51 }
 0x204   :  { %v13564_v31 = vpop.permute.xlu1 %2753  ;;  %v13566_v30 = vpop.permute.xlu0 %2748  ;;  %10781 = vmatprep.mubr.msk.f32.mxu0 %vm696_vm1, %v2824_v58  ;;  %v3806_v58 = vld [vmem:[#allocation2 + $0x6b0] sm:$0xff] }
 0x205   :  { %16425 = vst [vmem:[#allocation191_spill] sm:$0xff] %v13564_v31  ;;  %16426 = vst [vmem:[#allocation192_spill] sm:$0xff] %v13566_v30  ;;  %v2826_v4 = vmul.f32 %v13579_v49, %v13566_v30  ;;  %3923 = vperm.xlu1 %12029, %v3805_v23   ;;  %3918 = vperm.xlu0 %12028, %v3804_v33   ;;  %v2827_v30 = vmul.f32 %v13592_v51, %v13564_v31  ;;  %v13599_v23 = vld [vmem:[%s15771_s0 + $0xb0] sm:$0xff]  ;;  %v3809_v33 = vld [vmem:[#allocation2 + $0x6c8] sm:$0xff] }
 0x206   :  { %16432 = vst [vmem:[#allocation198_spill] sm:$0xff] %v13599_v23  ;;  %v13612_v31 = vld [vmem:[%s15771_s0 + $0xb8] sm:$0xff] }
 0x207   :  { %10782 = vmatmul.mubr.msk.f32.gmra.mrb[18].mxu0 %vm696_vm1, %v2825_v1  ;;  %16435 = vst [vmem:[#allocation201_spill] sm:$0xff] %v13612_v31 }
 0x208   :  { %v13584_v13 = vpop.permute.xlu1 %2763  ;;  %v13586_v12 = vpop.permute.xlu0 %2758  ;;  %10784 = vmatprep.mubr.msk.f32.mxu0 %vm696_vm1, %v2826_v4  ;;  %v3808_v4 = vld [vmem:[#allocation2 + $0x6c0] sm:$0xff] }
 0x209   :  { %16429 = vst [vmem:[#allocation195_spill] sm:$0xff] %v13584_v13  ;;  %16430 = vst [vmem:[#allocation196_spill] sm:$0xff] %v13586_v12  ;;  %v2828_v1 = vmul.f32 %v13599_v23, %v13586_v12  ;;  %3933 = vperm.xlu1 %12029, %v3807_v17   ;;  %3928 = vperm.xlu0 %12028, %v3806_v58   ;;  %v2829_v12 = vmul.f32 %v13612_v31, %v13584_v13  ;;  %v13619_v17 = vld [vmem:[%s15771_s0 + $0xc0] sm:$0xff]  ;;  %v3811_v58 = vld [vmem:[#allocation2 + $0x6d8] sm:$0xff] }
 0x20a   :  { %16436 = vst [vmem:[#allocation202_spill] sm:$0xff] %v13619_v17  ;;  %v13632_v13 = vld [vmem:[%s15771_s0 + $0xc8] sm:$0xff] }
 0x20b   :  { %10785 = vmatmul.mubr.msk.f32.gmra.mrb[20].mxu0 %vm696_vm1, %v2827_v30  ;;  %16439 = vst [vmem:[#allocation205_spill] sm:$0xff] %v13632_v13 }
 0x20c   :  { %v13604_v49 = vpop.permute.xlu1 %2773  ;;  %v13606_v63 = vpop.permute.xlu0 %2768  ;;  %10787 = vmatprep.mubr.msk.f32.mxu0 %vm696_vm1, %v2828_v1  ;;  %v3810_v1 = vld [vmem:[#allocation2 + $0x6d0] sm:$0xff] }
 0x20d   :  { %16433 = vst [vmem:[#allocation199_spill] sm:$0xff] %v13604_v49  ;;  %16434 = vst [vmem:[#allocation200_spill] sm:$0xff] %v13606_v63  ;;  %v2830_v30 = vmul.f32 %v13619_v17, %v13606_v63  ;;  %3943 = vperm.xlu1 %12029, %v3809_v33   ;;  %3938 = vperm.xlu0 %12028, %v3808_v4   ;;  %v2831_v63 = vmul.f32 %v13632_v13, %v13604_v49  ;;  %v13639_v33 = vld [vmem:[%s15771_s0 + $0xd0] sm:$0xff]  ;;  %v3813_v4 = vld [vmem:[#allocation2 + $0x6e8] sm:$0xff] }
 0x20e   :  { %16440 = vst [vmem:[#allocation206_spill] sm:$0xff] %v13639_v33  ;;  %v13652_v49 = vld [vmem:[%s15771_s0 + $0xd8] sm:$0xff] }
 0x20f   :  { %10788 = vmatmul.mubr.msk.f32.gmra.mrb[22].mxu0 %vm696_vm1, %v2829_v12  ;;  %16443 = vst [vmem:[#allocation209_spill] sm:$0xff] %v13652_v49 }
 0x210   :  { %v13624_v23 = vpop.permute.xlu1 %2783  ;;  %v13626_v51 = vpop.permute.xlu0 %2778  ;;  %10790 = vmatprep.mubr.msk.f32.mxu0 %vm696_vm1, %v2830_v30  ;;  %v3812_v30 = vld [vmem:[#allocation2 + $0x6e0] sm:$0xff] }
 0x211   :  { %16437 = vst [vmem:[#allocation203_spill] sm:$0xff] %v13624_v23  ;;  %16438 = vst [vmem:[#allocation204_spill] sm:$0xff] %v13626_v51  ;;  %v2832_v12 = vmul.f32 %v13639_v33, %v13626_v51  ;;  %3953 = vperm.xlu1 %12029, %v3811_v58   ;;  %3948 = vperm.xlu0 %12028, %v3810_v1   ;;  %v2833_v51 = vmul.f32 %v13652_v49, %v13624_v23  ;;  %v13659_v58 = vld [vmem:[%s15771_s0 + $0xe0] sm:$0xff]  ;;  %v3815_v1 = vld [vmem:[#allocation2 + $0x6f8] sm:$0xff] }
 0x212   :  { %16444 = vst [vmem:[#allocation210_spill] sm:$0xff] %v13659_v58  ;;  %v13672_v23 = vld [vmem:[%s15771_s0 + $0xe8] sm:$0xff] }
 0x213   :  { %10791 = vmatmul.mubr.msk.f32.gmra.mrb[24].mxu0 %vm696_vm1, %v2831_v63  ;;  %16447 = vst [vmem:[#allocation213_spill] sm:$0xff] %v13672_v23 }
 0x214   :  { %v13644_v17 = vpop.permute.xlu1 %2793  ;;  %v13646_v31 = vpop.permute.xlu0 %2788  ;;  %10793 = vmatprep.mubr.msk.f32.mxu0 %vm696_vm1, %v2832_v12  ;;  %v3814_v12 = vld [vmem:[#allocation2 + $0x6f0] sm:$0xff] }
 0x215   :  { %16441 = vst [vmem:[#allocation207_spill] sm:$0xff] %v13644_v17  ;;  %16442 = vst [vmem:[#allocation208_spill] sm:$0xff] %v13646_v31  ;;  %v2834_v63 = vmul.f32 %v13659_v58, %v13646_v31  ;;  %3963 = vperm.xlu1 %12029, %v3813_v4   ;;  %3958 = vperm.xlu0 %12028, %v3812_v30   ;;  %v2835_v31 = vmul.f32 %v13672_v23, %v13644_v17  ;;  %v13679_v4 = vld [vmem:[%s15771_s0 + $0xf0] sm:$0xff]  ;;  %v4368_v30 = vld [vmem:[#allocation2 + $0x708] sm:$0xff] }
 0x217   :  { %10794 = vmatmul.mubr.msk.f32.gmra.mrb[26].mxu0 %vm696_vm1, %v2833_v51 }
 0x218   :  { %v13664_v33 = vpop.permute.xlu1 %2803  ;;  %v13666_v13 = vpop.permute.xlu0 %2798  ;;  %10796 = vmatprep.mubr.msk.f32.mxu0 %vm696_vm1, %v2834_v63  ;;  %v4367_v63 = vld [vmem:[#allocation2 + $0x700] sm:$0xff] }
 0x219   :  { %16445 = vst [vmem:[#allocation211_spill] sm:$0xff] %v13664_v33  ;;  %16446 = vst [vmem:[#allocation212_spill] sm:$0xff] %v13666_v13  ;;  %v2836_v51 = vmul.f32 %v13679_v4, %v13666_v13  ;;  %3973 = vperm.xlu1 %12029, %v3815_v1   ;;  %3968 = vperm.xlu0 %12028, %v3814_v12   ;;  %v2837_v17 = vmul.f32 %v13664_v33, %v13158_v57  ;;  %v4370_v1 = vld [vmem:[#allocation2 + $0x718] sm:$0xff]  ;;  %v4369_v12 = vld [vmem:[#allocation2 + $0x710] sm:$0xff] }
 0x21b   :  { %10797 = vmatmul.mubr.msk.f32.gmra.mrb[28].mxu0 %vm696_vm1, %v2835_v31 }
 0x21c   :  { %v13684_v58 = vpop.permute.xlu1 %3238  ;;  %v13686_v49 = vpop.permute.xlu0 %3233  ;;  %10799 = vmatprep.mubr.msk.f32.mxu0 %vm696_vm1, %v2836_v51 }
 0x21d   :  { %16448 = vst [vmem:[#allocation214_spill] sm:$0xff] %v13684_v58  ;;  %16449 = vst [vmem:[#allocation215_spill] sm:$0xff] %v13686_v49  ;;  %v3391_v23 = vmul.f32 %v13686_v49, %v12907_v7  ;;  %4406 = vperm.xlu1 %12029, %v4368_v30   ;;  %4401 = vperm.xlu0 %12028, %v4367_v63   ;;  %v3392_v51 = vmul.f32 %v13684_v58, %v12911_v29  ;;  %v4372_v7 = vld [vmem:[#allocation2 + $0x728] sm:$0xff]  ;;  %v4371_v30 = vld [vmem:[#allocation2 + $0x720] sm:$0xff] }
 0x21e   :  { %v13704_v63 = vld [vmem:[#allocation4 + $0x1c] sm:$0x7] }
 0x21f   :  { %10800 = vmatmul.mubr.msk.f32.gmra.mrb[30].mxu0 %vm696_vm1, %v2837_v17 }
 0x220   :  { %v13694_v13 = vpop.permute.xlu1 %3248  ;;  %v13696_v31 = vpop.permute.xlu0 %3243  ;;  %10804 = vmatprep.mubr.msk.f32.mxu0 %vm696_vm1, %v3391_v23 }
 0x221   :  { %16450 = vst [vmem:[#allocation216_spill] sm:$0xff] %v13694_v13  ;;  %16451 = vst [vmem:[#allocation217_spill] sm:$0xff] %v13696_v31  ;;  %v3393_v33 = vmul.f32 %v13696_v31, %v12925_v22  ;;  %4416 = vperm.xlu1 %12029, %v4370_v1   ;;  %4411 = vperm.xlu0 %12028, %v4369_v12   ;;  %v3394_v31 = vmul.f32 %v13694_v13, %v12929_v37  ;;  %v4374_v12 = vld [vmem:[#allocation2 + $0x738] sm:$0xff] }
 0x223   :  { %10805 = vmatmul.mubr.msk.f32.vlgmr.msra.gmra.mrb[0].mxu0 %vm696_vm1, %v3392_v51  ;;  %v4373_v51 = vld [vmem:[#allocation2 + $0x730] sm:$0xff] }
 0x224   :  { %10853 = vmatpush3.msk.msra.mxu0 %vm793_vm0, %v13398_v41  ;;  %v13708_v17 = vpop.permute.xlu1 %3258  ;;  %v13710_v23 = vpop.permute.xlu0 %3253  ;;  %10807 = vmatprep.mubr.msk.f32.mxu0 %vm696_vm1, %v3393_v33 }
 0x225   :  { %16452 = vst [vmem:[#allocation218_spill] sm:$0xff] %v13708_v17  ;;  %16453 = vst [vmem:[#allocation219_spill] sm:$0xff] %v13710_v23  ;;  %v3395_v1 = vmul.f32 %v13710_v23, %v12947_v32  ;;  %4426 = vperm.xlu1 %12029, %v4372_v7   ;;  %4421 = vperm.xlu0 %12028, %v4371_v30   ;;  %v3396_v33 = vmul.f32 %v13708_v17, %v12951_v36  ;;  %v4376_v30 = vld [vmem:[#allocation2 + $0x748] sm:$0xff]  ;;  %v4375_v23 = vld [vmem:[#allocation2 + $0x740] sm:$0xff] }
 0x226   :  { %10902 = vmatprep.subr.msk.mxu0 %vm793_vm0, %v13704_v63 }
 0x227   :  { %10808 = vmatmul.mubr.msk.f32.gmra.mrb[2].mxu0 %vm696_vm1, %v3394_v31 }
 0x228   :  { %v13720_v41 = vpop.permute.xlu1 %3268  ;;  %v13722_v58 = vpop.permute.xlu0 %3263  ;;  %10810 = vmatprep.mubr.msk.f32.mxu0 %vm696_vm1, %v3395_v1 }
 0x229   :  { %16454 = vst [vmem:[#allocation220_spill] sm:$0xff] %v13720_v41  ;;  %16455 = vst [vmem:[#allocation221_spill] sm:$0xff] %v13722_v58  ;;  %v3397_v7 = vmul.f32 %v13722_v58, %v12967_v40  ;;  %4436 = vperm.xlu1 %12029, %v4374_v12   ;;  %4431 = vperm.xlu0 %12028, %v4373_v51   ;;  %v3398_v1 = vmul.f32 %v13720_v41, %v12971_v54  ;;  %v4378_v12 = vld [vmem:[#allocation2 + $0x758] sm:$0xff]  ;;  %v4377_v51 = vld [vmem:[#allocation2 + $0x750] sm:$0xff] }
 0x22b   :  { %10811 = vmatmul.mubr.msk.f32.gmra.mrb[4].mxu0 %vm696_vm1, %v3396_v33 }
 0x22c   :  { %v13730_v13 = vpop.permute.xlu1 %3278  ;;  %v13732_v31 = vpop.permute.xlu0 %3273  ;;  %10813 = vmatprep.mubr.msk.f32.mxu0 %vm696_vm1, %v3397_v7 }
 0x22d   :  { %16456 = vst [vmem:[#allocation222_spill] sm:$0xff] %v13730_v13  ;;  %16457 = vst [vmem:[#allocation223_spill] sm:$0xff] %v13732_v31  ;;  %v3399_v17 = vmul.f32 %v13732_v31, %v12985_v46  ;;  %4446 = vperm.xlu1 %12029, %v4376_v30   ;;  %4441 = vperm.xlu0 %12028, %v4375_v23   ;;  %v3400_v7 = vmul.f32 %v13730_v13, %v12989_v61  ;;  %v4380_v30 = vld [vmem:[#allocation2 + $0x768] sm:$0xff]  ;;  %v4379_v23 = vld [vmem:[#allocation2 + $0x760] sm:$0xff] }
 0x22f   :  { %10814 = vmatmul.mubr.msk.f32.gmra.mrb[6].mxu0 %vm696_vm1, %v3398_v1 }
 0x230   :  { %v13740_v58 = vpop.permute.xlu1 %3288  ;;  %v13742_v33 = vpop.permute.xlu0 %3283  ;;  %10816 = vmatprep.mubr.msk.f32.mxu0 %vm696_vm1, %v3399_v17 }
 0x231   :  { %16458 = vst [vmem:[#allocation224_spill] sm:$0xff] %v13740_v58  ;;  %16459 = vst [vmem:[#allocation225_spill] sm:$0xff] %v13742_v33  ;;  %v3401_v41 = vmul.f32 %v13742_v33, %v13003_v18  ;;  %4456 = vperm.xlu1 %12029, %v4378_v12   ;;  %4451 = vperm.xlu0 %12028, %v4377_v51   ;;  %v3402_v17 = vmul.f32 %v13740_v58, %v13007_v25  ;;  %v4382_v12 = vld [vmem:[#allocation2 + $0x778] sm:$0xff]  ;;  %v4381_v51 = vld [vmem:[#allocation2 + $0x770] sm:$0xff] }
 0x233   :  { %10817 = vmatmul.mubr.msk.f32.gmra.mrb[8].mxu0 %vm696_vm1, %v3400_v7 }
 0x234   :  { %v13750_v31 = vpop.permute.xlu1 %3298  ;;  %v13752_v1 = vpop.permute.xlu0 %3293  ;;  %10819 = vmatprep.mubr.msk.f32.mxu0 %vm696_vm1, %v3401_v41 }
 0x235   :  { %16460 = vst [vmem:[#allocation226_spill] sm:$0xff] %v13750_v31  ;;  %16461 = vst [vmem:[#allocation227_spill] sm:$0xff] %v13752_v1  ;;  %v3403_v13 = vmul.f32 %v13752_v1, %v13021_v48  ;;  %4466 = vperm.xlu1 %12029, %v4380_v30   ;;  %4461 = vperm.xlu0 %12028, %v4379_v23   ;;  %v3404_v41 = vmul.f32 %v13750_v31, %v13025_v8  ;;  %v4384_v30 = vld [vmem:[#allocation2 + $0x788] sm:$0xff]  ;;  %v4383_v23 = vld [vmem:[#allocation2 + $0x780] sm:$0xff] }
 0x237   :  { %10820 = vmatmul.mubr.msk.f32.gmra.mrb[10].mxu0 %vm696_vm1, %v3402_v17 }
 0x238   :  { %v13760_v33 = vpop.permute.xlu1 %3308  ;;  %v13762_v7 = vpop.permute.xlu0 %3303  ;;  %10822 = vmatprep.mubr.msk.f32.mxu0 %vm696_vm1, %v3403_v13 }
 0x239   :  { %16462 = vst [vmem:[#allocation228_spill] sm:$0xff] %v13760_v33  ;;  %16463 = vst [vmem:[#allocation229_spill] sm:$0xff] %v13762_v7  ;;  %v3405_v58 = vmul.f32 %v13762_v7, %v13039_v56  ;;  %4476 = vperm.xlu1 %12029, %v4382_v12   ;;  %4471 = vperm.xlu0 %12028, %v4381_v51   ;;  %v3406_v13 = vmul.f32 %v13760_v33, %v13043_v16  ;;  %v4386_v12 = vld [vmem:[#allocation2 + $0x798] sm:$0xff]  ;;  %v4385_v51 = vld [vmem:[#allocation2 + $0x790] sm:$0xff] }
 0x23b   :  { %10823 = vmatmul.mubr.msk.f32.gmra.mrb[12].mxu0 %vm696_vm1, %v3404_v41 }
 0x23c   :  { %v13770_v1 = vpop.permute.xlu1 %3318  ;;  %v13772_v17 = vpop.permute.xlu0 %3313  ;;  %10825 = vmatprep.mubr.msk.f32.mxu0 %vm696_vm1, %v3405_v58 }
 0x23d   :  { %16464 = vst [vmem:[#allocation230_spill] sm:$0xff] %v13770_v1  ;;  %16465 = vst [vmem:[#allocation231_spill] sm:$0xff] %v13772_v17  ;;  %v3407_v31 = vmul.f32 %v13772_v17, %v13057_v0  ;;  %4486 = vperm.xlu1 %12029, %v4384_v30   ;;  %4481 = vperm.xlu0 %12028, %v4383_v23   ;;  %v3408_v58 = vmul.f32 %v13770_v1, %v13061_v34  ;;  %v4388_v30 = vld [vmem:[#allocation2 + $0x7a8] sm:$0xff]  ;;  %v4387_v23 = vld [vmem:[#allocation2 + $0x7a0] sm:$0xff] }
 0x23f   :  { %10826 = vmatmul.mubr.msk.f32.gmra.mrb[14].mxu0 %vm696_vm1, %v3406_v13 }
 0x240   :  { %v13780_v7 = vpop.permute.xlu1 %3328  ;;  %v13782_v41 = vpop.permute.xlu0 %3323  ;;  %10828 = vmatprep.mubr.msk.f32.mxu0 %vm696_vm1, %v3407_v31 }
 0x241   :  { %16466 = vst [vmem:[#allocation232_spill] sm:$0xff] %v13780_v7  ;;  %16467 = vst [vmem:[#allocation233_spill] sm:$0xff] %v13782_v41  ;;  %v3409_v33 = vmul.f32 %v13782_v41, %v13075_v11  ;;  %4496 = vperm.xlu1 %12029, %v4386_v12   ;;  %4491 = vperm.xlu0 %12028, %v4385_v51   ;;  %v3410_v31 = vmul.f32 %v13780_v7, %v13079_v26  ;;  %v4390_v12 = vld [vmem:[#allocation2 + $0x7b8] sm:$0xff]  ;;  %v4389_v51 = vld [vmem:[#allocation2 + $0x7b0] sm:$0xff] }
 0x243   :  { %10829 = vmatmul.mubr.msk.f32.gmra.mrb[16].mxu0 %vm696_vm1, %v3408_v58 }
 0x244   :  { %v13790_v17 = vpop.permute.xlu1 %3338  ;;  %v13792_v13 = vpop.permute.xlu0 %3333  ;;  %10831 = vmatprep.mubr.msk.f32.mxu0 %vm696_vm1, %v3409_v33 }
 0x245   :  { %16468 = vst [vmem:[#allocation234_spill] sm:$0xff] %v13790_v17  ;;  %16469 = vst [vmem:[#allocation235_spill] sm:$0xff] %v13792_v13  ;;  %v3411_v1 = vmul.f32 %v13792_v13, %v13093_v28  ;;  %4506 = vperm.xlu1 %12029, %v4388_v30   ;;  %4501 = vperm.xlu0 %12028, %v4387_v23   ;;  %v3412_v33 = vmul.f32 %v13790_v17, %v13097_v14  ;;  %v4392_v30 = vld [vmem:[#allocation2 + $0x7c8] sm:$0xff]  ;;  %v4391_v23 = vld [vmem:[#allocation2 + $0x7c0] sm:$0xff] }
 0x247   :  { %10832 = vmatmul.mubr.msk.f32.gmra.mrb[18].mxu0 %vm696_vm1, %v3410_v31 }
 0x248   :  { %v13800_v41 = vpop.permute.xlu1 %3348  ;;  %v13802_v58 = vpop.permute.xlu0 %3343  ;;  %10834 = vmatprep.mubr.msk.f32.mxu0 %vm696_vm1, %v3411_v1 }
 0x249   :  { %16470 = vst [vmem:[#allocation236_spill] sm:$0xff] %v13800_v41  ;;  %16471 = vst [vmem:[#allocation237_spill] sm:$0xff] %v13802_v58  ;;  %v3413_v7 = vmul.f32 %v13802_v58, %v13111_v44  ;;  %4516 = vperm.xlu1 %12029, %v4390_v12   ;;  %4511 = vperm.xlu0 %12028, %v4389_v51   ;;  %v3414_v1 = vmul.f32 %v13800_v41, %v13115_v15  ;;  %v4394_v12 = vld [vmem:[#allocation2 + $0x7d8] sm:$0xff]  ;;  %v4393_v51 = vld [vmem:[#allocation2 + $0x7d0] sm:$0xff] }
 0x24b   :  { %10835 = vmatmul.mubr.msk.f32.gmra.mrb[20].mxu0 %vm696_vm1, %v3412_v33 }
 0x24c   :  { %v13810_v13 = vpop.permute.xlu1 %3358  ;;  %v13812_v31 = vpop.permute.xlu0 %3353  ;;  %10837 = vmatprep.mubr.msk.f32.mxu0 %vm696_vm1, %v3413_v7 }
 0x24d   :  { %16472 = vst [vmem:[#allocation238_spill] sm:$0xff] %v13810_v13  ;;  %16473 = vst [vmem:[#allocation239_spill] sm:$0xff] %v13812_v31  ;;  %v3415_v17 = vmul.f32 %v13812_v31, %v13129_v60  ;;  %4526 = vperm.xlu1 %12029, %v4392_v30   ;;  %4521 = vperm.xlu0 %12028, %v4391_v23   ;;  %v3416_v7 = vmul.f32 %v13810_v13, %v13133_v62  ;;  %v4396_v30 = vld [vmem:[#allocation2 + $0x7e8] sm:$0xff]  ;;  %v4395_v23 = vld [vmem:[#allocation2 + $0x7e0] sm:$0xff] }
 0x24f   :  { %10838 = vmatmul.mubr.msk.f32.gmra.mrb[22].mxu0 %vm696_vm1, %v3414_v1 }
 0x250   :  { %v13820_v58 = vpop.permute.xlu1 %3368  ;;  %v13822_v33 = vpop.permute.xlu0 %3363  ;;  %10840 = vmatprep.mubr.msk.f32.mxu0 %vm696_vm1, %v3415_v17 }
 0x251   :  { %16474 = vst [vmem:[#allocation240_spill] sm:$0xff] %v13820_v58  ;;  %16475 = vst [vmem:[#allocation241_spill] sm:$0xff] %v13822_v33  ;;  %v3417_v41 = vmul.f32 %v13822_v33, %v13147_v20  ;;  %4536 = vperm.xlu1 %12029, %v4394_v12   ;;  %4531 = vperm.xlu0 %12028, %v4393_v51   ;;  %v3418_v17 = vmul.f32 %v13820_v58, %v13151_v42  ;;  %v4398_v12 = vld [vmem:[#allocation2 + $0x7f8] sm:$0xff]  ;;  %v4397_v51 = vld [vmem:[#allocation2 + $0x7f0] sm:$0xff] }
 0x253   :  { %10841 = vmatmul.mubr.msk.f32.gmra.mrb[24].mxu0 %vm696_vm1, %v3416_v7 }
 0x254   :  { %v13830_v31 = vpop.permute.xlu1 %3378  ;;  %v13832_v1 = vpop.permute.xlu0 %3373  ;;  %10843 = vmatprep.mubr.msk.f32.mxu0 %vm696_vm1, %v3417_v41 }
 0x255   :  { %16476 = vst [vmem:[#allocation242_spill] sm:$0xff] %v13830_v31  ;;  %16477 = vst [vmem:[#allocation243_spill] sm:$0xff] %v13832_v1  ;;  %v3419_v13 = vmul.f32 %v13832_v1, %v13170_v2  ;;  %4546 = vperm.xlu1 %12029, %v4396_v30   ;;  %4541 = vperm.xlu0 %12028, %v4395_v23   ;;  %v3420_v41 = vmul.f32 %v13830_v31, %v13174_v19  ;;  %v16480_v30 = vrot.slane %v13158_v57, 1  ;;  %v4950_v1 = vld [vmem:[#allocation2 + $0x800] sm:$0xff] }
 0x257   :  { %10844 = vmatmul.mubr.msk.f32.gmra.mrb[26].mxu0 %vm696_vm1, %v3418_v17  ;;  %v13852_v23 = vsel %vm1347_vm4, %v16480_v30, 0.0  ;;  %v4951_v17 = vld [vmem:[#allocation2 + $0x808] sm:$0xff]  ;;  %v4952_v30 = vld [vmem:[#allocation2 + $0x810] sm:$0xff] }
 0x258   :  { %v13840_v33 = vpop.permute.xlu1 %3388  ;;  %v13842_v7 = vpop.permute.xlu0 %3383  ;;  %10846 = vmatprep.mubr.msk.f32.mxu0 %vm696_vm1, %v3419_v13 }
 0x259   :  { %16478 = vst [vmem:[#allocation244_spill] sm:$0xff] %v13840_v33  ;;  %16479 = vst [vmem:[#allocation245_spill] sm:$0xff] %v13842_v7  ;;  %v3421_v58 = vmul.f32 %v13842_v7, %v13189_v35  ;;  %4556 = vperm.xlu1 %12029, %v4398_v12   ;;  %4551 = vperm.xlu0 %12028, %v4397_v51   ;;  %v3422_v7 = vmul.f32 %v13840_v33, %v13852_v23  ;;  %v4953_v51 = vld [vmem:[#allocation2 + $0x818] sm:$0xff] }
 0x25b   :  { %10847 = vmatmul.mubr.msk.f32.gmra.mrb[28].mxu0 %vm696_vm1, %v3420_v41 }
 0x25c   :  { %v13855_v49 = vpop.permute.xlu1 %3823  ;;  %v13857_v13 = vpop.permute.xlu0 %3818  ;;  %10849 = vmatprep.mubr.msk.f32.mxu0 %vm696_vm1, %v3421_v58 }
 0x25d   :  { %16481 = vst [vmem:[#allocation246_spill] sm:$0xff] %v13855_v49  ;;  %16482 = vst [vmem:[#allocation247_spill] sm:$0xff] %v13857_v13  ;;  %v3976_v12 = vmul.f32 %v13857_v13, %v12617_v27  ;;  %4989 = vperm.xlu1 %12029, %v4951_v17   ;;  %4984 = vperm.xlu0 %12028, %v4950_v1   ;;  %v3977_v58 = vmul.f32 %v13855_v49, %v12632_v47  ;;  %v4955_v27 = vld [vmem:[#allocation2 + $0x828] sm:$0xff]  ;;  %v4954_v1 = vld [vmem:[#allocation2 + $0x820] sm:$0xff] }
 0x25e   :  { %v13875_v17 = vld [vmem:[#allocation4 + $0x20] sm:$0x7]  ;;  %v16681_v49 = vld [vmem:[#allocation48_spill] sm:$0xff]  ;;  %v16682_v13 = vld [vmem:[#allocation51_spill] sm:$0xff] }
 0x25f   :  { %10850 = vmatmul.mubr.msk.f32.gmra.mrb[30].mxu0 %vm696_vm1, %v3422_v7 }
 0x260   :  { %v13865_v31 = vpop.permute.xlu1 %3833  ;;  %v13867_v41 = vpop.permute.xlu0 %3828  ;;  %10854 = vmatprep.mubr.msk.f32.mxu0 %vm696_vm1, %v3976_v12 }
 0x261   :  { %16483 = vst [vmem:[#allocation248_spill] sm:$0xff] %v13865_v31  ;;  %16484 = vst [vmem:[#allocation249_spill] sm:$0xff] %v13867_v41  ;;  %v3978_v33 = vmul.f32 %v13867_v41, %v12636_v43  ;;  %4999 = vperm.xlu1 %12029, %v4953_v51   ;;  %4994 = vperm.xlu0 %12028, %v4952_v30   ;;  %v3979_v43 = vmul.f32 %v13865_v31, %v12654_v55  ;;  %v4957_v51 = vld [vmem:[#allocation2 + $0x838] sm:$0xff]  ;;  %v4956_v30 = vld [vmem:[#allocation2 + $0x830] sm:$0xff] }
 0x263   :  { %10855 = vmatmul.mubr.msk.f32.vlgmr.msra.gmra.mrb[0].mxu0 %vm696_vm1, %v3977_v58 }
 0x264   :  { %10903 = vmatpush3.msk.msra.mxu0 %vm793_vm0, %v13704_v63  ;;  %v13879_v7 = vpop.permute.xlu1 %3843  ;;  %v13881_v12 = vpop.permute.xlu0 %3838  ;;  %10857 = vmatprep.mubr.msk.f32.mxu0 %vm696_vm1, %v3978_v33  ;;  %v4959_v33 = vld [vmem:[#allocation2 + $0x848] sm:$0xff] }
 0x265   :  { %16485 = vst [vmem:[#allocation250_spill] sm:$0xff] %v13879_v7  ;;  %16486 = vst [vmem:[#allocation251_spill] sm:$0xff] %v13881_v12  ;;  %v3980_v47 = vmul.f32 %v13881_v12, %v12658_v21  ;;  %5009 = vperm.xlu1 %12029, %v4955_v27   ;;  %5004 = vperm.xlu0 %12028, %v4954_v1   ;;  %v3981_v55 = vmul.f32 %v13879_v7, %v12674_v10  ;;  %v4958_v27 = vld [vmem:[#allocation2 + $0x840] sm:$0xff]  ;;  %v16674_v7 = vld [vmem:[#allocation47_spill] sm:$0xff] }
 0x266   :  { %10952 = vmatprep.subr.msk.mxu0 %vm793_vm0, %v13875_v17 }
 0x267   :  { %10858 = vmatmul.mubr.msk.f32.gmra.mrb[2].mxu0 %vm696_vm1, %v3979_v43 }
 0x268   :  { %v13891_v63 = vpop.permute.xlu1 %3853  ;;  %v13893_v58 = vpop.permute.xlu0 %3848  ;;  %10860 = vmatprep.mubr.msk.f32.mxu0 %vm696_vm1, %v3980_v47 }
 0x269   :  { %16487 = vst [vmem:[#allocation252_spill] sm:$0xff] %v13891_v63  ;;  %16488 = vst [vmem:[#allocation253_spill] sm:$0xff] %v13893_v58  ;;  %v3982_v21 = vmul.f32 %v13893_v58, %v12678_v39  ;;  %5019 = vperm.xlu1 %12029, %v4957_v51   ;;  %5014 = vperm.xlu0 %12028, %v4956_v30   ;;  %v3983_v47 = vmul.f32 %v13891_v63, %v12692_v59  ;;  %v4961_v39 = vld [vmem:[#allocation2 + $0x858] sm:$0xff]  ;;  %v4960_v51 = vld [vmem:[#allocation2 + $0x850] sm:$0xff] }
 0x26a   :  { %v16496_v63 = vld [vmem:[#allocation59_spill] sm:$0xff] }
 0x26b   :  { %10861 = vmatmul.mubr.msk.f32.gmra.mrb[4].mxu0 %vm696_vm1, %v3981_v55 }
 0x26c   :  { %v13901_v1 = vpop.permute.xlu1 %3863  ;;  %v13903_v43 = vpop.permute.xlu0 %3858  ;;  %10863 = vmatprep.mubr.msk.f32.mxu0 %vm696_vm1, %v3982_v21 }
 0x26d   :  { %16489 = vst [vmem:[#allocation254_spill] sm:$0xff] %v13901_v1  ;;  %16490 = vst [vmem:[#allocation255_spill] sm:$0xff] %v13903_v43  ;;  %v3984_v10 = vmul.f32 %v13903_v43, %v12696_v6  ;;  %5029 = vperm.xlu1 %12029, %v4959_v33   ;;  %5024 = vperm.xlu0 %12028, %v4958_v27   ;;  %v3985_v21 = vmul.f32 %v13901_v1, %v12710_v3  ;;  %v4963_v6 = vld [vmem:[#allocation2 + $0x868] sm:$0xff]  ;;  %v4962_v33 = vld [vmem:[#allocation2 + $0x860] sm:$0xff] }
 0x26e   :  { %v16495_v43 = vld [vmem:[#allocation58_spill] sm:$0xff]  ;;  %v16500_v1 = vld [vmem:[#allocation63_spill] sm:$0xff] }
 0x26f   :  { %10864 = vmatmul.mubr.msk.f32.gmra.mrb[6].mxu0 %vm696_vm1, %v3983_v47 }
 0x270   :  { %v13911_v30 = vpop.permute.xlu1 %3873  ;;  %v13913_v55 = vpop.permute.xlu0 %3868  ;;  %10866 = vmatprep.mubr.msk.f32.mxu0 %vm696_vm1, %v3984_v10 }
 0x271   :  { %16491 = vst [vmem:[#allocation256_spill] sm:$0xff] %v13911_v30  ;;  %16492 = vst [vmem:[#allocation257_spill] sm:$0xff] %v13913_v55  ;;  %v3986_v59 = vmul.f32 %v13913_v55, %v12714_v53  ;;  %5039 = vperm.xlu1 %12029, %v4961_v39   ;;  %5034 = vperm.xlu0 %12028, %v4960_v51   ;;  %v3987_v10 = vmul.f32 %v13911_v30, %v16495_v43  ;;  %v4965_v53 = vld [vmem:[#allocation2 + $0x878] sm:$0xff]  ;;  %v4964_v39 = vld [vmem:[#allocation2 + $0x870] sm:$0xff] }
 0x272   :  { %v16499_v55 = vld [vmem:[#allocation62_spill] sm:$0xff]  ;;  %v16504_v30 = vld [vmem:[#allocation67_spill] sm:$0xff] }
 0x273   :  { %10867 = vmatmul.mubr.msk.f32.gmra.mrb[8].mxu0 %vm696_vm1, %v3985_v21 }
 0x274   :  { %v13921_v27 = vpop.permute.xlu1 %3883  ;;  %v13923_v47 = vpop.permute.xlu0 %3878  ;;  %10869 = vmatprep.mubr.msk.f32.mxu0 %vm696_vm1, %v3986_v59 }
 0x275   :  { %16493 = vst [vmem:[#allocation258_spill] sm:$0xff] %v13921_v27  ;;  %16494 = vst [vmem:[#allocation259_spill] sm:$0xff] %v13923_v47  ;;  %v3988_v3 = vmul.f32 %v13923_v47, %v16496_v63  ;;  %5049 = vperm.xlu1 %12029, %v4963_v6   ;;  %5044 = vperm.xlu0 %12028, %v4962_v33   ;;  %v3989_v59 = vmul.f32 %v13921_v27, %v16499_v55  ;;  %v4967_v63 = vld [vmem:[#allocation2 + $0x888] sm:$0xff]  ;;  %v4966_v6 = vld [vmem:[#allocation2 + $0x880] sm:$0xff] }
 0x276   :  { %v16503_v47 = vld [vmem:[#allocation66_spill] sm:$0xff]  ;;  %v16508_v27 = vld [vmem:[#allocation71_spill] sm:$0xff] }
 0x277   :  { %10870 = vmatmul.mubr.msk.f32.gmra.mrb[10].mxu0 %vm696_vm1, %v3987_v10 }
 0x278   :  { %v13931_v51 = vpop.permute.xlu1 %3893  ;;  %v13933_v21 = vpop.permute.xlu0 %3888  ;;  %10872 = vmatprep.mubr.msk.f32.mxu0 %vm696_vm1, %v3988_v3 }
 0x279   :  { %16497 = vst [vmem:[#allocation58_spill] sm:$0xff] %v13931_v51  ;;  %16498 = vst [vmem:[#allocation59_spill] sm:$0xff] %v13933_v21  ;;  %v3990_v43 = vmul.f32 %v13933_v21, %v16500_v1  ;;  %5059 = vperm.xlu1 %12029, %v4965_v53   ;;  %5054 = vperm.xlu0 %12028, %v4964_v39   ;;  %v3991_v3 = vmul.f32 %v13931_v51, %v16503_v47  ;;  %v4969_v1 = vld [vmem:[#allocation2 + $0x898] sm:$0xff]  ;;  %v4968_v53 = vld [vmem:[#allocation2 + $0x890] sm:$0xff] }
 0x27a   :  { %v16507_v21 = vld [vmem:[#allocation70_spill] sm:$0xff] }
 0x27b   :  { %10873 = vmatmul.mubr.msk.f32.gmra.mrb[12].mxu0 %vm696_vm1, %v3989_v59 }
 0x27c   :  { %v13941_v33 = vpop.permute.xlu1 %3903  ;;  %v13943_v10 = vpop.permute.xlu0 %3898  ;;  %10875 = vmatprep.mubr.msk.f32.mxu0 %vm696_vm1, %v3990_v43 }
 0x27d   :  { %16501 = vst [vmem:[#allocation62_spill] sm:$0xff] %v13941_v33  ;;  %16502 = vst [vmem:[#allocation63_spill] sm:$0xff] %v13943_v10  ;;  %v3992_v55 = vmul.f32 %v13943_v10, %v16504_v30  ;;  %5069 = vperm.xlu1 %12029, %v4967_v63   ;;  %5064 = vperm.xlu0 %12028, %v4966_v6   ;;  %v3993_v43 = vmul.f32 %v13941_v33, %v16507_v21  ;;  %v4971_v30 = vld [vmem:[#allocation2 + $0x8a8] sm:$0xff]  ;;  %v4970_v63 = vld [vmem:[#allocation2 + $0x8a0] sm:$0xff] }
 0x27e   :  { %v16511_v10 = vld [vmem:[#allocation74_spill] sm:$0xff] }
 0x27f   :  { %10876 = vmatmul.mubr.msk.f32.gmra.mrb[14].mxu0 %vm696_vm1, %v3991_v3 }
 0x280   :  { %v13951_v39 = vpop.permute.xlu1 %3913  ;;  %v13953_v59 = vpop.permute.xlu0 %3908  ;;  %10878 = vmatprep.mubr.msk.f32.mxu0 %vm696_vm1, %v3992_v55 }
 0x281   :  { %16505 = vst [vmem:[#allocation66_spill] sm:$0xff] %v13951_v39  ;;  %16506 = vst [vmem:[#allocation67_spill] sm:$0xff] %v13953_v59  ;;  %v3994_v47 = vmul.f32 %v13953_v59, %v16508_v27  ;;  %5079 = vperm.xlu1 %12029, %v4969_v1   ;;  %5074 = vperm.xlu0 %12028, %v4968_v53   ;;  %v3995_v55 = vmul.f32 %v13951_v39, %v16511_v10  ;;  %v4973_v27 = vld [vmem:[#allocation2 + $0x8b8] sm:$0xff]  ;;  %v4972_v1 = vld [vmem:[#allocation2 + $0x8b0] sm:$0xff] }
 0x282   :  { %v16514_v59 = vld [vmem:[#allocation78_spill] sm:$0xff]  ;;  %v16672_v39 = vld [vmem:[#allocation44_spill] sm:$0xff] }
 0x283   :  { %10879 = vmatmul.mubr.msk.f32.gmra.mrb[16].mxu0 %vm696_vm1, %v3993_v43 }
 0x284   :  { %v13961_v6 = vpop.permute.xlu1 %3923  ;;  %v13963_v3 = vpop.permute.xlu0 %3918  ;;  %10881 = vmatprep.mubr.msk.f32.mxu0 %vm696_vm1, %v3994_v47 }
 0x285   :  { %16509 = vst [vmem:[#allocation70_spill] sm:$0xff] %v13961_v6  ;;  %16510 = vst [vmem:[#allocation71_spill] sm:$0xff] %v13963_v3  ;;  %v3996_v21 = vmul.f32 %v13963_v3, %v16372_v45  ;;  %5089 = vperm.xlu1 %12029, %v4971_v30   ;;  %5084 = vperm.xlu0 %12028, %v4970_v63   ;;  %v3997_v47 = vmul.f32 %v13961_v6, %v16514_v59  ;;  %v4975_v45 = vld [vmem:[#allocation2 + $0x8c8] sm:$0xff]  ;;  %v4974_v30 = vld [vmem:[#allocation2 + $0x8c0] sm:$0xff] }
 0x286   :  { %v16517_v3 = vld [vmem:[#allocation82_spill] sm:$0xff]  ;;  %v16521_v6 = vld [vmem:[#allocation87_spill] sm:$0xff] }
 0x287   :  { %10882 = vmatmul.mubr.msk.f32.gmra.mrb[18].mxu0 %vm696_vm1, %v3995_v55 }
 0x288   :  { %v13971_v53 = vpop.permute.xlu1 %3933  ;;  %v13973_v43 = vpop.permute.xlu0 %3928  ;;  %10884 = vmatprep.mubr.msk.f32.mxu0 %vm696_vm1, %v3996_v21 }
 0x289   :  { %16512 = vst [vmem:[#allocation74_spill] sm:$0xff] %v13971_v53  ;;  %16513 = vst [vmem:[#allocation260_spill] sm:$0xff] %v13973_v43  ;;  %v3998_v10 = vmul.f32 %v13973_v43, %v16376_v50  ;;  %5099 = vperm.xlu1 %12029, %v4973_v27   ;;  %5094 = vperm.xlu0 %12028, %v4972_v1   ;;  %v3999_v21 = vmul.f32 %v13971_v53, %v16517_v3  ;;  %v4977_v50 = vld [vmem:[#allocation2 + $0x8d8] sm:$0xff]  ;;  %v4976_v27 = vld [vmem:[#allocation2 + $0x8d0] sm:$0xff] }
 0x28a   :  { %v16520_v43 = vld [vmem:[#allocation86_spill] sm:$0xff] }
 0x28b   :  { %10885 = vmatmul.mubr.msk.f32.gmra.mrb[20].mxu0 %vm696_vm1, %v3997_v47 }
 0x28c   :  { %v13981_v63 = vpop.permute.xlu1 %3943  ;;  %v13983_v55 = vpop.permute.xlu0 %3938  ;;  %10887 = vmatprep.mubr.msk.f32.mxu0 %vm696_vm1, %v3998_v10 }
 0x28d   :  { %16515 = vst [vmem:[#allocation78_spill] sm:$0xff] %v13981_v63  ;;  %16516 = vst [vmem:[#allocation261_spill] sm:$0xff] %v13983_v55  ;;  %v4000_v59 = vmul.f32 %v13983_v55, %v16380_v52  ;;  %5109 = vperm.xlu1 %12029, %v4975_v45   ;;  %5104 = vperm.xlu0 %12028, %v4974_v30   ;;  %v4001_v10 = vmul.f32 %v13981_v63, %v16520_v43  ;;  %v4979_v52 = vld [vmem:[#allocation2 + $0x8e8] sm:$0xff]  ;;  %v4978_v45 = vld [vmem:[#allocation2 + $0x8e0] sm:$0xff] }
 0x28e   :  { %v16524_v55 = vld [vmem:[#allocation90_spill] sm:$0xff] }
 0x28f   :  { %10888 = vmatmul.mubr.msk.f32.gmra.mrb[22].mxu0 %vm696_vm1, %v3999_v21 }
 0x290   :  { %v13991_v1 = vpop.permute.xlu1 %3953  ;;  %v13993_v47 = vpop.permute.xlu0 %3948  ;;  %10890 = vmatprep.mubr.msk.f32.mxu0 %vm696_vm1, %v4000_v59 }
 0x291   :  { %16518 = vst [vmem:[#allocation82_spill] sm:$0xff] %v13991_v1  ;;  %16519 = vst [vmem:[#allocation262_spill] sm:$0xff] %v13993_v47  ;;  %v4002_v3 = vmul.f32 %v13993_v47, %v16521_v6  ;;  %5119 = vperm.xlu1 %12029, %v4977_v50   ;;  %5114 = vperm.xlu0 %12028, %v4976_v27   ;;  %v4003_v59 = vmul.f32 %v13991_v1, %v16524_v55  ;;  %v4981_v6 = vld [vmem:[#allocation2 + $0x8f8] sm:$0xff]  ;;  %v4980_v50 = vld [vmem:[#allocation2 + $0x8f0] sm:$0xff] }
 0x293   :  { %10891 = vmatmul.mubr.msk.f32.gmra.mrb[24].mxu0 %vm696_vm1, %v4001_v10 }
 0x294   :  { %v14001_v30 = vpop.permute.xlu1 %3963  ;;  %v14003_v21 = vpop.permute.xlu0 %3958  ;;  %10893 = vmatprep.mubr.msk.f32.mxu0 %vm696_vm1, %v4002_v3 }
 0x295   :  { %16522 = vst [vmem:[#allocation86_spill] sm:$0xff] %v14001_v30  ;;  %16523 = vst [vmem:[#allocation87_spill] sm:$0xff] %v14003_v21  ;;  %v4004_v43 = vmul.f32 %v14003_v21, %v16386_v5  ;;  %5129 = vperm.xlu1 %12029, %v4979_v52   ;;  %5124 = vperm.xlu0 %12028, %v4978_v45   ;;  %v4005_v3 = vmul.f32 %v14001_v30, %v12892_v9  ;;  %v16527_v5 = vrot.slane %v13158_v57, 7  ;;  %v16666_v21 = vld [vmem:[#allocation43_spill] sm:$0xff] }
 0x297   :  { %10894 = vmatmul.mubr.msk.f32.gmra.mrb[26].mxu0 %vm696_vm1, %v4003_v59  ;;  %v3782_v52 = vsel %vm150_vm3, %v16527_v5, 0.0 }
 0x298   :  { %v14011_v27 = vpop.permute.xlu1 %3973  ;;  %v14013_v10 = vpop.permute.xlu0 %3968  ;;  %10896 = vmatprep.mubr.msk.f32.mxu0 %vm696_vm1, %v4004_v43 }
 0x299   :  { %16525 = vst [vmem:[#allocation90_spill] sm:$0xff] %v14011_v27  ;;  %16526 = vst [vmem:[#allocation263_spill] sm:$0xff] %v14013_v10  ;;  %v4006_v55 = vmul.f32 %v14013_v10, %v13363_v24  ;;  %5139 = vperm.xlu1 %12029, %v4981_v6   ;;  %5134 = vperm.xlu0 %12028, %v4980_v50   ;;  %v4007_v43 = vmul.f32 %v14011_v27, %v3782_v52  ;;  %v16532_v6 = vld [vmem:[#allocation158_spill] sm:$0xff] }
 0x29a   :  { %v16536_v52 = vld [vmem:[#allocation162_spill] sm:$0xff] }
 0x29b   :  { %10897 = vmatmul.mubr.msk.f32.gmra.mrb[28].mxu0 %vm696_vm1, %v4005_v3  ;;  %v16533_v3 = vld [vmem:[#allocation161_spill] sm:$0xff] }
 0x29c   :  { %v14024_v45 = vpop.permute.xlu1 %4406  ;;  %v14026_v59 = vpop.permute.xlu0 %4401  ;;  %10899 = vmatprep.mubr.msk.f32.mxu0 %vm696_vm1, %v4006_v55 }
 0x29d   :  { %16528 = vst [vmem:[#allocation264_spill] sm:$0xff] %v14024_v45  ;;  %16529 = vst [vmem:[#allocation265_spill] sm:$0xff] %v14026_v59  ;;  %v4559_v9 = vmul.f32 %v13386_v38, %v14026_v59  ;;  %v4560_v50 = vmul.f32 %v16532_v6, %v14024_v45  ;;  %v16541_v45 = vld [vmem:[#allocation169_spill] sm:$0xff] }
 0x29e   :  { %v16661_v59 = vld [vmem:[#allocation41_spill] sm:$0xff] }
 0x29f   :  { %10900 = vmatmul.mubr.msk.f32.gmra.mrb[30].mxu0 %vm696_vm1, %v4007_v43 }
 0x2a0   :  { %v14033_v24 = vpop.permute.xlu1 %4416  ;;  %v14035_v57 = vpop.permute.xlu0 %4411  ;;  %10904 = vmatprep.mubr.msk.f32.mxu0 %vm696_vm1, %v4559_v9  ;;  %v16537_v9 = vld [vmem:[#allocation165_spill] sm:$0xff] }
 0x2a1   :  { %16530 = vst [vmem:[#allocation266_spill] sm:$0xff] %v14033_v24  ;;  %16531 = vst [vmem:[#allocation267_spill] sm:$0xff] %v14035_v57  ;;  %v4561_v5 = vmul.f32 %v16533_v3, %v14035_v57  ;;  %v4562_v43 = vmul.f32 %v16536_v52, %v14033_v24 }
 0x2a3   :  { %10905 = vmatmul.mubr.msk.f32.vlgmr.msra.gmra.mrb[0].mxu0 %vm696_vm1, %v4560_v50 }
 0x2a4   :  { %10953 = vmatpush3.msk.msra.mxu0 %vm793_vm0, %v13875_v17  ;;  %v14045_v38 = vpop.permute.xlu1 %4426  ;;  %v14047_v55 = vpop.permute.xlu0 %4421  ;;  %10907 = vmatprep.mubr.msk.f32.mxu0 %vm696_vm1, %v4561_v5  ;;  %v16540_v17 = vld [vmem:[#allocation166_spill] sm:$0xff] }
 0x2a5   :  { %16534 = vst [vmem:[#allocation158_spill] sm:$0xff] %v14045_v38  ;;  %16535 = vst [vmem:[#allocation161_spill] sm:$0xff] %v14047_v55  ;;  %v4563_v6 = vmul.f32 %v16537_v9, %v14047_v55  ;;  %v4564_v57 = vmul.f32 %v16540_v17, %v14045_v38  ;;  %v16545_v55 = vld [vmem:[#allocation173_spill] sm:$0xff] }
 0x2a7   :  { %10908 = vmatmul.mubr.msk.f32.gmra.mrb[2].mxu0 %vm696_vm1, %v4562_v43  ;;  %v16544_v43 = vld [vmem:[#allocation170_spill] sm:$0xff] }
 0x2a8   :  { %v14055_v3 = vpop.permute.xlu1 %4436  ;;  %v14057_v50 = vpop.permute.xlu0 %4431  ;;  %10910 = vmatprep.mubr.msk.f32.mxu0 %vm696_vm1, %v4563_v6 }
 0x2a9   :  { %16538 = vst [vmem:[#allocation162_spill] sm:$0xff] %v14055_v3  ;;  %16539 = vst [vmem:[#allocation165_spill] sm:$0xff] %v14057_v50  ;;  %v4565_v5 = vmul.f32 %v16541_v45, %v14057_v50  ;;  %v4566_v9 = vmul.f32 %v16544_v43, %v14055_v3  ;;  %v16548_v45 = vld [vmem:[#allocation174_spill] sm:$0xff]  ;;  %v16549_v50 = vld [vmem:[#allocation177_spill] sm:$0xff] }
 0x2ab   :  { %10911 = vmatmul.mubr.msk.f32.gmra.mrb[4].mxu0 %vm696_vm1, %v4564_v57 }
 0x2ac   :  { %v14065_v52 = vpop.permute.xlu1 %4446  ;;  %v14067_v24 = vpop.permute.xlu0 %4441  ;;  %10913 = vmatprep.mubr.msk.f32.mxu0 %vm696_vm1, %v4565_v5 }
 0x2ad   :  { %16542 = vst [vmem:[#allocation166_spill] sm:$0xff] %v14065_v52  ;;  %16543 = vst [vmem:[#allocation169_spill] sm:$0xff] %v14067_v24  ;;  %v4567_v6 = vmul.f32 %v16545_v55, %v14067_v24  ;;  %v4568_v57 = vmul.f32 %v16548_v45, %v14065_v52  ;;  %v16552_v55 = vld [vmem:[#allocation178_spill] sm:$0xff]  ;;  %v16553_v24 = vld [vmem:[#allocation181_spill] sm:$0xff] }
 0x2af   :  { %10914 = vmatmul.mubr.msk.f32.gmra.mrb[6].mxu0 %vm696_vm1, %v4566_v9 }
 0x2b0   :  { %v14075_v17 = vpop.permute.xlu1 %4456  ;;  %v14077_v38 = vpop.permute.xlu0 %4451  ;;  %10916 = vmatprep.mubr.msk.f32.mxu0 %vm696_vm1, %v4567_v6 }
 0x2b1   :  { %16546 = vst [vmem:[#allocation170_spill] sm:$0xff] %v14075_v17  ;;  %16547 = vst [vmem:[#allocation173_spill] sm:$0xff] %v14077_v38  ;;  %v4569_v5 = vmul.f32 %v16549_v50, %v14077_v38  ;;  %v4570_v9 = vmul.f32 %v16552_v55, %v14075_v17  ;;  %v16556_v50 = vld [vmem:[#allocation182_spill] sm:$0xff]  ;;  %v16557_v38 = vld [vmem:[#allocation185_spill] sm:$0xff] }
 0x2b3   :  { %10917 = vmatmul.mubr.msk.f32.gmra.mrb[8].mxu0 %vm696_vm1, %v4568_v57 }
 0x2b4   :  { %v14085_v43 = vpop.permute.xlu1 %4466  ;;  %v14087_v3 = vpop.permute.xlu0 %4461  ;;  %10919 = vmatprep.mubr.msk.f32.mxu0 %vm696_vm1, %v4569_v5 }
 0x2b5   :  { %16550 = vst [vmem:[#allocation174_spill] sm:$0xff] %v14085_v43  ;;  %16551 = vst [vmem:[#allocation177_spill] sm:$0xff] %v14087_v3  ;;  %v4571_v6 = vmul.f32 %v16553_v24, %v14087_v3  ;;  %v4572_v57 = vmul.f32 %v16556_v50, %v14085_v43  ;;  %v16560_v24 = vld [vmem:[#allocation186_spill] sm:$0xff]  ;;  %v16561_v3 = vld [vmem:[#allocation189_spill] sm:$0xff] }
 0x2b7   :  { %10920 = vmatmul.mubr.msk.f32.gmra.mrb[10].mxu0 %vm696_vm1, %v4570_v9 }
 0x2b8   :  { %v14095_v45 = vpop.permute.xlu1 %4476  ;;  %v14097_v52 = vpop.permute.xlu0 %4471  ;;  %10922 = vmatprep.mubr.msk.f32.mxu0 %vm696_vm1, %v4571_v6 }
 0x2b9   :  { %16554 = vst [vmem:[#allocation178_spill] sm:$0xff] %v14095_v45  ;;  %16555 = vst [vmem:[#allocation181_spill] sm:$0xff] %v14097_v52  ;;  %v4573_v5 = vmul.f32 %v16557_v38, %v14097_v52  ;;  %v4574_v9 = vmul.f32 %v16560_v24, %v14095_v45  ;;  %v16564_v38 = vld [vmem:[#allocation190_spill] sm:$0xff]  ;;  %v16565_v52 = vld [vmem:[#allocation193_spill] sm:$0xff] }
 0x2bb   :  { %10923 = vmatmul.mubr.msk.f32.gmra.mrb[12].mxu0 %vm696_vm1, %v4572_v57 }
 0x2bc   :  { %v14105_v55 = vpop.permute.xlu1 %4486  ;;  %v14107_v17 = vpop.permute.xlu0 %4481  ;;  %10925 = vmatprep.mubr.msk.f32.mxu0 %vm696_vm1, %v4573_v5 }
 0x2bd   :  { %16558 = vst [vmem:[#allocation182_spill] sm:$0xff] %v14105_v55  ;;  %16559 = vst [vmem:[#allocation185_spill] sm:$0xff] %v14107_v17  ;;  %v4575_v6 = vmul.f32 %v16561_v3, %v14107_v17  ;;  %v4576_v57 = vmul.f32 %v16564_v38, %v14105_v55  ;;  %v16568_v3 = vld [vmem:[#allocation194_spill] sm:$0xff]  ;;  %v16569_v17 = vld [vmem:[#allocation197_spill] sm:$0xff] }
 0x2bf   :  { %10926 = vmatmul.mubr.msk.f32.gmra.mrb[14].mxu0 %vm696_vm1, %v4574_v9 }
 0x2c0   :  { %v14115_v50 = vpop.permute.xlu1 %4496  ;;  %v14117_v43 = vpop.permute.xlu0 %4491  ;;  %10928 = vmatprep.mubr.msk.f32.mxu0 %vm696_vm1, %v4575_v6 }
 0x2c1   :  { %16562 = vst [vmem:[#allocation186_spill] sm:$0xff] %v14115_v50  ;;  %16563 = vst [vmem:[#allocation189_spill] sm:$0xff] %v14117_v43  ;;  %v4577_v5 = vmul.f32 %v16565_v52, %v14117_v43  ;;  %v4578_v9 = vmul.f32 %v16568_v3, %v14115_v50  ;;  %v16572_v52 = vld [vmem:[#allocation198_spill] sm:$0xff]  ;;  %v16573_v43 = vld [vmem:[#allocation201_spill] sm:$0xff] }
 0x2c3   :  { %10929 = vmatmul.mubr.msk.f32.gmra.mrb[16].mxu0 %vm696_vm1, %v4576_v57 }
 0x2c4   :  { %v14125_v24 = vpop.permute.xlu1 %4506  ;;  %v14127_v45 = vpop.permute.xlu0 %4501  ;;  %10931 = vmatprep.mubr.msk.f32.mxu0 %vm696_vm1, %v4577_v5 }
 0x2c5   :  { %16566 = vst [vmem:[#allocation190_spill] sm:$0xff] %v14125_v24  ;;  %16567 = vst [vmem:[#allocation193_spill] sm:$0xff] %v14127_v45  ;;  %v4579_v6 = vmul.f32 %v16569_v17, %v14127_v45  ;;  %v4580_v57 = vmul.f32 %v16572_v52, %v14125_v24  ;;  %v16576_v17 = vld [vmem:[#allocation202_spill] sm:$0xff]  ;;  %v16577_v45 = vld [vmem:[#allocation205_spill] sm:$0xff] }
 0x2c7   :  { %10932 = vmatmul.mubr.msk.f32.gmra.mrb[18].mxu0 %vm696_vm1, %v4578_v9 }
 0x2c8   :  { %v14135_v38 = vpop.permute.xlu1 %4516  ;;  %v14137_v55 = vpop.permute.xlu0 %4511  ;;  %10934 = vmatprep.mubr.msk.f32.mxu0 %vm696_vm1, %v4579_v6 }
 0x2c9   :  { %16570 = vst [vmem:[#allocation194_spill] sm:$0xff] %v14135_v38  ;;  %16571 = vst [vmem:[#allocation197_spill] sm:$0xff] %v14137_v55  ;;  %v4581_v5 = vmul.f32 %v16573_v43, %v14137_v55  ;;  %v4582_v9 = vmul.f32 %v16576_v17, %v14135_v38  ;;  %v16580_v43 = vld [vmem:[#allocation206_spill] sm:$0xff]  ;;  %v16581_v55 = vld [vmem:[#allocation209_spill] sm:$0xff] }
 0x2cb   :  { %10935 = vmatmul.mubr.msk.f32.gmra.mrb[20].mxu0 %vm696_vm1, %v4580_v57 }
 0x2cc   :  { %v14145_v3 = vpop.permute.xlu1 %4526  ;;  %v14147_v50 = vpop.permute.xlu0 %4521  ;;  %10937 = vmatprep.mubr.msk.f32.mxu0 %vm696_vm1, %v4581_v5 }
 0x2cd   :  { %16574 = vst [vmem:[#allocation198_spill] sm:$0xff] %v14145_v3  ;;  %16575 = vst [vmem:[#allocation201_spill] sm:$0xff] %v14147_v50  ;;  %v4583_v6 = vmul.f32 %v16577_v45, %v14147_v50  ;;  %v4584_v57 = vmul.f32 %v16580_v43, %v14145_v3  ;;  %v16584_v45 = vld [vmem:[#allocation210_spill] sm:$0xff]  ;;  %v16585_v50 = vld [vmem:[#allocation213_spill] sm:$0xff] }
 0x2cf   :  { %10938 = vmatmul.mubr.msk.f32.gmra.mrb[22].mxu0 %vm696_vm1, %v4582_v9 }
 0x2d0   :  { %v14155_v52 = vpop.permute.xlu1 %4536  ;;  %v14157_v24 = vpop.permute.xlu0 %4531  ;;  %10940 = vmatprep.mubr.msk.f32.mxu0 %vm696_vm1, %v4583_v6 }
 0x2d1   :  { %16578 = vst [vmem:[#allocation202_spill] sm:$0xff] %v14155_v52  ;;  %16579 = vst [vmem:[#allocation205_spill] sm:$0xff] %v14157_v24  ;;  %v4585_v5 = vmul.f32 %v16581_v55, %v14157_v24  ;;  %v4586_v9 = vmul.f32 %v16584_v45, %v14155_v52 }
 0x2d3   :  { %10941 = vmatmul.mubr.msk.f32.gmra.mrb[24].mxu0 %vm696_vm1, %v4584_v57  ;;  %v12061_v57 = vld [vmem:[%s15771_s0 + $0xf8] sm:$0xff] }
 0x2d4   :  { %v14165_v17 = vpop.permute.xlu1 %4546  ;;  %v14167_v38 = vpop.permute.xlu0 %4541  ;;  %10943 = vmatprep.mubr.msk.f32.mxu0 %vm696_vm1, %v4585_v5 }
 0x2d5   :  { %16582 = vst [vmem:[#allocation206_spill] sm:$0xff] %v14165_v17  ;;  %16583 = vst [vmem:[#allocation209_spill] sm:$0xff] %v14167_v38  ;;  %v4587_v6 = vmul.f32 %v16585_v50, %v14167_v38  ;;  %v4588_v55 = vmul.f32 %v13679_v4, %v14165_v17  ;;  %v16658_v38 = vld [vmem:[#allocation38_spill] sm:$0xff] }
 0x2d7   :  { %10944 = vmatmul.mubr.msk.f32.gmra.mrb[26].mxu0 %vm696_vm1, %v4586_v9 }
 0x2d8   :  { %v4557_v43 = vpop.permute.xlu1 %4556  ;;  %v14175_v3 = vpop.permute.xlu0 %4551  ;;  %10946 = vmatprep.mubr.msk.f32.mxu0 %vm696_vm1, %v4587_v6 }
 0x2d9   :  { %16586 = vst [vmem:[#allocation210_spill] sm:$0xff] %v14175_v3  ;;  %v4589_v5 = vmul.f32 %v12061_v57, %v14175_v3  ;;  %v14190_v9 = vmul.f32 0.0, %v4557_v43  ;;  %v16656_v3 = vld [vmem:[#allocation39_spill] sm:$0xff] }
 0x2db   :  { %10947 = vmatmul.mubr.msk.f32.gmra.mrb[28].mxu0 %vm696_vm1, %v4588_v55  ;;  %16589 = vst [vmem:[#allocation269_spill] sm:$0xff] %v14190_v9 }
 0x2dc   :  { %v14185_v45 = vpop.permute.xlu1 %4989  ;;  %v14187_v50 = vpop.permute.xlu0 %4984  ;;  %10949 = vmatprep.mubr.msk.f32.mxu0 %vm696_vm1, %v4589_v5 }
 0x2dd   :  { %16587 = vst [vmem:[#allocation213_spill] sm:$0xff] %v14185_v45  ;;  %16588 = vst [vmem:[#allocation268_spill] sm:$0xff] %v14187_v50  ;;  %v5142_v6 = vmul.f32 %v14187_v50, %v12911_v29  ;;  %v5143_v55 = vmul.f32 %v14185_v45, %v12925_v22 }
 0x2df   :  { %10950 = vmatmul.mubr.msk.f32.gmra.mrb[30].mxu0 %vm696_vm1, %v14190_v9 }
 0x2e0   :  { %v14196_v4 = vpop.permute.xlu1 %4999  ;;  %v14198_v17 = vpop.permute.xlu0 %4994  ;;  %10954 = vmatprep.mubr.msk.f32.mxu0 %vm696_vm1, %v5142_v6 }
 0x2e1   :  { %16590 = vst [vmem:[#allocation270_spill] sm:$0xff] %v14196_v4  ;;  %16591 = vst [vmem:[#allocation271_spill] sm:$0xff] %v14198_v17  ;;  %v5144_v57 = vmul.f32 %v14198_v17, %v12929_v37  ;;  %v5145_v5 = vmul.f32 %v14196_v4, %v12947_v32  ;;  %v16652_v17 = vld [vmem:[#allocation37_spill] sm:$0xff] }
 0x2e3   :  { %10955 = vmatmul.mubr.msk.f32.vlgmr.msra.gmra.mrb[0].mxu0 %vm696_vm1, %v5143_v55 }
 0x2e4   :  { %v14206_v43 = vpop.permute.xlu1 %5009  ;;  %v14208_v29 = vpop.permute.xlu0 %5004  ;;  %10957 = vmatprep.mubr.msk.f32.mxu0 %vm696_vm1, %v5144_v57 }
 0x2e5   :  { %16592 = vst [vmem:[#allocation272_spill] sm:$0xff] %v14206_v43  ;;  %16593 = vst [vmem:[#allocation273_spill] sm:$0xff] %v14208_v29  ;;  %v5146_v6 = vmul.f32 %v14208_v29, %v12951_v36  ;;  %v5147_v37 = vmul.f32 %v14206_v43, %v12967_v40  ;;  %v16648_v29 = vld [vmem:[#allocation35_spill] sm:$0xff] }
 0x2e7   :  { %10958 = vmatmul.mubr.msk.f32.gmra.mrb[2].mxu0 %vm696_vm1, %v5145_v5 }
 0x2e8   :  { %v14216_v22 = vpop.permute.xlu1 %5019  ;;  %v14218_v45 = vpop.permute.xlu0 %5014  ;;  %10960 = vmatprep.mubr.msk.f32.mxu0 %vm696_vm1, %v5146_v6 }
 0x2e9   :  { %16594 = vst [vmem:[#allocation274_spill] sm:$0xff] %v14216_v22  ;;  %16595 = vst [vmem:[#allocation275_spill] sm:$0xff] %v14218_v45  ;;  %v5148_v55 = vmul.f32 %v14218_v45, %v12971_v54  ;;  %v5149_v36 = vmul.f32 %v14216_v22, %v12985_v46  ;;  %v16644_v45 = vld [vmem:[#allocation33_spill] sm:$0xff] }
 0x2eb   :  { %10961 = vmatmul.mubr.msk.f32.gmra.mrb[4].mxu0 %vm696_vm1, %v5147_v37 }
 0x2ec   :  { %v14226_v32 = vpop.permute.xlu1 %5029  ;;  %v14228_v57 = vpop.permute.xlu0 %5024  ;;  %10963 = vmatprep.mubr.msk.f32.mxu0 %vm696_vm1, %v5148_v55 }
 0x2ed   :  { %16596 = vst [vmem:[#allocation276_spill] sm:$0xff] %v14226_v32  ;;  %16597 = vst [vmem:[#allocation277_spill] sm:$0xff] %v14228_v57  ;;  %v5150_v5 = vmul.f32 %v14228_v57, %v12989_v61  ;;  %v5151_v54 = vmul.f32 %v14226_v32, %v13003_v18  ;;  %v16641_v57 = vld [vmem:[#allocation31_spill] sm:$0xff] }
 0x2ef   :  { %10964 = vmatmul.mubr.msk.f32.gmra.mrb[6].mxu0 %vm696_vm1, %v5149_v36 }
 0x2f0   :  { %v14236_v40 = vpop.permute.xlu1 %5039  ;;  %v14238_v6 = vpop.permute.xlu0 %5034  ;;  %10966 = vmatprep.mubr.msk.f32.mxu0 %vm696_vm1, %v5150_v5 }
 0x2f1   :  { %16598 = vst [vmem:[#allocation278_spill] sm:$0xff] %v14236_v40  ;;  %16599 = vst [vmem:[#allocation279_spill] sm:$0xff] %v14238_v6  ;;  %v5152_v37 = vmul.f32 %v14238_v6, %v13007_v25  ;;  %v5153_v61 = vmul.f32 %v14236_v40, %v13021_v48  ;;  %v16639_v6 = vld [vmem:[#allocation29_spill] sm:$0xff] }
 0x2f3   :  { %10967 = vmatmul.mubr.msk.f32.gmra.mrb[8].mxu0 %vm696_vm1, %v5151_v54 }
 0x2f4   :  { %v14246_v46 = vpop.permute.xlu1 %5049  ;;  %v14248_v55 = vpop.permute.xlu0 %5044  ;;  %10969 = vmatprep.mubr.msk.f32.mxu0 %vm696_vm1, %v5152_v37 }
 0x2f5   :  { %16600 = vst [vmem:[#allocation280_spill] sm:$0xff] %v14246_v46  ;;  %16601 = vst [vmem:[#allocation281_spill] sm:$0xff] %v14248_v55  ;;  %v5154_v36 = vmul.f32 %v14248_v55, %v13025_v8  ;;  %v5155_v25 = vmul.f32 %v14246_v46, %v13039_v56  ;;  %v16637_v55 = vld [vmem:[#allocation27_spill] sm:$0xff] }
 0x2f7   :  { %10970 = vmatmul.mubr.msk.f32.gmra.mrb[10].mxu0 %vm696_vm1, %v5153_v61 }
 0x2f8   :  { %v14256_v18 = vpop.permute.xlu1 %5059  ;;  %v14258_v5 = vpop.permute.xlu0 %5054  ;;  %10972 = vmatprep.mubr.msk.f32.mxu0 %vm696_vm1, %v5154_v36 }
 0x2f9   :  { %16602 = vst [vmem:[#allocation282_spill] sm:$0xff] %v14256_v18  ;;  %16603 = vst [vmem:[#allocation283_spill] sm:$0xff] %v14258_v5  ;;  %v5156_v54 = vmul.f32 %v14258_v5, %v13043_v16  ;;  %v5157_v8 = vmul.f32 %v14256_v18, %v13057_v0  ;;  %v16635_v5 = vld [vmem:[#allocation25_spill] sm:$0xff] }
 0x2fb   :  { %10973 = vmatmul.mubr.msk.f32.gmra.mrb[12].mxu0 %vm696_vm1, %v5155_v25 }
 0x2fc   :  { %v14266_v48 = vpop.permute.xlu1 %5069  ;;  %v14268_v37 = vpop.permute.xlu0 %5064  ;;  %10975 = vmatprep.mubr.msk.f32.mxu0 %vm696_vm1, %v5156_v54 }
 0x2fd   :  { %16604 = vst [vmem:[#allocation284_spill] sm:$0xff] %v14266_v48  ;;  %16605 = vst [vmem:[#allocation285_spill] sm:$0xff] %v14268_v37  ;;  %v5158_v61 = vmul.f32 %v14268_v37, %v13061_v34  ;;  %v5159_v16 = vmul.f32 %v14266_v48, %v13075_v11  ;;  %v16633_v37 = vld [vmem:[#allocation23_spill] sm:$0xff] }
 0x2ff   :  { %10976 = vmatmul.mubr.msk.f32.gmra.mrb[14].mxu0 %vm696_vm1, %v5157_v8 }
 0x300   :  { %v14276_v56 = vpop.permute.xlu1 %5079  ;;  %v14278_v36 = vpop.permute.xlu0 %5074  ;;  %10978 = vmatprep.mubr.msk.f32.mxu0 %vm696_vm1, %v5158_v61 }
 0x301   :  { %16606 = vst [vmem:[#allocation286_spill] sm:$0xff] %v14276_v56  ;;  %16607 = vst [vmem:[#allocation287_spill] sm:$0xff] %v14278_v36  ;;  %v5160_v25 = vmul.f32 %v14278_v36, %v13079_v26  ;;  %v5161_v34 = vmul.f32 %v14276_v56, %v13093_v28  ;;  %v16631_v36 = vld [vmem:[#allocation21_spill] sm:$0xff] }
 0x303   :  { %10979 = vmatmul.mubr.msk.f32.gmra.mrb[16].mxu0 %vm696_vm1, %v5159_v16 }
 0x304   :  { %v14286_v0 = vpop.permute.xlu1 %5089  ;;  %v14288_v54 = vpop.permute.xlu0 %5084  ;;  %10981 = vmatprep.mubr.msk.f32.mxu0 %vm696_vm1, %v5160_v25 }
 0x305   :  { %16608 = vst [vmem:[#allocation288_spill] sm:$0xff] %v14286_v0  ;;  %16609 = vst [vmem:[#allocation289_spill] sm:$0xff] %v14288_v54  ;;  %v5162_v8 = vmul.f32 %v14288_v54, %v13097_v14  ;;  %v5163_v26 = vmul.f32 %v14286_v0, %v13111_v44 }
 0x307   :  { %10982 = vmatmul.mubr.msk.f32.gmra.mrb[18].mxu0 %vm696_vm1, %v5161_v34 }
 0x308   :  { %v14296_v11 = vpop.permute.xlu1 %5099  ;;  %v14298_v61 = vpop.permute.xlu0 %5094  ;;  %10984 = vmatprep.mubr.msk.f32.mxu0 %vm696_vm1, %v5162_v8 }
 0x309   :  { %16610 = vst [vmem:[#allocation290_spill] sm:$0xff] %v14296_v11  ;;  %16611 = vst [vmem:[#allocation291_spill] sm:$0xff] %v14298_v61  ;;  %v5164_v16 = vmul.f32 %v14298_v61, %v13115_v15  ;;  %v5165_v14 = vmul.f32 %v14296_v11, %v13129_v60 }
 0x30b   :  { %10985 = vmatmul.mubr.msk.f32.gmra.mrb[20].mxu0 %vm696_vm1, %v5163_v26 }
 0x30c   :  { %v14306_v28 = vpop.permute.xlu1 %5109  ;;  %v14308_v25 = vpop.permute.xlu0 %5104  ;;  %10987 = vmatprep.mubr.msk.f32.mxu0 %vm696_vm1, %v5164_v16 }
 0x30d   :  { %16612 = vst [vmem:[#allocation292_spill] sm:$0xff] %v14306_v28  ;;  %16613 = vst [vmem:[#allocation293_spill] sm:$0xff] %v14308_v25  ;;  %v5166_v34 = vmul.f32 %v14308_v25, %v13133_v62  ;;  %v5167_v15 = vmul.f32 %v14306_v28, %v13147_v20 }
 0x30f   :  { %10988 = vmatmul.mubr.msk.f32.gmra.mrb[22].mxu0 %vm696_vm1, %v5165_v14 }
 0x310   :  { %v14316_v44 = vpop.permute.xlu1 %5119  ;;  %v14318_v8 = vpop.permute.xlu0 %5114  ;;  %10990 = vmatprep.mubr.msk.f32.mxu0 %vm696_vm1, %v5166_v34 }
 0x311   :  { %16614 = vst [vmem:[#allocation294_spill] sm:$0xff] %v14316_v44  ;;  %16615 = vst [vmem:[#allocation295_spill] sm:$0xff] %v14318_v8  ;;  %v5168_v26 = vmul.f32 %v14318_v8, %v13151_v42  ;;  %v5169_v62 = vmul.f32 %v14316_v44, %v13170_v2  ;;  %v6566_v44 = vld [vmem:[#allocation7 + $0x28] sm:$0xff] }
 0x313   :  { %10991 = vmatmul.mubr.msk.f32.gmra.mrb[24].mxu0 %vm696_vm1, %v5167_v15 }
 0x314   :  { %v14326_v60 = vpop.permute.xlu1 %5129  ;;  %v14328_v16 = vpop.permute.xlu0 %5124  ;;  %10993 = vmatprep.mubr.msk.f32.mxu0 %vm696_vm1, %v5168_v26  ;;  %v5793_v26 = vld [vmem:[#allocation7 + $0x18] sm:$0xff] }
 0x315   :  { %16616 = vst [vmem:[#allocation296_spill] sm:$0xff] %v14326_v60  ;;  %16617 = vst [vmem:[#allocation297_spill] sm:$0xff] %v14328_v16  ;;  %v5170_v14 = vmul.f32 %v14328_v16, %v13174_v19  ;;  %v5171_v42 = vmul.f32 %v14326_v60, %v13189_v35  ;;  %v5792_v19 = vld [vmem:[#allocation7 + $0x10] sm:$0xff]  ;;  %v5759_v35 = vld [vmem:[#allocation7 + $0x8] sm:$0xff] }
 0x317   :  { %10994 = vmatmul.mubr.msk.f32.gmra.mrb[26].mxu0 %vm696_vm1, %v5169_v62  ;;  %v11470_v62 = vpack.c.bf16 %v5793_v26, %v5792_v19 }
 0x318   :  { %v14336_v20 = vpop.permute.xlu0 %5134  ;;  %10996 = vmatprep.mubr.msk.f32.mxu0 %vm696_vm1, %v5170_v14  ;;  %v5140_v15 = vpop.permute.xlu1 %5139  ;;  %v5758_v14 = vld [vmem:[#allocation7] sm:$0xff] }
 0x319   :  { %16618 = vst [vmem:[#allocation298_spill] sm:$0xff] %v14336_v20  ;;  %v5172_v34 = vmul.f32 %v14336_v20, %v13852_v23  ;;  %v14345_v2 = vmul.f32 0.0, %v5140_v15  ;;  %11471 = vmatprep.subr.bf16.mxu1 %v11470_v62  ;;  %v11474_v60 = vpack.c.bf16 %v5759_v35, %v5758_v14  ;;  %v14349_v23 = vld [vmem:[#allocation6] ss:$0 sm:$0xff]  ;;  %v16622_v35 = vld [vmem:[#allocation15_spill] sm:$0xff] }
 0x31a   :  { %11473 = vmatpush3.bf16.msra.mxu1 %v11470_v62 }
 0x31b   :  { %10997 = vmatmul.mubr.msk.f32.gmra.mrb[28].mxu0 %vm696_vm1, %v5171_v42  ;;  %16619 = vst [vmem:[#allocation299_spill] sm:$0xff] %v14345_v2  ;;  %11475 = vmatprep.subr.bf16.mxu1 %v11474_v60 }
 0x31c   :  { %10999 = vmatprep.mubr.msk.f32.mxu0 %vm696_vm1, %v5172_v34 }
 0x31f   :  { %11000 = vmatmul.mubr.msk.f32.gmra.mrb[30].mxu0 %vm696_vm1, %v14345_v2  ;;  %v6565_v2 = vld [vmem:[#allocation7 + $0x20] sm:$0xff] }
 0x320   :  { %v14361_v25 = vpack.c.bf16 %v6566_v44, %v6565_v2  ;;  %v16626_v2 = vld [vmem:[#allocation14_spill] sm:$0xff] }
 0x3b6   :  { %v10956_v20 = vpop.f32.mrb[0].mxu0 }
 0x3b7   :  { %v5540_v42 = vadd.f32 %v10956_v20, %v14349_v23  ;;  %v5341_v34 = vpop.f32.mrb[1].mxu0  ;;  %v16623_v20 = vld [vmem:[#allocation13_spill] sm:$0xff] }
 0x3b8   :  { %v5539_v15 = vadd.f32 %v14349_v23, %v5341_v34 }
 0x3b9   :  { %v14353_v16 = vmax.f32 %v5540_v42, 0.0 }
 0x3ba   :  { %v14355_v8 = vmax.f32 %v5539_v15, 0.0  ;;  %v10959_v19 = vpop.f32.mrb[2].mxu0 }
 0x3bb   :  { %16620 = vst [vmem:[#allocation300_spill] sm:$0xff] %v14353_v16  ;;  %v5542_v26 = vadd.f32 %v10959_v19, %v14349_v23  ;;  %v5351_v62 = vpop.f32.mrb[3].mxu0  ;;  %v5761_v34 = vmul.f32 %v14353_v16, %v16623_v20  ;;  %v16627_v20 = vld [vmem:[#allocation17_spill] sm:$0xff]  ;;  %v5635_v10 = vrot.slane %v14353_v16, 7 }
 0x3bc   :  { %16621 = vst [vmem:[#allocation301_spill] sm:$0xff] %v14355_v8  ;;  %v5541_v14 = vadd.f32 %v14349_v23, %v5351_v62  ;;  %v5760_v28 = vmul.f32 %v14355_v8, %v16622_v35 }
 0x3bd   :  { %v14365_v42 = vmax.f32 %v5542_v26, 0.0 }
 0x3be   :  { %v14367_v11 = vmax.f32 %v5541_v14, 0.0  ;;  %v10962_v15 = vpop.f32.mrb[4].mxu0  ;;  %11007 = vmatmul.mubr.msk.f32.vlgmr.msra.gmra.mrb[0].mxu1 %vm5794_vm2, %v5760_v28 }
 0x3bf   :  { %16624 = vst [vmem:[#allocation15_spill] sm:$0xff] %v14365_v42  ;;  %11477 = vmatpush3.bf16.msra.mxu1 %v11474_v60  ;;  %v5361_v19 = vpop.f32.mrb[5].mxu0  ;;  %11009 = vmatprep.mubr.msk.f32.mxu1 %vm5794_vm2, %v5761_v34  ;;  %v5544_v62 = vadd.f32 %v10962_v15, %v14349_v23  ;;  %v5763_v61 = vmul.f32 %v14365_v42, %v16627_v20  ;;  %v16629_v20 = vld [vmem:[#allocation19_spill] sm:$0xff]  ;;  %v5639_v47 = vrot.slane %v14365_v42, 7 }
 0x3c0   :  { %16625 = vst [vmem:[#allocation13_spill] sm:$0xff] %v14367_v11  ;;  %11479 = vmatprep.subr.bf16.mxu1 %v14361_v25  ;;  %v5543_v44 = vadd.f32 %v14349_v23, %v5361_v19  ;;  %v5762_v35 = vmul.f32 %v14367_v11, %v16626_v2  ;;  %v16628_v19 = vld [vmem:[#allocation16_spill] sm:$0xff] }
 0x3c1   :  { %v14376_v26 = vmax.f32 %v5544_v62, 0.0 }
 0x3c2   :  { %v10965_v14 = vpop.f32.mrb[6].mxu0  ;;  %v14380_v28 = vmax.f32 %v5543_v44, 0.0  ;;  %11010 = vmatmul.mubr.msk.f32.gmra.mrb[2].mxu1 %vm5794_vm2, %v5762_v35 }
 0x3c3   :  { %v5546_v60 = vadd.f32 %v10965_v14, %v14349_v23  ;;  %v5371_v34 = vpop.f32.mrb[7].mxu0  ;;  %11012 = vmatprep.mubr.msk.f32.mxu1 %vm5794_vm2, %v5763_v61  ;;  %v5765_v44 = vmul.f32 %v14376_v26, %v16629_v20  ;;  %v16630_v61 = vld [vmem:[#allocation18_spill] sm:$0xff] }
 0x3c4   :  { %v5545_v15 = vadd.f32 %v14349_v23, %v5371_v34  ;;  %v5764_v2 = vmul.f32 %v14380_v28, %v16628_v19 }
 0x3c5   :  { %v14388_v62 = vmax.f32 %v5546_v60, 0.0 }
 0x3c6   :  { %v14390_v0 = vmax.f32 %v5545_v15, 0.0  ;;  %v10968_v54 = vpop.f32.mrb[8].mxu0  ;;  %11013 = vmatmul.mubr.msk.f32.gmra.mrb[4].mxu1 %vm5794_vm2, %v5764_v2 }
 0x3c7   :  { %v5548_v14 = vadd.f32 %v10968_v54, %v14349_v23  ;;  %v5381_v35 = vpop.f32.mrb[9].mxu0  ;;  %11015 = vmatprep.mubr.msk.f32.mxu1 %vm5794_vm2, %v5765_v44  ;;  %v5767_v20 = vmul.f32 %v14388_v62, %v16631_v36  ;;  %v16632_v44 = vld [vmem:[#allocation20_spill] sm:$0xff] }
 0x3c8   :  { %v5547_v34 = vadd.f32 %v14349_v23, %v5381_v35  ;;  %v5766_v19 = vmul.f32 %v14390_v0, %v16630_v61 }
 0x3c9   :  { %v14400_v60 = vmax.f32 %v5548_v14, 0.0 }
 0x3ca   :  { %v14402_v15 = vmax.f32 %v5547_v34, 0.0  ;;  %v10971_v56 = vpop.f32.mrb[10].mxu0  ;;  %11016 = vmatmul.mubr.msk.f32.gmra.mrb[6].mxu1 %vm5794_vm2, %v5766_v19 }
 0x3cb   :  { %v5550_v54 = vadd.f32 %v10971_v56, %v14349_v23  ;;  %v5391_v2 = vpop.f32.mrb[11].mxu0  ;;  %11018 = vmatprep.mubr.msk.f32.mxu1 %vm5794_vm2, %v5767_v20  ;;  %v5769_v36 = vmul.f32 %v14400_v60, %v16633_v37  ;;  %v16634_v20 = vld [vmem:[#allocation22_spill] sm:$0xff] }
 0x3cc   :  { %v5549_v35 = vadd.f32 %v14349_v23, %v5391_v2  ;;  %v5768_v61 = vmul.f32 %v14402_v15, %v16632_v44 }
 0x3cd   :  { %v14412_v14 = vmax.f32 %v5550_v54, 0.0 }
 0x3ce   :  { %v14414_v34 = vmax.f32 %v5549_v35, 0.0  ;;  %v10974_v48 = vpop.f32.mrb[12].mxu0  ;;  %11019 = vmatmul.mubr.msk.f32.gmra.mrb[8].mxu1 %vm5794_vm2, %v5768_v61 }
 0x3cf   :  { %v5552_v56 = vadd.f32 %v10974_v48, %v14349_v23  ;;  %v5401_v19 = vpop.f32.mrb[13].mxu0  ;;  %11021 = vmatprep.mubr.msk.f32.mxu1 %vm5794_vm2, %v5769_v36  ;;  %v5771_v37 = vmul.f32 %v14412_v14, %v16635_v5  ;;  %v16636_v36 = vld [vmem:[#allocation24_spill] sm:$0xff] }
 0x3d0   :  { %v5551_v2 = vadd.f32 %v14349_v23, %v5401_v19  ;;  %v5770_v44 = vmul.f32 %v14414_v34, %v16634_v20 }
 0x3d1   :  { %v14424_v54 = vmax.f32 %v5552_v56, 0.0 }
 0x3d2   :  { %v14426_v35 = vmax.f32 %v5551_v2, 0.0  ;;  %v10977_v18 = vpop.f32.mrb[14].mxu0  ;;  %11022 = vmatmul.mubr.msk.f32.gmra.mrb[10].mxu1 %vm5794_vm2, %v5770_v44 }
 0x3d3   :  { %v5554_v48 = vadd.f32 %v10977_v18, %v14349_v23  ;;  %v5411_v61 = vpop.f32.mrb[15].mxu0  ;;  %11024 = vmatprep.mubr.msk.f32.mxu1 %vm5794_vm2, %v5771_v37  ;;  %v5773_v5 = vmul.f32 %v14424_v54, %v16637_v55  ;;  %v16638_v37 = vld [vmem:[#allocation26_spill] sm:$0xff] }
 0x3d4   :  { %v5553_v19 = vadd.f32 %v14349_v23, %v5411_v61  ;;  %v5772_v20 = vmul.f32 %v14426_v35, %v16636_v36 }
 0x3d5   :  { %v14436_v56 = vmax.f32 %v5554_v48, 0.0 }
 0x3d6   :  { %v14438_v2 = vmax.f32 %v5553_v19, 0.0  ;;  %v10980_v46 = vpop.f32.mrb[16].mxu0  ;;  %11025 = vmatmul.mubr.msk.f32.gmra.mrb[12].mxu1 %vm5794_vm2, %v5772_v20 }
 0x3d7   :  { %v5556_v18 = vadd.f32 %v10980_v46, %v14349_v23  ;;  %v5421_v44 = vpop.f32.mrb[17].mxu0  ;;  %11027 = vmatprep.mubr.msk.f32.mxu1 %vm5794_vm2, %v5773_v5  ;;  %v5775_v55 = vmul.f32 %v14436_v56, %v16639_v6  ;;  %v16640_v5 = vld [vmem:[#allocation28_spill] sm:$0xff] }
 0x3d8   :  { %v5555_v61 = vadd.f32 %v14349_v23, %v5421_v44  ;;  %v5774_v36 = vmul.f32 %v14438_v2, %v16638_v37 }
 0x3d9   :  { %v14448_v48 = vmax.f32 %v5556_v18, 0.0 }
 0x3da   :  { %v14450_v19 = vmax.f32 %v5555_v61, 0.0  ;;  %v10983_v40 = vpop.f32.mrb[18].mxu0  ;;  %11028 = vmatmul.mubr.msk.f32.gmra.mrb[14].mxu1 %vm5794_vm2, %v5774_v36 }
 0x3db   :  { %v5558_v46 = vadd.f32 %v10983_v40, %v14349_v23  ;;  %v5431_v20 = vpop.f32.mrb[19].mxu0  ;;  %11030 = vmatprep.mubr.msk.f32.mxu1 %vm5794_vm2, %v5775_v55  ;;  %v5777_v6 = vmul.f32 %v14448_v48, %v16641_v57  ;;  %v16642_v55 = vld [vmem:[#allocation30_spill] sm:$0xff] }
 0x3dc   :  { %v5557_v44 = vadd.f32 %v14349_v23, %v5431_v20  ;;  %v5776_v37 = vmul.f32 %v14450_v19, %v16640_v5 }
 0x3dd   :  { %v14460_v18 = vmax.f32 %v5558_v46, 0.0 }
 0x3de   :  { %v14462_v61 = vmax.f32 %v5557_v44, 0.0  ;;  %v10986_v32 = vpop.f32.mrb[20].mxu0  ;;  %11031 = vmatmul.mubr.msk.f32.gmra.mrb[16].mxu1 %vm5794_vm2, %v5776_v37 }
 0x3df   :  { %v5560_v40 = vadd.f32 %v10986_v32, %v14349_v23  ;;  %v5441_v36 = vpop.f32.mrb[21].mxu0  ;;  %11033 = vmatprep.mubr.msk.f32.mxu1 %vm5794_vm2, %v5777_v6  ;;  %v5779_v57 = vmul.f32 %v14460_v18, %v16644_v45  ;;  %v16645_v6 = vld [vmem:[#allocation32_spill] sm:$0xff] }
 0x3e0   :  { %v5559_v20 = vadd.f32 %v14349_v23, %v5441_v36  ;;  %v5778_v5 = vmul.f32 %v14462_v61, %v16642_v55 }
 0x3e1   :  { %v14472_v46 = vmax.f32 %v5560_v40, 0.0 }
 0x3e2   :  { %v14474_v44 = vmax.f32 %v5559_v20, 0.0  ;;  %v10989_v22 = vpop.f32.mrb[22].mxu0  ;;  %11034 = vmatmul.mubr.msk.f32.gmra.mrb[18].mxu1 %vm5794_vm2, %v5778_v5 }
 0x3e3   :  { %16643 = vst [vmem:[#allocation14_spill] sm:$0xff] %v14472_v46  ;;  %v5562_v32 = vadd.f32 %v10989_v22, %v14349_v23  ;;  %v5451_v37 = vpop.f32.mrb[23].mxu0  ;;  %11036 = vmatprep.mubr.msk.f32.mxu1 %vm5794_vm2, %v5779_v57  ;;  %v5781_v45 = vmul.f32 %v14472_v46, %v16648_v29  ;;  %v16649_v57 = vld [vmem:[#allocation34_spill] sm:$0xff] }
 0x3e4   :  { %v5561_v36 = vadd.f32 %v14349_v23, %v5451_v37  ;;  %v5780_v55 = vmul.f32 %v14474_v44, %v16645_v6 }
 0x3e5   :  { %v14484_v40 = vmax.f32 %v5562_v32, 0.0 }
 0x3e6   :  { %v14486_v20 = vmax.f32 %v5561_v36, 0.0  ;;  %v10992_v43 = vpop.f32.mrb[24].mxu0  ;;  %11037 = vmatmul.mubr.msk.f32.gmra.mrb[20].mxu1 %vm5794_vm2, %v5780_v55 }
 0x3e7   :  { %16646 = vst [vmem:[#allocation17_spill] sm:$0xff] %v14484_v40  ;;  %v5564_v22 = vadd.f32 %v10992_v43, %v14349_v23  ;;  %v5461_v5 = vpop.f32.mrb[25].mxu0  ;;  %11039 = vmatprep.mubr.msk.f32.mxu1 %vm5794_vm2, %v5781_v45  ;;  %v5783_v29 = vmul.f32 %v14484_v40, %v16652_v17 }
 0x3e8   :  { %16647 = vst [vmem:[#allocation16_spill] sm:$0xff] %v14486_v20  ;;  %v5563_v37 = vadd.f32 %v14349_v23, %v5461_v5  ;;  %v5782_v6 = vmul.f32 %v14486_v20, %v16649_v57 }
 0x3e9   :  { %v14496_v32 = vmax.f32 %v5564_v22, 0.0  ;;  %v16653_v22 = vld [vmem:[#allocation36_spill] sm:$0xff] }
 0x3ea   :  { %v14498_v36 = vmax.f32 %v5563_v37, 0.0  ;;  %v10995_v4 = vpop.f32.mrb[26].mxu0  ;;  %11040 = vmatmul.mubr.msk.f32.gmra.mrb[22].mxu1 %vm5794_vm2, %v5782_v6 }
 0x3eb   :  { %16650 = vst [vmem:[#allocation19_spill] sm:$0xff] %v14496_v32  ;;  %v5683_v43 = vrot.slane %v14496_v32, 7  ;;  %v5566_v55 = vadd.f32 %v10995_v4, %v14349_v23  ;;  %v5471_v5 = vpop.f32.mrb[27].mxu0  ;;  %11042 = vmatprep.mubr.msk.f32.mxu1 %vm5794_vm2, %v5783_v29  ;;  %v5785_v4 = vmul.f32 %v14496_v32, %v16656_v3 }
 0x3ec   :  { %16651 = vst [vmem:[#allocation18_spill] sm:$0xff] %v14498_v36  ;;  %v16108_v45 = vrot.slane %v14498_v36, 7  ;;  %v5565_v9 = vadd.f32 %v14349_v23, %v5471_v5  ;;  %v5784_v37 = vmul.f32 %v14498_v36, %v16653_v22 }
 0x3ed   :  { %v14510_v57 = vmax.f32 %v5566_v55, 0.0 }
 0x3ee   :  { %v14512_v50 = vmax.f32 %v5565_v9, 0.0  ;;  %v10998_v17 = vpop.f32.mrb[28].mxu0  ;;  %v14519_v6 = vsel %vm150_vm3, %v16108_v45, %v5683_v43  ;;  %11043 = vmatmul.mubr.msk.f32.gmra.mrb[24].mxu1 %vm5794_vm2, %v5784_v37 }
 0x3ef   :  { %16654 = vst [vmem:[#allocation21_spill] sm:$0xff] %v14510_v57  ;;  %16657 = vst [vmem:[#allocation23_spill] sm:$0xff] %v14519_v6  ;;  %v5687_v5 = vrot.slane %v14510_v57, 7  ;;  %v5568_v29 = vadd.f32 %v10998_v17, %v14349_v23  ;;  %v5481_v22 = vpop.f32.mrb[29].mxu0  ;;  %11045 = vmatprep.mubr.msk.f32.mxu1 %vm5794_vm2, %v5785_v4  ;;  %v5787_v17 = vmul.f32 %v14510_v57, %v16661_v59  ;;  %v16664_v59 = vld [vmem:[#allocation40_spill] sm:$0xff] }
 0x3f0   :  { %16655 = vst [vmem:[#allocation20_spill] sm:$0xff] %v14512_v50  ;;  %v5685_v55 = vrot.slane %v14512_v50, 7  ;;  %v5567_v9 = vadd.f32 %v14349_v23, %v5481_v22  ;;  %v5786_v3 = vmul.f32 %v14512_v50, %v16658_v38 }
 0x3f1   :  { %v14529_v52 = vmax.f32 %v5568_v29, 0.0 }
 0x3f2   :  { %v14531_v45 = vmax.f32 %v5567_v9, 0.0  ;;  %v11001_v24 = vpop.f32.mrb[30].mxu0  ;;  %v14536_v37 = vsel %vm150_vm3, %v5683_v43, %v5685_v55  ;;  %v14539_v27 = vsel %vm150_vm3, %v5685_v55, %v5687_v5  ;;  %11046 = vmatmul.mubr.msk.f32.gmra.mrb[26].mxu1 %vm5794_vm2, %v5786_v3  ;;  %v5634_v55 = vrot.slane %v14355_v8, 7 }
 0x3f3   :  { %16659 = vst [vmem:[#allocation22_spill] sm:$0xff] %v14529_v52  ;;  %16662 = vst [vmem:[#allocation24_spill] sm:$0xff] %v14536_v37  ;;  %v5691_v22 = vrot.slane %v14529_v52, 7  ;;  %v5570_v4 = vadd.f32 %v11001_v24, %v14349_v23  ;;  %v5491_v38 = vpop.f32.mrb[31].mxu0  ;;  %11048 = vmatprep.mubr.msk.f32.mxu1 %vm5794_vm2, %v5787_v17  ;;  %v5789_v24 = vmul.f32 %v14529_v52, %v16666_v21  ;;  %v6956_v21 = vld [vmem:[#allocation7 + $0x30] sm:$0xff]  ;;  %v6493_v63 = vrot.slane %v14529_v52, 1 }
 0x3f4   :  { %16660 = vst [vmem:[#allocation25_spill] sm:$0xff] %v14531_v45  ;;  %16663 = vst [vmem:[#allocation27_spill] sm:$0xff] %v14539_v27  ;;  %v5689_v29 = vrot.slane %v14531_v45, 7  ;;  %v5569_v9 = vadd.f32 %v14349_v23, %v5491_v38  ;;  %v5788_v43 = vmul.f32 %v14531_v45, %v16664_v59  ;;  %v5637_v23 = vrot.slane %v14367_v11, 7  ;;  %v16669_v38 = vld [vmem:[#allocation42_spill] sm:$0xff] }
 0x3f5   :  { %v14568_v59 = vsel %vm150_vm3, 0.0, %v5634_v55  ;;  %v14582_v53 = vmax.f32 %v5570_v4, 0.0  ;;  %v6491_v4 = vrot.slane %v14531_v45, 1  ;;  %v5655_v45 = vrot.slane %v14412_v14, 7 }
 0x3f6   :  { %v14551_v30 = vmax.f32 %v5569_v9, 0.0  ;;  %v14556_v3 = vsel %vm150_vm3, %v5687_v5, %v5689_v29  ;;  %v14559_v1 = vsel %vm150_vm3, %v5689_v29, %v5691_v22  ;;  %11049 = vmatmul.mubr.msk.f32.gmra.mrb[28].mxu1 %vm5794_vm2, %v5788_v43  ;;  %v6957_v5 = vld [vmem:[#allocation7 + $0x38] sm:$0xff]  ;;  %v14572_v29 = vsel %vm150_vm3, %v5634_v55, %v5635_v10 }
 0x3f7   :  { %16667 = vst [vmem:[#allocation29_spill] sm:$0xff] %v14556_v3  ;;  %16668 = vst [vmem:[#allocation28_spill] sm:$0xff] %v14559_v1  ;;  %11051 = vmatprep.mubr.msk.f32.mxu1 %vm5794_vm2, %v5789_v24  ;;  %v6485_v24 = vrot.slane %v14496_v32, 1  ;;  %v5727_v33 = vmul.f32 %v14568_v59, %v16672_v39  ;;  %v16673_v55 = vld [vmem:[#allocation45_spill] sm:$0xff]  ;;  %v14590_v51 = vsel %vm150_vm3, %v5635_v10, %v5637_v23  ;;  %v5643_v10 = vrot.slane %v14376_v26, 7  ;;  %v16692_v32 = vld [vmem:[#allocation55_spill] sm:$0xff] }
 0x3f8   :  { %16665 = vst [vmem:[#allocation26_spill] sm:$0xff] %v14551_v30  ;;  %v16122_v17 = vrot.slane %v14551_v30, 7  ;;  %v5790_v9 = vmul.f32 %v14551_v30, %v16669_v38  ;;  %v6487_v38 = vrot.slane %v14512_v50, 1  ;;  %16671 = vst [vmem:[#allocation30_spill] sm:$0xff] %v14582_v53  ;;  %v6495_v58 = vrot.slane %v14551_v30, 1 }
 0x3f9   :  { %v5728_v39 = vmul.f32 %v14572_v29, %v16674_v7  ;;  %v16676_v7 = vld [vmem:[#allocation46_spill] sm:$0xff]  ;;  %v5657_v50 = vrot.slane %v14426_v35, 7 }
 0x3fa   :  { %v14577_v43 = vsel %vm150_vm3, %v5691_v22, %v16122_v17  ;;  %11052 = vmatmul.mubr.msk.f32.gmra.mrb[30].mxu1 %vm5794_vm2, %v5790_v9  ;;  %v14592_v22 = vpack.c.bf16 %v6957_v5, %v6956_v21  ;;  %v6489_v17 = vrot.slane %v14510_v57, 1  ;;  %v5641_v9 = vrot.slane %v14380_v28, 7 }
 0x3fb   :  { %16670 = vst [vmem:[#allocation31_spill] sm:$0xff] %v14577_v43  ;;  %11058 = vmatprep.mubr.msk.f32.mxu1 %vm5794_vm2, %v16673_v55  ;;  %v14602_v55 = vsel %vm150_vm3, %v5637_v23, %v5639_v47  ;;  %v16675_v5 = vrot.slane %v14498_v36, 1  ;;  %v14613_v31 = vsel %vm1347_vm4, %v6485_v24, %v6487_v38  ;;  %v5729_v23 = vmul.f32 %v14590_v51, %v16676_v7 }
 0x3fc   :  { %v14621_v21 = vsel %vm1347_vm4, %v6487_v38, %v6489_v17  ;;  %v14636_v7 = vsel %vm150_vm3, %v5639_v47, %v5641_v9  ;;  %v5647_v38 = vrot.slane %v14388_v62, 7  ;;  %v5649_v47 = vrot.slane %v14402_v15, 7 }
 0x3fd   :  { %v14610_v12 = vsel %vm1347_vm4, %v16675_v5, %v6485_v24  ;;  %v14627_v5 = vsel %vm1347_vm4, %v6491_v4, %v6493_v63  ;;  %v14630_v24 = vsel %vm1347_vm4, %v6493_v63, %v6495_v58 }
 0x3fe   :  { %11059 = vmatmul.mubr.msk.f32.vlgmr.msra.gmra.mrb[0].mxu1 %vm5794_vm2, %v5727_v33  ;;  %v14624_v33 = vsel %vm1347_vm4, %v6489_v17, %v6491_v4  ;;  %16677 = vst [vmem:[#allocation33_spill] sm:$0xff] %v14627_v5  ;;  %v14641_v17 = vsel %vm150_vm3, %v5641_v9, %v5643_v10  ;;  %v16679_v4 = vrot.slane %v14582_v53, 1  ;;  %v5651_v9 = vrot.slane %v14400_v60, 7 }
 0x3ff   :  { %11481 = vmatpush3.bf16.msra.mxu1 %v14361_v25  ;;  %11061 = vmatprep.mubr.msk.f32.mxu1 %vm5794_vm2, %v5728_v39  ;;  %v5645_v25 = vrot.slane %v14390_v0, 7  ;;  %v16678_v39 = vld [vmem:[#allocation49_spill] sm:$0xff]  ;;  %v5732_v52 = vmul.f32 %v14641_v17, %v16682_v13  ;;  %v14670_v57 = vsel %vm150_vm3, %v5647_v38, %v5649_v47 }
 0x400   :  { %11483 = vmatprep.subr.bf16.mxu1 %v14592_v22  ;;  %v5730_v41 = vmul.f32 %v14602_v55, %v16678_v39  ;;  %v14646_v63 = vsel %vm1347_vm4, %v6495_v58, %v16679_v4  ;;  %v5731_v39 = vmul.f32 %v14636_v7, %v16681_v49  ;;  %v16684_v49 = vld [vmem:[#allocation50_spill] sm:$0xff]  ;;  %v5653_v4 = vrot.slane %v14414_v34, 7  ;;  %v16685_v13 = vld [vmem:[#allocation53_spill] sm:$0xff]  ;;  %16686 = vst [vmem:[#allocation34_spill] sm:$0xff] %v14670_v57 }
 0x401   :  { %16680 = vst [vmem:[#allocation32_spill] sm:$0xff] %v14646_v63  ;;  %v14661_v58 = vsel %vm150_vm3, %v5645_v25, %v5647_v38 }
 0x402   :  { %11062 = vmatmul.mubr.msk.f32.gmra.mrb[2].mxu1 %vm5794_vm2, %v5729_v23  ;;  %v14655_v23 = vsel %vm150_vm3, %v5643_v10, %v5645_v25  ;;  %16683 = vst [vmem:[#allocation35_spill] sm:$0xff] %v14661_v58  ;;  %v5734_v10 = vmul.f32 %v14661_v58, %v16685_v13  ;;  %v14675_v25 = vsel %vm150_vm3, %v5649_v47, %v5651_v9  ;;  %v16691_v13 = vld [vmem:[#allocation52_spill] sm:$0xff] }
 0x403   :  { %11064 = vmatprep.mubr.msk.f32.mxu1 %vm5794_vm2, %v5730_v41  ;;  %v5733_v41 = vmul.f32 %v14655_v23, %v16684_v49  ;;  %16687 = vst [vmem:[#allocation37_spill] sm:$0xff] %v14675_v25  ;;  %v5735_v38 = vmul.f32 %v14670_v57, %v16691_v13  ;;  %v14691_v47 = vsel %vm150_vm3, %v5651_v9, %v5653_v4  ;;  %v5661_v13 = vrot.slane %v14438_v2, 7 }
 0x404   :  { %16693 = vst [vmem:[#allocation39_spill] sm:$0xff] %v14691_v47  ;;  %v14705_v9 = vsel %vm150_vm3, %v5655_v45, %v5657_v50 }
 0x405   :  { %16697 = vst [vmem:[#allocation41_spill] sm:$0xff] %v14705_v9 }
 0x406   :  { %11065 = vmatmul.mubr.msk.f32.gmra.mrb[4].mxu1 %vm5794_vm2, %v5731_v39  ;;  %v16689_v39 = vrot.slane %v14551_v30, 7  ;;  %v16696_v30 = vld [vmem:[#allocation57_spill] sm:$0xff] }
 0x407   :  { %11067 = vmatprep.mubr.msk.f32.mxu1 %vm5794_vm2, %v5732_v52  ;;  %v16688_v52 = vrot.slane %v14582_v53, 7  ;;  %v5659_v53 = vrot.slane %v14424_v54, 7 }
 0x409   :  { %v14682_v49 = vsel %vm150_vm3, %v16689_v39, %v16688_v52  ;;  %v14696_v52 = vsel %vm150_vm3, %v5653_v4, %v5655_v45  ;;  %v14710_v4 = vsel %vm150_vm3, %v5657_v50, %v5659_v53  ;;  %v14719_v45 = vsel %vm150_vm3, %v5659_v53, %v5661_v13 }
 0x40a   :  { %11068 = vmatmul.mubr.msk.f32.gmra.mrb[6].mxu1 %vm5794_vm2, %v5733_v41  ;;  %16690 = vst [vmem:[#allocation36_spill] sm:$0xff] %v14682_v49  ;;  %v5736_v41 = vmul.f32 %v14675_v25, %v16692_v32  ;;  %16694 = vst [vmem:[#allocation38_spill] sm:$0xff] %v14696_v52  ;;  %v5738_v32 = vmul.f32 %v14696_v52, %v16696_v30  ;;  %v5663_v49 = vrot.slane %v14436_v56, 7  ;;  %v5667_v52 = vrot.slane %v14448_v48, 7 }
 0x40b   :  { %11070 = vmatprep.mubr.msk.f32.mxu1 %vm5794_vm2, %v5734_v10  ;;  %v16695_v10 = vld [vmem:[#allocation54_spill] sm:$0xff]  ;;  %16698 = vst [vmem:[#allocation40_spill] sm:$0xff] %v14710_v4  ;;  %16701 = vst [vmem:[#allocation43_spill] sm:$0xff] %v14719_v45 }
 0x40c   :  { %v5737_v39 = vmul.f32 %v14691_v47, %v16695_v10  ;;  %v5665_v10 = vrot.slane %v14450_v19, 7  ;;  %v16700_v47 = vld [vmem:[#allocation61_spill] sm:$0xff]  ;;  %v14724_v50 = vsel %vm150_vm3, %v5661_v13, %v5663_v49 }
 0x40d   :  { %v5740_v30 = vmul.f32 %v14710_v4, %v16700_v47  ;;  %16702 = vst [vmem:[#allocation42_spill] sm:$0xff] %v14724_v50  ;;  %v5671_v4 = vrot.slane %v14460_v18, 7 }
 0x40e   :  { %11071 = vmatmul.mubr.msk.f32.gmra.mrb[8].mxu1 %vm5794_vm2, %v5735_v38  ;;  %v16699_v38 = vld [vmem:[#allocation56_spill] sm:$0xff]  ;;  %v14733_v53 = vsel %vm150_vm3, %v5663_v49, %v5665_v10  ;;  %v14738_v13 = vsel %vm150_vm3, %v5665_v10, %v5667_v52 }
 0x40f   :  { %11073 = vmatprep.mubr.msk.f32.mxu1 %vm5794_vm2, %v5736_v41  ;;  %v5739_v41 = vmul.f32 %v14705_v9, %v16699_v38  ;;  %v5669_v38 = vrot.slane %v14462_v61, 7  ;;  %v16704_v9 = vld [vmem:[#allocation65_spill] sm:$0xff]  ;;  %16705 = vst [vmem:[#allocation44_spill] sm:$0xff] %v14733_v53  ;;  %16706 = vst [vmem:[#allocation45_spill] sm:$0xff] %v14738_v13 }
 0x410   :  { %v5742_v47 = vmul.f32 %v14724_v50, %v16704_v9  ;;  %v5675_v50 = vrot.slane %v14472_v46, 7 }
 0x411   :  { %v14747_v49 = vsel %vm150_vm3, %v5667_v52, %v5669_v38  ;;  %v14752_v10 = vsel %vm150_vm3, %v5669_v38, %v5671_v4 }
 0x412   :  { %11074 = vmatmul.mubr.msk.f32.gmra.mrb[10].mxu1 %vm5794_vm2, %v5737_v39  ;;  %v16703_v39 = vld [vmem:[#allocation60_spill] sm:$0xff]  ;;  %16709 = vst [vmem:[#allocation47_spill] sm:$0xff] %v14747_v49  ;;  %16710 = vst [vmem:[#allocation46_spill] sm:$0xff] %v14752_v10 }
 0x413   :  { %11076 = vmatprep.mubr.msk.f32.mxu1 %vm5794_vm2, %v5738_v32  ;;  %v5741_v32 = vmul.f32 %v14719_v45, %v16703_v39  ;;  %v5673_v39 = vrot.slane %v14474_v44, 7  ;;  %v16708_v45 = vld [vmem:[#allocation69_spill] sm:$0xff] }
 0x414   :  { %v5744_v9 = vmul.f32 %v14738_v13, %v16708_v45  ;;  %v5679_v13 = vrot.slane %v14484_v40, 7 }
 0x415   :  { %v14761_v52 = vsel %vm150_vm3, %v5671_v4, %v5673_v39  ;;  %v14766_v38 = vsel %vm150_vm3, %v5673_v39, %v5675_v50  ;;  %v16716_v39 = vld [vmem:[#allocation76_spill] sm:$0xff] }
 0x416   :  { %11077 = vmatmul.mubr.msk.f32.gmra.mrb[12].mxu1 %vm5794_vm2, %v5739_v41  ;;  %v16707_v41 = vld [vmem:[#allocation64_spill] sm:$0xff] }
 0x417   :  { %11079 = vmatprep.mubr.msk.f32.mxu1 %vm5794_vm2, %v5740_v30  ;;  %v5743_v30 = vmul.f32 %v14733_v53, %v16707_v41  ;;  %v5677_v41 = vrot.slane %v14486_v20, 7  ;;  %v16712_v53 = vld [vmem:[#allocation73_spill] sm:$0xff] }
 0x418   :  { %v5746_v45 = vmul.f32 %v14752_v10, %v16712_v53 }
 0x419   :  { %v14774_v53 = vsel %vm150_vm3, %v5675_v50, %v5677_v41  ;;  %v14778_v4 = vsel %vm150_vm3, %v5677_v41, %v5679_v13  ;;  %v16719_v50 = vld [vmem:[#allocation80_spill] sm:$0xff] }
 0x41a   :  { %11080 = vmatmul.mubr.msk.f32.gmra.mrb[14].mxu1 %vm5794_vm2, %v5741_v32  ;;  %v16711_v32 = vld [vmem:[#allocation68_spill] sm:$0xff]  ;;  %16715 = vst [vmem:[#allocation49_spill] sm:$0xff] %v14778_v4 }
 0x41b   :  { %11082 = vmatprep.mubr.msk.f32.mxu1 %vm5794_vm2, %v5742_v47  ;;  %v5745_v47 = vmul.f32 %v14747_v49, %v16711_v32  ;;  %v16714_v32 = vld [vmem:[#allocation77_spill] sm:$0xff] }
 0x41c   :  { %v5748_v49 = vmul.f32 %v14766_v38, %v16714_v32 }
 0x41e   :  { %11083 = vmatmul.mubr.msk.f32.gmra.mrb[16].mxu1 %vm5794_vm2, %v5743_v30  ;;  %v16713_v30 = vld [vmem:[#allocation72_spill] sm:$0xff] }
 0x41f   :  { %11085 = vmatprep.mubr.msk.f32.mxu1 %vm5794_vm2, %v5744_v9  ;;  %v5747_v9 = vmul.f32 %v14761_v52, %v16713_v30  ;;  %v16718_v30 = vrot.slane %v14498_v36, 7 }
 0x421   :  { %v14788_v32 = vsel %vm150_vm3, %v5679_v13, %v16718_v30 }
 0x422   :  { %11086 = vmatmul.mubr.msk.f32.gmra.mrb[18].mxu1 %vm5794_vm2, %v5745_v47  ;;  %v5749_v47 = vmul.f32 %v14774_v53, %v16716_v39  ;;  %v5751_v41 = vmul.f32 %v14788_v32, %v16719_v50  ;;  %v16721_v39 = vld [vmem:[#allocation84_spill] sm:$0xff]  ;;  %v6437_v50 = vrot.slane %v14353_v16, 1  ;;  %v16726_v16 = vld [vmem:[#allocation95_spill] sm:$0xff] }
 0x423   :  { %11088 = vmatprep.mubr.msk.f32.mxu1 %vm5794_vm2, %v5746_v45  ;;  %v16717_v45 = vld [vmem:[#allocation81_spill] sm:$0xff] }
 0x424   :  { %v5750_v10 = vmul.f32 %v14778_v4, %v16717_v45  ;;  %v5753_v45 = vmul.f32 %v14536_v37, %v16721_v39  ;;  %v16722_v4 = vld [vmem:[#allocation89_spill] sm:$0xff]  ;;  %v16725_v39 = vld [vmem:[#allocation92_spill] sm:$0xff] }
 0x425   :  { %v5754_v13 = vmul.f32 %v14539_v27, %v16722_v4 }
 0x426   :  { %11089 = vmatmul.mubr.msk.f32.gmra.mrb[20].mxu1 %vm5794_vm2, %v5747_v9  ;;  %v16720_v9 = vld [vmem:[#allocation85_spill] sm:$0xff] }
 0x427   :  { %11091 = vmatprep.mubr.msk.f32.mxu1 %vm5794_vm2, %v5748_v49  ;;  %v5752_v49 = vmul.f32 %v14519_v6, %v16720_v9 }
 0x42a   :  { %11092 = vmatmul.mubr.msk.f32.gmra.mrb[22].mxu1 %vm5794_vm2, %v5749_v47  ;;  %v6436_v47 = vrot.slane %v14355_v8, 1 }
 0x42b   :  { %11094 = vmatprep.mubr.msk.f32.mxu1 %vm5794_vm2, %v5750_v10  ;;  %v16723_v10 = vld [vmem:[#allocation88_spill] sm:$0xff] }
 0x42c   :  { %v5755_v30 = vmul.f32 %v14556_v3, %v16723_v10  ;;  %v6531_v4 = vsel %vm1347_vm4, 0.0, %v6436_v47  ;;  %v6441_v10 = vrot.slane %v14365_v42, 1  ;;  %v7344_v3 = vld [vmem:[#allocation7 + $0x40] sm:$0xff]  ;;  %v6445_v42 = vrot.slane %v14376_v26, 1 }
 0x42d   :  { %v6532_v8 = vmul.f32 %v6531_v4, %v16726_v16 }
 0x42e   :  { %11095 = vmatmul.mubr.msk.f32.gmra.mrb[24].mxu1 %vm5794_vm2, %v5751_v41  ;;  %v16724_v41 = vld [vmem:[#allocation93_spill] sm:$0xff] }
 0x42f   :  { %11097 = vmatprep.mubr.msk.f32.mxu1 %vm5794_vm2, %v5752_v49  ;;  %v5756_v9 = vmul.f32 %v14559_v1, %v16724_v41  ;;  %v6439_v49 = vrot.slane %v14367_v11, 1  ;;  %v7345_v41 = vld [vmem:[#allocation7 + $0x48] sm:$0xff]  ;;  %v6443_v11 = vrot.slane %v14380_v28, 1 }
 0x431   :  { %v14835_v4 = vsel %vm1347_vm4, %v6439_v49, %v6441_v10 }
 0x432   :  { %11098 = vmatmul.mubr.msk.f32.gmra.mrb[26].mxu1 %vm5794_vm2, %v5753_v45  ;;  %v5757_v45 = vmul.f32 %v14577_v43, %v16725_v39  ;;  %v16729_v43 = vld [vmem:[#allocation97_spill] sm:$0xff]  ;;  %16730 = vst [vmem:[#allocation51_spill] sm:$0xff] %v14835_v4 }
 0x433   :  { %11100 = vmatprep.mubr.msk.f32.mxu1 %vm5794_vm2, %v5754_v13  ;;  %v14817_v13 = vsel %vm1347_vm4, %v6436_v47, %v6437_v50  ;;  %v14829_v47 = vpack.c.bf16 %v7345_v41, %v7344_v3 }
 0x436   :  { %11101 = vmatmul.mubr.msk.f32.gmra.mrb[28].mxu1 %vm5794_vm2, %v5755_v30  ;;  %v14824_v30 = vsel %vm1347_vm4, %v6437_v50, %v6439_v49  ;;  %v14840_v50 = vsel %vm1347_vm4, %v6441_v10, %v6443_v11  ;;  %v16733_v49 = vld [vmem:[#allocation99_spill] sm:$0xff]  ;;  %v6451_v10 = vrot.slane %v14402_v15, 1 }
 0x437   :  { %11103 = vmatprep.mubr.msk.f32.mxu1 %vm5794_vm2, %v5756_v9  ;;  %16727 = vst [vmem:[#allocation48_spill] sm:$0xff] %v14824_v30  ;;  %v16728_v9 = vld [vmem:[#allocation94_spill] sm:$0xff]  ;;  %v6534_v16 = vmul.f32 %v14824_v30, %v16729_v43  ;;  %16731 = vst [vmem:[#allocation50_spill] sm:$0xff] %v14840_v50  ;;  %v6449_v43 = vrot.slane %v14388_v62, 1  ;;  %v6536_v41 = vmul.f32 %v14840_v50, %v16733_v49  ;;  %v6455_v50 = vrot.slane %v14414_v34, 1 }
 0x438   :  { %v6533_v39 = vmul.f32 %v14817_v13, %v16728_v9  ;;  %v14851_v9 = vsel %vm1347_vm4, %v6443_v11, %v6445_v42 }
 0x439   :  { %16734 = vst [vmem:[#allocation53_spill] sm:$0xff] %v14851_v9 }
 0x43a   :  { %11104 = vmatmul.mubr.msk.f32.gmra.mrb[30].mxu1 %vm5794_vm2, %v5757_v45  ;;  %v6447_v45 = vrot.slane %v14390_v0, 1 }
 0x43b   :  { %11110 = vmatprep.mubr.msk.f32.mxu1 %vm5794_vm2, %v6532_v8  ;;  %v16732_v8 = vld [vmem:[#allocation96_spill] sm:$0xff] }
 0x43c   :  { %v6535_v3 = vmul.f32 %v14835_v4, %v16732_v8  ;;  %v6453_v8 = vrot.slane %v14400_v60, 1  ;;  %v16737_v4 = vld [vmem:[#allocation101_spill] sm:$0xff]  ;;  %v14865_v11 = vsel %vm1347_vm4, %v6447_v45, %v6449_v43 }
 0x43d   :  { %16738 = vst [vmem:[#allocation55_spill] sm:$0xff] %v14865_v11 }
 0x43e   :  { %11111 = vmatmul.mubr.msk.f32.vlgmr.msra.gmra.mrb[0].mxu1 %vm5794_vm2, %v6533_v39  ;;  %v16736_v39 = vld [vmem:[#allocation98_spill] sm:$0xff] }
 0x43f   :  { %11485 = vmatpush3.bf16.msra.mxu1 %v14592_v22  ;;  %11113 = vmatprep.mubr.msk.f32.mxu1 %vm5794_vm2, %v6534_v16  ;;  %v14856_v22 = vsel %vm1347_vm4, %v6445_v42, %v6447_v45  ;;  %v6537_v16 = vmul.f32 %v14851_v9, %v16736_v39  ;;  %v14870_v42 = vsel %vm1347_vm4, %v6449_v43, %v6451_v10  ;;  %v6457_v39 = vrot.slane %v14412_v14, 1  ;;  %v16741_v9 = vld [vmem:[#allocation103_spill] sm:$0xff] }
 0x440   :  { %11487 = vmatprep.subr.bf16.mxu1 %v14829_v47  ;;  %16735 = vst [vmem:[#allocation52_spill] sm:$0xff] %v14856_v22  ;;  %v6538_v49 = vmul.f32 %v14856_v22, %v16737_v4  ;;  %16739 = vst [vmem:[#allocation54_spill] sm:$0xff] %v14870_v42  ;;  %v6540_v4 = vmul.f32 %v14870_v42, %v16741_v9  ;;  %v14879_v45 = vsel %vm1347_vm4, %v6451_v10, %v6453_v8 }
 0x441   :  { %16742 = vst [vmem:[#allocation57_spill] sm:$0xff] %v14879_v45  ;;  %v6459_v22 = vrot.slane %v14426_v35, 1  ;;  %v14884_v43 = vsel %vm1347_vm4, %v6453_v8, %v6455_v50  ;;  %v14893_v10 = vsel %vm1347_vm4, %v6455_v50, %v6457_v39  ;;  %v6463_v42 = vrot.slane %v14438_v2, 1 }
 0x442   :  { %11114 = vmatmul.mubr.msk.f32.gmra.mrb[2].mxu1 %vm5794_vm2, %v6535_v3  ;;  %v16740_v3 = vld [vmem:[#allocation100_spill] sm:$0xff]  ;;  %16743 = vst [vmem:[#allocation56_spill] sm:$0xff] %v14884_v43  ;;  %16746 = vst [vmem:[#allocation61_spill] sm:$0xff] %v14893_v10 }
 0x443   :  { %11116 = vmatprep.mubr.msk.f32.mxu1 %vm5794_vm2, %v6536_v41  ;;  %v6539_v41 = vmul.f32 %v14865_v11, %v16740_v3  ;;  %v6461_v3 = vrot.slane %v14424_v54, 1  ;;  %v16745_v11 = vld [vmem:[#allocation105_spill] sm:$0xff]  ;;  %v14898_v8 = vsel %vm1347_vm4, %v6457_v39, %v6459_v22 }
 0x444   :  { %v6542_v9 = vmul.f32 %v14884_v43, %v16745_v11  ;;  %16747 = vst [vmem:[#allocation60_spill] sm:$0xff] %v14898_v8  ;;  %v6467_v43 = vrot.slane %v14450_v19, 1 }
 0x445   :  { %v14907_v50 = vsel %vm1347_vm4, %v6459_v22, %v6461_v3  ;;  %v14912_v39 = vsel %vm1347_vm4, %v6461_v3, %v6463_v42 }
 0x446   :  { %11117 = vmatmul.mubr.msk.f32.gmra.mrb[4].mxu1 %vm5794_vm2, %v6537_v16  ;;  %v16744_v16 = vld [vmem:[#allocation102_spill] sm:$0xff]  ;;  %16750 = vst [vmem:[#allocation65_spill] sm:$0xff] %v14907_v50  ;;  %16751 = vst [vmem:[#allocation64_spill] sm:$0xff] %v14912_v39 }
 0x447   :  { %11119 = vmatprep.mubr.msk.f32.mxu1 %vm5794_vm2, %v6538_v49  ;;  %v6541_v49 = vmul.f32 %v14879_v45, %v16744_v16  ;;  %v6465_v16 = vrot.slane %v14436_v56, 1  ;;  %v16749_v45 = vld [vmem:[#allocation107_spill] sm:$0xff] }
 0x448   :  { %v6544_v11 = vmul.f32 %v14898_v8, %v16749_v45  ;;  %v6471_v8 = vrot.slane %v14462_v61, 1 }
 0x449   :  { %v14921_v22 = vsel %vm1347_vm4, %v6463_v42, %v6465_v16  ;;  %v14926_v3 = vsel %vm1347_vm4, %v6465_v16, %v6467_v43 }
 0x44a   :  { %11120 = vmatmul.mubr.msk.f32.gmra.mrb[6].mxu1 %vm5794_vm2, %v6539_v41  ;;  %v16748_v41 = vld [vmem:[#allocation104_spill] sm:$0xff]  ;;  %16754 = vst [vmem:[#allocation69_spill] sm:$0xff] %v14921_v22  ;;  %16755 = vst [vmem:[#allocation68_spill] sm:$0xff] %v14926_v3 }
 0x44b   :  { %11122 = vmatprep.mubr.msk.f32.mxu1 %vm5794_vm2, %v6540_v4  ;;  %v6543_v4 = vmul.f32 %v14893_v10, %v16748_v41  ;;  %v6469_v41 = vrot.slane %v14448_v48, 1  ;;  %v16753_v10 = vld [vmem:[#allocation109_spill] sm:$0xff] }
 0x44c   :  { %v6546_v45 = vmul.f32 %v14912_v39, %v16753_v10  ;;  %v6475_v39 = vrot.slane %v14474_v44, 1 }
 0x44d   :  { %v14935_v42 = vsel %vm1347_vm4, %v6467_v43, %v6469_v41  ;;  %v14940_v16 = vsel %vm1347_vm4, %v6469_v41, %v6471_v8 }
 0x44e   :  { %11123 = vmatmul.mubr.msk.f32.gmra.mrb[8].mxu1 %vm5794_vm2, %v6541_v49  ;;  %v16752_v49 = vld [vmem:[#allocation106_spill] sm:$0xff]  ;;  %16758 = vst [vmem:[#allocation73_spill] sm:$0xff] %v14935_v42  ;;  %16759 = vst [vmem:[#allocation72_spill] sm:$0xff] %v14940_v16 }
 0x44f   :  { %11125 = vmatprep.mubr.msk.f32.mxu1 %vm5794_vm2, %v6542_v9  ;;  %v6545_v9 = vmul.f32 %v14907_v50, %v16752_v49  ;;  %v6473_v49 = vrot.slane %v14460_v18, 1  ;;  %v16757_v50 = vld [vmem:[#allocation111_spill] sm:$0xff] }
 0x450   :  { %v6548_v10 = vmul.f32 %v14926_v3, %v16757_v50  ;;  %v6479_v3 = vrot.slane %v14486_v20, 1 }
 0x451   :  { %v14949_v43 = vsel %vm1347_vm4, %v6471_v8, %v6473_v49  ;;  %v14954_v41 = vsel %vm1347_vm4, %v6473_v49, %v6475_v39  ;;  %v16766_v49 = vld [vmem:[#allocation114_spill] sm:$0xff] }
 0x452   :  { %11126 = vmatmul.mubr.msk.f32.gmra.mrb[10].mxu1 %vm5794_vm2, %v6543_v4  ;;  %v16756_v4 = vld [vmem:[#allocation108_spill] sm:$0xff]  ;;  %16762 = vst [vmem:[#allocation77_spill] sm:$0xff] %v14949_v43 }
 0x453   :  { %11128 = vmatprep.mubr.msk.f32.mxu1 %vm5794_vm2, %v6544_v11  ;;  %v6547_v11 = vmul.f32 %v14921_v22, %v16756_v4  ;;  %v6477_v4 = vrot.slane %v14472_v46, 1  ;;  %v16761_v22 = vld [vmem:[#allocation113_spill] sm:$0xff] }
 0x454   :  { %v6550_v50 = vmul.f32 %v14940_v16, %v16761_v22  ;;  %v16767_v16 = vld [vmem:[#allocation117_spill] sm:$0xff] }
 0x455   :  { %v14963_v8 = vsel %vm1347_vm4, %v6475_v39, %v6477_v4  ;;  %v16768_v39 = vrot.slane %v14498_v36, 1 }
 0x456   :  { %11129 = vmatmul.mubr.msk.f32.gmra.mrb[12].mxu1 %vm5794_vm2, %v6545_v9  ;;  %v16760_v9 = vld [vmem:[#allocation110_spill] sm:$0xff] }
 0x457   :  { %11131 = vmatprep.mubr.msk.f32.mxu1 %vm5794_vm2, %v6546_v45  ;;  %v6549_v45 = vmul.f32 %v14935_v42, %v16760_v9  ;;  %v6481_v9 = vrot.slane %v14484_v40, 1  ;;  %v16764_v42 = vld [vmem:[#allocation115_spill] sm:$0xff] }
 0x458   :  { %v6552_v22 = vmul.f32 %v14954_v41, %v16764_v42 }
 0x459   :  { %v14981_v42 = vsel %vm1347_vm4, %v6481_v9, %v16768_v39  ;;  %v16774_v39 = vld [vmem:[#allocation123_spill] sm:$0xff] }
 0x45a   :  { %11132 = vmatmul.mubr.msk.f32.gmra.mrb[14].mxu1 %vm5794_vm2, %v6547_v11  ;;  %v16763_v11 = vld [vmem:[#allocation112_spill] sm:$0xff] }
 0x45b   :  { %11134 = vmatprep.mubr.msk.f32.mxu1 %vm5794_vm2, %v6548_v10  ;;  %v6551_v10 = vmul.f32 %v14949_v43, %v16763_v11  ;;  %v14975_v43 = vsel %vm1347_vm4, %v6479_v3, %v6481_v9  ;;  %v16773_v9 = vld [vmem:[#allocation120_spill] sm:$0xff] }
 0x45e   :  { %11135 = vmatmul.mubr.msk.f32.gmra.mrb[16].mxu1 %vm5794_vm2, %v6549_v45  ;;  %v14967_v45 = vsel %vm1347_vm4, %v6477_v4, %v6479_v3  ;;  %v16769_v4 = vld [vmem:[#allocation116_spill] sm:$0xff]  ;;  %v16771_v3 = vld [vmem:[#allocation118_spill] sm:$0xff] }
 0x45f   :  { %11137 = vmatprep.mubr.msk.f32.mxu1 %vm5794_vm2, %v6550_v50  ;;  %16765 = vst [vmem:[#allocation76_spill] sm:$0xff] %v14967_v45  ;;  %v6553_v50 = vmul.f32 %v14963_v8, %v16766_v49  ;;  %v6554_v11 = vmul.f32 %v14967_v45, %v16767_v16  ;;  %v6557_v16 = vmul.f32 %v14610_v12, %v16771_v3 }
 0x462   :  { %11138 = vmatmul.mubr.msk.f32.gmra.mrb[18].mxu1 %vm5794_vm2, %v6551_v10  ;;  %v6555_v10 = vmul.f32 %v14975_v43, %v16769_v4  ;;  %v6560_v4 = vmul.f32 %v14624_v33, %v16774_v39  ;;  %v7734_v39 = vld [vmem:[#allocation7 + $0x50] sm:$0xff] }
 0x463   :  { %11140 = vmatprep.mubr.msk.f32.mxu1 %vm5794_vm2, %v6552_v22  ;;  %v16770_v22 = vld [vmem:[#allocation119_spill] sm:$0xff] }
 0x464   :  { %v6556_v49 = vmul.f32 %v14981_v42, %v16770_v22 }
 0x466   :  { %11141 = vmatmul.mubr.msk.f32.gmra.mrb[20].mxu1 %vm5794_vm2, %v6553_v50  ;;  %v16772_v50 = vld [vmem:[#allocation121_spill] sm:$0xff] }
 0x467   :  { %11143 = vmatprep.mubr.msk.f32.mxu1 %vm5794_vm2, %v6554_v11  ;;  %v6558_v45 = vmul.f32 %v14613_v31, %v16772_v50  ;;  %v6559_v11 = vmul.f32 %v14621_v21, %v16773_v9  ;;  %v16778_v50 = vld [vmem:[#allocation127_spill] sm:$0xff] }
 0x468   :  { %v6923_v9 = vmul.f32 %v14568_v59, %v16778_v50  ;;  %v16781_v59 = vld [vmem:[#allocation128_spill] sm:$0xff] }
 0x46a   :  { %11144 = vmatmul.mubr.msk.f32.gmra.mrb[22].mxu1 %vm5794_vm2, %v6555_v10  ;;  %v16775_v10 = vld [vmem:[#allocation122_spill] sm:$0xff] }
 0x46b   :  { %11146 = vmatprep.mubr.msk.f32.mxu1 %vm5794_vm2, %v6556_v49  ;;  %v6561_v22 = vmul.f32 %v14627_v5, %v16775_v10  ;;  %v16776_v49 = vld [vmem:[#allocation125_spill] sm:$0xff] }
 0x46c   :  { %v6562_v3 = vmul.f32 %v14630_v24, %v16776_v49 }
 0x46e   :  { %11147 = vmatmul.mubr.msk.f32.gmra.mrb[24].mxu1 %vm5794_vm2, %v6557_v16 }
 0x46f   :  { %11149 = vmatprep.mubr.msk.f32.mxu1 %vm5794_vm2, %v6558_v45  ;;  %v16777_v45 = vld [vmem:[#allocation124_spill] sm:$0xff] }
 0x470   :  { %v6563_v16 = vmul.f32 %v14646_v63, %v16777_v45  ;;  %v6926_v45 = vmul.f32 %v14602_v55, %v16781_v59  ;;  %v16787_v59 = vld [vmem:[#allocation134_spill] sm:$0xff] }
 0x472   :  { %11150 = vmatmul.mubr.msk.f32.gmra.mrb[26].mxu1 %vm5794_vm2, %v6559_v11  ;;  %v7735_v11 = vld [vmem:[#allocation7 + $0x58] sm:$0xff] }
 0x473   :  { %11152 = vmatprep.mubr.msk.f32.mxu1 %vm5794_vm2, %v6560_v4  ;;  %v16779_v4 = vld [vmem:[#allocation126_spill] sm:$0xff]  ;;  %v15016_v49 = vpack.c.bf16 %v7735_v11, %v7734_v39  ;;  %v16784_v11 = vld [vmem:[#allocation133_spill] sm:$0xff] }
 0x474   :  { %v6924_v10 = vmul.f32 %v14572_v29, %v16779_v4  ;;  %v16785_v4 = vld [vmem:[#allocation132_spill] sm:$0xff] }
 0x476   :  { %11153 = vmatmul.mubr.msk.f32.gmra.mrb[28].mxu1 %vm5794_vm2, %v6561_v22  ;;  %v16780_v22 = vld [vmem:[#allocation129_spill] sm:$0xff] }
 0x477   :  { %11155 = vmatprep.mubr.msk.f32.mxu1 %vm5794_vm2, %v6562_v3  ;;  %v6925_v3 = vmul.f32 %v14590_v51, %v16780_v22  ;;  %v16786_v22 = vld [vmem:[#allocation135_spill] sm:$0xff] }
 0x47a   :  { %11156 = vmatmul.mubr.msk.f32.gmra.mrb[30].mxu1 %vm5794_vm2, %v6563_v16  ;;  %v16782_v16 = vld [vmem:[#allocation131_spill] sm:$0xff] }
 0x47b   :  { %11162 = vmatprep.mubr.msk.f32.mxu1 %vm5794_vm2, %v6923_v9  ;;  %v6927_v50 = vmul.f32 %v14636_v7, %v16782_v16  ;;  %v16783_v9 = vld [vmem:[#allocation130_spill] sm:$0xff]  ;;  %v16788_v16 = vld [vmem:[#allocation137_spill] sm:$0xff] }
 0x47c   :  { %v6928_v39 = vmul.f32 %v14641_v17, %v16783_v9 }
 0x47e   :  { %11163 = vmatmul.mubr.msk.f32.vlgmr.msra.gmra.mrb[0].mxu1 %vm5794_vm2, %v6924_v10  ;;  %v6930_v10 = vmul.f32 %v14661_v58, %v16785_v4  ;;  %v16792_v4 = vld [vmem:[#allocation139_spill] sm:$0xff]  ;;  %v16793_v58 = vld [vmem:[#allocation41_spill] sm:$0xff] }
 0x47f   :  { %11489 = vmatpush3.bf16.msra.mxu1 %v14829_v47  ;;  %11165 = vmatprep.mubr.msk.f32.mxu1 %vm5794_vm2, %v6925_v3  ;;  %v6929_v47 = vmul.f32 %v14655_v23, %v16784_v11  ;;  %v6931_v3 = vmul.f32 %v14670_v57, %v16786_v22  ;;  %v16791_v11 = vld [vmem:[#allocation38_spill] sm:$0xff]  ;;  %v6935_v22 = vmul.f32 %v16793_v58, %v16792_v4  ;;  %v16797_v57 = vld [vmem:[#allocation43_spill] sm:$0xff] }
 0x480   :  { %11491 = vmatprep.subr.bf16.mxu1 %v15016_v49  ;;  %v16805_v58 = vld [vmem:[#allocation47_spill] sm:$0xff] }
 0x482   :  { %11166 = vmatmul.mubr.msk.f32.gmra.mrb[2].mxu1 %vm5794_vm2, %v6926_v45  ;;  %v6932_v45 = vmul.f32 %v14675_v25, %v16787_v59  ;;  %v16796_v25 = vld [vmem:[#allocation141_spill] sm:$0xff] }
 0x483   :  { %11168 = vmatprep.mubr.msk.f32.mxu1 %vm5794_vm2, %v6927_v50  ;;  %v16789_v50 = vld [vmem:[#allocation39_spill] sm:$0xff] }
 0x484   :  { %v6933_v9 = vmul.f32 %v16789_v50, %v16788_v16  ;;  %v6937_v16 = vmul.f32 %v16797_v57, %v16796_v25  ;;  %v16801_v50 = vld [vmem:[#allocation44_spill] sm:$0xff] }
 0x486   :  { %11169 = vmatmul.mubr.msk.f32.gmra.mrb[4].mxu1 %vm5794_vm2, %v6928_v39  ;;  %v16790_v39 = vld [vmem:[#allocation136_spill] sm:$0xff] }
 0x487   :  { %11171 = vmatprep.mubr.msk.f32.mxu1 %vm5794_vm2, %v6929_v47  ;;  %v6934_v47 = vmul.f32 %v16791_v11, %v16790_v39  ;;  %v16800_v11 = vld [vmem:[#allocation143_spill] sm:$0xff] }
 0x488   :  { %v6939_v4 = vmul.f32 %v16801_v50, %v16800_v11 }
 0x48a   :  { %11172 = vmatmul.mubr.msk.f32.gmra.mrb[6].mxu1 %vm5794_vm2, %v6930_v10  ;;  %v16794_v10 = vld [vmem:[#allocation138_spill] sm:$0xff] }
 0x48b   :  { %11174 = vmatprep.mubr.msk.f32.mxu1 %vm5794_vm2, %v6931_v3  ;;  %v16795_v3 = vld [vmem:[#allocation40_spill] sm:$0xff] }
 0x48c   :  { %v6936_v59 = vmul.f32 %v16795_v3, %v16794_v10  ;;  %v16804_v3 = vld [vmem:[#allocation145_spill] sm:$0xff] }
 0x48d   :  { %v6941_v25 = vmul.f32 %v16805_v58, %v16804_v3 }
 0x48e   :  { %11175 = vmatmul.mubr.msk.f32.gmra.mrb[8].mxu1 %vm5794_vm2, %v6932_v45  ;;  %v16798_v45 = vld [vmem:[#allocation140_spill] sm:$0xff] }
 0x48f   :  { %11177 = vmatprep.mubr.msk.f32.mxu1 %vm5794_vm2, %v6933_v9  ;;  %v16799_v9 = vld [vmem:[#allocation42_spill] sm:$0xff] }
 0x490   :  { %v6938_v39 = vmul.f32 %v16799_v9, %v16798_v45  ;;  %v16808_v9 = vld [vmem:[#allocation147_spill] sm:$0xff] }
 0x491   :  { %v6943_v11 = vmul.f32 %v14761_v52, %v16808_v9 }
 0x492   :  { %11178 = vmatmul.mubr.msk.f32.gmra.mrb[10].mxu1 %vm5794_vm2, %v6934_v47  ;;  %v16802_v47 = vld [vmem:[#allocation142_spill] sm:$0xff] }
 0x493   :  { %11180 = vmatprep.mubr.msk.f32.mxu1 %vm5794_vm2, %v6935_v22  ;;  %v16803_v22 = vld [vmem:[#allocation45_spill] sm:$0xff] }
 0x494   :  { %v6940_v10 = vmul.f32 %v16803_v22, %v16802_v47  ;;  %v16810_v47 = vld [vmem:[#allocation149_spill] sm:$0xff] }
 0x495   :  { %v6945_v3 = vmul.f32 %v14774_v53, %v16810_v47 }
 0x496   :  { %11181 = vmatmul.mubr.msk.f32.gmra.mrb[12].mxu1 %vm5794_vm2, %v6936_v59  ;;  %v16806_v59 = vld [vmem:[#allocation144_spill] sm:$0xff] }
 0x497   :  { %11183 = vmatprep.mubr.msk.f32.mxu1 %vm5794_vm2, %v6937_v16  ;;  %v16807_v16 = vld [vmem:[#allocation46_spill] sm:$0xff] }
 0x498   :  { %v6942_v45 = vmul.f32 %v16807_v16, %v16806_v59  ;;  %v16813_v16 = vld [vmem:[#allocation150_spill] sm:$0xff] }
 0x499   :  { %v6947_v9 = vmul.f32 %v14788_v32, %v16813_v16 }
 0x49a   :  { %11184 = vmatmul.mubr.msk.f32.gmra.mrb[14].mxu1 %vm5794_vm2, %v6938_v39  ;;  %v16809_v39 = vld [vmem:[#allocation146_spill] sm:$0xff] }
 0x49b   :  { %11186 = vmatprep.mubr.msk.f32.mxu1 %vm5794_vm2, %v6939_v4  ;;  %v6944_v4 = vmul.f32 %v14766_v38, %v16809_v39  ;;  %v16815_v39 = vld [vmem:[#allocation151_spill] sm:$0xff] }
 0x49c   :  { %v6949_v47 = vmul.f32 %v14536_v37, %v16815_v39  ;;  %v16825_v37 = vld [vmem:[#allocation301_spill] sm:$0xff] }
 0x49e   :  { %11187 = vmatmul.mubr.msk.f32.gmra.mrb[16].mxu1 %vm5794_vm2, %v6940_v10  ;;  %v16811_v10 = vld [vmem:[#allocation148_spill] sm:$0xff] }
 0x49f   :  { %11189 = vmatprep.mubr.msk.f32.mxu1 %vm5794_vm2, %v6941_v25  ;;  %v16812_v25 = vld [vmem:[#allocation49_spill] sm:$0xff] }
 0x4a0   :  { %v6946_v59 = vmul.f32 %v16812_v25, %v16811_v10  ;;  %v16817_v10 = vld [vmem:[#allocation152_spill] sm:$0xff]  ;;  %v16818_v25 = vld [vmem:[#allocation29_spill] sm:$0xff] }
 0x4a1   :  { %v6951_v16 = vmul.f32 %v16818_v25, %v16817_v10  ;;  %v8124_v25 = vld [vmem:[#allocation7 + $0x60] sm:$0xff] }
 0x4a2   :  { %11190 = vmatmul.mubr.msk.f32.gmra.mrb[18].mxu1 %vm5794_vm2, %v6942_v45  ;;  %v16814_v45 = vld [vmem:[#allocation75_spill] sm:$0xff] }
 0x4a3   :  { %11192 = vmatprep.mubr.msk.f32.mxu1 %vm5794_vm2, %v6943_v11  ;;  %v6948_v11 = vmul.f32 %v14519_v6, %v16814_v45  ;;  %v16820_v45 = vld [vmem:[#allocation154_spill] sm:$0xff]  ;;  %v16821_v6 = vld [vmem:[#allocation31_spill] sm:$0xff] }
 0x4a4   :  { %v6953_v39 = vmul.f32 %v16821_v6, %v16820_v45  ;;  %v16829_v6 = vld [vmem:[#allocation13_spill] sm:$0xff] }
 0x4a6   :  { %11193 = vmatmul.mubr.msk.f32.gmra.mrb[20].mxu1 %vm5794_vm2, %v6944_v4  ;;  %v16816_v4 = vld [vmem:[#allocation79_spill] sm:$0xff] }
 0x4a7   :  { %11195 = vmatprep.mubr.msk.f32.mxu1 %vm5794_vm2, %v6945_v3  ;;  %v6950_v3 = vmul.f32 %v14539_v27, %v16816_v4  ;;  %v16824_v27 = vld [vmem:[#allocation155_spill] sm:$0xff] }
 0x4a8   :  { %v7311_v10 = vmul.f32 %v16825_v37, %v16824_v27  ;;  %v16830_v27 = vld [vmem:[#allocation156_spill] sm:$0xff]  ;;  %v16831_v37 = vld [vmem:[#allocation15_spill] sm:$0xff] }
 0x4aa   :  { %11196 = vmatmul.mubr.msk.f32.gmra.mrb[22].mxu1 %vm5794_vm2, %v6946_v59  ;;  %v16819_v59 = vld [vmem:[#allocation83_spill] sm:$0xff] }
 0x4ab   :  { %11198 = vmatprep.mubr.msk.f32.mxu1 %vm5794_vm2, %v6947_v9  ;;  %v6952_v9 = vmul.f32 %v14559_v1, %v16819_v59  ;;  %v16827_v59 = vld [vmem:[#allocation300_spill] sm:$0xff] }
 0x4ae   :  { %11199 = vmatmul.mubr.msk.f32.gmra.mrb[24].mxu1 %vm5794_vm2, %v6948_v11  ;;  %v16822_v11 = vld [vmem:[#allocation153_spill] sm:$0xff] }
 0x4af   :  { %11201 = vmatprep.mubr.msk.f32.mxu1 %vm5794_vm2, %v6949_v47  ;;  %v16823_v47 = vld [vmem:[#allocation36_spill] sm:$0xff] }
 0x4b0   :  { %v6954_v4 = vmul.f32 %v16823_v47, %v16822_v11  ;;  %v7314_v11 = vmul.f32 %v16831_v37, %v16830_v27 }
 0x4b2   :  { %11202 = vmatmul.mubr.msk.f32.gmra.mrb[26].mxu1 %vm5794_vm2, %v6950_v3  ;;  %v8125_v3 = vld [vmem:[#allocation7 + $0x68] sm:$0xff] }
 0x4b3   :  { %11204 = vmatprep.mubr.msk.f32.mxu1 %vm5794_vm2, %v6951_v16  ;;  %v16826_v16 = vld [vmem:[#allocation91_spill] sm:$0xff]  ;;  %v15116_v45 = vpack.c.bf16 %v8125_v3, %v8124_v25 }
 0x4b4   :  { %v7312_v1 = vmul.f32 %v16827_v59, %v16826_v16  ;;  %v16833_v25 = vld [vmem:[#allocation159_spill] sm:$0xff] }
 0x4b5   :  { %v7316_v3 = vmul.f32 %v14376_v26, %v16833_v25  ;;  %v16835_v16 = vld [vmem:[#allocation163_spill] sm:$0xff] }
 0x4b6   :  { %11205 = vmatmul.mubr.msk.f32.gmra.mrb[28].mxu1 %vm5794_vm2, %v6952_v9  ;;  %v16828_v9 = vld [vmem:[#allocation157_spill] sm:$0xff] }
 0x4b7   :  { %11207 = vmatprep.mubr.msk.f32.mxu1 %vm5794_vm2, %v6953_v39  ;;  %v7313_v39 = vmul.f32 %v16829_v6, %v16828_v9  ;;  %v7318_v9 = vmul.f32 %v14388_v62, %v16835_v16 }
 0x4ba   :  { %11208 = vmatmul.mubr.msk.f32.gmra.mrb[30].mxu1 %vm5794_vm2, %v6954_v4  ;;  %v16832_v4 = vld [vmem:[#allocation160_spill] sm:$0xff] }
 0x4bb   :  { %11214 = vmatprep.mubr.msk.f32.mxu1 %vm5794_vm2, %v7311_v10  ;;  %v7315_v10 = vmul.f32 %v14380_v28, %v16832_v4 }
 0x4be   :  { %11215 = vmatmul.mubr.msk.f32.vlgmr.msra.gmra.mrb[0].mxu1 %vm5794_vm2, %v7312_v1  ;;  %v16834_v1 = vld [vmem:[#allocation164_spill] sm:$0xff] }
 0x4bf   :  { %11493 = vmatpush3.bf16.msra.mxu1 %v15016_v49  ;;  %11217 = vmatprep.mubr.msk.f32.mxu1 %vm5794_vm2, %v7313_v39  ;;  %v7317_v49 = vmul.f32 %v14390_v0, %v16834_v1  ;;  %v16836_v39 = vld [vmem:[#allocation168_spill] sm:$0xff] }
 0x4c0   :  { %11495 = vmatprep.subr.bf16.mxu1 %v15116_v45  ;;  %v7319_v27 = vmul.f32 %v14402_v15, %v16836_v39 }
 0x4c2   :  { %11218 = vmatmul.mubr.msk.f32.gmra.mrb[2].mxu1 %vm5794_vm2, %v7314_v11  ;;  %v16837_v11 = vld [vmem:[#allocation167_spill] sm:$0xff] }
 0x4c3   :  { %11220 = vmatprep.mubr.msk.f32.mxu1 %vm5794_vm2, %v7315_v10  ;;  %v7320_v4 = vmul.f32 %v14400_v60, %v16837_v11  ;;  %v16838_v10 = vld [vmem:[#allocation172_spill] sm:$0xff] }
 0x4c4   :  { %v7321_v25 = vmul.f32 %v14414_v34, %v16838_v10 }
 0x4c6   :  { %11221 = vmatmul.mubr.msk.f32.gmra.mrb[4].mxu1 %vm5794_vm2, %v7316_v3  ;;  %v16839_v3 = vld [vmem:[#allocation171_spill] sm:$0xff] }
 0x4c7   :  { %11223 = vmatprep.mubr.msk.f32.mxu1 %vm5794_vm2, %v7317_v49  ;;  %v7322_v1 = vmul.f32 %v14412_v14, %v16839_v3  ;;  %v16840_v49 = vld [vmem:[#allocation176_spill] sm:$0xff] }
 0x4c8   :  { %v7323_v16 = vmul.f32 %v14426_v35, %v16840_v49 }
 0x4ca   :  { %11224 = vmatmul.mubr.msk.f32.gmra.mrb[6].mxu1 %vm5794_vm2, %v7318_v9  ;;  %v16841_v9 = vld [vmem:[#allocation175_spill] sm:$0xff] }
 0x4cb   :  { %11226 = vmatprep.mubr.msk.f32.mxu1 %vm5794_vm2, %v7319_v27  ;;  %v7324_v39 = vmul.f32 %v14424_v54, %v16841_v9  ;;  %v16842_v27 = vld [vmem:[#allocation180_spill] sm:$0xff] }
 0x4cc   :  { %v7325_v11 = vmul.f32 %v14438_v2, %v16842_v27 }
 0x4ce   :  { %11227 = vmatmul.mubr.msk.f32.gmra.mrb[8].mxu1 %vm5794_vm2, %v7320_v4  ;;  %v16843_v4 = vld [vmem:[#allocation179_spill] sm:$0xff] }
 0x4cf   :  { %11229 = vmatprep.mubr.msk.f32.mxu1 %vm5794_vm2, %v7321_v25  ;;  %v7326_v10 = vmul.f32 %v14436_v56, %v16843_v4  ;;  %v16844_v25 = vld [vmem:[#allocation184_spill] sm:$0xff] }
 0x4d0   :  { %v7327_v3 = vmul.f32 %v14450_v19, %v16844_v25 }
 0x4d2   :  { %11230 = vmatmul.mubr.msk.f32.gmra.mrb[10].mxu1 %vm5794_vm2, %v7322_v1  ;;  %v16845_v1 = vld [vmem:[#allocation183_spill] sm:$0xff] }
 0x4d3   :  { %11232 = vmatprep.mubr.msk.f32.mxu1 %vm5794_vm2, %v7323_v16  ;;  %v7328_v49 = vmul.f32 %v14448_v48, %v16845_v1  ;;  %v16846_v16 = vld [vmem:[#allocation188_spill] sm:$0xff] }
 0x4d4   :  { %v7329_v9 = vmul.f32 %v14462_v61, %v16846_v16 }
 0x4d6   :  { %11233 = vmatmul.mubr.msk.f32.gmra.mrb[12].mxu1 %vm5794_vm2, %v7324_v39  ;;  %v16847_v39 = vld [vmem:[#allocation187_spill] sm:$0xff] }
 0x4d7   :  { %11235 = vmatprep.mubr.msk.f32.mxu1 %vm5794_vm2, %v7325_v11  ;;  %v7330_v27 = vmul.f32 %v14460_v18, %v16847_v39  ;;  %v16848_v11 = vld [vmem:[#allocation192_spill] sm:$0xff] }
 0x4d8   :  { %v7331_v4 = vmul.f32 %v14474_v44, %v16848_v11  ;;  %v16854_v11 = vld [vmem:[#allocation19_spill] sm:$0xff] }
 0x4da   :  { %11236 = vmatmul.mubr.msk.f32.gmra.mrb[14].mxu1 %vm5794_vm2, %v7326_v10  ;;  %v16849_v10 = vld [vmem:[#allocation191_spill] sm:$0xff] }
 0x4db   :  { %11238 = vmatprep.mubr.msk.f32.mxu1 %vm5794_vm2, %v7327_v3  ;;  %v7332_v25 = vmul.f32 %v14472_v46, %v16849_v10  ;;  %v16850_v3 = vld [vmem:[#allocation196_spill] sm:$0xff] }
 0x4dc   :  { %v7333_v1 = vmul.f32 %v14486_v20, %v16850_v3  ;;  %v16855_v10 = vld [vmem:[#allocation204_spill] sm:$0xff]  ;;  %v16860_v20 = vld [vmem:[#allocation25_spill] sm:$0xff] }
 0x4dd   :  { %v16856_v46 = vld [vmem:[#allocation20_spill] sm:$0xff] }
 0x4de   :  { %11239 = vmatmul.mubr.msk.f32.gmra.mrb[16].mxu1 %vm5794_vm2, %v7328_v49  ;;  %v16851_v49 = vld [vmem:[#allocation195_spill] sm:$0xff]  ;;  %v7337_v3 = vmul.f32 %v16856_v46, %v16855_v10 }
 0x4df   :  { %11241 = vmatprep.mubr.msk.f32.mxu1 %vm5794_vm2, %v7329_v9  ;;  %v7334_v16 = vmul.f32 %v14484_v40, %v16851_v49  ;;  %v16852_v9 = vld [vmem:[#allocation200_spill] sm:$0xff] }
 0x4e0   :  { %v7335_v39 = vmul.f32 %v14498_v36, %v16852_v9  ;;  %v16859_v40 = vld [vmem:[#allocation208_spill] sm:$0xff]  ;;  %v16864_v36 = vld [vmem:[#allocation26_spill] sm:$0xff] }
 0x4e1   :  { %v7339_v9 = vmul.f32 %v16860_v20, %v16859_v40  ;;  %v8511_v20 = vld [vmem:[#allocation7 + $0x70] sm:$0xff] }
 0x4e2   :  { %11242 = vmatmul.mubr.msk.f32.gmra.mrb[18].mxu1 %vm5794_vm2, %v7330_v27  ;;  %v16853_v27 = vld [vmem:[#allocation199_spill] sm:$0xff] }
 0x4e3   :  { %11244 = vmatprep.mubr.msk.f32.mxu1 %vm5794_vm2, %v7331_v4  ;;  %v7336_v4 = vmul.f32 %v16854_v11, %v16853_v27  ;;  %v16863_v11 = vld [vmem:[#allocation212_spill] sm:$0xff] }
 0x4e4   :  { %v7341_v10 = vmul.f32 %v16864_v36, %v16863_v11  ;;  %v16870_v36 = vld [vmem:[#allocation51_spill] sm:$0xff] }
 0x4e6   :  { %11245 = vmatmul.mubr.msk.f32.gmra.mrb[20].mxu1 %vm5794_vm2, %v7332_v25  ;;  %v16857_v25 = vld [vmem:[#allocation203_spill] sm:$0xff] }
 0x4e7   :  { %11247 = vmatprep.mubr.msk.f32.mxu1 %vm5794_vm2, %v7333_v1  ;;  %v16858_v1 = vld [vmem:[#allocation21_spill] sm:$0xff] }
 0x4e8   :  { %v7338_v49 = vmul.f32 %v16858_v1, %v16857_v25  ;;  %v16867_v1 = vld [vmem:[#allocation215_spill] sm:$0xff] }
 0x4e9   :  { %v7701_v40 = vmul.f32 %v14817_v13, %v16867_v1  ;;  %v16871_v13 = vld [vmem:[#allocation216_spill] sm:$0xff]  ;;  %v16872_v1 = vld [vmem:[#allocation50_spill] sm:$0xff] }
 0x4ea   :  { %11248 = vmatmul.mubr.msk.f32.gmra.mrb[22].mxu1 %vm5794_vm2, %v7334_v16  ;;  %v16861_v16 = vld [vmem:[#allocation207_spill] sm:$0xff] }
 0x4eb   :  { %11250 = vmatprep.mubr.msk.f32.mxu1 %vm5794_vm2, %v7335_v39  ;;  %v16862_v39 = vld [vmem:[#allocation22_spill] sm:$0xff] }
 0x4ec   :  { %v7340_v27 = vmul.f32 %v16862_v39, %v16861_v16 }
 0x4ee   :  { %11251 = vmatmul.mubr.msk.f32.gmra.mrb[24].mxu1 %vm5794_vm2, %v7336_v4  ;;  %v16865_v4 = vld [vmem:[#allocation211_spill] sm:$0xff] }
 0x4ef   :  { %11253 = vmatprep.mubr.msk.f32.mxu1 %vm5794_vm2, %v7337_v3  ;;  %v16866_v3 = vld [vmem:[#allocation30_spill] sm:$0xff] }
 0x4f0   :  { %v7342_v25 = vmul.f32 %v16866_v3, %v16865_v4  ;;  %v7704_v4 = vmul.f32 %v16872_v1, %v16871_v13  ;;  %v16880_v13 = vld [vmem:[#allocation54_spill] sm:$0xff] }
 0x4f2   :  { %11254 = vmatmul.mubr.msk.f32.gmra.mrb[26].mxu1 %vm5794_vm2, %v7338_v49  ;;  %v8512_v49 = vld [vmem:[#allocation7 + $0x78] sm:$0xff] }
 0x4f3   :  { %11256 = vmatprep.mubr.msk.f32.mxu1 %vm5794_vm2, %v7339_v9  ;;  %v16868_v9 = vld [vmem:[#allocation214_spill] sm:$0xff]  ;;  %v15216_v11 = vpack.c.bf16 %v8512_v49, %v8511_v20  ;;  %v16876_v49 = vld [vmem:[#allocation52_spill] sm:$0xff] }
 0x4f4   :  { %v7702_v16 = vmul.f32 %v14824_v30, %v16868_v9  ;;  %v16875_v20 = vld [vmem:[#allocation218_spill] sm:$0xff]  ;;  %v16882_v30 = vld [vmem:[#allocation57_spill] sm:$0xff] }
 0x4f5   :  { %v7706_v9 = vmul.f32 %v16876_v49, %v16875_v20  ;;  %v16885_v49 = vld [vmem:[#allocation225_spill] sm:$0xff] }
 0x4f6   :  { %11257 = vmatmul.mubr.msk.f32.gmra.mrb[28].mxu1 %vm5794_vm2, %v7340_v27  ;;  %v16869_v27 = vld [vmem:[#allocation217_spill] sm:$0xff] }
 0x4f7   :  { %11259 = vmatprep.mubr.msk.f32.mxu1 %vm5794_vm2, %v7341_v10  ;;  %v7703_v10 = vmul.f32 %v16870_v36, %v16869_v27  ;;  %v16878_v27 = vld [vmem:[#allocation55_spill] sm:$0xff] }
 0x4f8   :  { %v16881_v36 = vld [vmem:[#allocation223_spill] sm:$0xff] }
 0x4fa   :  { %11260 = vmatmul.mubr.msk.f32.gmra.mrb[30].mxu1 %vm5794_vm2, %v7342_v25  ;;  %v16873_v25 = vld [vmem:[#allocation219_spill] sm:$0xff] }
 0x4fb   :  { %11266 = vmatprep.mubr.msk.f32.mxu1 %vm5794_vm2, %v7701_v40  ;;  %v16874_v40 = vld [vmem:[#allocation53_spill] sm:$0xff] }
 0x4fc   :  { %v7705_v39 = vmul.f32 %v16874_v40, %v16873_v25  ;;  %v7709_v25 = vmul.f32 %v16882_v30, %v16881_v36  ;;  %v16886_v40 = vld [vmem:[#allocation61_spill] sm:$0xff] }
 0x4fd   :  { %v16894_v30 = vld [vmem:[#allocation69_spill] sm:$0xff] }
 0x4fe   :  { %11267 = vmatmul.mubr.msk.f32.vlgmr.msra.gmra.mrb[0].mxu1 %vm5794_vm2, %v7702_v16  ;;  %v16877_v16 = vld [vmem:[#allocation221_spill] sm:$0xff] }
 0x4ff   :  { %11497 = vmatpush3.bf16.msra.mxu1 %v15116_v45  ;;  %11269 = vmatprep.mubr.msk.f32.mxu1 %vm5794_vm2, %v7703_v10  ;;  %v7707_v45 = vmul.f32 %v16878_v27, %v16877_v16  ;;  %v16879_v10 = vld [vmem:[#allocation220_spill] sm:$0xff]  ;;  %v7711_v16 = vmul.f32 %v16886_v40, %v16885_v49  ;;  %v16890_v27 = vld [vmem:[#allocation65_spill] sm:$0xff] }
 0x500   :  { %11499 = vmatprep.subr.bf16.mxu1 %v15216_v11  ;;  %v7708_v1 = vmul.f32 %v16880_v13, %v16879_v10  ;;  %v16889_v13 = vld [vmem:[#allocation227_spill] sm:$0xff]  ;;  %v16898_v40 = vld [vmem:[#allocation73_spill] sm:$0xff] }
 0x501   :  { %v7713_v36 = vmul.f32 %v16890_v27, %v16889_v13  ;;  %v16902_v27 = vld [vmem:[#allocation77_spill] sm:$0xff] }
 0x502   :  { %11270 = vmatmul.mubr.msk.f32.gmra.mrb[2].mxu1 %vm5794_vm2, %v7704_v4  ;;  %v16884_v4 = vld [vmem:[#allocation56_spill] sm:$0xff] }
 0x503   :  { %11272 = vmatprep.mubr.msk.f32.mxu1 %vm5794_vm2, %v7705_v39  ;;  %v16883_v39 = vld [vmem:[#allocation222_spill] sm:$0xff] }
 0x504   :  { %v7710_v20 = vmul.f32 %v16884_v4, %v16883_v39  ;;  %v16893_v4 = vld [vmem:[#allocation229_spill] sm:$0xff] }
 0x505   :  { %v7715_v49 = vmul.f32 %v16894_v30, %v16893_v4 }
 0x506   :  { %11273 = vmatmul.mubr.msk.f32.gmra.mrb[4].mxu1 %vm5794_vm2, %v7706_v9  ;;  %v16887_v9 = vld [vmem:[#allocation224_spill] sm:$0xff] }
 0x507   :  { %11275 = vmatprep.mubr.msk.f32.mxu1 %vm5794_vm2, %v7707_v45  ;;  %v16888_v45 = vld [vmem:[#allocation60_spill] sm:$0xff] }
 0x508   :  { %v7712_v10 = vmul.f32 %v16888_v45, %v16887_v9  ;;  %v16897_v45 = vld [vmem:[#allocation231_spill] sm:$0xff] }
 0x509   :  { %v7717_v13 = vmul.f32 %v16898_v40, %v16897_v45 }
 0x50a   :  { %11276 = vmatmul.mubr.msk.f32.gmra.mrb[6].mxu1 %vm5794_vm2, %v7708_v1  ;;  %v16891_v1 = vld [vmem:[#allocation226_spill] sm:$0xff] }
 0x50b   :  { %11278 = vmatprep.mubr.msk.f32.mxu1 %vm5794_vm2, %v7709_v25  ;;  %v16892_v25 = vld [vmem:[#allocation64_spill] sm:$0xff] }
 0x50c   :  { %v7714_v39 = vmul.f32 %v16892_v25, %v16891_v1  ;;  %v16901_v25 = vld [vmem:[#allocation233_spill] sm:$0xff] }
 0x50d   :  { %v7719_v4 = vmul.f32 %v16902_v27, %v16901_v25 }
 0x50e   :  { %11279 = vmatmul.mubr.msk.f32.gmra.mrb[8].mxu1 %vm5794_vm2, %v7710_v20  ;;  %v16895_v20 = vld [vmem:[#allocation228_spill] sm:$0xff] }
 0x50f   :  { %11281 = vmatprep.mubr.msk.f32.mxu1 %vm5794_vm2, %v7711_v16  ;;  %v16896_v16 = vld [vmem:[#allocation68_spill] sm:$0xff] }
 0x510   :  { %v7716_v9 = vmul.f32 %v16896_v16, %v16895_v20  ;;  %v16904_v20 = vld [vmem:[#allocation235_spill] sm:$0xff] }
 0x511   :  { %v7721_v45 = vmul.f32 %v14963_v8, %v16904_v20 }
 0x512   :  { %11282 = vmatmul.mubr.msk.f32.gmra.mrb[10].mxu1 %vm5794_vm2, %v7712_v10  ;;  %v16899_v10 = vld [vmem:[#allocation230_spill] sm:$0xff] }
 0x513   :  { %11284 = vmatprep.mubr.msk.f32.mxu1 %vm5794_vm2, %v7713_v36  ;;  %v16900_v36 = vld [vmem:[#allocation72_spill] sm:$0xff] }
 0x514   :  { %v7718_v1 = vmul.f32 %v16900_v36, %v16899_v10  ;;  %v16907_v36 = vld [vmem:[#allocation237_spill] sm:$0xff] }
 0x515   :  { %v7723_v25 = vmul.f32 %v14975_v43, %v16907_v36 }
 0x516   :  { %11285 = vmatmul.mubr.msk.f32.gmra.mrb[12].mxu1 %vm5794_vm2, %v7714_v39  ;;  %v16903_v39 = vld [vmem:[#allocation232_spill] sm:$0xff] }
 0x517   :  { %11287 = vmatprep.mubr.msk.f32.mxu1 %vm5794_vm2, %v7715_v49  ;;  %v7720_v49 = vmul.f32 %v14954_v41, %v16903_v39  ;;  %v16909_v39 = vld [vmem:[#allocation239_spill] sm:$0xff] }
 0x518   :  { %v7725_v20 = vmul.f32 %v14610_v12, %v16909_v39 }
 0x51a   :  { %11288 = vmatmul.mubr.msk.f32.gmra.mrb[14].mxu1 %vm5794_vm2, %v7716_v9  ;;  %v16905_v9 = vld [vmem:[#allocation234_spill] sm:$0xff] }
 0x51b   :  { %11290 = vmatprep.mubr.msk.f32.mxu1 %vm5794_vm2, %v7717_v13  ;;  %v16906_v13 = vld [vmem:[#allocation76_spill] sm:$0xff] }
 0x51c   :  { %v7722_v10 = vmul.f32 %v16906_v13, %v16905_v9  ;;  %v16911_v9 = vld [vmem:[#allocation241_spill] sm:$0xff] }
 0x51d   :  { %v7727_v36 = vmul.f32 %v14621_v21, %v16911_v9 }
 0x51e   :  { %11291 = vmatmul.mubr.msk.f32.gmra.mrb[16].mxu1 %vm5794_vm2, %v7718_v1  ;;  %v16908_v1 = vld [vmem:[#allocation236_spill] sm:$0xff] }
 0x51f   :  { %11293 = vmatprep.mubr.msk.f32.mxu1 %vm5794_vm2, %v7719_v4  ;;  %v7724_v4 = vmul.f32 %v14981_v42, %v16908_v1  ;;  %v16913_v1 = vld [vmem:[#allocation243_spill] sm:$0xff] }
 0x520   :  { %v7729_v39 = vmul.f32 %v14627_v5, %v16913_v1  ;;  %v16918_v1 = vld [vmem:[#allocation247_spill] sm:$0xff] }
 0x521   :  { %v8897_v5 = vld [vmem:[#allocation7 + $0x80] sm:$0xff] }
 0x522   :  { %11294 = vmatmul.mubr.msk.f32.gmra.mrb[18].mxu1 %vm5794_vm2, %v7720_v49  ;;  %v16910_v49 = vld [vmem:[#allocation238_spill] sm:$0xff] }
 0x523   :  { %11296 = vmatprep.mubr.msk.f32.mxu1 %vm5794_vm2, %v7721_v45  ;;  %v7726_v45 = vmul.f32 %v14613_v31, %v16910_v49  ;;  %v16915_v49 = vld [vmem:[#allocation245_spill] sm:$0xff] }
 0x524   :  { %v7731_v9 = vmul.f32 %v14646_v63, %v16915_v49  ;;  %v16919_v49 = vld [vmem:[#allocation246_spill] sm:$0xff] }
 0x526   :  { %11297 = vmatmul.mubr.msk.f32.gmra.mrb[20].mxu1 %vm5794_vm2, %v7722_v10  ;;  %v16912_v10 = vld [vmem:[#allocation240_spill] sm:$0xff] }
 0x527   :  { %11299 = vmatprep.mubr.msk.f32.mxu1 %vm5794_vm2, %v7723_v25  ;;  %v7728_v25 = vmul.f32 %v14624_v33, %v16912_v10  ;;  %v16917_v10 = vld [vmem:[#allocation244_spill] sm:$0xff] }
 0x52a   :  { %11300 = vmatmul.mubr.msk.f32.gmra.mrb[22].mxu1 %vm5794_vm2, %v7724_v4  ;;  %v16914_v4 = vld [vmem:[#allocation242_spill] sm:$0xff] }
 0x52b   :  { %11302 = vmatprep.mubr.msk.f32.mxu1 %vm5794_vm2, %v7725_v20  ;;  %v7730_v20 = vmul.f32 %v14630_v24, %v16914_v4  ;;  %v8898_v4 = vld [vmem:[#allocation7 + $0x88] sm:$0xff] }
 0x52c   :  { %v15321_v63 = vpack.c.bf16 %v8898_v4, %v8897_v5  ;;  %v16924_v5 = vld [vmem:[#allocation253_spill] sm:$0xff]  ;;  %v16927_v4 = vld [vmem:[#allocation34_spill] sm:$0xff] }
 0x52e   :  { %11303 = vmatmul.mubr.msk.f32.gmra.mrb[24].mxu1 %vm5794_vm2, %v7726_v45  ;;  %v16916_v45 = vrot.slane %v16866_v3, 1 }
 0x52f   :  { %11305 = vmatprep.mubr.msk.f32.mxu1 %vm5794_vm2, %v7727_v36 }
 0x530   :  { %v15309_v36 = vsel %vm1347_vm4, %v16916_v45, 0.0  ;;  %v8092_v45 = vmul.f32 %v14590_v51, %v16919_v49  ;;  %v16923_v51 = vld [vmem:[#allocation250_spill] sm:$0xff] }
 0x532   :  { %11306 = vmatmul.mubr.msk.f32.gmra.mrb[26].mxu1 %vm5794_vm2, %v7728_v25  ;;  %v7732_v25 = vmul.f32 %v15309_v36, %v16917_v10 }
 0x533   :  { %11308 = vmatprep.mubr.msk.f32.mxu1 %vm5794_vm2, %v7729_v39  ;;  %v8091_v39 = vmul.f32 %v14572_v29, %v16918_v1  ;;  %v16921_v29 = vld [vmem:[#allocation248_spill] sm:$0xff] }
 0x534   :  { %v8094_v10 = vmul.f32 %v14636_v7, %v16921_v29  ;;  %v16926_v7 = vld [vmem:[#allocation252_spill] sm:$0xff]  ;;  %v16931_v29 = vld [vmem:[#allocation39_spill] sm:$0xff] }
 0x535   :  { %v8098_v49 = vmul.f32 %v16927_v4, %v16926_v7  ;;  %v16938_v4 = vld [vmem:[#allocation258_spill] sm:$0xff] }
 0x536   :  { %11309 = vmatmul.mubr.msk.f32.gmra.mrb[28].mxu1 %vm5794_vm2, %v7730_v20  ;;  %v16920_v20 = vld [vmem:[#allocation249_spill] sm:$0xff] }
 0x537   :  { %11311 = vmatprep.mubr.msk.f32.mxu1 %vm5794_vm2, %v7731_v9  ;;  %v8093_v9 = vmul.f32 %v14602_v55, %v16920_v20  ;;  %v8096_v55 = vmul.f32 %v14655_v23, %v16923_v51  ;;  %v16929_v20 = vld [vmem:[#allocation37_spill] sm:$0xff]  ;;  %v16934_v51 = vld [vmem:[#allocation256_spill] sm:$0xff] }
 0x53a   :  { %11312 = vmatmul.mubr.msk.f32.gmra.mrb[30].mxu1 %vm5794_vm2, %v7732_v25  ;;  %v16922_v25 = vld [vmem:[#allocation251_spill] sm:$0xff] }
 0x53b   :  { %11318 = vmatprep.mubr.msk.f32.mxu1 %vm5794_vm2, %v8091_v39  ;;  %v8095_v1 = vmul.f32 %v14641_v17, %v16922_v25  ;;  %v16925_v39 = vld [vmem:[#allocation35_spill] sm:$0xff]  ;;  %v16933_v25 = vld [vmem:[#allocation38_spill] sm:$0xff] }
 0x53e   :  { %11319 = vmatmul.mubr.msk.f32.vlgmr.msra.gmra.mrb[0].mxu1 %vm5794_vm2, %v8092_v45  ;;  %v16928_v45 = vld [vmem:[#allocation255_spill] sm:$0xff] }
 0x53f   :  { %11501 = vmatpush3.bf16.msra.mxu1 %v15216_v11  ;;  %11321 = vmatprep.mubr.msk.f32.mxu1 %vm5794_vm2, %v8093_v9  ;;  %v8097_v11 = vmul.f32 %v16925_v39, %v16924_v5  ;;  %v8099_v17 = vmul.f32 %v16929_v20, %v16928_v45  ;;  %v16930_v9 = vld [vmem:[#allocation254_spill] sm:$0xff]  ;;  %v16936_v39 = vld [vmem:[#allocation259_spill] sm:$0xff] }
 0x540   :  { %11503 = vmatprep.subr.bf16.mxu1 %v15321_v63  ;;  %v8100_v23 = vmul.f32 %v16931_v29, %v16930_v9  ;;  %v16939_v45 = vld [vmem:[#allocation59_spill] sm:$0xff]  ;;  %v16940_v20 = vld [vmem:[#allocation42_spill] sm:$0xff] }
 0x541   :  { %v16941_v9 = vld [vmem:[#allocation58_spill] sm:$0xff] }
 0x542   :  { %11322 = vmatmul.mubr.msk.f32.gmra.mrb[2].mxu1 %vm5794_vm2, %v8094_v10  ;;  %v16932_v10 = vld [vmem:[#allocation257_spill] sm:$0xff]  ;;  %v8106_v29 = vmul.f32 %v16801_v50, %v16941_v9  ;;  %v16954_v9 = vld [vmem:[#allocation78_spill] sm:$0xff] }
 0x543   :  { %11324 = vmatprep.mubr.msk.f32.mxu1 %vm5794_vm2, %v8095_v1  ;;  %v8101_v1 = vmul.f32 %v16933_v25, %v16932_v10  ;;  %v16943_v25 = vld [vmem:[#allocation62_spill] sm:$0xff] }
 0x546   :  { %11325 = vmatmul.mubr.msk.f32.gmra.mrb[4].mxu1 %vm5794_vm2, %v8096_v55  ;;  %v16935_v55 = vld [vmem:[#allocation41_spill] sm:$0xff] }
 0x547   :  { %11327 = vmatprep.mubr.msk.f32.mxu1 %vm5794_vm2, %v8097_v11  ;;  %v8102_v5 = vmul.f32 %v16935_v55, %v16934_v51  ;;  %v16937_v11 = vld [vmem:[#allocation40_spill] sm:$0xff]  ;;  %v16945_v51 = vld [vmem:[#allocation46_spill] sm:$0xff] }
 0x548   :  { %v8103_v7 = vmul.f32 %v16937_v11, %v16936_v39  ;;  %v16947_v39 = vld [vmem:[#allocation71_spill] sm:$0xff]  ;;  %v16948_v11 = vld [vmem:[#allocation70_spill] sm:$0xff] }
 0x54a   :  { %11328 = vmatmul.mubr.msk.f32.gmra.mrb[6].mxu1 %vm5794_vm2, %v8098_v49  ;;  %v8104_v49 = vmul.f32 %v16797_v57, %v16938_v4  ;;  %v8108_v57 = vmul.f32 %v16805_v58, %v16943_v25  ;;  %v8112_v58 = vmul.f32 %v14774_v53, %v16948_v11  ;;  %v16950_v4 = vld [vmem:[#allocation49_spill] sm:$0xff]  ;;  %v16964_v11 = vld [vmem:[#allocation263_spill] sm:$0xff] }
 0x54b   :  { %11330 = vmatprep.mubr.msk.f32.mxu1 %vm5794_vm2, %v8099_v17  ;;  %v8105_v17 = vmul.f32 %v16940_v20, %v16939_v45  ;;  %v16951_v45 = vld [vmem:[#allocation74_spill] sm:$0xff]  ;;  %v16952_v20 = vld [vmem:[#allocation261_spill] sm:$0xff] }
 0x54e   :  { %11331 = vmatmul.mubr.msk.f32.gmra.mrb[8].mxu1 %vm5794_vm2, %v8100_v23  ;;  %v16942_v23 = vld [vmem:[#allocation63_spill] sm:$0xff] }
 0x54f   :  { %11333 = vmatprep.mubr.msk.f32.mxu1 %vm5794_vm2, %v8101_v1  ;;  %v8107_v10 = vmul.f32 %v16803_v22, %v16942_v23  ;;  %v16944_v1 = vld [vmem:[#allocation67_spill] sm:$0xff]  ;;  %v8111_v22 = vmul.f32 %v14766_v38, %v16947_v39  ;;  %v16956_v23 = vld [vmem:[#allocation262_spill] sm:$0xff] }
 0x550   :  { %v8109_v55 = vmul.f32 %v16945_v51, %v16944_v1  ;;  %v16959_v1 = vld [vmem:[#allocation29_spill] sm:$0xff]  ;;  %v16960_v51 = vld [vmem:[#allocation87_spill] sm:$0xff] }
 0x551   :  { %v16963_v39 = vld [vmem:[#allocation31_spill] sm:$0xff] }
 0x552   :  { %11334 = vmatmul.mubr.msk.f32.gmra.mrb[10].mxu1 %vm5794_vm2, %v8102_v5  ;;  %v16946_v5 = vld [vmem:[#allocation66_spill] sm:$0xff] }
 0x553   :  { %11336 = vmatprep.mubr.msk.f32.mxu1 %vm5794_vm2, %v8103_v7  ;;  %v8110_v50 = vmul.f32 %v14761_v52, %v16946_v5  ;;  %v16949_v7 = vld [vmem:[#allocation260_spill] sm:$0xff]  ;;  %v8114_v52 = vmul.f32 %v14788_v32, %v16951_v45 }
 0x556   :  { %11337 = vmatmul.mubr.msk.f32.gmra.mrb[12].mxu1 %vm5794_vm2, %v8104_v49  ;;  %v8113_v49 = vmul.f32 %v16950_v4, %v16949_v7  ;;  %v16965_v7 = vrot.slane %v16866_v3, 7 }
 0x557   :  { %11339 = vmatprep.mubr.msk.f32.mxu1 %vm5794_vm2, %v8105_v17  ;;  %v16953_v17 = vld [vmem:[#allocation23_spill] sm:$0xff] }
 0x558   :  { %v8115_v38 = vmul.f32 %v16953_v17, %v16952_v20  ;;  %v8090_v4 = vsel %vm150_vm3, %v16965_v7, 0.0  ;;  %v16968_v17 = vld [vmem:[#allocation264_spill] sm:$0xff]  ;;  %v16986_v7 = vld [vmem:[#allocation186_spill] sm:$0xff] }
 0x55a   :  { %11340 = vmatmul.mubr.msk.f32.gmra.mrb[14].mxu1 %vm5794_vm2, %v8106_v29  ;;  %v16955_v29 = vld [vmem:[#allocation24_spill] sm:$0xff] }
 0x55b   :  { %11342 = vmatprep.mubr.msk.f32.mxu1 %vm5794_vm2, %v8107_v10  ;;  %v8116_v53 = vmul.f32 %v16955_v29, %v16954_v9  ;;  %v16957_v10 = vld [vmem:[#allocation27_spill] sm:$0xff]  ;;  %v16970_v29 = vld [vmem:[#allocation266_spill] sm:$0xff] }
 0x55c   :  { %v8117_v25 = vmul.f32 %v16957_v10, %v16956_v23 }
 0x55e   :  { %11343 = vmatmul.mubr.msk.f32.gmra.mrb[16].mxu1 %vm5794_vm2, %v8108_v57  ;;  %v16958_v57 = vld [vmem:[#allocation82_spill] sm:$0xff] }
 0x55f   :  { %11345 = vmatprep.mubr.msk.f32.mxu1 %vm5794_vm2, %v8109_v55  ;;  %v8118_v32 = vmul.f32 %v16959_v1, %v16958_v57  ;;  %v16961_v55 = vld [vmem:[#allocation28_spill] sm:$0xff]  ;;  %v16975_v57 = vld [vmem:[#allocation169_spill] sm:$0xff]  ;;  %v16976_v1 = vld [vmem:[#allocation166_spill] sm:$0xff] }
 0x560   :  { %v8119_v5 = vmul.f32 %v16961_v55, %v16960_v51  ;;  %v16978_v51 = vld [vmem:[#allocation170_spill] sm:$0xff]  ;;  %v16979_v55 = vld [vmem:[#allocation177_spill] sm:$0xff] }
 0x562   :  { %11346 = vmatmul.mubr.msk.f32.gmra.mrb[18].mxu1 %vm5794_vm2, %v8110_v50  ;;  %v16962_v50 = vld [vmem:[#allocation86_spill] sm:$0xff] }
 0x563   :  { %11348 = vmatprep.mubr.msk.f32.mxu1 %vm5794_vm2, %v8111_v22  ;;  %v8120_v22 = vmul.f32 %v16963_v39, %v16962_v50  ;;  %v16981_v50 = vld [vmem:[#allocation181_spill] sm:$0xff]  ;;  %v16982_v39 = vld [vmem:[#allocation178_spill] sm:$0xff] }
 0x566   :  { %11349 = vmatmul.mubr.msk.f32.gmra.mrb[20].mxu1 %vm5794_vm2, %v8112_v58  ;;  %v8121_v58 = vmul.f32 %v16823_v47, %v16964_v11  ;;  %v8480_v47 = vmul.f32 %v16829_v6, %v16968_v17  ;;  %v16972_v6 = vld [vmem:[#allocation158_spill] sm:$0xff]  ;;  %v16992_v17 = vld [vmem:[#allocation17_spill] sm:$0xff] }
 0x567   :  { %11351 = vmatprep.mubr.msk.f32.mxu1 %vm5794_vm2, %v8113_v49  ;;  %v16966_v49 = vld [vmem:[#allocation90_spill] sm:$0xff]  ;;  %v8484_v10 = vmul.f32 %v14390_v0, %v16972_v6  ;;  %v8488_v0 = vmul.f32 %v14414_v34, %v16976_v1  ;;  %v16998_v6 = vld [vmem:[#allocation205_spill] sm:$0xff] }
 0x568   :  { %v8122_v45 = vmul.f32 %v8090_v4, %v16966_v49  ;;  %v16984_v11 = vld [vmem:[#allocation182_spill] sm:$0xff]  ;;  %v16987_v4 = vld [vmem:[#allocation193_spill] sm:$0xff] }
 0x569   :  { %v16988_v49 = vld [vmem:[#allocation14_spill] sm:$0xff] }
 0x56a   :  { %11352 = vmatmul.mubr.msk.f32.gmra.mrb[22].mxu1 %vm5794_vm2, %v8114_v52  ;;  %v16967_v52 = vld [vmem:[#allocation265_spill] sm:$0xff] }
 0x56b   :  { %11354 = vmatprep.mubr.msk.f32.mxu1 %vm5794_vm2, %v8115_v38  ;;  %v8479_v20 = vmul.f32 %v16827_v59, %v16967_v52  ;;  %v16969_v38 = vld [vmem:[#allocation267_spill] sm:$0xff]  ;;  %v16971_v59 = vld [vmem:[#allocation161_spill] sm:$0xff]  ;;  %v16990_v52 = vld [vmem:[#allocation16_spill] sm:$0xff] }
 0x56c   :  { %v8481_v9 = vmul.f32 %v16831_v37, %v16969_v38  ;;  %v8483_v23 = vmul.f32 %v14376_v26, %v16971_v59  ;;  %v16973_v37 = vld [vmem:[#allocation165_spill] sm:$0xff]  ;;  %v8487_v26 = vmul.f32 %v14400_v60, %v16975_v57  ;;  %v8491_v60 = vmul.f32 %v14424_v54, %v16979_v55  ;;  %v16994_v38 = vld [vmem:[#allocation18_spill] sm:$0xff]  ;;  %v17008_v55 = vld [vmem:[#allocation48_spill] sm:$0xff] }
 0x56d   :  { %v16997_v59 = vld [vmem:[#allocation198_spill] sm:$0xff]  ;;  %v17002_v57 = vld [vmem:[#allocation209_spill] sm:$0xff] }
 0x56e   :  { %11355 = vmatmul.mubr.msk.f32.gmra.mrb[24].mxu1 %vm5794_vm2, %v8116_v53  ;;  %v8482_v53 = vmul.f32 %v14380_v28, %v16970_v29  ;;  %v16996_v29 = vld [vmem:[#allocation19_spill] sm:$0xff] }
 0x56f   :  { %11357 = vmatprep.mubr.msk.f32.mxu1 %vm5794_vm2, %v8117_v25  ;;  %v8485_v25 = vmul.f32 %v14388_v62, %v16973_v37 }
 0x572   :  { %11358 = vmatmul.mubr.msk.f32.gmra.mrb[26].mxu1 %vm5794_vm2, %v8118_v32  ;;  %v16977_v32 = vld [vmem:[#allocation173_spill] sm:$0xff] }
 0x573   :  { %11360 = vmatprep.mubr.msk.f32.mxu1 %vm5794_vm2, %v8119_v5  ;;  %v8489_v62 = vmul.f32 %v14412_v14, %v16977_v32  ;;  %v16980_v5 = vld [vmem:[#allocation174_spill] sm:$0xff]  ;;  %v8493_v14 = vmul.f32 %v14436_v56, %v16981_v50  ;;  %v17011_v50 = vld [vmem:[#allocation51_spill] sm:$0xff] }
 0x574   :  { %v8492_v34 = vmul.f32 %v14438_v2, %v16980_v5  ;;  %v8496_v2 = vmul.f32 %v14462_v61, %v16984_v11  ;;  %v17005_v32 = vld [vmem:[#allocation26_spill] sm:$0xff]  ;;  %v17009_v5 = vld [vmem:[#allocation269_spill] sm:$0xff] }
 0x576   :  { %11361 = vmatmul.mubr.msk.f32.gmra.mrb[28].mxu1 %vm5794_vm2, %v8120_v22  ;;  %v16983_v22 = vld [vmem:[#allocation185_spill] sm:$0xff] }
 0x577   :  { %11363 = vmatprep.mubr.msk.f32.mxu1 %vm5794_vm2, %v8121_v58  ;;  %v8495_v54 = vmul.f32 %v14448_v48, %v16983_v22  ;;  %v16985_v58 = vld [vmem:[#allocation189_spill] sm:$0xff]  ;;  %v8499_v48 = vmul.f32 %v16988_v49, %v16987_v4  ;;  %v17020_v49 = vld [vmem:[#allocation275_spill] sm:$0xff] }
 0x578   :  { %v8497_v56 = vmul.f32 %v14460_v18, %v16985_v58  ;;  %v17017_v58 = vld [vmem:[#allocation52_spill] sm:$0xff] }
 0x57a   :  { %11364 = vmatmul.mubr.msk.f32.gmra.mrb[30].mxu1 %vm5794_vm2, %v8122_v45  ;;  %v16989_v45 = vld [vmem:[#allocation190_spill] sm:$0xff] }
 0x57b   :  { %11370 = vmatprep.mubr.msk.f32.mxu1 %vm5794_vm2, %v8479_v20  ;;  %v8500_v61 = vmul.f32 %v16990_v52, %v16989_v45  ;;  %v16991_v20 = vld [vmem:[#allocation197_spill] sm:$0xff]  ;;  %v17022_v52 = vld [vmem:[#allocation274_spill] sm:$0xff] }
 0x57c   :  { %v8501_v18 = vmul.f32 %v16992_v17, %v16991_v20  ;;  %v17024_v17 = vld [vmem:[#allocation277_spill] sm:$0xff] }
 0x57e   :  { %11371 = vmatmul.mubr.msk.f32.vlgmr.msra.gmra.mrb[0].mxu1 %vm5794_vm2, %v8480_v47  ;;  %v16993_v47 = vld [vmem:[#allocation194_spill] sm:$0xff] }
 0x57f   :  { %11505 = vmatpush3.bf16.msra.mxu1 %v15321_v63  ;;  %11373 = vmatprep.mubr.msk.f32.mxu1 %vm5794_vm2, %v8481_v9  ;;  %v16974_v63 = vld [vmem:[#allocation162_spill] sm:$0xff]  ;;  %v16995_v9 = vld [vmem:[#allocation201_spill] sm:$0xff] }
 0x580   :  { %v8486_v28 = vmul.f32 %v14402_v15, %v16974_v63  ;;  %v8490_v15 = vmul.f32 %v14426_v35, %v16978_v51  ;;  %v8494_v35 = vmul.f32 %v14450_v19, %v16982_v39  ;;  %v8498_v19 = vmul.f32 %v14474_v44, %v16986_v7  ;;  %v17001_v63 = vld [vmem:[#allocation25_spill] sm:$0xff]  ;;  %v17012_v39 = vld [vmem:[#allocation271_spill] sm:$0xff]  ;;  %v17018_v7 = vld [vmem:[#allocation272_spill] sm:$0xff] }
 0x581   :  { %v8502_v44 = vmul.f32 %v16994_v38, %v16993_v47  ;;  %v17026_v38 = vld [vmem:[#allocation276_spill] sm:$0xff] }
 0x582   :  { %11374 = vmatmul.mubr.msk.f32.gmra.mrb[2].mxu1 %vm5794_vm2, %v8482_v53  ;;  %v8503_v53 = vmul.f32 %v16996_v29, %v16995_v9  ;;  %v17028_v29 = vld [vmem:[#allocation279_spill] sm:$0xff] }
 0x583   :  { %11376 = vmatprep.mubr.msk.f32.mxu1 %vm5794_vm2, %v8483_v23  ;;  %v8504_v23 = vmul.f32 %v16856_v46, %v16997_v59 }
 0x586   :  { %11377 = vmatmul.mubr.msk.f32.gmra.mrb[4].mxu1 %vm5794_vm2, %v8484_v10  ;;  %v16999_v10 = vld [vmem:[#allocation21_spill] sm:$0xff] }
 0x587   :  { %11379 = vmatprep.mubr.msk.f32.mxu1 %vm5794_vm2, %v8485_v25  ;;  %v8505_v37 = vmul.f32 %v16999_v10, %v16998_v6  ;;  %v17000_v25 = vld [vmem:[#allocation202_spill] sm:$0xff]  ;;  %v17031_v6 = vld [vmem:[#allocation65_spill] sm:$0xff] }
 0x58a   :  { %11380 = vmatmul.mubr.msk.f32.gmra.mrb[6].mxu1 %vm5794_vm2, %v8486_v28  ;;  %v8506_v28 = vmul.f32 %v17001_v63, %v17000_v25  ;;  %v17033_v25 = vld [vmem:[#allocation64_spill] sm:$0xff] }
 0x58b   :  { %11382 = vmatprep.mubr.msk.f32.mxu1 %vm5794_vm2, %v8487_v26  ;;  %v17003_v26 = vld [vmem:[#allocation22_spill] sm:$0xff] }
 0x58c   :  { %v8507_v1 = vmul.f32 %v17003_v26, %v17002_v57  ;;  %v17035_v26 = vld [vmem:[#allocation283_spill] sm:$0xff] }
 0x58e   :  { %11383 = vmatmul.mubr.msk.f32.gmra.mrb[8].mxu1 %vm5794_vm2, %v8488_v0  ;;  %v17004_v0 = vld [vmem:[#allocation206_spill] sm:$0xff] }
 0x58f   :  { %11385 = vmatprep.mubr.msk.f32.mxu1 %vm5794_vm2, %v8489_v62  ;;  %v8508_v46 = vmul.f32 %v17005_v32, %v17004_v0  ;;  %v17006_v62 = vld [vmem:[#allocation210_spill] sm:$0xff] }
 0x590   :  { %v8509_v51 = vmul.f32 %v16866_v3, %v17006_v62  ;;  %v17014_v3 = vld [vmem:[#allocation270_spill] sm:$0xff]  ;;  %v17038_v62 = vld [vmem:[#allocation72_spill] sm:$0xff] }
 0x591   :  { %v17036_v0 = vld [vmem:[#allocation282_spill] sm:$0xff] }
 0x592   :  { %11386 = vmatmul.mubr.msk.f32.gmra.mrb[10].mxu1 %vm5794_vm2, %v8490_v15  ;;  %v17007_v15 = vld [vmem:[#allocation268_spill] sm:$0xff]  ;;  %v8880_v32 = vmul.f32 %v16898_v40, %v17036_v0 }
 0x593   :  { %11388 = vmatprep.mubr.msk.f32.mxu1 %vm5794_vm2, %v8491_v60  ;;  %v8865_v60 = vmul.f32 %v17008_v55, %v17007_v15  ;;  %v17039_v15 = vld [vmem:[#allocation284_spill] sm:$0xff]  ;;  %v17040_v55 = vld [vmem:[#allocation287_spill] sm:$0xff] }
 0x596   :  { %11389 = vmatmul.mubr.msk.f32.gmra.mrb[12].mxu1 %vm5794_vm2, %v8492_v34  ;;  %v17010_v34 = vld [vmem:[#allocation213_spill] sm:$0xff] }
 0x597   :  { %11391 = vmatprep.mubr.msk.f32.mxu1 %vm5794_vm2, %v8493_v14  ;;  %v8866_v14 = vmul.f32 %v17011_v50, %v17010_v34  ;;  %v17043_v50 = vld [vmem:[#allocation288_spill] sm:$0xff] }
 0x59a   :  { %11392 = vmatmul.mubr.msk.f32.gmra.mrb[14].mxu1 %vm5794_vm2, %v8494_v35  ;;  %v17013_v35 = vld [vmem:[#allocation50_spill] sm:$0xff] }
 0x59b   :  { %11394 = vmatprep.mubr.msk.f32.mxu1 %vm5794_vm2, %v8495_v54  ;;  %v8867_v22 = vmul.f32 %v17013_v35, %v17012_v39  ;;  %v17015_v54 = vld [vmem:[#allocation53_spill] sm:$0xff]  ;;  %v17045_v39 = vld [vmem:[#allocation290_spill] sm:$0xff] }
 0x59c   :  { %v8868_v11 = vmul.f32 %v17015_v54, %v17014_v3  ;;  %v17046_v35 = vld [vmem:[#allocation293_spill] sm:$0xff]  ;;  %v17048_v3 = vld [vmem:[#allocation295_spill] sm:$0xff]  ;;  %v17049_v54 = vld [vmem:[#allocation294_spill] sm:$0xff] }
 0x59e   :  { %11395 = vmatmul.mubr.msk.f32.gmra.mrb[16].mxu1 %vm5794_vm2, %v8496_v2  ;;  %v17016_v2 = vld [vmem:[#allocation273_spill] sm:$0xff] }
 0x59f   :  { %11397 = vmatprep.mubr.msk.f32.mxu1 %vm5794_vm2, %v8497_v56  ;;  %v8869_v56 = vmul.f32 %v17017_v58, %v17016_v2  ;;  %v17051_v2 = vld [vmem:[#allocation297_spill] sm:$0xff]  ;;  %v17052_v58 = vld [vmem:[#allocation296_spill] sm:$0xff] }
 0x5a2   :  { %11398 = vmatmul.mubr.msk.f32.gmra.mrb[18].mxu1 %vm5794_vm2, %v8498_v19  ;;  %v17019_v19 = vld [vmem:[#allocation55_spill] sm:$0xff] }
 0x5a3   :  { %11400 = vmatprep.mubr.msk.f32.mxu1 %vm5794_vm2, %v8499_v48  ;;  %v8870_v4 = vmul.f32 %v17019_v19, %v17018_v7  ;;  %v17021_v48 = vld [vmem:[#allocation54_spill] sm:$0xff]  ;;  %v17055_v19 = vld [vmem:[#allocation299_spill] sm:$0xff] }
 0x5a4   :  { %v8871_v45 = vmul.f32 %v17021_v48, %v17020_v49  ;;  %v17054_v7 = vld [vmem:[#allocation298_spill] sm:$0xff] }
 0x5a6   :  { %11401 = vmatmul.mubr.msk.f32.gmra.mrb[20].mxu1 %vm5794_vm2, %v8500_v61  ;;  %v17023_v61 = vld [vmem:[#allocation57_spill] sm:$0xff] }
 0x5a7   :  { %11403 = vmatprep.mubr.msk.f32.mxu1 %vm5794_vm2, %v8501_v18  ;;  %v8872_v20 = vmul.f32 %v17023_v61, %v17022_v52  ;;  %v17025_v18 = vld [vmem:[#allocation56_spill] sm:$0xff] }
 0x5a8   :  { %v8873_v47 = vmul.f32 %v17025_v18, %v17024_v17 }
 0x5aa   :  { %11404 = vmatmul.mubr.msk.f32.gmra.mrb[22].mxu1 %vm5794_vm2, %v8502_v44  ;;  %v17027_v44 = vld [vmem:[#allocation61_spill] sm:$0xff] }
 0x5ab   :  { %11406 = vmatprep.mubr.msk.f32.mxu1 %vm5794_vm2, %v8503_v53  ;;  %v8874_v9 = vmul.f32 %v17027_v44, %v17026_v38  ;;  %v17029_v53 = vld [vmem:[#allocation60_spill] sm:$0xff] }
 0x5ac   :  { %v8875_v59 = vmul.f32 %v17029_v53, %v17028_v29 }
 0x5ae   :  { %11407 = vmatmul.mubr.msk.f32.gmra.mrb[24].mxu1 %vm5794_vm2, %v8504_v23  ;;  %v17030_v23 = vld [vmem:[#allocation278_spill] sm:$0xff] }
 0x5af   :  { %11409 = vmatprep.mubr.msk.f32.mxu1 %vm5794_vm2, %v8505_v37  ;;  %v8876_v10 = vmul.f32 %v17031_v6, %v17030_v23  ;;  %v17032_v37 = vld [vmem:[#allocation281_spill] sm:$0xff] }
 0x5b0   :  { %v8877_v63 = vmul.f32 %v17033_v25, %v17032_v37 }
 0x5b2   :  { %11410 = vmatmul.mubr.msk.f32.gmra.mrb[26].mxu1 %vm5794_vm2, %v8506_v28  ;;  %v17034_v28 = vld [vmem:[#allocation280_spill] sm:$0xff] }
 0x5b3   :  { %11412 = vmatprep.mubr.msk.f32.mxu1 %vm5794_vm2, %v8507_v1  ;;  %v8878_v57 = vmul.f32 %v16894_v30, %v17034_v28  ;;  %v8879_v1 = vmul.f32 %v16896_v16, %v17035_v26  ;;  %v8882_v30 = vmul.f32 %v16902_v27, %v17039_v15  ;;  %v8883_v16 = vmul.f32 %v14954_v41, %v17040_v55 }
 0x5b4   :  { %v8886_v27 = vmul.f32 %v14975_v43, %v17043_v50 }
 0x5b6   :  { %11413 = vmatmul.mubr.msk.f32.gmra.mrb[28].mxu1 %vm5794_vm2, %v8508_v46  ;;  %v17037_v46 = vld [vmem:[#allocation285_spill] sm:$0xff] }
 0x5b7   :  { %11415 = vmatprep.mubr.msk.f32.mxu1 %vm5794_vm2, %v8509_v51  ;;  %v8881_v51 = vmul.f32 %v17038_v62, %v17037_v46 }
 0x5ba   :  { %11416 = vmatmul.mubr.msk.f32.gmra.mrb[30].mxu1 %vm5794_vm2, %v17009_v5  ;;  %v17042_v5 = vld [vmem:[#allocation289_spill] sm:$0xff] }
 0x5bb   :  { %11422 = vmatprep.mubr.msk.f32.mxu1 %vm5794_vm2, %v8865_v60  ;;  %v17041_v60 = vld [vmem:[#allocation286_spill] sm:$0xff]  ;;  %v8885_v34 = vmul.f32 %v16906_v13, %v17042_v5  ;;  %v8889_v13 = vmul.f32 %v14613_v31, %v17046_v35  ;;  %v8893_v31 = vmul.f32 %v14630_v24, %v17051_v2 }
 0x5bc   :  { %v8884_v40 = vmul.f32 %v14963_v8, %v17041_v60  ;;  %v8888_v8 = vmul.f32 %v14610_v12, %v17045_v39 }
 0x5be   :  { %11423 = vmatmul.mubr.msk.f32.vlgmr.msra.gmra.mrb[0].mxu1 %vm5794_vm2, %v8866_v14  ;;  %v17044_v14 = vld [vmem:[#allocation291_spill] sm:$0xff] }
 0x5bf   :  { %11425 = vmatprep.mubr.msk.f32.mxu1 %vm5794_vm2, %v8867_v22  ;;  %v8887_v41 = vmul.f32 %v14981_v42, %v17044_v14  ;;  %v17047_v22 = vld [vmem:[#allocation292_spill] sm:$0xff]  ;;  %v8891_v42 = vmul.f32 %v14624_v33, %v17048_v3  ;;  %v8895_v33 = vmul.f32 %v15309_v36, %v17054_v7 }
 0x5c0   :  { %v8890_v43 = vmul.f32 %v14621_v21, %v17047_v22 }
 0x5c2   :  { %11426 = vmatmul.mubr.msk.f32.gmra.mrb[2].mxu1 %vm5794_vm2, %v8868_v11  ;;  %v17050_v11 = vld [vmem:[#allocation33_spill] sm:$0xff] }
 0x5c3   :  { %11428 = vmatprep.mubr.msk.f32.mxu1 %vm5794_vm2, %v8869_v56  ;;  %v8892_v12 = vmul.f32 %v17050_v11, %v17049_v54  ;;  %v17053_v56 = vld [vmem:[#allocation32_spill] sm:$0xff] }
 0x5c4   :  { %v8894_v21 = vmul.f32 %v17053_v56, %v17052_v58 }
 0x5c6   :  { %11429 = vmatmul.mubr.msk.f32.gmra.mrb[4].mxu1 %vm5794_vm2, %v8870_v4  ;;  %v15609_v4 = vld [vmem:[#allocation9] ss:$0 sm:$0xff] }
 0x5c7   :  { %11431 = vmatprep.mubr.msk.f32.mxu1 %vm5794_vm2, %v8871_v45 }
 0x5ca   :  { %11432 = vmatmul.mubr.msk.f32.gmra.mrb[6].mxu1 %vm5794_vm2, %v8872_v20 }
 0x5cb   :  { %11434 = vmatprep.mubr.msk.f32.mxu1 %vm5794_vm2, %v8873_v47 }
 0x5ce   :  { %11435 = vmatmul.mubr.msk.f32.gmra.mrb[8].mxu1 %vm5794_vm2, %v8874_v9 }
 0x5cf   :  { %11437 = vmatprep.mubr.msk.f32.mxu1 %vm5794_vm2, %v8875_v59 }
 0x5d2   :  { %11438 = vmatmul.mubr.msk.f32.gmra.mrb[10].mxu1 %vm5794_vm2, %v8876_v10 }
 0x5d3   :  { %11440 = vmatprep.mubr.msk.f32.mxu1 %vm5794_vm2, %v8877_v63 }
 0x5d6   :  { %11441 = vmatmul.mubr.msk.f32.gmra.mrb[12].mxu1 %vm5794_vm2, %v8878_v57 }
 0x5d7   :  { %11443 = vmatprep.mubr.msk.f32.mxu1 %vm5794_vm2, %v8879_v1 }
 0x5da   :  { %11444 = vmatmul.mubr.msk.f32.gmra.mrb[14].mxu1 %vm5794_vm2, %v8880_v32 }
 0x5db   :  { %11446 = vmatprep.mubr.msk.f32.mxu1 %vm5794_vm2, %v8881_v51 }
 0x5de   :  { %11447 = vmatmul.mubr.msk.f32.gmra.mrb[16].mxu1 %vm5794_vm2, %v8882_v30 }
 0x5df   :  { %11449 = vmatprep.mubr.msk.f32.mxu1 %vm5794_vm2, %v8883_v16 }
 0x5e2   :  { %11450 = vmatmul.mubr.msk.f32.gmra.mrb[18].mxu1 %vm5794_vm2, %v8884_v40 }
 0x5e3   :  { %11452 = vmatprep.mubr.msk.f32.mxu1 %vm5794_vm2, %v8885_v34 }
 0x5e6   :  { %11453 = vmatmul.mubr.msk.f32.gmra.mrb[20].mxu1 %vm5794_vm2, %v8886_v27 }
 0x5e7   :  { %11455 = vmatprep.mubr.msk.f32.mxu1 %vm5794_vm2, %v8887_v41 }
 0x5ea   :  { %11456 = vmatmul.mubr.msk.f32.gmra.mrb[22].mxu1 %vm5794_vm2, %v8888_v8 }
 0x5eb   :  { %11458 = vmatprep.mubr.msk.f32.mxu1 %vm5794_vm2, %v8889_v13 }
 0x5ee   :  { %11459 = vmatmul.mubr.msk.f32.gmra.mrb[24].mxu1 %vm5794_vm2, %v8890_v43 }
 0x5ef   :  { %11461 = vmatprep.mubr.msk.f32.mxu1 %vm5794_vm2, %v8891_v42 }
 0x5f2   :  { %11462 = vmatmul.mubr.msk.f32.gmra.mrb[26].mxu1 %vm5794_vm2, %v8892_v12 }
 0x5f3   :  { %11464 = vmatprep.mubr.msk.f32.mxu1 %vm5794_vm2, %v8893_v31 }
 0x5f6   :  { %11465 = vmatmul.mubr.msk.f32.gmra.mrb[28].mxu1 %vm5794_vm2, %v8894_v21 }
 0x5f7   :  { %11467 = vmatprep.mubr.msk.f32.mxu1 %vm5794_vm2, %v8895_v33 }
 0x5fa   :  { %11468 = vmatmul.mubr.msk.f32.gmra.mrb[30].mxu1 %vm5794_vm2, %v17055_v19 }
 0x691   :  { %v11424_v24 = vpop.f32.mrb[0].mxu1 }
 0x692   :  { %v9259_v49 = vadd.f32 %v11424_v24, %v15609_v4  ;;  %v9060_v48 = vpop.f32.mrb[1].mxu1 }
 0x693   :  { %v9258_v45 = vadd.f32 %v15609_v4, %v9060_v48 }
 0x694   :  { %v9291_v52 = vmax.f32 %v9259_v49, 0.0 }
 0x695   :  { %v9290_v61 = vmax.f32 %v9258_v45, 0.0  ;;  %v11427_v20 = vpop.f32.mrb[2].mxu1 }
 0x696   :  { %9324 = vst.msk [vmem:[%s15777_s6 + $0x8] sm:$0xff] %vm9322_vm5, %v9291_v52  ;;  %v9261_v36 = vadd.f32 %v11427_v20, %v15609_v4  ;;  %v9070_v17 = vpop.f32.mrb[3].mxu1 }
 0x697   :  { %9323 = vst.msk [vmem:[%s15777_s6] sm:$0xff] %vm9322_vm5, %v9290_v61  ;;  %v9260_v18 = vadd.f32 %v15609_v4, %v9070_v17 }
 0x698   :  { %v9293_v47 = vmax.f32 %v9261_v36, 0.0 }
 0x699   :  { %v9292_v38 = vmax.f32 %v9260_v18, 0.0  ;;  %v11430_v44 = vpop.f32.mrb[4].mxu1 }
 0x69a   :  { %9326 = vst.msk [vmem:[%s15777_s6 + $0x18] sm:$0xff] %vm9322_vm5, %v9293_v47  ;;  %v9263_v9 = vadd.f32 %v11430_v44, %v15609_v4  ;;  %v9080_v29 = vpop.f32.mrb[5].mxu1 }
 0x69b   :  { %9325 = vst.msk [vmem:[%s15777_s6 + $0x10] sm:$0xff] %vm9322_vm5, %v9292_v38  ;;  %v9262_v53 = vadd.f32 %v15609_v4, %v9080_v29 }
 0x69c   :  { %v9295_v59 = vmax.f32 %v9263_v9, 0.0 }
 0x69d   :  { %v9294_v23 = vmax.f32 %v9262_v53, 0.0  ;;  %v11433_v6 = vpop.f32.mrb[6].mxu1 }
 0x69e   :  { %9328 = vst.msk [vmem:[%s15777_s6 + $0x28] sm:$0xff] %vm9322_vm5, %v9295_v59  ;;  %v9265_v10 = vadd.f32 %v11433_v6, %v15609_v4  ;;  %v9090_v37 = vpop.f32.mrb[7].mxu1 }
 0x69f   :  { %9327 = vst.msk [vmem:[%s15777_s6 + $0x20] sm:$0xff] %vm9322_vm5, %v9294_v23  ;;  %v9264_v25 = vadd.f32 %v15609_v4, %v9090_v37 }
 0x6a0   :  { %v9297_v63 = vmax.f32 %v9265_v10, 0.0 }
 0x6a1   :  { %v9296_v28 = vmax.f32 %v9264_v25, 0.0  ;;  %v11436_v57 = vpop.f32.mrb[8].mxu1 }
 0x6a2   :  { %9330 = vst.msk [vmem:[%s15777_s6 + $0x38] sm:$0xff] %vm9322_vm5, %v9297_v63  ;;  %v9267_v26 = vadd.f32 %v11436_v57, %v15609_v4  ;;  %v9100_v1 = vpop.f32.mrb[9].mxu1 }
 0x6a3   :  { %9329 = vst.msk [vmem:[%s15777_s6 + $0x30] sm:$0xff] %vm9322_vm5, %v9296_v28  ;;  %v9266_v0 = vadd.f32 %v15609_v4, %v9100_v1 }
 0x6a4   :  { %v9299_v32 = vmax.f32 %v9267_v26, 0.0 }
 0x6a5   :  { %v9298_v46 = vmax.f32 %v9266_v0, 0.0  ;;  %v11439_v62 = vpop.f32.mrb[10].mxu1 }
 0x6a6   :  { %9332 = vst.msk [vmem:[%s15777_s6 + $0x48] sm:$0xff] %vm9322_vm5, %v9299_v32  ;;  %v9269_v51 = vadd.f32 %v11439_v62, %v15609_v4  ;;  %v9110_v15 = vpop.f32.mrb[11].mxu1 }
 0x6a7   :  { %9331 = vst.msk [vmem:[%s15777_s6 + $0x40] sm:$0xff] %vm9322_vm5, %v9298_v46  ;;  %v9268_v30 = vadd.f32 %v15609_v4, %v9110_v15 }
 0x6a8   :  { %v9301_v55 = vmax.f32 %v9269_v51, 0.0 }
 0x6a9   :  { %v9300_v16 = vmax.f32 %v9268_v30, 0.0  ;;  %v11442_v60 = vpop.f32.mrb[12].mxu1 }
 0x6aa   :  { %9334 = vst.msk [vmem:[%s15777_s6 + $0x58] sm:$0xff] %vm9322_vm5, %v9301_v55  ;;  %v9271_v40 = vadd.f32 %v11442_v60, %v15609_v4  ;;  %v9120_v5 = vpop.f32.mrb[13].mxu1 }
 0x6ab   :  { %9333 = vst.msk [vmem:[%s15777_s6 + $0x50] sm:$0xff] %vm9322_vm5, %v9300_v16  ;;  %v9270_v34 = vadd.f32 %v15609_v4, %v9120_v5 }
 0x6ac   :  { %v9303_v50 = vmax.f32 %v9271_v40, 0.0 }
 0x6ad   :  { %v9302_v27 = vmax.f32 %v9270_v34, 0.0  ;;  %v11445_v14 = vpop.f32.mrb[14].mxu1 }
 0x6ae   :  { %9336 = vst.msk [vmem:[%s15777_s6 + $0x68] sm:$0xff] %vm9322_vm5, %v9303_v50  ;;  %v9273_v41 = vadd.f32 %v11445_v14, %v15609_v4  ;;  %v9130_v39 = vpop.f32.mrb[15].mxu1 }
 0x6af   :  { %9335 = vst.msk [vmem:[%s15777_s6 + $0x60] sm:$0xff] %vm9322_vm5, %v9302_v27  ;;  %v9272_v8 = vadd.f32 %v15609_v4, %v9130_v39 }
 0x6b0   :  { %v9305_v35 = vmax.f32 %v9273_v41, 0.0 }
 0x6b1   :  { %v9304_v13 = vmax.f32 %v9272_v8, 0.0  ;;  %v11448_v22 = vpop.f32.mrb[16].mxu1 }
 0x6b2   :  { %9338 = vst.msk [vmem:[%s15777_s6 + $0x78] sm:$0xff] %vm9322_vm5, %v9305_v35  ;;  %v9275_v43 = vadd.f32 %v11448_v22, %v15609_v4  ;;  %v9140_v3 = vpop.f32.mrb[17].mxu1 }
 0x6b3   :  { %9337 = vst.msk [vmem:[%s15777_s6 + $0x70] sm:$0xff] %vm9322_vm5, %v9304_v13  ;;  %v9274_v42 = vadd.f32 %v15609_v4, %v9140_v3 }
 0x6b4   :  { %v9307_v54 = vmax.f32 %v9275_v43, 0.0 }
 0x6b5   :  { %v9306_v11 = vmax.f32 %v9274_v42, 0.0  ;;  %v11451_v12 = vpop.f32.mrb[18].mxu1 }
 0x6b6   :  { %9340 = vst.msk [vmem:[%s15777_s6 + $0x88] sm:$0xff] %vm9322_vm5, %v9307_v54  ;;  %v9277_v2 = vadd.f32 %v11451_v12, %v15609_v4  ;;  %v9150_v31 = vpop.f32.mrb[19].mxu1 }
 0x6b7   :  { %9339 = vst.msk [vmem:[%s15777_s6 + $0x80] sm:$0xff] %vm9322_vm5, %v9306_v11  ;;  %v9276_v58 = vadd.f32 %v15609_v4, %v9150_v31 }
 0x6b8   :  { %v9309_v56 = vmax.f32 %v9277_v2, 0.0 }
 0x6b9   :  { %v9308_v21 = vmax.f32 %v9276_v58, 0.0  ;;  %v11454_v7 = vpop.f32.mrb[20].mxu1 }
 0x6ba   :  { %9342 = vst.msk [vmem:[%s15777_s6 + $0x98] sm:$0xff] %vm9322_vm5, %v9309_v56  ;;  %v9279_v33 = vadd.f32 %v11454_v7, %v15609_v4  ;;  %v9160_v19 = vpop.f32.mrb[21].mxu1 }
 0x6bb   :  { %9341 = vst.msk [vmem:[%s15777_s6 + $0x90] sm:$0xff] %vm9322_vm5, %v9308_v21  ;;  %v9278_v24 = vadd.f32 %v15609_v4, %v9160_v19 }
 0x6bc   :  { %v9311_v49 = vmax.f32 %v9279_v33, 0.0 }
 0x6bd   :  { %v9310_v48 = vmax.f32 %v9278_v24, 0.0  ;;  %v11457_v45 = vpop.f32.mrb[22].mxu1 }
 0x6be   :  { %9344 = vst.msk [vmem:[%s15777_s6 + $0xa8] sm:$0xff] %vm9322_vm5, %v9311_v49  ;;  %v9281_v52 = vadd.f32 %v11457_v45, %v15609_v4  ;;  %v9170_v61 = vpop.f32.mrb[23].mxu1 }
 0x6bf   :  { %9343 = vst.msk [vmem:[%s15777_s6 + $0xa0] sm:$0xff] %vm9322_vm5, %v9310_v48  ;;  %v9280_v20 = vadd.f32 %v15609_v4, %v9170_v61 }
 0x6c0   :  { %v9313_v36 = vmax.f32 %v9281_v52, 0.0 }
 0x6c1   :  { %v9312_v17 = vmax.f32 %v9280_v20, 0.0  ;;  %v11460_v18 = vpop.f32.mrb[24].mxu1 }
 0x6c2   :  { %9346 = vst.msk [vmem:[%s15777_s6 + $0xb8] sm:$0xff] %vm9322_vm5, %v9313_v36  ;;  %v9283_v47 = vadd.f32 %v11460_v18, %v15609_v4  ;;  %v9180_v38 = vpop.f32.mrb[25].mxu1 }
 0x6c3   :  { %9345 = vst.msk [vmem:[%s15777_s6 + $0xb0] sm:$0xff] %vm9322_vm5, %v9312_v17  ;;  %v9282_v44 = vadd.f32 %v15609_v4, %v9180_v38 }
 0x6c4   :  { %v9315_v9 = vmax.f32 %v9283_v47, 0.0 }
 0x6c5   :  { %v9314_v29 = vmax.f32 %v9282_v44, 0.0  ;;  %v11463_v53 = vpop.f32.mrb[26].mxu1 }
 0x6c6   :  { %9348 = vst.msk [vmem:[%s15777_s6 + $0xc8] sm:$0xff] %vm9322_vm5, %v9315_v9  ;;  %v9285_v59 = vadd.f32 %v11463_v53, %v15609_v4  ;;  %v9190_v23 = vpop.f32.mrb[27].mxu1 }
 0x6c7   :  { %9347 = vst.msk [vmem:[%s15777_s6 + $0xc0] sm:$0xff] %vm9322_vm5, %v9314_v29  ;;  %v9284_v6 = vadd.f32 %v15609_v4, %v9190_v23 }
 0x6c8   :  { %v9317_v10 = vmax.f32 %v9285_v59, 0.0 }
 0x6c9   :  { %v9316_v37 = vmax.f32 %v9284_v6, 0.0  ;;  %v11466_v25 = vpop.f32.mrb[28].mxu1 }
 0x6ca   :  { %9350 = vst.msk [vmem:[%s15777_s6 + $0xd8] sm:$0xff] %vm9322_vm5, %v9317_v10  ;;  %v9287_v63 = vadd.f32 %v11466_v25, %v15609_v4  ;;  %v9200_v28 = vpop.f32.mrb[29].mxu1 }
 0x6cb   :  { %9349 = vst.msk [vmem:[%s15777_s6 + $0xd0] sm:$0xff] %vm9322_vm5, %v9316_v37  ;;  %v9286_v57 = vadd.f32 %v15609_v4, %v9200_v28 }
 0x6cc   :  { %v9319_v26 = vmax.f32 %v9287_v63, 0.0 }
 0x6cd   :  { %v9318_v1 = vmax.f32 %v9286_v57, 0.0  ;;  %v11469_v0 = vpop.f32.mrb[30].mxu1 }
 0x6ce   :  { %9352 = vst.msk [vmem:[%s15777_s6 + $0xe8] sm:$0xff] %vm9322_vm5, %v9319_v26  ;;  %v9289_v32 = vadd.f32 %v11469_v0, %v15609_v4  ;;  %v9210_v46 = vpop.f32.mrb[31].mxu1 }
 0x6cf   :  { %9351 = vst.msk [vmem:[%s15777_s6 + $0xe0] sm:$0xff] %vm9322_vm5, %v9318_v1  ;;  %v9288_v62 = vadd.f32 %v15609_v4, %v9210_v46 }
 0x6d0   :  { %v9321_v51 = vmax.f32 %v9289_v32, 0.0 }
 0x6d1   :  { %v9320_v15 = vmax.f32 %v9288_v62, 0.0 }
 0x6d2   :  { %9354 = vst.msk [vmem:[%s15777_s6 + $0xf8] sm:$0xff] %vm9322_vm5, %v9321_v51 }
 0x6d3   :  { %9353 = vst.msk [vmem:[%s15777_s6 + $0xf0] sm:$0xff] %vm9322_vm5, %v9320_v15 }
 0x6d4   :  { %9359 = vsyncpa [#allocation3], 1 }
 0x6d5   :  { %9360 = vsyncpa [#allocation5], 1 }
 0x6d6   :  { %9361 = vsyncpa [#allocation8], 1 }

</bundles_post_ra>
